<compile_context>
chip_gen: v7x
topology: tpu7x:2x2x1
jax: 0.10.0
libtpu: 0.0.40
codegen_flags: <defaults>
</compile_context>

<pallas_src>
import jax
import jax.numpy as jnp
from jax.experimental import pallas as pl
from jax.experimental.pallas import tpu as pltpu


def _conv3x3_kernel(x_ref, w_ref, b_ref, o_ref):
    """3x3 / stride 1 / pad 1 conv over the full batch (one block, no grid).

    x_ref: (B*(H+2)*(W+2), Cin)  bf16 zero-padded NHWC input, rows flattened
    w_ref: (9, Cin, Cout_p)      bf16 HWIO weights flattened over the 9 taps
    b_ref: (1, Cout_p)           f32 bias
    o_ref: (B, H, W, Cout_p)     f32 NHWC output
    """
    B, H, W, Cout = o_ref.shape
    Hp, Wp = H + 2, W + 2

    x = x_ref[...]                                   # load once, reused by all 9 taps
    acc = jnp.zeros((B, H, W, Cout), jnp.float32)
    for ky in range(3):
        for kx in range(3):
            # Full-slab matmul: the extra (padding) rows are free MXU slack
            # (kernel is HBM-bound); all shifting / reshaping below happens on
            # the narrow Cout side (<=128 lanes), not the wide Cin side.
            y = jnp.dot(x, w_ref[3 * ky + kx],
                        preferred_element_type=jnp.float32)
            y = y.reshape(B, Hp, Wp, Cout)
            acc += y[:, ky:ky + H, kx:kx + W, :]
    acc += b_ref[...].reshape(1, 1, 1, Cout)         # bias add in f32
    o_ref[...] = acc.astype(o_ref.dtype)


def conv3x3_same(x_nchw, w_taps_bf16, bias_f32_2d):
    """Pallas 3x3 'same' conv, stride 1.

    x_nchw:       (B, Cin, H, W) f32   (PyTorch layout)
    w_taps_bf16:  (9, Cin, Cout_p) bf16
    bias_f32_2d:  (1, Cout_p) f32
    returns       (B, H, W, Cout_p) f32 NHWC
    """
    B, Cin, H, W = x_nchw.shape
    Cout_p = w_taps_bf16.shape[-1]
    Hp, Wp = H + 2, W + 2

    # NCHW -> NHWC, zero-pad spatial halo, flatten rows, cast to bf16.
    # XLA fuses these into one producer, so activations make a single HBM
    # round trip before the kernel.
    x = jnp.transpose(x_nchw, (0, 2, 3, 1))
    x = jnp.pad(x, ((0, 0), (1, 1), (1, 1), (0, 0)))
    x = x.reshape(B * Hp * Wp, Cin).astype(jnp.bfloat16)

    return pl.pallas_call(
        _conv3x3_kernel,
        out_shape=jax.ShapeDtypeStruct((B, H, W, Cout_p), jnp.float32),
        in_specs=[
            pl.BlockSpec(memory_space=pltpu.MemorySpace.VMEM),
            pl.BlockSpec(memory_space=pltpu.MemorySpace.VMEM),
            pl.BlockSpec(memory_space=pltpu.MemorySpace.VMEM),
        ],
        out_specs=pl.BlockSpec(memory_space=pltpu.MemorySpace.VMEM),
    )(x, w_taps_bf16, bias_f32_2d)


def _pad_cout(cout):
    """Round Cout up to a multiple of 128 iff the overhead is <= ~12.5%."""
    padded = ((cout + 127) // 128) * 128
    if padded != cout and (padded - cout) * 8 <= cout:
        return padded
    return cout


class ClassiHeadPallas:
    """JAX/Pallas port of the PyTorch `classi_head` module."""

    IN_CHANNELS = {
        "conv4_3": 512, "conv7": 1024, "conv8_2": 512,
        "conv9_2": 256, "conv10_2": 256, "conv11_2": 256,
    }
    ORDER = ["conv4_3", "conv7", "conv8_2", "conv9_2", "conv10_2", "conv11_2"]

    def __init__(self, n_class, n_bbox, key):
        self.n_class = n_class
        self.n_bbox = n_bbox
        self.params = []         # master f32 (w_hwio (3,3,Cin,Cout), bias (Cout,))
        self.kernel_params = []  # (w_taps bf16 (9,Cin,Cout_p), bias f32 (1,Cout_p), Cout)
        for name in self.ORDER:
            cin = self.IN_CHANNELS[name]
            cout = n_class * n_bbox[name]
            key, kw, kb = jax.random.split(key, 3)
            # Deterministic synthetic init (roughly kaiming-uniform scale).
            bound = 1.0 / jnp.sqrt(cin * 9.0)
            w = jax.random.uniform(kw, (3, 3, cin, cout), jnp.float32, -bound, bound)
            b = jax.random.uniform(kb, (cout,), jnp.float32, -bound, bound)
            self.params.append((w, b))

            cout_p = _pad_cout(cout)
            w_p = jnp.zeros((3, 3, cin, cout_p), jnp.float32).at[..., :cout].set(w)
            b_p = jnp.zeros((cout_p,), jnp.float32).at[:cout].set(b)
            w_taps = w_p.reshape(9, cin, cout_p).astype(jnp.bfloat16)
            self.kernel_params.append((w_taps, b_p.reshape(1, cout_p), cout))

    def __call__(self, *feature_maps_nchw):
        """feature_maps_nchw: six NCHW arrays (matching the PyTorch forward)."""
        outs = []
        for (w_taps, b2d, cout), x_nchw in zip(self.kernel_params, feature_maps_nchw):
            B = x_nchw.shape[0]
            y = conv3x3_same(x_nchw, w_taps, b2d)      # (B, H, W, Cout_p) NHWC
            y = y[..., :cout]                          # drop lane padding (fuses)
            outs.append(y.reshape(B, -1, self.n_class))  # == permute+reshape in torch
        return outs


def _reference_conv(x_nchw, w_hwio, bias):
    """Plain-JAX f32 reference (lax conv) for correctness checking."""
    y = jax.lax.conv_general_dilated(
        x_nchw, w_hwio, window_strides=(1, 1), padding="SAME",
        dimension_numbers=("NCHW", "HWIO", "NHWC"))
    return y + bias.reshape(1, 1, 1, -1)


if __name__ == "__main__":
    # Small shapes consistent with the module: channel counts fixed by
    # __init__ (512/1024/512/256/256/256); spatial sizes and n_class kept small.
    n_class = 20
    n_bbox = {"conv4_3": 4, "conv7": 6, "conv8_2": 6,
              "conv9_2": 6, "conv10_2": 4, "conv11_2": 4}
    B = 2
    spatial = {"conv4_3": 8, "conv7": 4, "conv8_2": 4,
               "conv9_2": 2, "conv10_2": 2, "conv11_2": 1}

    key = jax.random.PRNGKey(0)
    key, kparams = jax.random.split(key)
    head = ClassiHeadPallas(n_class, n_bbox, kparams)

    feats = []
    for name in ClassiHeadPallas.ORDER:
        key, kx = jax.random.split(key)
        c = ClassiHeadPallas.IN_CHANNELS[name]
        s = spatial[name]
        feats.append(jax.random.normal(kx, (B, c, s, s), jnp.float32))

    outs = head(*feats)
    outs = [jax.block_until_ready(o) for o in outs]

    # Verify against a plain-JAX f32 conv reference (kernel streams bf16,
    # accumulates f32 -> loose-ish tolerance).
    ok = True
    for name, (w, b), x, o in zip(ClassiHeadPallas.ORDER, head.params, feats, outs):
        ref = _reference_conv(x, w, b).reshape(B, -1, n_class)
        ok &= bool(jnp.allclose(o, ref, atol=3e-2, rtol=3e-2))
        s = spatial[name]
        assert o.shape == (B, s * s * n_bbox[name], n_class), o.shape

    print("KERNEL_OK" if ok else "KERNEL_MISMATCH")
</pallas_src>

<mosaic_0001>
module attributes {stable_mosaic.version = 11 : i64} {
  func.func @_conv3x3_kernel(%arg0: memref<200x512xbf16, #tpu.memory_space<vmem>>, %arg1: memref<9x512x80xbf16, #tpu.memory_space<vmem>>, %arg2: memref<1x80xf32, #tpu.memory_space<vmem>>, %arg3: memref<2x8x8x80xf32, #tpu.memory_space<vmem>>) attributes {dimension_semantics = [], scalar_prefetch = 0 : i64, scratch_operands = 0 : i64, tpu.core_type = #tpu.core_type<tc>} {
    %c0 = arith.constant 0 : index
    %c0_0 = arith.constant 0 : index
    %0 = vector.load %arg0[%c0, %c0_0] : memref<200x512xbf16, #tpu.memory_space<vmem>>, vector<200x512xbf16>
    %cst = arith.constant 0.000000e+00 : f32
    %1 = vector.broadcast %cst : f32 to vector<2x8x8x80xf32>
    %c0_1 = arith.constant 0 : index
    %c0_2 = arith.constant 0 : index
    %c0_3 = arith.constant 0 : index
    %2 = vector.load %arg1[%c0_1, %c0_2, %c0_3] : memref<9x512x80xbf16, #tpu.memory_space<vmem>>, vector<1x512x80xbf16>
    %3 = vector.shape_cast %2 : vector<1x512x80xbf16> to vector<512x80xbf16>
    %cst_4 = arith.constant dense<0.000000e+00> : vector<200x80xf32>
    %4 = tpu.matmul %0, %3, %cst_4 {dimension_numbers = #tpu.dot_dimension_numbers<[1], [0], [0], [1], [0, 0, 1, 1], [], []>} : vector<200x512xbf16>, vector<512x80xbf16>, vector<200x80xf32> -> vector<200x80xf32>
    %5 = vector.shape_cast %4 : vector<200x80xf32> to vector<2x10x10x80xf32>
    %6 = vector.extract_strided_slice %5 {offsets = [0, 0, 0, 0], sizes = [2, 8, 8, 80], strides = [1, 1, 1, 1]} : vector<2x10x10x80xf32> to vector<2x8x8x80xf32>
    %7 = arith.addf %1, %6 : vector<2x8x8x80xf32>
    %c1 = arith.constant 1 : index
    %c0_5 = arith.constant 0 : index
    %c0_6 = arith.constant 0 : index
    %8 = vector.load %arg1[%c1, %c0_5, %c0_6] : memref<9x512x80xbf16, #tpu.memory_space<vmem>>, vector<1x512x80xbf16>
    %9 = vector.shape_cast %8 : vector<1x512x80xbf16> to vector<512x80xbf16>
    %cst_7 = arith.constant dense<0.000000e+00> : vector<200x80xf32>
    %10 = tpu.matmul %0, %9, %cst_7 {dimension_numbers = #tpu.dot_dimension_numbers<[1], [0], [0], [1], [0, 0, 1, 1], [], []>} : vector<200x512xbf16>, vector<512x80xbf16>, vector<200x80xf32> -> vector<200x80xf32>
    %11 = vector.shape_cast %10 : vector<200x80xf32> to vector<2x10x10x80xf32>
    %12 = vector.extract_strided_slice %11 {offsets = [0, 0, 1, 0], sizes = [2, 8, 8, 80], strides = [1, 1, 1, 1]} : vector<2x10x10x80xf32> to vector<2x8x8x80xf32>
    %13 = arith.addf %7, %12 : vector<2x8x8x80xf32>
    %c2 = arith.constant 2 : index
    %c0_8 = arith.constant 0 : index
    %c0_9 = arith.constant 0 : index
    %14 = vector.load %arg1[%c2, %c0_8, %c0_9] : memref<9x512x80xbf16, #tpu.memory_space<vmem>>, vector<1x512x80xbf16>
    %15 = vector.shape_cast %14 : vector<1x512x80xbf16> to vector<512x80xbf16>
    %cst_10 = arith.constant dense<0.000000e+00> : vector<200x80xf32>
    %16 = tpu.matmul %0, %15, %cst_10 {dimension_numbers = #tpu.dot_dimension_numbers<[1], [0], [0], [1], [0, 0, 1, 1], [], []>} : vector<200x512xbf16>, vector<512x80xbf16>, vector<200x80xf32> -> vector<200x80xf32>
    %17 = vector.shape_cast %16 : vector<200x80xf32> to vector<2x10x10x80xf32>
    %18 = vector.extract_strided_slice %17 {offsets = [0, 0, 2, 0], sizes = [2, 8, 8, 80], strides = [1, 1, 1, 1]} : vector<2x10x10x80xf32> to vector<2x8x8x80xf32>
    %19 = arith.addf %13, %18 : vector<2x8x8x80xf32>
    %c3 = arith.constant 3 : index
    %c0_11 = arith.constant 0 : index
    %c0_12 = arith.constant 0 : index
    %20 = vector.load %arg1[%c3, %c0_11, %c0_12] : memref<9x512x80xbf16, #tpu.memory_space<vmem>>, vector<1x512x80xbf16>
    %21 = vector.shape_cast %20 : vector<1x512x80xbf16> to vector<512x80xbf16>
    %cst_13 = arith.constant dense<0.000000e+00> : vector<200x80xf32>
    %22 = tpu.matmul %0, %21, %cst_13 {dimension_numbers = #tpu.dot_dimension_numbers<[1], [0], [0], [1], [0, 0, 1, 1], [], []>} : vector<200x512xbf16>, vector<512x80xbf16>, vector<200x80xf32> -> vector<200x80xf32>
    %23 = vector.shape_cast %22 : vector<200x80xf32> to vector<2x10x10x80xf32>
    %24 = vector.extract_strided_slice %23 {offsets = [0, 1, 0, 0], sizes = [2, 8, 8, 80], strides = [1, 1, 1, 1]} : vector<2x10x10x80xf32> to vector<2x8x8x80xf32>
    %25 = arith.addf %19, %24 : vector<2x8x8x80xf32>
    %c4 = arith.constant 4 : index
    %c0_14 = arith.constant 0 : index
    %c0_15 = arith.constant 0 : index
    %26 = vector.load %arg1[%c4, %c0_14, %c0_15] : memref<9x512x80xbf16, #tpu.memory_space<vmem>>, vector<1x512x80xbf16>
    %27 = vector.shape_cast %26 : vector<1x512x80xbf16> to vector<512x80xbf16>
    %cst_16 = arith.constant dense<0.000000e+00> : vector<200x80xf32>
    %28 = tpu.matmul %0, %27, %cst_16 {dimension_numbers = #tpu.dot_dimension_numbers<[1], [0], [0], [1], [0, 0, 1, 1], [], []>} : vector<200x512xbf16>, vector<512x80xbf16>, vector<200x80xf32> -> vector<200x80xf32>
    %29 = vector.shape_cast %28 : vector<200x80xf32> to vector<2x10x10x80xf32>
    %30 = vector.extract_strided_slice %29 {offsets = [0, 1, 1, 0], sizes = [2, 8, 8, 80], strides = [1, 1, 1, 1]} : vector<2x10x10x80xf32> to vector<2x8x8x80xf32>
    %31 = arith.addf %25, %30 : vector<2x8x8x80xf32>
    %c5 = arith.constant 5 : index
    %c0_17 = arith.constant 0 : index
    %c0_18 = arith.constant 0 : index
    %32 = vector.load %arg1[%c5, %c0_17, %c0_18] : memref<9x512x80xbf16, #tpu.memory_space<vmem>>, vector<1x512x80xbf16>
    %33 = vector.shape_cast %32 : vector<1x512x80xbf16> to vector<512x80xbf16>
    %cst_19 = arith.constant dense<0.000000e+00> : vector<200x80xf32>
    %34 = tpu.matmul %0, %33, %cst_19 {dimension_numbers = #tpu.dot_dimension_numbers<[1], [0], [0], [1], [0, 0, 1, 1], [], []>} : vector<200x512xbf16>, vector<512x80xbf16>, vector<200x80xf32> -> vector<200x80xf32>
    %35 = vector.shape_cast %34 : vector<200x80xf32> to vector<2x10x10x80xf32>
    %36 = vector.extract_strided_slice %35 {offsets = [0, 1, 2, 0], sizes = [2, 8, 8, 80], strides = [1, 1, 1, 1]} : vector<2x10x10x80xf32> to vector<2x8x8x80xf32>
    %37 = arith.addf %31, %36 : vector<2x8x8x80xf32>
    %c6 = arith.constant 6 : index
    %c0_20 = arith.constant 0 : index
    %c0_21 = arith.constant 0 : index
    %38 = vector.load %arg1[%c6, %c0_20, %c0_21] : memref<9x512x80xbf16, #tpu.memory_space<vmem>>, vector<1x512x80xbf16>
    %39 = vector.shape_cast %38 : vector<1x512x80xbf16> to vector<512x80xbf16>
    %cst_22 = arith.constant dense<0.000000e+00> : vector<200x80xf32>
    %40 = tpu.matmul %0, %39, %cst_22 {dimension_numbers = #tpu.dot_dimension_numbers<[1], [0], [0], [1], [0, 0, 1, 1], [], []>} : vector<200x512xbf16>, vector<512x80xbf16>, vector<200x80xf32> -> vector<200x80xf32>
    %41 = vector.shape_cast %40 : vector<200x80xf32> to vector<2x10x10x80xf32>
    %42 = vector.extract_strided_slice %41 {offsets = [0, 2, 0, 0], sizes = [2, 8, 8, 80], strides = [1, 1, 1, 1]} : vector<2x10x10x80xf32> to vector<2x8x8x80xf32>
    %43 = arith.addf %37, %42 : vector<2x8x8x80xf32>
    %c7 = arith.constant 7 : index
    %c0_23 = arith.constant 0 : index
    %c0_24 = arith.constant 0 : index
    %44 = vector.load %arg1[%c7, %c0_23, %c0_24] : memref<9x512x80xbf16, #tpu.memory_space<vmem>>, vector<1x512x80xbf16>
    %45 = vector.shape_cast %44 : vector<1x512x80xbf16> to vector<512x80xbf16>
    %cst_25 = arith.constant dense<0.000000e+00> : vector<200x80xf32>
    %46 = tpu.matmul %0, %45, %cst_25 {dimension_numbers = #tpu.dot_dimension_numbers<[1], [0], [0], [1], [0, 0, 1, 1], [], []>} : vector<200x512xbf16>, vector<512x80xbf16>, vector<200x80xf32> -> vector<200x80xf32>
    %47 = vector.shape_cast %46 : vector<200x80xf32> to vector<2x10x10x80xf32>
    %48 = vector.extract_strided_slice %47 {offsets = [0, 2, 1, 0], sizes = [2, 8, 8, 80], strides = [1, 1, 1, 1]} : vector<2x10x10x80xf32> to vector<2x8x8x80xf32>
    %49 = arith.addf %43, %48 : vector<2x8x8x80xf32>
    %c8 = arith.constant 8 : index
    %c0_26 = arith.constant 0 : index
    %c0_27 = arith.constant 0 : index
    %50 = vector.load %arg1[%c8, %c0_26, %c0_27] : memref<9x512x80xbf16, #tpu.memory_space<vmem>>, vector<1x512x80xbf16>
    %51 = vector.shape_cast %50 : vector<1x512x80xbf16> to vector<512x80xbf16>
    %cst_28 = arith.constant dense<0.000000e+00> : vector<200x80xf32>
    %52 = tpu.matmul %0, %51, %cst_28 {dimension_numbers = #tpu.dot_dimension_numbers<[1], [0], [0], [1], [0, 0, 1, 1], [], []>} : vector<200x512xbf16>, vector<512x80xbf16>, vector<200x80xf32> -> vector<200x80xf32>
    %53 = vector.shape_cast %52 : vector<200x80xf32> to vector<2x10x10x80xf32>
    %54 = vector.extract_strided_slice %53 {offsets = [0, 2, 2, 0], sizes = [2, 8, 8, 80], strides = [1, 1, 1, 1]} : vector<2x10x10x80xf32> to vector<2x8x8x80xf32>
    %55 = arith.addf %49, %54 : vector<2x8x8x80xf32>
    %c0_29 = arith.constant 0 : index
    %c0_30 = arith.constant 0 : index
    %56 = vector.load %arg2[%c0_29, %c0_30] : memref<1x80xf32, #tpu.memory_space<vmem>>, vector<1x80xf32>
    %57 = vector.shape_cast %56 : vector<1x80xf32> to vector<1x1x1x80xf32>
    %58 = vector.broadcast %57 : vector<1x1x1x80xf32> to vector<2x8x8x80xf32>
    %59 = arith.addf %55, %58 : vector<2x8x8x80xf32>
    %c0_31 = arith.constant 0 : index
    %c0_32 = arith.constant 0 : index
    %c0_33 = arith.constant 0 : index
    %c0_34 = arith.constant 0 : index
    %60 = vector.load %arg3[%c0_31, %c0_32, %c0_33, %c0_34] : memref<2x8x8x80xf32, #tpu.memory_space<vmem>>, vector<2x8x8x80xf32>
    tpu.vector_store %arg3[%c0_31, %c0_32, %c0_33, %c0_34], %59 {strides = array<i32>} : memref<2x8x8x80xf32, #tpu.memory_space<vmem>>, vector<2x8x8x80xf32>,
    return
  }
}

</mosaic_0001>

<bundles_post_ra>
// kernel: tpu_custom_call.1
= control target key start
LH: loop header
LB: loop body
LE: loop exit
PB: predicated region body
PF: predicated region fallthrough
CT: control target
= control target key end

     0   :  { %s20246_s0 = inlined_call_operand.vmem [shape: bf16[200,512], index: 0, kind: input, shape index: {}]   ;;  %s20247_s1 = inlined_call_operand.vmem [shape: bf16[9,512,80], index: 1, kind: input, shape index: {}]   ;;  %s20248_s2 = inlined_call_operand.vmem [shape: f32[1,80], index: 2, kind: input, shape index: {}]   ;;  %s20249_s3 = inlined_call_operand.hbm [shape: f32[2,8,8,80], index: 3, kind: output, shape index: {}]  }
   0x1   :  { %v13083_v0 = vld [vmem:[%s20247_s1 + $0x40] sm:$0xff]   ;;  %v13087_v4 = vld [vmem:[%s20247_s1 + $0x48] sm:$0xff]   ;;  %v13091_v8 = vld [vmem:[%s20247_s1 + $0x50] sm:$0xff]  }
   0x2   :  { %v13084_v1 = vld [vmem:[%s20247_s1 + $0xc0] sm:$0xff]   ;;  %11387 = vmatprep.subr.bf16.mxu0 %v13083_v0  ;;  %v13088_v5 = vld [vmem:[%s20247_s1 + $0xc8] sm:$0xff]   ;;  %v13092_v9 = vld [vmem:[%s20247_s1 + $0xd0] sm:$0xff]  }
   0x3   :  { %v13085_v2 = vld [vmem:[%s20247_s1] sm:$0xff]   ;;  %11481 = vmatprep.subr.bf16.mxu1 %v13084_v1  ;;  %v13089_v6 = vld [vmem:[%s20247_s1 + $0x8] sm:$0xff]   ;;  %v13093_v10 = vld [vmem:[%s20247_s1 + $0x10] sm:$0xff]  }
   0x4   :  { %v13086_v3 = vld [vmem:[%s20247_s1 + $0x80] sm:$0xff]   ;;  %11388 = vmatpush3.bf16.msra.mxu0 %v13085_v2  ;;  %v13090_v7 = vld [vmem:[%s20247_s1 + $0x88] sm:$0xff]   ;;  %v13094_v11 = vld [vmem:[%s20247_s1 + $0x90] sm:$0xff]  }
   0x5   :  { %11482 = vmatpush3.bf16.msra.mxu1 %v13086_v3  ;;  %11389 = vmatprep.subr.bf16.mxu0 %v13087_v4  ;;  %v13095_v12 = vld [vmem:[%s20247_s1 + $0x58] sm:$0xff]   ;;  %v13099_v16 = vld [vmem:[%s20247_s1 + $0x60] sm:$0xff]   ;;  %v13103_v20 = vld [vmem:[%s20247_s1 + $0x68] sm:$0xff]  }
   0x6   :  { %11483 = vmatprep.subr.bf16.mxu1 %v13088_v5  ;;  %v13096_v13 = vld [vmem:[%s20247_s1 + $0xd8] sm:$0xff]   ;;  %v13100_v17 = vld [vmem:[%s20247_s1 + $0xe0] sm:$0xff]   ;;  %v13104_v21 = vld [vmem:[%s20247_s1 + $0xe8] sm:$0xff]  }
   0x7   :  { %v13097_v14 = vld [vmem:[%s20247_s1 + $0x18] sm:$0xff]   ;;  %v13101_v18 = vld [vmem:[%s20247_s1 + $0x20] sm:$0xff]   ;;  %v13105_v22 = vld [vmem:[%s20247_s1 + $0x28] sm:$0xff]  }
   0x8   :  { %11390 = vmatpush3.bf16.msra.mxu0 %v13089_v6  ;;  %v13098_v15 = vld [vmem:[%s20247_s1 + $0x98] sm:$0xff]   ;;  %v13102_v19 = vld [vmem:[%s20247_s1 + $0xa0] sm:$0xff]   ;;  %v13106_v23 = vld [vmem:[%s20247_s1 + $0xa8] sm:$0xff]  }
   0x9   :  { %11484 = vmatpush3.bf16.msra.mxu1 %v13090_v7  ;;  %11391 = vmatprep.subr.bf16.mxu0 %v13091_v8  ;;  %v13107_v24 = vld [vmem:[%s20247_s1 + $0x70] sm:$0xff]   ;;  %v13111_v28 = vld [vmem:[%s20247_s1 + $0x78] sm:$0xff]   ;;  %v13121_v36 = vld [vmem:[%s20247_s1 + $0x140] sm:$0xff]  }
   0xa   :  { %11485 = vmatprep.subr.bf16.mxu1 %v13092_v9  ;;  %v13108_v25 = vld [vmem:[%s20247_s1 + $0xf0] sm:$0xff]   ;;  %v13112_v29 = vld [vmem:[%s20247_s1 + $0xf8] sm:$0xff]   ;;  %v13122_v37 = vld [vmem:[%s20247_s1 + $0x1c0] sm:$0xff]  }
   0xb   :  { %v13109_v26 = vld [vmem:[%s20247_s1 + $0x30] sm:$0xff]   ;;  %v13113_v30 = vld [vmem:[%s20247_s1 + $0x38] sm:$0xff]   ;;  %v13123_v38 = vld [vmem:[%s20247_s1 + $0x100] sm:$0xff]  }
   0xc   :  { %11392 = vmatpush3.bf16.msra.mxu0 %v13093_v10  ;;  %v13110_v27 = vld [vmem:[%s20247_s1 + $0xb0] sm:$0xff]   ;;  %v13114_v31 = vld [vmem:[%s20247_s1 + $0xb8] sm:$0xff]   ;;  %v13124_v39 = vld [vmem:[%s20247_s1 + $0x180] sm:$0xff]  }
   0xd   :  { %11486 = vmatpush3.bf16.msra.mxu1 %v13094_v11  ;;  %11393 = vmatprep.subr.bf16.mxu0 %v13095_v12  ;;  %v13806_v32 = vld [vmem:[%s20246_s0 + $0x4] ss:$16 sps:$4 sm:$0xff]   ;;  %v13811_v33 = vld [vmem:[%s20246_s0 + $0xc] ss:$16 sps:$4 sm:$0xff]   ;;  %v13817_v34 = vld [vmem:[%s20246_s0] ss:$16 sps:$4 sm:$0xff]  }
   0xe   :  { %11487 = vmatprep.subr.bf16.mxu1 %v13096_v13  ;;  %608 = vmatprep.mubr.bf16.mxu0 %v13806_v32  ;;  %v13822_v35 = vld [vmem:[%s20246_s0 + $0x8] ss:$16 sps:$4 sm:$0xff]   ;;  %v13842_v40 = vld [vmem:[%s20246_s0 + $0x24] ss:$16 sps:$4 sm:$0xff]   ;;  %v13847_v41 = vld [vmem:[%s20246_s0 + $0x2c] ss:$16 sps:$4 sm:$0xff]  }
   0xf   :  { %740 = vmatprep.mubr.bf16.mxu1 %v13811_v33  ;;  %v13852_v42 = vld [vmem:[%s20246_s0 + $0x20] ss:$16 sps:$4 sm:$0xff]   ;;  %v13858_v43 = vld [vmem:[%s20246_s0 + $0x28] ss:$16 sps:$4 sm:$0xff]   ;;  %v13878_v48 = vld [vmem:[%s20246_s0 + $0x44] ss:$16 sps:$4 sm:$0xff]  }
  0x10   :  { %11394 = vmatpush3.bf16.msra.mxu0 %v13097_v14  ;;  %v13131_v44 = vld [vmem:[%s20247_s1 + $0x148] sm:$0xff]   ;;  %v13888_v50 = vld [vmem:[%s20246_s0 + $0x40] ss:$16 sps:$4 sm:$0xff]   ;;  %v13899_v52 = vld [vmem:[%s20246_s0 + $0x64] ss:$16 sps:$4 sm:$0xff]  }
  0x11   :  { %11488 = vmatpush3.bf16.msra.mxu1 %v13098_v15  ;;  %11395 = vmatprep.subr.bf16.mxu0 %v13099_v16  ;;  %v13132_v45 = vld [vmem:[%s20247_s1 + $0x1c8] sm:$0xff]   ;;  %v13147_v54 = vld [vmem:[%s20247_s1 + $0x150] sm:$0xff]   ;;  %v13161_v62 = vld [vmem:[%s20247_s1 + $0x158] sm:$0xff]  }
  0x12   :  { %11489 = vmatprep.subr.bf16.mxu1 %v13100_v17  ;;  %v13133_v46 = vld [vmem:[%s20247_s1 + $0x108] sm:$0xff]   ;;  %v13148_v55 = vld [vmem:[%s20247_s1 + $0x1d0] sm:$0xff]   ;;  %v13162_v63 = vld [vmem:[%s20247_s1 + $0x1d8] sm:$0xff]  }
  0x13   :  { %v13134_v47 = vld [vmem:[%s20247_s1 + $0x188] sm:$0xff]   ;;  %v13149_v56 = vld [vmem:[%s20247_s1 + $0x110] sm:$0xff]   ;;  %v13165_v2 = vld [vmem:[%s20247_s1 + $0x118] sm:$0xff]  }
  0x14   :  { %11396 = vmatpush3.bf16.msra.mxu0 %v13101_v18  ;;  %v13883_v49 = vld [vmem:[%s20246_s0 + $0x4c] ss:$16 sps:$4 sm:$0xff]   ;;  %v13893_v51 = vld [vmem:[%s20246_s0 + $0x48] ss:$16 sps:$4 sm:$0xff]   ;;  %v13150_v57 = vld [vmem:[%s20247_s1 + $0x190] sm:$0xff]  }
  0x15   :  { %11490 = vmatpush3.bf16.msra.mxu1 %v13102_v19  ;;  %11397 = vmatprep.subr.bf16.mxu0 %v13103_v20  ;;  %v13905_v53 = vld [vmem:[%s20246_s0 + $0x6c] ss:$16 sps:$4 sm:$0xff]   ;;  %v13926_v58 = vld [vmem:[%s20246_s0 + $0x60] ss:$16 sps:$4 sm:$0xff]   ;;  %v13931_v59 = vld [vmem:[%s20246_s0 + $0x68] ss:$16 sps:$4 sm:$0xff]  }
  0x16   :  { %11491 = vmatprep.subr.bf16.mxu1 %v13104_v21  ;;  %v13936_v60 = vld [vmem:[%s20246_s0 + $0x84] ss:$16 sps:$4 sm:$0xff]   ;;  %v13941_v61 = vld [vmem:[%s20246_s0 + $0x8c] ss:$16 sps:$4 sm:$0xff]   ;;  %v13956_v0 = vld [vmem:[%s20246_s0 + $0x80] ss:$16 sps:$4 sm:$0xff]  }
  0x17   :  { %v13961_v1 = vld [vmem:[%s20246_s0 + $0x88] ss:$16 sps:$4 sm:$0xff]   ;;  %v13972_v4 = vld [vmem:[%s20246_s0 + $0xa4] ss:$16 sps:$4 sm:$0xff]   ;;  %v13977_v5 = vld [vmem:[%s20246_s0 + $0xac] ss:$16 sps:$4 sm:$0xff]  }
  0x18   :  { %11398 = vmatpush3.bf16.msra.mxu0 %v13105_v22  ;;  %v13166_v3 = vld [vmem:[%s20247_s1 + $0x198] sm:$0xff]   ;;  %v13173_v6 = vld [vmem:[%s20247_s1 + $0x160] sm:$0xff]   ;;  %v13189_v14 = vld [vmem:[%s20247_s1 + $0x168] sm:$0xff]  }
  0x19   :  { %11492 = vmatpush3.bf16.msra.mxu1 %v13106_v23  ;;  %11399 = vmatprep.subr.bf16.mxu0 %v13107_v24  ;;  %v13174_v7 = vld [vmem:[%s20247_s1 + $0x1e0] sm:$0xff]   ;;  %v14003_v11 = vld [vmem:[%s20246_s0 + $0xa8] ss:$16 sps:$4 sm:$0xff]   ;;  %v14013_v13 = vld [vmem:[%s20246_s0 + $0xcc] ss:$16 sps:$4 sm:$0xff]  }
  0x1a   :  { %11493 = vmatprep.subr.bf16.mxu1 %v13108_v25  ;;  %v13175_v8 = vld [vmem:[%s20247_s1 + $0x120] sm:$0xff]   ;;  %v13190_v15 = vld [vmem:[%s20247_s1 + $0x1e8] sm:$0xff]   ;;  %v13199_v22 = vld [vmem:[%s20247_s1 + $0x170] sm:$0xff]  }
  0x1b   :  { %v13176_v9 = vld [vmem:[%s20247_s1 + $0x1a0] sm:$0xff]   ;;  %v14033_v17 = vld [vmem:[%s20246_s0 + $0xc8] ss:$16 sps:$4 sm:$0xff]   ;;  %v14049_v21 = vld [vmem:[%s20246_s0 + $0xec] ss:$16 sps:$4 sm:$0xff]  }
  0x1c   :  { %11400 = vmatpush3.bf16.msra.mxu0 %v13109_v26  ;;  %v13998_v10 = vld [vmem:[%s20246_s0 + $0xa0] ss:$16 sps:$4 sm:$0xff]   ;;  %v14008_v12 = vld [vmem:[%s20246_s0 + $0xc4] ss:$16 sps:$4 sm:$0xff]   ;;  %v13191_v18 = vld [vmem:[%s20247_s1 + $0x128] sm:$0xff]  }
  0x1d   :  { %11494 = vmatpush3.bf16.msra.mxu1 %v13110_v27  ;;  %11401 = vmatprep.subr.bf16.mxu0 %v13111_v28  ;;  %v14028_v16 = vld [vmem:[%s20246_s0 + $0xc0] ss:$16 sps:$4 sm:$0xff]   ;;  %v13192_v19 = vld [vmem:[%s20247_s1 + $0x1a8] sm:$0xff]   ;;  %v14044_v20 = vld [vmem:[%s20246_s0 + $0xe4] ss:$16 sps:$4 sm:$0xff]  }
  0x1e   :  { %11495 = vmatprep.subr.bf16.mxu1 %v13112_v29  ;;  %v13200_v23 = vld [vmem:[%s20247_s1 + $0x1f0] sm:$0xff]   ;;  %v14069_v25 = vld [vmem:[%s20246_s0 + $0xe8] ss:$16 sps:$4 sm:$0xff]   ;;  %v14085_v29 = vld [vmem:[%s20246_s0 + $0x10c] ss:$16 sps:$4 sm:$0xff]  }
  0x1f   :  { %v14064_v24 = vld [vmem:[%s20246_s0 + $0xe0] ss:$16 sps:$4 sm:$0xff]   ;;  %v14077_v27 = vld [vmem:[%s20246_s0 + $0x104] ss:$16 sps:$4 sm:$0xff]  }
  0x20   :  { %11402 = vmatpush3.bf16.msra.mxu0 %v13113_v30  ;;  %v13205_v26 = vld [vmem:[%s20247_s1 + $0x130] sm:$0xff]   ;;  %v13215_v30 = vld [vmem:[%s20247_s1 + $0x178] sm:$0xff]  }
  0x21   :  { %11496 = vmatpush3.bf16.msra.mxu1 %v13114_v31  ;;  %11575 = vmatprep.subr.bf16.mxu0 %v13121_v36  ;;  %v13206_v28 = vld [vmem:[%s20247_s1 + $0x1b0] sm:$0xff]   ;;  %v13216_v31 = vld [vmem:[%s20247_s1 + $0x1f8] sm:$0xff]  }
  0x22   :  { %11669 = vmatprep.subr.bf16.mxu1 %v13122_v37  ;;  %v14100_v36 = vld [vmem:[%s20246_s0 + $0x100] ss:$16 sps:$4 sm:$0xff]   ;;  %v14105_v37 = vld [vmem:[%s20246_s0 + $0x108] ss:$16 sps:$4 sm:$0xff]  }
  0x23   :  { %609 = vmatmul.mubr.bf16.vlgmr.msra.gmra.mrb[0].mxu0 %v13817_v34 }
  0x24   :  { %741 = vmatmul.mubr.bf16.vlgmr.msra.gmra.mrb[0].mxu1 %v13822_v35  ;;  %11576 = vmatpush3.bf16.msra.mxu0 %v13123_v38  ;;  %v13217_v38 = vld [vmem:[%s20247_s1 + $0x138] sm:$0xff]  }
  0x25   :  { %11670 = vmatpush3.bf16.msra.mxu1 %v13124_v39  ;;  %616 = vmatprep.mubr.bf16.mxu0 %v13842_v40  ;;  %v13218_v39 = vld [vmem:[%s20247_s1 + $0x1b8] sm:$0xff]  }
  0x26   :  { %748 = vmatprep.mubr.bf16.mxu1 %v13847_v41  ;;  %11577 = vmatprep.subr.bf16.mxu0 %v13131_v44  ;;  %v14116_v44 = vld [vmem:[%s20246_s0 + $0x124] ss:$16 sps:$4 sm:$0xff]  }
  0x27   :  { %11671 = vmatprep.subr.bf16.mxu1 %v13132_v45  ;;  %v14121_v45 = vld [vmem:[%s20246_s0 + $0x12c] ss:$16 sps:$4 sm:$0xff]  }
  0x28   :  { %11578 = vmatpush3.bf16.msra.mxu0 %v13133_v46  ;;  %v13223_v46 = vld [vmem:[%s20247_s1 + $0x240] sm:$0xff]  }
  0x29   :  { %11672 = vmatpush3.bf16.msra.mxu1 %v13134_v47  ;;  %11579 = vmatprep.subr.bf16.mxu0 %v13147_v54  ;;  %v13224_v47 = vld [vmem:[%s20247_s1 + $0x2c0] sm:$0xff]  }
  0x2a   :  { %11673 = vmatprep.subr.bf16.mxu1 %v13148_v55  ;;  %v14136_v54 = vld [vmem:[%s20246_s0 + $0x120] ss:$16 sps:$4 sm:$0xff]   ;;  %v14141_v55 = vld [vmem:[%s20246_s0 + $0x128] ss:$16 sps:$4 sm:$0xff]  }
  0x2b   :  { %617 = vmatmul.mubr.bf16.gmra.mrb[4].mxu0 %v13852_v42 }
  0x2c   :  { %749 = vmatmul.mubr.bf16.gmra.mrb[4].mxu1 %v13858_v43  ;;  %624 = vmatprep.mubr.bf16.mxu0 %v13878_v48 }
  0x2d   :  { %756 = vmatprep.mubr.bf16.mxu1 %v13883_v49  ;;  %11580 = vmatpush3.bf16.msra.mxu0 %v13149_v56  ;;  %v14146_v56 = vld [vmem:[%s20246_s0 + $0x144] ss:$16 sps:$4 sm:$0xff]  }
  0x2e   :  { %11674 = vmatpush3.bf16.msra.mxu1 %v13150_v57  ;;  %11581 = vmatprep.subr.bf16.mxu0 %v13161_v62  ;;  %v14151_v57 = vld [vmem:[%s20246_s0 + $0x14c] ss:$16 sps:$4 sm:$0xff]   ;;  %v14160_v62 = vld [vmem:[%s20246_s0 + $0x140] ss:$16 sps:$4 sm:$0xff]  }
  0x2f   :  { %11675 = vmatprep.subr.bf16.mxu1 %v13162_v63  ;;  %v14165_v63 = vld [vmem:[%s20246_s0 + $0x148] ss:$16 sps:$4 sm:$0xff]  }
  0x31   :  { %11582 = vmatpush3.bf16.msra.mxu0 %v13165_v2  ;;  %v14170_v2 = vld [vmem:[%s20246_s0 + $0x164] ss:$16 sps:$4 sm:$0xff]  }
  0x32   :  { %11676 = vmatpush3.bf16.msra.mxu1 %v13166_v3  ;;  %11583 = vmatprep.subr.bf16.mxu0 %v13173_v6  ;;  %v14175_v3 = vld [vmem:[%s20246_s0 + $0x16c] ss:$16 sps:$4 sm:$0xff]   ;;  %v64_v6 = vld [vmem:[%s20246_s0 + $0x180] sm:$0xff] }
  0x33   :  { %625 = vmatmul.mubr.bf16.gmra.mrb[8].mxu0 %v13888_v50  ;;  %11677 = vmatprep.subr.bf16.mxu1 %v13174_v7  ;;  %v65_v7 = vld [vmem:[%s20246_s0 + $0x188] sm:$0xff] }
  0x34   :  { %757 = vmatmul.mubr.bf16.gmra.mrb[8].mxu1 %v13893_v51  ;;  %632 = vmatprep.mubr.bf16.mxu0 %v13899_v52 }
  0x35   :  { %764 = vmatprep.mubr.bf16.mxu1 %v13905_v53  ;;  %11584 = vmatpush3.bf16.msra.mxu0 %v13175_v8  ;;  %v14190_v8 = vld [vmem:[%s20246_s0 + $0x160] ss:$16 sps:$4 sm:$0xff]  }
  0x36   :  { %11678 = vmatpush3.bf16.msra.mxu1 %v13176_v9  ;;  %11585 = vmatprep.subr.bf16.mxu0 %v13189_v14  ;;  %v14195_v9 = vld [vmem:[%s20246_s0 + $0x168] ss:$16 sps:$4 sm:$0xff]   ;;  %v14197_v14 = vcombine.high %v64_v6, %v64_v6 }
  0x37   :  { %11679 = vmatprep.subr.bf16.mxu1 %v13190_v15  ;;  %v14199_v15 = vcombine.high %v65_v7, %v65_v7 }
  0x38   :  { %20393 = vst [vmem:[#allocation5_spill] sm:$0xff] %v14197_v14 }
  0x39   :  { %11586 = vmatpush3.bf16.msra.mxu0 %v13191_v18  ;;  %20394 = vst [vmem:[#allocation6_spill] sm:$0xff] %v14199_v15  ;;  %v14205_v18 = vcombine.low %v64_v6, %v64_v6  ;;  %v13245_v6 = vld [vmem:[%s20247_s1 + $0x228] sm:$0xff]  }
  0x3a   :  { %11680 = vmatpush3.bf16.msra.mxu1 %v13192_v19  ;;  %11587 = vmatprep.subr.bf16.mxu0 %v13199_v22  ;;  %v14207_v19 = vcombine.low %v65_v7, %v65_v7  ;;  %v13225_v22 = vld [vmem:[%s20247_s1 + $0x200] sm:$0xff]   ;;  %v13246_v7 = vld [vmem:[%s20247_s1 + $0x2a8] sm:$0xff]  }
  0x3b   :  { %633 = vmatmul.mubr.bf16.gmra.mrb[12].mxu0 %v13926_v58  ;;  %11681 = vmatprep.subr.bf16.mxu1 %v13200_v23  ;;  %20395 = vst [vmem:[#allocation7_spill] sm:$0xff] %v14205_v18  ;;  %v13226_v23 = vld [vmem:[%s20247_s1 + $0x280] sm:$0xff]  }
  0x3c   :  { %765 = vmatmul.mubr.bf16.gmra.mrb[12].mxu1 %v13931_v59  ;;  %640 = vmatprep.mubr.bf16.mxu0 %v13936_v60  ;;  %20396 = vst [vmem:[#allocation8_spill] sm:$0xff] %v14207_v19 }
  0x3d   :  { %772 = vmatprep.mubr.bf16.mxu1 %v13941_v61  ;;  %11588 = vmatpush3.bf16.msra.mxu0 %v13205_v26  ;;  %v13227_v26 = vld [vmem:[%s20247_s1 + $0x248] sm:$0xff]  }
  0x3e   :  { %11682 = vmatpush3.bf16.msra.mxu1 %v13206_v28  ;;  %11589 = vmatprep.subr.bf16.mxu0 %v13215_v30  ;;  %v13228_v28 = vld [vmem:[%s20247_s1 + $0x2c8] sm:$0xff]   ;;  %v13231_v30 = vld [vmem:[%s20247_s1 + $0x250] sm:$0xff]  }
  0x3f   :  { %11683 = vmatprep.subr.bf16.mxu1 %v13216_v31  ;;  %v13232_v31 = vld [vmem:[%s20247_s1 + $0x2d0] sm:$0xff]  }
  0x41   :  { %11590 = vmatpush3.bf16.msra.mxu0 %v13217_v38  ;;  %v13237_v38 = vld [vmem:[%s20247_s1 + $0x218] sm:$0xff]  }
  0x42   :  { %11684 = vmatpush3.bf16.msra.mxu1 %v13218_v39  ;;  %11763 = vmatprep.subr.bf16.mxu0 %v13223_v46  ;;  %v13238_v39 = vld [vmem:[%s20247_s1 + $0x298] sm:$0xff]   ;;  %v13239_v46 = vld [vmem:[%s20247_s1 + $0x260] sm:$0xff]  }
  0x43   :  { %641 = vmatmul.mubr.bf16.gmra.mrb[16].mxu0 %v13956_v0  ;;  %11857 = vmatprep.subr.bf16.mxu1 %v13224_v47  ;;  %v13244_v47 = vld [vmem:[%s20247_s1 + $0x2e8] sm:$0xff]  }
  0x44   :  { %773 = vmatmul.mubr.bf16.gmra.mrb[16].mxu1 %v13961_v1  ;;  %648 = vmatprep.mubr.bf16.mxu0 %v13972_v4 }
  0x45   :  { %780 = vmatprep.mubr.bf16.mxu1 %v13977_v5 }
  0x4b   :  { %649 = vmatmul.mubr.bf16.gmra.mrb[20].mxu0 %v13998_v10 }
  0x4c   :  { %781 = vmatmul.mubr.bf16.gmra.mrb[20].mxu1 %v14003_v11  ;;  %654 = vmatprep.mubr.bf16.mxu0 %v14008_v12 }
  0x4d   :  { %786 = vmatprep.mubr.bf16.mxu1 %v14013_v13 }
  0x53   :  { %655 = vmatmul.mubr.bf16.gmra.mrb[24].mxu0 %v14028_v16 }
  0x54   :  { %787 = vmatmul.mubr.bf16.gmra.mrb[24].mxu1 %v14033_v17  ;;  %662 = vmatprep.mubr.bf16.mxu0 %v14044_v20 }
  0x55   :  { %794 = vmatprep.mubr.bf16.mxu1 %v14049_v21 }
  0x5b   :  { %663 = vmatmul.mubr.bf16.gmra.mrb[28].mxu0 %v14064_v24 }
  0x5c   :  { %795 = vmatmul.mubr.bf16.gmra.mrb[28].mxu1 %v14069_v25  ;;  %670 = vmatprep.mubr.bf16.mxu0 %v14077_v27 }
  0x5d   :  { %802 = vmatprep.mubr.bf16.mxu1 %v14085_v29 }
  0x63   :  { %671 = vmatmul.mubr.bf16.gmra.mrb[32].mxu0 %v14100_v36 }
  0x64   :  { %803 = vmatmul.mubr.bf16.gmra.mrb[32].mxu1 %v14105_v37  ;;  %678 = vmatprep.mubr.bf16.mxu0 %v14116_v44 }
  0x65   :  { %810 = vmatprep.mubr.bf16.mxu1 %v14121_v45 }
  0x6b   :  { %679 = vmatmul.mubr.bf16.gmra.mrb[36].mxu0 %v14136_v54 }
  0x6c   :  { %811 = vmatmul.mubr.bf16.gmra.mrb[36].mxu1 %v14141_v55  ;;  %686 = vmatprep.mubr.bf16.mxu0 %v14146_v56 }
  0x6d   :  { %818 = vmatprep.mubr.bf16.mxu1 %v14151_v57 }
  0x73   :  { %687 = vmatmul.mubr.bf16.gmra.mrb[40].mxu0 %v14160_v62 }
  0x74   :  { %819 = vmatmul.mubr.bf16.gmra.mrb[40].mxu1 %v14165_v63  ;;  %694 = vmatprep.mubr.bf16.mxu0 %v14170_v2 }
  0x75   :  { %826 = vmatprep.mubr.bf16.mxu1 %v14175_v3 }
  0x7b   :  { %695 = vmatmul.mubr.bf16.gmra.mrb[44].mxu0 %v14190_v8 }
  0x7c   :  { %827 = vmatmul.mubr.bf16.gmra.mrb[44].mxu1 %v14195_v9  ;;  %701 = vmatprep.mubr.bf16.mxu0 %v14197_v14 }
  0x7d   :  { %833 = vmatprep.mubr.bf16.mxu1 %v14199_v15 }
  0x83   :  { %702 = vmatmul.mubr.bf16.gmra.mrb[48].mxu0 %v14205_v18 }
  0x84   :  { %834 = vmatmul.mubr.bf16.gmra.mrb[48].mxu1 %v14207_v19  ;;  %1610 = vmatprep.mubr.bf16.mxu0 %v13806_v32  ;;  %v13229_v32 = vld [vmem:[%s20247_s1 + $0x208] sm:$0xff]  }
  0x85   :  { %1742 = vmatprep.mubr.bf16.mxu1 %v13811_v33  ;;  %v13230_v33 = vld [vmem:[%s20247_s1 + $0x288] sm:$0xff]  }
  0x8b   :  { %1611 = vmatmul.mubr.bf16.vlgmr.msra.gmra.mrb[52].mxu0 %v13817_v34  ;;  %v13233_v34 = vld [vmem:[%s20247_s1 + $0x210] sm:$0xff]  }
  0x8c   :  { %1743 = vmatmul.mubr.bf16.vlgmr.msra.gmra.mrb[52].mxu1 %v13822_v35  ;;  %11764 = vmatpush3.bf16.msra.mxu0 %v13225_v22  ;;  %v13234_v35 = vld [vmem:[%s20247_s1 + $0x290] sm:$0xff]  }
  0x8d   :  { %11858 = vmatpush3.bf16.msra.mxu1 %v13226_v23  ;;  %1618 = vmatprep.mubr.bf16.mxu0 %v13842_v40  ;;  %v13235_v40 = vld [vmem:[%s20247_s1 + $0x258] sm:$0xff]   ;;  %v13247_v22 = vld [vmem:[%s20247_s1 + $0x270] sm:$0xff]  }
  0x8e   :  { %1750 = vmatprep.mubr.bf16.mxu1 %v13847_v41  ;;  %11765 = vmatprep.subr.bf16.mxu0 %v13227_v26  ;;  %v13236_v41 = vld [vmem:[%s20247_s1 + $0x2d8] sm:$0xff]  }
  0x8f   :  { %11859 = vmatprep.subr.bf16.mxu1 %v13228_v28  ;;  %v13252_v23 = vld [vmem:[%s20247_s1 + $0x2f8] sm:$0xff]  }
  0x90   :  { %11766 = vmatpush3.bf16.msra.mxu0 %v13229_v32  ;;  %v13253_v26 = vld [vmem:[%s20247_s1 + $0x238] sm:$0xff]   ;;  %v13255_v32 = vld [vmem:[%s20247_s1 + $0x340] sm:$0xff]  }
  0x91   :  { %11860 = vmatpush3.bf16.msra.mxu1 %v13230_v33  ;;  %11767 = vmatprep.subr.bf16.mxu0 %v13231_v30  ;;  %v13254_v28 = vld [vmem:[%s20247_s1 + $0x2b8] sm:$0xff]  }
  0x92   :  { %11861 = vmatprep.subr.bf16.mxu1 %v13232_v31  ;;  %v13269_v33 = vld [vmem:[%s20247_s1 + $0x318] sm:$0xff]  }
  0x93   :  { %1619 = vmatmul.mubr.bf16.gmra.mrb[56].mxu0 %v13852_v42  ;;  %v13240_v42 = vld [vmem:[%s20247_s1 + $0x2e0] sm:$0xff]   ;;  %v13270_v30 = vld [vmem:[%s20247_s1 + $0x398] sm:$0xff]  }
  0x94   :  { %1751 = vmatmul.mubr.bf16.gmra.mrb[56].mxu1 %v13858_v43  ;;  %1626 = vmatprep.mubr.bf16.mxu0 %v13878_v48  ;;  %v13241_v43 = vld [vmem:[%s20247_s1 + $0x220] sm:$0xff]  }
  0x95   :  { %1758 = vmatprep.mubr.bf16.mxu1 %v13883_v49  ;;  %11768 = vmatpush3.bf16.msra.mxu0 %v13233_v34  ;;  %v13242_v48 = vld [vmem:[%s20247_s1 + $0x2a0] sm:$0xff]   ;;  %v13243_v49 = vld [vmem:[%s20247_s1 + $0x268] sm:$0xff]  }
  0x96   :  { %11862 = vmatpush3.bf16.msra.mxu1 %v13234_v35  ;;  %11769 = vmatprep.subr.bf16.mxu0 %v13235_v40  ;;  %v14456_v34 = vld [vmem:[%s20246_s0 + $0x44] ss:$16 sps:$4 sm:$0xff]   ;;  %v14462_v35 = vld [vmem:[%s20246_s0 + $0x4c] ss:$16 sps:$4 sm:$0xff]  }
  0x97   :  { %11863 = vmatprep.subr.bf16.mxu1 %v13236_v41  ;;  %v13271_v40 = vld [vmem:[%s20247_s1 + $0x360] sm:$0xff]  }
  0x98   :  { %v13272_v41 = vld [vmem:[%s20247_s1 + $0x3e0] sm:$0xff]  }
  0x99   :  { %11770 = vmatpush3.bf16.msra.mxu0 %v13237_v38 }
  0x9a   :  { %11864 = vmatpush3.bf16.msra.mxu1 %v13238_v39  ;;  %11771 = vmatprep.subr.bf16.mxu0 %v13239_v46 }
  0x9b   :  { %11865 = vmatprep.subr.bf16.mxu1 %v13240_v42  ;;  %1627 = vmatmul.mubr.bf16.gmra.mrb[60].mxu0 %v13888_v50  ;;  %v13248_v50 = vld [vmem:[%s20247_s1 + $0x2f0] sm:$0xff]  }
  0x9c   :  { %1759 = vmatmul.mubr.bf16.gmra.mrb[60].mxu1 %v13893_v51  ;;  %1634 = vmatprep.mubr.bf16.mxu0 %v13899_v52  ;;  %v13249_v51 = vld [vmem:[%s20247_s1 + $0x230] sm:$0xff]  }
  0x9d   :  { %1766 = vmatprep.mubr.bf16.mxu1 %v13905_v53  ;;  %11772 = vmatpush3.bf16.msra.mxu0 %v13241_v43  ;;  %v13250_v52 = vld [vmem:[%s20247_s1 + $0x2b0] sm:$0xff]   ;;  %v13251_v53 = vld [vmem:[%s20247_s1 + $0x278] sm:$0xff]  }
  0x9e   :  { %11866 = vmatpush3.bf16.msra.mxu1 %v13242_v48  ;;  %11773 = vmatprep.subr.bf16.mxu0 %v13243_v49 }
  0x9f   :  { %11867 = vmatprep.subr.bf16.mxu1 %v13244_v47  ;;  %v13273_v47 = vld [vmem:[%s20247_s1 + $0x320] sm:$0xff]  }
  0xa1   :  { %11774 = vmatpush3.bf16.msra.mxu0 %v13245_v6  ;;  %v13274_v6 = vld [vmem:[%s20247_s1 + $0x3a0] sm:$0xff]  }
  0xa2   :  { %11868 = vmatpush3.bf16.msra.mxu1 %v13246_v7  ;;  %11775 = vmatprep.subr.bf16.mxu0 %v13247_v22 }
  0xa3   :  { %11869 = vmatprep.subr.bf16.mxu1 %v13248_v50  ;;  %1635 = vmatmul.mubr.bf16.gmra.mrb[64].mxu0 %v13926_v58  ;;  %v13256_v58 = vld [vmem:[%s20247_s1 + $0x3c0] sm:$0xff]  }
  0xa4   :  { %1767 = vmatmul.mubr.bf16.gmra.mrb[64].mxu1 %v13931_v59  ;;  %1642 = vmatprep.mubr.bf16.mxu0 %v13936_v60  ;;  %v14362_v59 = vld [vmem:[%s20246_s0 + $0x4] ss:$16 sps:$4 sm:$0xff]   ;;  %v14368_v60 = vld [vmem:[%s20246_s0 + $0xc] ss:$16 sps:$4 sm:$0xff]  }
  0xa5   :  { %1774 = vmatprep.mubr.bf16.mxu1 %v13941_v61  ;;  %11776 = vmatpush3.bf16.msra.mxu0 %v13249_v51  ;;  %v13257_v61 = vld [vmem:[%s20247_s1 + $0x300] sm:$0xff]   ;;  %v13275_v51 = vld [vmem:[%s20247_s1 + $0x368] sm:$0xff]  }
  0xa6   :  { %11870 = vmatpush3.bf16.msra.mxu1 %v13250_v52  ;;  %11777 = vmatprep.subr.bf16.mxu0 %v13251_v53  ;;  %v13276_v52 = vld [vmem:[%s20247_s1 + $0x3e8] sm:$0xff]  }
  0xa7   :  { %11871 = vmatprep.subr.bf16.mxu1 %v13252_v23 }
  0xa9   :  { %11778 = vmatpush3.bf16.msra.mxu0 %v13253_v26 }
  0xaa   :  { %11872 = vmatpush3.bf16.msra.mxu1 %v13254_v28  ;;  %11951 = vmatprep.subr.bf16.mxu0 %v13255_v32  ;;  %v14488_v28 = vld [vmem:[%s20246_s0 + $0x40] ss:$16 sps:$4 sm:$0xff]   ;;  %v14494_v32 = vld [vmem:[%s20246_s0 + $0x48] ss:$16 sps:$4 sm:$0xff]  }
  0xab   :  { %12045 = vmatprep.subr.bf16.mxu1 %v13256_v58  ;;  %1643 = vmatmul.mubr.bf16.gmra.mrb[68].mxu0 %v13956_v0  ;;  %v13258_v0 = vld [vmem:[%s20247_s1 + $0x380] sm:$0xff]   ;;  %v13277_v58 = vld [vmem:[%s20247_s1 + $0x328] sm:$0xff]  }
  0xac   :  { %1775 = vmatmul.mubr.bf16.gmra.mrb[68].mxu1 %v13961_v1  ;;  %1650 = vmatprep.mubr.bf16.mxu0 %v13972_v4  ;;  %v13259_v1 = vld [vmem:[%s20247_s1 + $0x348] sm:$0xff]  }
  0xad   :  { %1782 = vmatprep.mubr.bf16.mxu1 %v13977_v5  ;;  %v13260_v4 = vld [vmem:[%s20247_s1 + $0x3c8] sm:$0xff]  }
  0xae   :  { %v13261_v5 = vld [vmem:[%s20247_s1 + $0x308] sm:$0xff]  }
  0xb3   :  { %1651 = vmatmul.mubr.bf16.gmra.mrb[72].mxu0 %v13998_v10  ;;  %v13262_v10 = vld [vmem:[%s20247_s1 + $0x388] sm:$0xff]  }
  0xb4   :  { %1783 = vmatmul.mubr.bf16.gmra.mrb[72].mxu1 %v14003_v11  ;;  %1656 = vmatprep.mubr.bf16.mxu0 %v14008_v12  ;;  %v14392_v11 = vld [vmem:[%s20246_s0] ss:$16 sps:$4 sm:$0xff]   ;;  %v14398_v12 = vld [vmem:[%s20246_s0 + $0x8] ss:$16 sps:$4 sm:$0xff]  }
  0xb5   :  { %1788 = vmatprep.mubr.bf16.mxu1 %v14013_v13  ;;  %v14404_v13 = vld [vmem:[%s20246_s0 + $0x24] ss:$16 sps:$4 sm:$0xff]  }
  0xbb   :  { %1657 = vmatmul.mubr.bf16.gmra.mrb[76].mxu0 %v14028_v16  ;;  %v14410_v16 = vld [vmem:[%s20246_s0 + $0x2c] ss:$16 sps:$4 sm:$0xff]  }
  0xbc   :  { %1789 = vmatmul.mubr.bf16.gmra.mrb[76].mxu1 %v14033_v17  ;;  %1664 = vmatprep.mubr.bf16.mxu0 %v14044_v20  ;;  %v13263_v17 = vld [vmem:[%s20247_s1 + $0x350] sm:$0xff]  }
  0xbd   :  { %1796 = vmatprep.mubr.bf16.mxu1 %v14049_v21  ;;  %v13264_v20 = vld [vmem:[%s20247_s1 + $0x3d0] sm:$0xff]  }
  0xc3   :  { %1665 = vmatmul.mubr.bf16.gmra.mrb[80].mxu0 %v14064_v24 }
  0xc4   :  { %1797 = vmatmul.mubr.bf16.gmra.mrb[80].mxu1 %v14069_v25  ;;  %1672 = vmatprep.mubr.bf16.mxu0 %v14077_v27 }
  0xc5   :  { %1804 = vmatprep.mubr.bf16.mxu1 %v14085_v29  ;;  %v13265_v29 = vld [vmem:[%s20247_s1 + $0x310] sm:$0xff]  }
  0xcb   :  { %1673 = vmatmul.mubr.bf16.gmra.mrb[84].mxu0 %v14100_v36  ;;  %v13266_v36 = vld [vmem:[%s20247_s1 + $0x390] sm:$0xff]  }
  0xcc   :  { %1805 = vmatmul.mubr.bf16.gmra.mrb[84].mxu1 %v14105_v37  ;;  %1680 = vmatprep.mubr.bf16.mxu0 %v14116_v44 }
  0xcd   :  { %1812 = vmatprep.mubr.bf16.mxu1 %v14121_v45 }
  0xd3   :  { %1681 = vmatmul.mubr.bf16.gmra.mrb[88].mxu0 %v14136_v54 }
  0xd4   :  { %1813 = vmatmul.mubr.bf16.gmra.mrb[88].mxu1 %v14141_v55  ;;  %1688 = vmatprep.mubr.bf16.mxu0 %v14146_v56  ;;  %v13267_v55 = vld [vmem:[%s20247_s1 + $0x358] sm:$0xff]  }
  0xd5   :  { %1820 = vmatprep.mubr.bf16.mxu1 %v14151_v57 }
  0xdb   :  { %1689 = vmatmul.mubr.bf16.gmra.mrb[92].mxu0 %v14160_v62  ;;  %v13268_v62 = vld [vmem:[%s20247_s1 + $0x3d8] sm:$0xff]  }
  0xdc   :  { %1821 = vmatmul.mubr.bf16.gmra.mrb[92].mxu1 %v14165_v63  ;;  %1696 = vmatprep.mubr.bf16.mxu0 %v14170_v2 }
  0xdd   :  { %1828 = vmatprep.mubr.bf16.mxu1 %v14175_v3 }
  0xe3   :  { %1697 = vmatmul.mubr.bf16.gmra.mrb[96].mxu0 %v14190_v8  ;;  %v14436_v8 = vld [vmem:[%s20246_s0 + $0x20] ss:$16 sps:$4 sm:$0xff]  }
  0xe4   :  { %1829 = vmatmul.mubr.bf16.gmra.mrb[96].mxu1 %v14195_v9  ;;  %1703 = vmatprep.mubr.bf16.mxu0 %v14197_v14  ;;  %v14442_v9 = vld [vmem:[%s20246_s0 + $0x28] ss:$16 sps:$4 sm:$0xff]  }
  0xe5   :  { %1835 = vmatprep.mubr.bf16.mxu1 %v14199_v15 }
  0xeb   :  { %1704 = vmatmul.mubr.bf16.gmra.mrb[100].mxu0 %v14205_v18 }
  0xec   :  { %1836 = vmatmul.mubr.bf16.gmra.mrb[100].mxu1 %v14207_v19  ;;  %2835 = vmatprep.mubr.bf16.mxu0 %v14362_v59 }
  0xed   :  { %2967 = vmatprep.mubr.bf16.mxu1 %v14368_v60 }
  0xf3   :  { %2836 = vmatmul.mubr.bf16.vlgmr.msra.gmra.mrb[104].mxu0 %v14392_v11 }
  0xf4   :  { %2968 = vmatmul.mubr.bf16.vlgmr.msra.gmra.mrb[104].mxu1 %v14398_v12  ;;  %11952 = vmatpush3.bf16.msra.mxu0 %v13257_v61  ;;  %v13278_v61 = vld [vmem:[%s20247_s1 + $0x3a8] sm:$0xff]  }
  0xf5   :  { %12046 = vmatpush3.bf16.msra.mxu1 %v13258_v0  ;;  %2843 = vmatprep.mubr.bf16.mxu0 %v14404_v13 }
  0xf6   :  { %2975 = vmatprep.mubr.bf16.mxu1 %v14410_v16  ;;  %v11403_v21 = vpop.f32.mrb[0].mxu0  ;;  %11953 = vmatprep.subr.bf16.mxu0 %v13259_v1  ;;  %v14508_v1 = vld [vmem:[%s20246_s0 + $0x64] ss:$16 sps:$4 sm:$0xff]  }
  0xf7   :  { %v11497_v24 = vpop.f32.mrb[0].mxu1  ;;  %12047 = vmatprep.subr.bf16.mxu1 %v13260_v4  ;;  %v11404_v25 = vpop.f32.mrb[1].mxu0  ;;  %v14514_v4 = vld [vmem:[%s20246_s0 + $0x6c] ss:$16 sps:$4 sm:$0xff]  }
  0xf8   :  { %v11498_v27 = vpop.f32.mrb[1].mxu1  ;;  %v11405_v37 = vadd.f32 %v11404_v25, %v11403_v21  ;;  %v11406_v45 = vpop.f32.mrb[2].mxu0  ;;  %11954 = vmatpush3.bf16.msra.mxu0 %v13261_v5  ;;  %v13279_v5 = vld [vmem:[%s20247_s1 + $0x370] sm:$0xff]  }
  0xf9   :  { %v11499_v44 = vadd.f32 %v11498_v27, %v11497_v24  ;;  %v11500_v54 = vpop.f32.mrb[2].mxu1  ;;  %12048 = vmatpush3.bf16.msra.mxu1 %v13262_v10  ;;  %v11407_v56 = vpop.f32.mrb[3].mxu0  ;;  %11955 = vmatprep.subr.bf16.mxu0 %v13263_v17  ;;  %v13280_v24 = vld [vmem:[%s20247_s1 + $0x3f0] sm:$0xff]  }
  0xfa   :  { %v11501_v57 = vpop.f32.mrb[3].mxu1  ;;  %12049 = vmatprep.subr.bf16.mxu1 %v13264_v20  ;;  %v11408_v2 = vadd.f32 %v11407_v56, %v11406_v45  ;;  %v13281_v25 = vld [vmem:[%s20247_s1 + $0x330] sm:$0xff]   ;;  %v13284_v56 = vld [vmem:[%s20247_s1 + $0x3f8] sm:$0xff]  }
  0xfb   :  { %v14431_v63 = vadd.f32 %v11499_v44, %v11405_v37  ;;  %v11502_v3 = vadd.f32 %v11501_v57, %v11500_v54  ;;  %2844 = vmatmul.mubr.bf16.gmra.mrb[108].mxu0 %v14436_v8  ;;  %v13282_v44 = vld [vmem:[%s20247_s1 + $0x3b0] sm:$0xff]  }
  0xfc   :  { %2976 = vmatmul.mubr.bf16.gmra.mrb[108].mxu1 %v14442_v9  ;;  %2851 = vmatprep.mubr.bf16.mxu0 %v14456_v34 }
  0xfd   :  { %v14451_v31 = vadd.f32 %v11502_v3, %v11408_v2  ;;  %2983 = vmatprep.mubr.bf16.mxu1 %v14462_v35  ;;  %11956 = vmatpush3.bf16.msra.mxu0 %v13265_v29  ;;  %v14540_v3 = vld [vmem:[%s20246_s0 + $0x60] ss:$16 sps:$4 sm:$0xff]  }
  0xfe   :  { %12050 = vmatpush3.bf16.msra.mxu1 %v13266_v36  ;;  %v11409_v38 = vpop.f32.mrb[4].mxu0  ;;  %11957 = vmatprep.subr.bf16.mxu0 %v13267_v55  ;;  %v13283_v55 = vld [vmem:[%s20247_s1 + $0x378] sm:$0xff]  }
  0xff   :  { %v11503_v39 = vpop.f32.mrb[4].mxu1  ;;  %v11410_v46 = vpop.f32.mrb[5].mxu0  ;;  %12051 = vmatprep.subr.bf16.mxu1 %v13268_v62 }
 0x100   :  { %v11504_v42 = vpop.f32.mrb[5].mxu1  ;;  %v11411_v43 = vadd.f32 %v11410_v46, %v11409_v38  ;;  %v11412_v48 = vpop.f32.mrb[6].mxu0  ;;  %v13285_v38 = vld [vmem:[%s20247_s1 + $0x338] sm:$0xff]  }
 0x101   :  { %v11506_v49 = vpop.f32.mrb[6].mxu1  ;;  %v11505_v7 = vadd.f32 %v11504_v42, %v11503_v39  ;;  %v11413_v22 = vpop.f32.mrb[7].mxu0  ;;  %11958 = vmatpush3.bf16.msra.mxu0 %v13269_v33  ;;  %v14546_v33 = vld [vmem:[%s20246_s0 + $0x68] ss:$16 sps:$4 sm:$0xff]  }
 0x102   :  { %v11507_v50 = vpop.f32.mrb[7].mxu1  ;;  %12052 = vmatpush3.bf16.msra.mxu1 %v13270_v30  ;;  %v11414_v53 = vadd.f32 %v11413_v22, %v11412_v48  ;;  %11959 = vmatprep.subr.bf16.mxu0 %v13271_v40  ;;  %v14554_v40 = vld [vmem:[%s20246_s0 + $0x84] ss:$16 sps:$4 sm:$0xff]   ;;  %v13286_v42 = vld [vmem:[%s20247_s1 + $0x3b8] sm:$0xff]  }
 0x103   :  { %v11508_v23 = vadd.f32 %v11507_v50, %v11506_v49  ;;  %12053 = vmatprep.subr.bf16.mxu1 %v13272_v41  ;;  %v14483_v26 = vadd.f32 %v11505_v7, %v11411_v43  ;;  %2852 = vmatmul.mubr.bf16.gmra.mrb[112].mxu0 %v14488_v28  ;;  %v14560_v41 = vld [vmem:[%s20246_s0 + $0x8c] ss:$16 sps:$4 sm:$0xff]   ;;  %v13287_v49 = vld [vmem:[%s20247_s1 + $0x440] sm:$0xff]  }
 0x104   :  { %2984 = vmatmul.mubr.bf16.gmra.mrb[112].mxu1 %v14494_v32  ;;  %2859 = vmatprep.mubr.bf16.mxu0 %v14508_v1 }
 0x105   :  { %v14503_v0 = vadd.f32 %v11508_v23, %v11414_v53  ;;  %2991 = vmatprep.mubr.bf16.mxu1 %v14514_v4  ;;  %11960 = vmatpush3.bf16.msra.mxu0 %v13273_v47  ;;  %v13288_v47 = vld [vmem:[%s20247_s1 + $0x4c0] sm:$0xff]  }
 0x106   :  { %12054 = vmatpush3.bf16.msra.mxu1 %v13274_v6  ;;  %v11415_v10 = vpop.f32.mrb[8].mxu0  ;;  %11961 = vmatprep.subr.bf16.mxu0 %v13275_v51 }
 0x107   :  { %v11509_v17 = vpop.f32.mrb[8].mxu1  ;;  %12055 = vmatprep.subr.bf16.mxu1 %v13276_v52  ;;  %v11416_v20 = vpop.f32.mrb[9].mxu0 }
 0x108   :  { %v11510_v21 = vpop.f32.mrb[9].mxu1  ;;  %v11417_v27 = vadd.f32 %v11416_v20, %v11415_v10  ;;  %v11418_v36 = vpop.f32.mrb[10].mxu0  ;;  %v14600_v20 = vld [vmem:[%s20246_s0 + $0xac] ss:$16 sps:$4 sm:$0xff]  }
 0x109   :  { %v11511_v29 = vadd.f32 %v11510_v21, %v11509_v17  ;;  %v11512_v37 = vpop.f32.mrb[10].mxu1  ;;  %v11419_v45 = vpop.f32.mrb[11].mxu0  ;;  %11962 = vmatpush3.bf16.msra.mxu0 %v13277_v58  ;;  %v14594_v17 = vld [vmem:[%s20246_s0 + $0xa4] ss:$16 sps:$4 sm:$0xff]   ;;  %20397 = vst [vmem:[#allocation9_spill] sm:$0xff] %v14600_v20 }
 0x10a   :  { %v11513_v54 = vpop.f32.mrb[11].mxu1  ;;  %12056 = vmatpush3.bf16.msra.mxu1 %v13278_v61  ;;  %v11420_v62 = vadd.f32 %v11419_v45, %v11418_v36  ;;  %11963 = vmatprep.subr.bf16.mxu0 %v13279_v5  ;;  %v14580_v61 = vld [vmem:[%s20246_s0 + $0x80] ss:$16 sps:$4 sm:$0xff]   ;;  %v14586_v5 = vld [vmem:[%s20246_s0 + $0x88] ss:$16 sps:$4 sm:$0xff]  }
 0x10b   :  { %v14535_v57 = vadd.f32 %v11511_v29, %v11417_v27  ;;  %v11514_v2 = vadd.f32 %v11513_v54, %v11512_v37  ;;  %2860 = vmatmul.mubr.bf16.gmra.mrb[116].mxu0 %v14540_v3  ;;  %12057 = vmatprep.subr.bf16.mxu1 %v13280_v24 }
 0x10c   :  { %2992 = vmatmul.mubr.bf16.gmra.mrb[116].mxu1 %v14546_v33  ;;  %2867 = vmatprep.mubr.bf16.mxu0 %v14554_v40 }
 0x10d   :  { %v14549_v30 = vadd.f32 %v11514_v2, %v11420_v62  ;;  %2999 = vmatprep.mubr.bf16.mxu1 %v14560_v41  ;;  %11964 = vmatpush3.bf16.msra.mxu0 %v13281_v25 }
 0x10e   :  { %v11421_v39 = vpop.f32.mrb[12].mxu0  ;;  %12058 = vmatpush3.bf16.msra.mxu1 %v13282_v44  ;;  %11965 = vmatprep.subr.bf16.mxu0 %v13283_v55 }
 0x10f   :  { %v11515_v46 = vpop.f32.mrb[12].mxu1  ;;  %v11422_v43 = vpop.f32.mrb[13].mxu0  ;;  %12059 = vmatprep.subr.bf16.mxu1 %v13284_v56 }
 0x110   :  { %v11516_v48 = vpop.f32.mrb[13].mxu1  ;;  %v11423_v6 = vadd.f32 %v11422_v43, %v11421_v39  ;;  %v11424_v22 = vpop.f32.mrb[14].mxu0 }
 0x111   :  { %v11517_v7 = vadd.f32 %v11516_v48, %v11515_v46  ;;  %v11518_v50 = vpop.f32.mrb[14].mxu1  ;;  %v11425_v51 = vpop.f32.mrb[15].mxu0  ;;  %11966 = vmatpush3.bf16.msra.mxu0 %v13285_v38 }
 0x112   :  { %v11519_v52 = vpop.f32.mrb[15].mxu1  ;;  %v11426_v23 = vadd.f32 %v11425_v51, %v11424_v22  ;;  %12060 = vmatpush3.bf16.msra.mxu1 %v13286_v42  ;;  %12139 = vmatprep.subr.bf16.mxu0 %v13287_v49 }
 0x113   :  { %v14575_v53 = vadd.f32 %v11517_v7, %v11423_v6  ;;  %v11520_v58 = vadd.f32 %v11519_v52, %v11518_v50  ;;  %2868 = vmatmul.mubr.bf16.gmra.mrb[120].mxu0 %v14580_v61  ;;  %12233 = vmatprep.subr.bf16.mxu1 %v13288_v47 }
 0x114   :  { %3000 = vmatmul.mubr.bf16.gmra.mrb[120].mxu1 %v14586_v5  ;;  %2875 = vmatprep.mubr.bf16.mxu0 %v14594_v17 }
 0x115   :  { %v14589_v10 = vadd.f32 %v11520_v58, %v11426_v23  ;;  %3007 = vmatprep.mubr.bf16.mxu1 %v14600_v20 }
 0x116   :  { %v11427_v21 = vpop.f32.mrb[16].mxu0 }
 0x117   :  { %v11521_v24 = vpop.f32.mrb[16].mxu1 }
 0x118   :  { %8 = vsyncpa [#allocation3], 0  ;;  %v11428_v25 = vpop.f32.mrb[17].mxu0  ;;  %v11522_v27 = vpop.f32.mrb[17].mxu1  ;;  %v14608_v2 = vld [vmem:[%s20246_s0 + $0xa0] ss:$16 sps:$4 sm:$0xff]  }
 0x119   :  { %v11429_v29 = vadd.f32 %v11428_v25, %v11427_v21  ;;  %v11523_v36 = vadd.f32 %v11522_v27, %v11521_v24  ;;  %v11430_v37 = vpop.f32.mrb[18].mxu0  ;;  %v11524_v44 = vpop.f32.mrb[18].mxu1  ;;  %20398 = vst [vmem:[#allocation10_spill] sm:$0xff] %v14608_v2  ;;  %v14614_v38 = vld [vmem:[%s20246_s0 + $0xa8] ss:$16 sps:$4 sm:$0xff]   ;;  %vm2203_vm0 = vcmask 1040384  }
 0x11a   :  { %v11431_v45 = vpop.f32.mrb[19].mxu0  ;;  %v11525_v54 = vpop.f32.mrb[19].mxu1  ;;  %20399 = vst [vmem:[#allocation11_spill] sm:$0xff] %v14614_v38  ;;  %v14622_v46 = vld [vmem:[%s20246_s0 + $0xc4] ss:$16 sps:$4 sm:$0xff]   ;;  %vm2204_vm1 = vcmask 1042434  }
 0x11b   :  { %v14603_v55 = vadd.f32 %v11523_v36, %v11429_v29  ;;  %v11432_v56 = vadd.f32 %v11431_v45, %v11430_v37  ;;  %v11526_v62 = vadd.f32 %v11525_v54, %v11524_v44  ;;  %2876 = vmatmul.mubr.bf16.gmra.mrb[124].mxu0 %v14608_v2  ;;  %20400 = vst [vmem:[#allocation12_spill] sm:$0xff] %v14622_v46  ;;  %v14628_v42 = vld [vmem:[%s20246_s0 + $0xcc] ss:$16 sps:$4 sm:$0xff]   ;;  %v14634_v51 = vld [vmem:[%s20246_s0 + $0xc0] ss:$16 sps:$4 sm:$0xff]   ;;  %vm14984_vm2 = vmor %vm2203_vm0, %vm2204_vm1  ;;  %vm2206_vm3 = vcmask 1044484  }
 0x11c   :  { %3008 = vmatmul.mubr.bf16.gmra.mrb[124].mxu1 %v14614_v38  ;;  %2881 = vmatprep.mubr.bf16.mxu0 %v14622_v46  ;;  %20401 = vst [vmem:[#allocation13_spill] sm:$0xff] %v14628_v42  ;;  %20402 = vst [vmem:[#allocation14_spill] sm:$0xff] %v14634_v51  ;;  %v14640_v52 = vld [vmem:[%s20246_s0 + $0xc8] ss:$16 sps:$4 sm:$0xff]   ;;  %v14646_v23 = vld [vmem:[%s20246_s0 + $0xe4] ss:$16 sps:$4 sm:$0xff]  }
 0x11d   :  { %v14617_v39 = vadd.f32 %v11526_v62, %v11432_v56  ;;  %3013 = vmatprep.mubr.bf16.mxu1 %v14628_v42  ;;  %20403 = vst [vmem:[#allocation15_spill] sm:$0xff] %v14640_v52  ;;  %20404 = vst [vmem:[#allocation16_spill] sm:$0xff] %v14646_v23  ;;  %v14652_v58 = vld [vmem:[%s20246_s0 + $0xec] ss:$16 sps:$4 sm:$0xff]   ;;  %v994_v2 = vcombine.high %v14603_v55, %v14603_v55  ;;  %vm2208_vm5 = vcmask 1046534   ;;  %vm10453_vm7 = vcmask 654336  }
 0x11e   :  { %v11433_v43 = vpop.f32.mrb[20].mxu0  ;;  %20405 = vst [vmem:[#allocation17_spill] sm:$0xff] %v14652_v58  ;;  %vm15020_vm4 = vmor %vm14984_vm2, %vm2206_vm3 }
 0x11f   :  { %v11527_v48 = vpop.f32.mrb[20].mxu1  ;;  %v11434_v49 = vpop.f32.mrb[21].mxu0  ;;  %vm15056_vm6 = vmor %vm15020_vm4, %vm2208_vm5 }
 0x120   :  { %v11528_v47 = vpop.f32.mrb[21].mxu1  ;;  %v11436_v6 = vpop.f32.mrb[22].mxu0  ;;  %v13477_v48 = vld [vmem:[%s20246_s0 + $0xe0] ss:$16 sps:$4 sm:$0xff]   ;;  %v13478_v49 = vld [vmem:[%s20246_s0 + $0xe8] ss:$16 sps:$4 sm:$0xff]  }
 0x121   :  { %v11530_v7 = vpop.f32.mrb[22].mxu1  ;;  %v11437_v22 = vpop.f32.mrb[23].mxu0  ;;  %v13479_v6 = vld [vmem:[%s20246_s0 + $0x104] ss:$16 sps:$4 sm:$0xff]  }
 0x122   :  { %v11531_v50 = vpop.f32.mrb[23].mxu1  ;;  %v13480_v7 = vld [vmem:[%s20246_s0 + $0x10c] ss:$16 sps:$4 sm:$0xff]  }
 0x123   :  { %2882 = vmatmul.mubr.bf16.gmra.mrb[128].mxu0 %v14634_v51 }
 0x124   :  { %3014 = vmatmul.mubr.bf16.gmra.mrb[128].mxu1 %v14640_v52  ;;  %2889 = vmatprep.mubr.bf16.mxu0 %v14646_v23 }
 0x125   :  { %3021 = vmatprep.mubr.bf16.mxu1 %v14652_v58 }
 0x126   :  { %v11439_v21 = vpop.f32.mrb[24].mxu0 }
 0x127   :  { %v11533_v24 = vpop.f32.mrb[24].mxu1  ;;  %v11440_v25 = vpop.f32.mrb[25].mxu0 }
 0x128   :  { %v11534_v27 = vpop.f32.mrb[25].mxu1  ;;  %v11441_v29 = vadd.f32 %v11440_v25, %v11439_v21  ;;  %v11442_v37 = vpop.f32.mrb[26].mxu0 }
 0x129   :  { %v11535_v36 = vadd.f32 %v11534_v27, %v11533_v24  ;;  %v11536_v44 = vpop.f32.mrb[26].mxu1  ;;  %v11443_v45 = vpop.f32.mrb[27].mxu0 }
 0x12a   :  { %v11537_v54 = vpop.f32.mrb[27].mxu1  ;;  %v11444_v62 = vadd.f32 %v11443_v45, %v11442_v37 }
 0x12b   :  { %v14655_v56 = vadd.f32 %v11535_v36, %v11441_v29  ;;  %v11538_v43 = vadd.f32 %v11537_v54, %v11536_v44  ;;  %2890 = vmatmul.mubr.bf16.gmra.mrb[132].mxu0 %v13477_v48  ;;  %v13482_v48 = vld [vmem:[%s20246_s0 + $0x108] ss:$16 sps:$4 sm:$0xff]  }
 0x12c   :  { %3022 = vmatmul.mubr.bf16.gmra.mrb[132].mxu1 %v13478_v49  ;;  %2897 = vmatprep.mubr.bf16.mxu0 %v13479_v6  ;;  %v13483_v6 = vld [vmem:[%s20246_s0 + $0x124] ss:$16 sps:$4 sm:$0xff]  }
 0x12d   :  { %v14663_v47 = vadd.f32 %v11538_v43, %v11444_v62  ;;  %3029 = vmatprep.mubr.bf16.mxu1 %v13480_v7  ;;  %v13481_v43 = vld [vmem:[%s20246_s0 + $0x100] ss:$16 sps:$4 sm:$0xff]   ;;  %v13484_v7 = vld [vmem:[%s20246_s0 + $0x12c] ss:$16 sps:$4 sm:$0xff]  }
 0x12e   :  { %v11445_v22 = vpop.f32.mrb[28].mxu0 }
 0x12f   :  { %v11539_v50 = vpop.f32.mrb[28].mxu1  ;;  %v11446_v21 = vpop.f32.mrb[29].mxu0 }
 0x130   :  { %v11540_v24 = vpop.f32.mrb[29].mxu1  ;;  %v11447_v25 = vadd.f32 %v11446_v21, %v11445_v22  ;;  %v11448_v27 = vpop.f32.mrb[30].mxu0 }
 0x131   :  { %v11542_v29 = vpop.f32.mrb[30].mxu1  ;;  %v11541_v36 = vadd.f32 %v11540_v24, %v11539_v50  ;;  %v11449_v37 = vpop.f32.mrb[31].mxu0 }
 0x132   :  { %v11543_v44 = vpop.f32.mrb[31].mxu1  ;;  %v11450_v45 = vadd.f32 %v11449_v37, %v11448_v27 }
 0x133   :  { %v11544_v54 = vadd.f32 %v11543_v44, %v11542_v29  ;;  %v14671_v62 = vadd.f32 %v11541_v36, %v11447_v25  ;;  %2898 = vmatmul.mubr.bf16.gmra.mrb[136].mxu0 %v13481_v43 }
 0x134   :  { %3030 = vmatmul.mubr.bf16.gmra.mrb[136].mxu1 %v13482_v48  ;;  %2905 = vmatprep.mubr.bf16.mxu0 %v13483_v6  ;;  %v13485_v48 = vld [vmem:[%s20246_s0 + $0x120] ss:$16 sps:$4 sm:$0xff]   ;;  %v13486_v6 = vld [vmem:[%s20246_s0 + $0x128] ss:$16 sps:$4 sm:$0xff]  }
 0x135   :  { %v14679_v49 = vadd.f32 %v11544_v54, %v11450_v45  ;;  %3037 = vmatprep.mubr.bf16.mxu1 %v13484_v7 }
 0x136   :  { %v11451_v22 = vpop.f32.mrb[32].mxu0 }
 0x137   :  { %v11545_v50 = vpop.f32.mrb[32].mxu1  ;;  %v11452_v21 = vpop.f32.mrb[33].mxu0 }
 0x138   :  { %v11546_v24 = vpop.f32.mrb[33].mxu1  ;;  %v11453_v25 = vadd.f32 %v11452_v21, %v11451_v22  ;;  %v11454_v29 = vpop.f32.mrb[34].mxu0  ;;  %v13487_v22 = vld [vmem:[%s20246_s0 + $0x144] ss:$16 sps:$4 sm:$0xff]   ;;  %v13683_v21 = vmov 1983009808  }
 0x139   :  { %v11547_v27 = vadd.f32 %v11546_v24, %v11545_v50  ;;  %v11548_v36 = vpop.f32.mrb[34].mxu1  ;;  %v11455_v37 = vpop.f32.mrb[35].mxu0  ;;  %v13488_v50 = vld [vmem:[%s20246_s0 + $0x14c] ss:$16 sps:$4 sm:$0xff]   ;;  %v863_v24 = vunpack.c.l.s4 %v13683_v21  ;;  %v13490_v21 = vld [vmem:[%s20246_s0 + $0x148] ss:$16 sps:$4 sm:$0xff]  }
 0x13a   :  { %v11549_v44 = vpop.f32.mrb[35].mxu1  ;;  %v11456_v54 = vadd.f32 %v11455_v37, %v11454_v29 }
 0x13b   :  { %v14687_v45 = vadd.f32 %v11547_v27, %v11453_v25  ;;  %v11550_v43 = vadd.f32 %v11549_v44, %v11548_v36  ;;  %2906 = vmatmul.mubr.bf16.gmra.mrb[140].mxu0 %v13485_v48  ;;  %v865_v25 = vlaneseq }
 0x13c   :  { %3038 = vmatmul.mubr.bf16.gmra.mrb[140].mxu1 %v13486_v6  ;;  %2913 = vmatprep.mubr.bf16.mxu0 %v13487_v22  ;;  %v864_v6 = vunpack.c.0.s8 %v863_v24  ;;  %v13491_v24 = vld [vmem:[%s20246_s0 + $0x164] ss:$16 sps:$4 sm:$0xff]  }
 0x13d   :  { %v14695_v7 = vadd.f32 %v11550_v43, %v11456_v54  ;;  %3045 = vmatprep.mubr.bf16.mxu1 %v13488_v50  ;;  %v866_v58 = vshrl.u32 %v865_v25, 7  ;;  %v13489_v50 = vld [vmem:[%s20246_s0 + $0x140] ss:$16 sps:$4 sm:$0xff]  }
 0x13e   :  { %v11457_v27 = vpop.f32.mrb[36].mxu0 }
 0x13f   :  { %20406 = vst [vmem:[#allocation18_spill] sm:$0xff] %v14695_v7  ;;  %v11551_v29 = vpop.f32.mrb[36].mxu1  ;;  %v11458_v36 = vpop.f32.mrb[37].mxu0  ;;  %v14719_v25 = vsub.s32 %v864_v6, %v866_v58 }
 0x140   :  { %v11552_v37 = vpop.f32.mrb[37].mxu1  ;;  %v11459_v44 = vadd.f32 %v11458_v36, %v11457_v27  ;;  %v11460_v43 = vpop.f32.mrb[38].mxu0 }
 0x141   :  { %v11553_v54 = vadd.f32 %v11552_v37, %v11551_v29  ;;  %v11554_v48 = vpop.f32.mrb[38].mxu1  ;;  %v11461_v23 = vpop.f32.mrb[39].mxu0  ;;  %v861_v29 = vcombine.high %v14431_v63, %v14431_v63 }
 0x142   :  { %v11555_v22 = vpop.f32.mrb[39].mxu1  ;;  %v11462_v51 = vadd.f32 %v11461_v23, %v11460_v43  ;;  %v13492_v23 = vld [vmem:[%s20246_s0 + $0x16c] ss:$16 sps:$4 sm:$0xff]  }
 0x143   :  { %v14703_v52 = vadd.f32 %v11553_v54, %v11459_v44  ;;  %v11556_v42 = vadd.f32 %v11555_v22, %v11554_v48  ;;  %2914 = vmatmul.mubr.bf16.gmra.mrb[144].mxu0 %v13489_v50  ;;  %v14727_v22 = vrot.slane %v14431_v63, %v14719_v25 }
 0x144   :  { %3046 = vmatmul.mubr.bf16.gmra.mrb[144].mxu1 %v13490_v21  ;;  %2921 = vmatprep.mubr.bf16.mxu0 %v13491_v24  ;;  %v14730_v21 = vrot.slane %v861_v29, %v14719_v25  ;;  %v14734_v24 = vrot.slane %v14451_v31, %v14719_v25 }
 0x145   :  { %v14711_v27 = vadd.f32 %v11556_v42, %v11462_v51  ;;  %3053 = vmatprep.mubr.bf16.mxu1 %v13492_v23  ;;  %v878_v42 = vcombine.high %v14451_v31, %v14451_v31  ;;  %v13494_v31 = vld [vmem:[%s20246_s0 + $0x168] ss:$16 sps:$4 sm:$0xff]  }
 0x146   :  { %v11463_v36 = vpop.f32.mrb[40].mxu0  ;;  %20407 = vst [vmem:[#allocation19_spill] sm:$0xff] %v14730_v21 }
 0x147   :  { %v11557_v37 = vpop.f32.mrb[40].mxu1  ;;  %v11464_v51 = vpop.f32.mrb[41].mxu0 }
 0x148   :  { %v11558_v44 = vpop.f32.mrb[41].mxu1  ;;  %v11465_v54 = vadd.f32 %v11464_v51, %v11463_v36  ;;  %v11466_v43 = vpop.f32.mrb[42].mxu0  ;;  %v14737_v36 = vrot.slane %v878_v42, %v14719_v25  ;;  %v895_v51 = vcombine.high %v14483_v26, %v14483_v26  ;;  %v911_v42 = vcombine.high %v14503_v0, %v14503_v0 }
 0x149   :  { %v11560_v48 = vpop.f32.mrb[42].mxu1  ;;  %v11559_v50 = vadd.f32 %v11558_v44, %v11557_v37  ;;  %v11467_v58 = vpop.f32.mrb[43].mxu0  ;;  %v13493_v37 = vld [vmem:[%s20246_s0 + $0x160] ss:$16 sps:$4 sm:$0xff]   ;;  %v14757_v44 = vrot.slane %v14503_v0, %v14719_v25  ;;  %v944_v0 = vcombine.high %v14549_v30, %v14549_v30 }
 0x14a   :  { %v11561_v6 = vpop.f32.mrb[43].mxu1  ;;  %v11468_v23 = vadd.f32 %v11467_v58, %v11466_v43  ;;  %20408 = vst [vmem:[#allocation20_spill] sm:$0xff] %v14737_v36  ;;  %v978_v43 = vcombine.high %v14589_v10, %v14589_v10  ;;  %v1053_v58 = vcombine.high %v14671_v62, %v14671_v62 }
 0x14b   :  { %v11562_v46 = vadd.f32 %v11561_v6, %v11560_v48  ;;  %v14741_v63 = vadd.f32 %v11559_v50, %v11465_v54  ;;  %2922 = vmatmul.mubr.bf16.gmra.mrb[148].mxu0 %v13493_v37  ;;  %v14768_v6 = vrot.slane %v895_v51, %v14719_v25  ;;  %v14779_v51 = vrot.slane %v911_v42, %v14719_v25 }
 0x14c   :  { %3054 = vmatmul.mubr.bf16.gmra.mrb[148].mxu1 %v13494_v31  ;;  %2928 = vmatprep.mubr.bf16.mxu0 %v14197_v14  ;;  %v961_v31 = vcombine.high %v14575_v53, %v14575_v53 }
 0x14d   :  { %v14749_v29 = vadd.f32 %v11562_v46, %v11468_v23  ;;  %3060 = vmatprep.mubr.bf16.mxu1 %v14199_v15 }
 0x14e   :  { %v11469_v48 = vpop.f32.mrb[44].mxu0 }
 0x14f   :  { %v11563_v46 = vpop.f32.mrb[44].mxu1  ;;  %v11470_v23 = vpop.f32.mrb[45].mxu0 }
 0x150   :  { %v11564_v37 = vpop.f32.mrb[45].mxu1  ;;  %v11471_v54 = vadd.f32 %v11470_v23, %v11469_v48  ;;  %v11472_v50 = vpop.f32.mrb[46].mxu0  ;;  %v928_v48 = vcombine.high %v14535_v57, %v14535_v57  ;;  %v14800_v23 = vrot.slane %v944_v0, %v14719_v25 }
 0x151   :  { %v11565_v15 = vadd.f32 %v11564_v37, %v11563_v46  ;;  %v11566_v14 = vpop.f32.mrb[46].mxu1  ;;  %v11473_v36 = vpop.f32.mrb[47].mxu0  ;;  %v14793_v46 = vrot.slane %v14549_v30, %v14719_v25  ;;  %v1027_v30 = vcombine.high %v14655_v56, %v14655_v56  ;;  %v1011_v56 = vcombine.high %v14617_v39, %v14617_v39 }
 0x152   :  { %v11567_v20 = vpop.f32.mrb[47].mxu1  ;;  %v14789_v14 = vrot.slane %v14535_v57, %v14719_v25  ;;  %v14809_v57 = vrot.slane %v961_v31, %v14719_v25  ;;  %v14822_v36 = vrot.slane %v14603_v55, %v14719_v25  ;;  %v14830_v0 = vrot.slane %v928_v48, %v14719_v25 }
 0x153   :  { %v14795_v42 = vadd.f32 %v11565_v15, %v11471_v54  ;;  %v14804_v20 = vrot.slane %v14575_v53, %v14719_v25  ;;  %2929 = vmatmul.mubr.bf16.gmra.mrb[152].mxu0 %v14205_v18  ;;  %v14812_v15 = vrot.slane %v978_v43, %v14719_v25  ;;  %v14825_v54 = vrot.slane %v994_v2, %v14719_v25 }
 0x154   :  { %3061 = vmatmul.mubr.bf16.gmra.mrb[152].mxu1 %v14207_v19  ;;  %3837 = vmatprep.mubr.bf16.mxu0 %v14362_v59  ;;  %v1036_v43 = vcombine.high %v14663_v47, %v14663_v47  ;;  %20409 = vst [vmem:[#allocation21_spill] sm:$0xff] %v14830_v0  ;;  %v1069_v59 = vcombine.high %v14679_v49, %v14679_v49 }
 0x155   :  { %3969 = vmatprep.mubr.bf16.mxu1 %v14368_v60  ;;  %v14855_v31 = vrot.slane %v1027_v30, %v14719_v25  ;;  %v14869_v30 = vrot.slane %v14663_v47, %v14719_v25  ;;  %v14875_v50 = vrot.slane %v1011_v56, %v14719_v25  ;;  %v13291_v47 = vld [vmem:[%s20247_s1 + $0x448] sm:$0xff]  }
 0x156   :  { %v11475_v55 = vpop.f32.mrb[48].mxu0  ;;  %v14896_v56 = vrot.slane %v1069_v59, %v14719_v25  ;;  %v13293_v59 = vld [vmem:[%s20247_s1 + $0x408] sm:$0xff]  }
 0x157   :  { %v11569_v37 = vpop.f32.mrb[48].mxu1  ;;  %v11476_v53 = vpop.f32.mrb[49].mxu0  ;;  %20411 = vst [vmem:[#allocation23_spill] sm:$0xff] %v14875_v50  ;;  %v14881_v55 = vrot.slane %v14671_v62, %v14719_v25  ;;  %v1103_v62 = vcombine.high %v14695_v7, %v14695_v7  ;;  %v14947_v50 = vrot.slane %v14703_v52, %v14719_v25 }
 0x158   :  { %v11570_v38 = vpop.f32.mrb[49].mxu1  ;;  %v14852_v37 = vrot.slane %v14617_v39, %v14719_v25  ;;  %v11478_v2 = vpop.f32.mrb[50].mxu0  ;;  %v13289_v53 = vld [vmem:[%s20247_s1 + $0x400] sm:$0xff]   ;;  %v1086_v39 = vcombine.high %v14687_v45, %v14687_v45  ;;  %20413 = vst [vmem:[#allocation25_spill] sm:$0xff] %v14896_v56 }
 0x159   :  { %v11572_v48 = vpop.f32.mrb[50].mxu1  ;;  %v13290_v38 = vld [vmem:[%s20247_s1 + $0x480] sm:$0xff]   ;;  %v14872_v2 = vrot.slane %v1036_v43, %v14719_v25  ;;  %20412 = vst [vmem:[#allocation24_spill] sm:$0xff] %v14881_v55  ;;  %v13292_v43 = vld [vmem:[%s20247_s1 + $0x4c8] sm:$0xff]   ;;  %20417 = vst [vmem:[#allocation29_spill] sm:$0xff] %v14947_v50 }
 0x15a   :  { %v11479_v48 = vpop.f32.mrb[51].mxu0  ;;  %v11573_v60 = vpop.f32.mrb[51].mxu1 }
 0x15b   :  { %20410 = vst [vmem:[#allocation22_spill] sm:$0xff] %v14872_v2  ;;  %v14893_v60 = vrot.slane %v14679_v49, %v14719_v25  ;;  %3838 = vmatmul.mubr.bf16.vlgmr.msra.gmra.mrb[156].mxu0 %v14392_v11  ;;  %v14908_v49 = vrot.slane %v14687_v45, %v14719_v25  ;;  %v13294_v11 = vld [vmem:[%s20247_s1 + $0x488] sm:$0xff]   ;;  %v1119_v45 = vcombine.high %v14703_v52, %v14703_v52 }
 0x15c   :  { %3970 = vmatmul.mubr.bf16.vlgmr.msra.gmra.mrb[156].mxu1 %v14398_v12  ;;  %12140 = vmatpush3.bf16.msra.mxu0 %v13289_v53  ;;  %v13295_v53 = vld [vmem:[%s20247_s1 + $0x450] sm:$0xff]   ;;  %v14931_v12 = vrot.slane %v1053_v58, %v14719_v25  ;;  %v14936_v48 = vrot.slane %v1086_v39, %v14719_v25  ;;  %v14943_v58 = vrot.slane %v1103_v62, %v14719_v25 }
 0x15d   :  { %12234 = vmatpush3.bf16.msra.mxu1 %v13290_v38  ;;  %3844 = vmatprep.mubr.bf16.mxu0 %v14404_v13  ;;  %v13296_v38 = vld [vmem:[%s20247_s1 + $0x4d0] sm:$0xff]   ;;  %v14954_v19 = vrot.slane %v1119_v45, %v14719_v25  ;;  %v1136_v52 = vcombine.high %v14711_v27, %v14711_v27 }
 0x15e   :  { %3976 = vmatprep.mubr.bf16.mxu1 %v14410_v16  ;;  %20414 = vst [vmem:[#allocation26_spill] sm:$0xff] %v14931_v12  ;;  %20415 = vst [vmem:[#allocation27_spill] sm:$0xff] %v14936_v48  ;;  %v11591_v13 = vpop.f32.mrb[52].mxu0  ;;  %12141 = vmatprep.subr.bf16.mxu0 %v13291_v47 }
 0x15f   :  { %v11685_v0 = vpop.f32.mrb[52].mxu1  ;;  %12235 = vmatprep.subr.bf16.mxu1 %v13292_v43  ;;  %20416 = vst [vmem:[#allocation28_spill] sm:$0xff] %v14943_v58  ;;  %v11592_v39 = vpop.f32.mrb[53].mxu0  ;;  %20418 = vst [vmem:[#allocation30_spill] sm:$0xff] %v14954_v19 }
 0x160   :  { %v11686_v12 = vpop.f32.mrb[53].mxu1  ;;  %v11593_v43 = vadd.f32 %v11592_v39, %v11591_v13  ;;  %v11594_v55 = vpop.f32.mrb[54].mxu0  ;;  %12142 = vmatpush3.bf16.msra.mxu0 %v13293_v59  ;;  %v13298_v59 = vld [vmem:[%s20247_s1 + $0x490] sm:$0xff]   ;;  %v13299_v39 = vld [vmem:[%s20247_s1 + $0x458] sm:$0xff]  }
 0x161   :  { %v11687_v18 = vadd.f32 %v11686_v12, %v11685_v0  ;;  %v11688_v2 = vpop.f32.mrb[54].mxu1  ;;  %12236 = vmatpush3.bf16.msra.mxu1 %v13294_v11  ;;  %v11595_v16 = vpop.f32.mrb[55].mxu0  ;;  %12143 = vmatprep.subr.bf16.mxu0 %v13295_v53  ;;  %v13297_v0 = vld [vmem:[%s20247_s1 + $0x410] sm:$0xff]   ;;  %v13300_v53 = vld [vmem:[%s20247_s1 + $0x4d8] sm:$0xff]   ;;  %v14978_v11 = vrot.slane %v14711_v27, %v14719_v25  ;;  %v1152_v27 = vcombine.high %v14741_v63, %v14741_v63 }
 0x162   :  { %v11689_v56 = vpop.f32.mrb[55].mxu1  ;;  %12237 = vmatprep.subr.bf16.mxu1 %v13296_v38  ;;  %v11596_v45 = vadd.f32 %v11595_v16, %v11594_v55  ;;  %v13301_v16 = vld [vmem:[%s20247_s1 + $0x418] sm:$0xff]   ;;  %v15037_v38 = vrot.slane %v14749_v29, %v14719_v25 }
 0x163   :  { %v1745_v12 = vadd.f32 %v11687_v18, %v11593_v43  ;;  %v11690_v13 = vadd.f32 %v11689_v56, %v11688_v2  ;;  %20419 = vst [vmem:[#allocation31_spill] sm:$0xff] %v14978_v11  ;;  %3845 = vmatmul.mubr.bf16.gmra.mrb[160].mxu0 %v14436_v8  ;;  %v15045_v19 = vrot.slane %v1152_v27, %v14719_v25  ;;  %v20425_v27 = vmov 0 }
 0x164   :  { %3977 = vmatmul.mubr.bf16.gmra.mrb[160].mxu1 %v14442_v9  ;;  %3852 = vmatprep.mubr.bf16.mxu0 %v14456_v34  ;;  %v14996_v9 = vrot.slane %v1136_v52, %v14719_v25  ;;  %v13302_v34 = vld [vmem:[%s20247_s1 + $0x498] sm:$0xff]   ;;  %v20426_v27 = vsel %vm15056_vm6, 4294967295, %v20425_v27 }
 0x165   :  { %v1863_v55 = vcombine.high %v1745_v12, %v1745_v12  ;;  %v14989_v2 = vrot.slane %v1745_v12, %v14719_v25  ;;  %v1748_v56 = vadd.f32 %v11690_v13, %v11596_v45  ;;  %3984 = vmatprep.mubr.bf16.mxu1 %v14462_v35  ;;  %12144 = vmatpush3.bf16.msra.mxu0 %v13297_v0  ;;  %v13303_v0 = vld [vmem:[%s20247_s1 + $0x460] sm:$0xff]  }
 0x166   :  { %20422 = vst [vmem:[#allocation32_spill] sm:$0xff] %v14996_v9  ;;  %12238 = vmatpush3.bf16.msra.mxu1 %v13298_v59  ;;  %v11597_v12 = vpop.f32.mrb[56].mxu0  ;;  %12145 = vmatprep.subr.bf16.mxu0 %v13299_v39  ;;  %v13304_v59 = vld [vmem:[%s20247_s1 + $0x4e0] sm:$0xff]   ;;  %20427 = vst [vmem:[#allocation33_spill] sm:$0xff] %v20426_v27 }
 0x167   :  { %v15007_v35 = vrot.slane %v1863_v55, %v14719_v25  ;;  %v1878_v43 = vcombine.high %v14989_v2, %v14989_v2  ;;  %v1880_v52 = vcombine.high %v1748_v56, %v1748_v56  ;;  %v11691_v45 = vpop.f32.mrb[56].mxu1  ;;  %12239 = vmatprep.subr.bf16.mxu1 %v13300_v53  ;;  %v15028_v53 = vrot.slane %v14741_v63, %v14719_v25  ;;  %v11598_v62 = vpop.f32.mrb[57].mxu0  ;;  %v16330_v27 = vld [vmem:[%s20246_s0 + $0x80] ss:$16 sps:$4 sm:$0xff]  }
 0x168   :  { %v1169_v55 = vcombine.high %v14749_v29, %v14749_v29  ;;  %v15033_v8 = vrot.slane %v1748_v56, %v14719_v25  ;;  %v11692_v18 = vpop.f32.mrb[57].mxu1  ;;  %v11600_v63 = vpop.f32.mrb[58].mxu0  ;;  %v11599_v56 = vadd.f32 %v11598_v62, %v11597_v12  ;;  %v13305_v29 = vld [vmem:[%s20247_s1 + $0x420] sm:$0xff]   ;;  %v10666_v62 = vrot.slane %v14989_v2, 9  ;;  %v13307_v12 = vld [vmem:[%s20247_s1 + $0x468] sm:$0xff]  }
 0x169   :  { %v1879_v47 = vcombine.high %v15007_v35, %v15007_v35  ;;  %v2212_v39 = vrot.slane %v1878_v43, 7  ;;  %v15042_v9 = vrot.slane %v1880_v52, %v14719_v25  ;;  %v11694_v11 = vpop.f32.mrb[58].mxu1  ;;  %v11693_v50 = vadd.f32 %v11692_v18, %v11691_v45  ;;  %v11601_v58 = vpop.f32.mrb[59].mxu0  ;;  %12146 = vmatpush3.bf16.msra.mxu0 %v13301_v16  ;;  %v13306_v43 = vld [vmem:[%s20247_s1 + $0x4a0] sm:$0xff]   ;;  %v13308_v45 = vld [vmem:[%s20247_s1 + $0x4e8] sm:$0xff]  }
 0x16a   :  { %v11695_v7 = vpop.f32.mrb[59].mxu1  ;;  %12240 = vmatpush3.bf16.msra.mxu1 %v13302_v34  ;;  %v1895_v34 = vcombine.high %v15033_v8, %v15033_v8  ;;  %12147 = vmatprep.subr.bf16.mxu0 %v13303_v0  ;;  %v11602_v18 = vadd.f32 %v11601_v58, %v11600_v63  ;;  %v13311_v63 = vld [vmem:[%s20247_s1 + $0x470] sm:$0xff]  }
 0x16b   :  { %v2214_v52 = vrot.slane %v2212_v39, 2  ;;  %v15061_v16 = vrot.slane %v1879_v47, 7  ;;  %12241 = vmatprep.subr.bf16.mxu1 %v13304_v59  ;;  %v1896_v2 = vcombine.high %v15042_v9, %v15042_v9  ;;  %v1753_v47 = vadd.f32 %v11693_v50, %v11599_v56  ;;  %3853 = vmatmul.mubr.bf16.gmra.mrb[164].mxu0 %v14488_v28  ;;  %v13312_v56 = vld [vmem:[%s20247_s1 + $0x4f0] sm:$0xff]  }
 0x16c   :  { %3985 = vmatmul.mubr.bf16.gmra.mrb[164].mxu1 %v14494_v32  ;;  %v11696_v48 = vadd.f32 %v11695_v7, %v11694_v11  ;;  %3860 = vmatprep.mubr.bf16.mxu0 %v14508_v1  ;;  %v2213_v13 = vsel %vm15056_vm6, %v10666_v62, %v2212_v39  ;;  %v15084_v50 = vrot.slane %v1169_v55, %v14719_v25  ;;  %v2221_v28 = vrot.slane %v15033_v8, 7  ;;  %v13309_v32 = vld [vmem:[%s20247_s1 + $0x428] sm:$0xff]  }
 0x16d   :  { %20428 = vst [vmem:[#allocation34_spill] sm:$0xff] %v15061_v16  ;;  %v2220_v59 = vrot.slane %v15061_v16, 2  ;;  %3992 = vmatprep.mubr.bf16.mxu1 %v14514_v4  ;;  %v1897_v58 = vcombine.high %v1753_v47, %v1753_v47  ;;  %12148 = vmatpush3.bf16.msra.mxu0 %v13305_v29  ;;  %v13310_v1 = vld [vmem:[%s20247_s1 + $0x4a8] sm:$0xff]   ;;  %v20430_v4 = vrot.slane %v15007_v35, 7  ;;  %v10667_v11 = vrot.slane %v1895_v34, 9 }
 0x16e   :  { %20429 = vst [vmem:[#allocation35_spill] sm:$0xff] %v15084_v50  ;;  %12242 = vmatpush3.bf16.msra.mxu1 %v13306_v43  ;;  %v1756_v39 = vadd.f32 %v11696_v48, %v11602_v18  ;;  %v11603_v55 = vpop.f32.mrb[60].mxu0  ;;  %12149 = vmatprep.subr.bf16.mxu0 %v13307_v12  ;;  %v15104_v29 = vadd.f32 %v2213_v13, %v14727_v22  ;;  %v20445_v50 = vld [vmem:[#allocation10_spill] sm:$0xff] }
 0x16f   :  { %v2216_v7 = vsel %vm15056_vm6, %v2214_v52, %v20430_v4  ;;  %v11697_v8 = vpop.f32.mrb[60].mxu1  ;;  %12243 = vmatprep.subr.bf16.mxu1 %v13308_v45  ;;  %v20432_v43 = vcombine.high %v14727_v22, %v14727_v22  ;;  %v15112_v52 = vrot.slane %v1896_v2, 7  ;;  %v15115_v34 = vrot.slane %v1897_v58, %v14719_v25  ;;  %v11604_v12 = vpop.f32.mrb[61].mxu0 }
 0x170   :  { %20431 = vst [vmem:[#allocation36_spill] sm:$0xff] %v15104_v29  ;;  %v11698_v45 = vpop.f32.mrb[61].mxu1  ;;  %v2222_v18 = vsel %vm15056_vm6, %v2220_v59, %v2221_v28  ;;  %v1904_v13 = vrot.slane %v1753_v47, %v14719_v25  ;;  %v1914_v4 = vcombine.high %v1756_v39, %v1756_v39  ;;  %v11605_v0 = vadd.f32 %v11604_v12, %v11603_v55  ;;  %v11606_v22 = vpop.f32.mrb[62].mxu0  ;;  %v13313_v47 = vld [vmem:[%s20247_s1 + $0x430] sm:$0xff]  }
 0x171   :  { %v15109_v62 = vadd.f32 %v2216_v7, %v20432_v43  ;;  %20434 = vst [vmem:[#allocation38_spill] sm:$0xff] %v15112_v52  ;;  %v11699_v29 = vadd.f32 %v11698_v45, %v11697_v8  ;;  %v11700_v7 = vpop.f32.mrb[62].mxu1  ;;  %v15125_v58 = vrot.slane %v1756_v39, %v14719_v25  ;;  %v11607_v48 = vpop.f32.mrb[63].mxu0  ;;  %12150 = vmatpush3.bf16.msra.mxu0 %v13309_v32  ;;  %v13314_v59 = vld [vmem:[%s20247_s1 + $0x4b0] sm:$0xff]   ;;  %v13315_v32 = vld [vmem:[%s20247_s1 + $0x478] sm:$0xff]   ;;  %v20435_v45 = vrot.slane %v15042_v9, 7 }
 0x172   :  { %12244 = vmatpush3.bf16.msra.mxu1 %v13310_v1  ;;  %v1913_v55 = vcombine.high %v15115_v34, %v15115_v34  ;;  %12151 = vmatprep.subr.bf16.mxu0 %v13311_v63  ;;  %v13316_v1 = vld [vmem:[%s20247_s1 + $0x4f8] sm:$0xff]   ;;  %v11608_v8 = vadd.f32 %v11607_v48, %v11606_v22  ;;  %v2230_v63 = vrot.slane %v15112_v52, 2  ;;  %v15151_v28 = vrot.slane %v1914_v4, %v14719_v25  ;;  %v13319_v4 = vld [vmem:[%s20247_s1 + $0x540] sm:$0xff]  }
 0x173   :  { %20433 = vst [vmem:[#allocation37_spill] sm:$0xff] %v15109_v62  ;;  %v11701_v62 = vpop.f32.mrb[63].mxu1  ;;  %v1761_v39 = vadd.f32 %v11699_v29, %v11605_v0  ;;  %12245 = vmatprep.subr.bf16.mxu1 %v13312_v56  ;;  %3861 = vmatmul.mubr.bf16.gmra.mrb[168].mxu0 %v14540_v3  ;;  %v2226_v0 = vsel %vm15056_vm6, %v10667_v11, %v20435_v45  ;;  %v2231_v29 = vrot.slane %v1904_v13, 7  ;;  %v13317_v11 = vld [vmem:[%s20247_s1 + $0x438] sm:$0xff]   ;;  %v13320_v22 = vld [vmem:[%s20247_s1 + $0x5c0] sm:$0xff]  }
 0x174   :  { %v11702_v12 = vadd.f32 %v11701_v62, %v11700_v7  ;;  %3993 = vmatmul.mubr.bf16.gmra.mrb[168].mxu1 %v14546_v33  ;;  %v1912_v56 = vcombine.high %v1904_v13, %v1904_v13  ;;  %3868 = vmatprep.mubr.bf16.mxu0 %v14554_v40  ;;  %v1929_v3 = vcombine.high %v15125_v58, %v15125_v58  ;;  %v13318_v48 = vld [vmem:[%s20247_s1 + $0x4b8] sm:$0xff]  }
 0x175   :  { %4000 = vmatprep.mubr.bf16.mxu1 %v14560_v41  ;;  %v15158_v33 = vrot.slane %v1761_v39, %v14719_v25  ;;  %12152 = vmatpush3.bf16.msra.mxu0 %v13313_v47  ;;  %v1931_v40 = vcombine.high %v1761_v39, %v1761_v39  ;;  %v20436_v7 = vcombine.high %v14730_v21, %v14730_v21 }
 0x176   :  { %v1764_v62 = vadd.f32 %v11702_v12, %v11608_v8  ;;  %12246 = vmatpush3.bf16.msra.mxu1 %v13314_v59  ;;  %v11609_v13 = vpop.f32.mrb[64].mxu0  ;;  %12153 = vmatprep.subr.bf16.mxu0 %v13315_v32  ;;  %v20438_v59 = vcombine.high %v14734_v24, %v14734_v24  ;;  %v15182_v32 = vrot.slane %v1913_v55, 7  ;;  %v2232_v24 = vsel %vm15056_vm6, %v2230_v63, %v2231_v29 }
 0x177   :  { %v11703_v41 = vpop.f32.mrb[64].mxu1  ;;  %12247 = vmatprep.subr.bf16.mxu1 %v13316_v1  ;;  %v15175_v47 = vadd.f32 %v2222_v18, %v20436_v7  ;;  %v1946_v8 = vcombine.high %v15158_v33, %v15158_v33  ;;  %v11610_v45 = vpop.f32.mrb[65].mxu0  ;;  %v15192_v55 = vrot.slane %v2231_v29, 2  ;;  %v15198_v1 = vrot.slane %v1929_v3, 7 }
 0x178   :  { %v15180_v39 = vadd.f32 %v2226_v0, %v20438_v59  ;;  %v1948_v12 = vcombine.high %v1764_v62, %v1764_v62  ;;  %v11704_v2 = vpop.f32.mrb[65].mxu1  ;;  %v15188_v43 = vrot.slane %v1764_v62, %v14719_v25  ;;  %v11611_v18 = vadd.f32 %v11610_v45, %v11609_v13 }
 0x179   :  { %20437 = vst [vmem:[#allocation39_spill] sm:$0xff] %v15175_v47  ;;  %v11705_v7 = vadd.f32 %v11704_v2, %v11703_v41  ;;  %v11612_v47 = vpop.f32.mrb[66].mxu0  ;;  %v11706_v52 = vpop.f32.mrb[66].mxu1  ;;  %v15194_v0 = vrot.slane %v1912_v56, 7  ;;  %v1930_v59 = vcombine.high %v15151_v28, %v15151_v28  ;;  %12154 = vmatpush3.bf16.msra.mxu0 %v13317_v11  ;;  %v15201_v2 = vrot.slane %v1931_v40, %v14719_v25 }
 0x17a   :  { %20439 = vst [vmem:[#allocation40_spill] sm:$0xff] %v15180_v39  ;;  %v11613_v39 = vpop.f32.mrb[67].mxu0  ;;  %v11707_v21 = vpop.f32.mrb[67].mxu1  ;;  %12248 = vmatpush3.bf16.msra.mxu1 %v13318_v48  ;;  %v20288_v62 = vrot.slane %v15158_v33, 7  ;;  %v15205_v63 = vrot.slane %v1948_v12, %v14719_v25  ;;  %12327 = vmatprep.subr.bf16.mxu0 %v13319_v4  ;;  %v10668_v56 = vrot.slane %v15115_v34, 9  ;;  %v20440_v3 = vrot.slane %v15125_v58, 7 }
 0x17b   :  { %v1769_v29 = vadd.f32 %v11705_v7, %v11611_v18  ;;  %12421 = vmatprep.subr.bf16.mxu1 %v13320_v22  ;;  %v1963_v11 = vcombine.high %v15188_v43, %v15188_v43  ;;  %v11614_v48 = vadd.f32 %v11613_v39, %v11612_v47  ;;  %3869 = vmatmul.mubr.bf16.gmra.mrb[172].mxu0 %v14580_v61  ;;  %v15218_v4 = vrot.slane %v1946_v8, 7  ;;  %v20441_v34 = vld [vmem:[#allocation9_spill] sm:$0xff]  ;;  %v20442_v12 = vld [vmem:[#allocation20_spill] sm:$0xff] }
 0x17c   :  { %v15210_v13 = vrot.slane %v20440_v3, 2  ;;  %4001 = vmatmul.mubr.bf16.gmra.mrb[172].mxu1 %v14586_v5  ;;  %3876 = vmatprep.mubr.bf16.mxu0 %v14594_v17  ;;  %v15223_v45 = vrot.slane %v1930_v59, 9  ;;  %v1964_v61 = vcombine.high %v15205_v63, %v15205_v63  ;;  %v11708_v47 = vadd.f32 %v11707_v21, %v11706_v52 }
 0x17d   :  { %v1965_v22 = vcombine.high %v1769_v29, %v1769_v29  ;;  %4008 = vmatprep.mubr.bf16.mxu1 %v20441_v34  ;;  %v15229_v5 = vrot.slane %v20288_v62, 2  ;;  %v15236_v3 = vrot.slane %v1963_v11, 7  ;;  %v15239_v59 = vrot.slane %v1769_v29, %v14719_v25 }
 0x17e   :  { %v11615_v18 = vpop.f32.mrb[68].mxu0  ;;  %v1772_v34 = vadd.f32 %v11708_v47, %v11614_v48  ;;  %v20443_v62 = vcombine.high %v20442_v12, %v20442_v12  ;;  %v2235_v11 = vsel %vm15056_vm6, %v15192_v55, %v15194_v0  ;;  %v2239_v29 = vsel %vm15056_vm6, %v10668_v56, %v15182_v32 }
 0x17f   :  { %v15234_v17 = vrot.slane %v1965_v22, %v14719_v25  ;;  %v11709_v7 = vpop.f32.mrb[68].mxu1  ;;  %v11616_v21 = vpop.f32.mrb[69].mxu0  ;;  %v15254_v48 = vrot.slane %v1964_v61, 7  ;;  %v1980_v56 = vcombine.high %v15239_v59, %v15239_v59 }
 0x180   :  { %v11710_v52 = vpop.f32.mrb[69].mxu1  ;;  %v15244_v41 = vadd.f32 %v2232_v24, %v20443_v62  ;;  %v11617_v39 = vadd.f32 %v11616_v21, %v11615_v18  ;;  %v11618_v22 = vpop.f32.mrb[70].mxu0  ;;  %v1982_v62 = vcombine.high %v1772_v34, %v1772_v34 }
 0x181   :  { %v11712_v40 = vpop.f32.mrb[70].mxu1  ;;  %v1981_v24 = vcombine.high %v15234_v17, %v15234_v17  ;;  %v11711_v47 = vadd.f32 %v11710_v52, %v11709_v7  ;;  %v11619_v8 = vpop.f32.mrb[71].mxu0  ;;  %v20446_v7 = vld [vmem:[#allocation11_spill] sm:$0xff]  ;;  %v20453_v52 = vrot.slane %v15182_v32, 2  ;;  %v10671_v0 = vrot.slane %v1980_v56, 9 }
 0x182   :  { %20444 = vst [vmem:[#allocation9_spill] sm:$0xff] %v15244_v41  ;;  %v11713_v18 = vpop.f32.mrb[71].mxu1  ;;  %v15260_v41 = vrot.slane %v1772_v34, %v14719_v25  ;;  %v11620_v12 = vadd.f32 %v11619_v8, %v11618_v22  ;;  %v15266_v61 = vrot.slane %v1982_v62, %v14719_v25  ;;  %v20447_v34 = vld [vmem:[#allocation12_spill] sm:$0xff]  ;;  %v20448_v8 = vld [vmem:[#allocation13_spill] sm:$0xff]  ;;  %v15279_v62 = vadd.f32 %v2239_v29, %v14768_v6 }
 0x183   :  { %v11714_v55 = vadd.f32 %v11713_v18, %v11712_v40  ;;  %v1777_v16 = vadd.f32 %v11711_v47, %v11617_v39  ;;  %3877 = vmatmul.mubr.bf16.gmra.mrb[176].mxu0 %v20445_v50  ;;  %v20449_v40 = vrot.slane %v14483_v26, %v14719_v25  ;;  %v15283_v47 = vrot.slane %v1981_v24, 7 }
 0x184   :  { %4009 = vmatmul.mubr.bf16.gmra.mrb[176].mxu1 %v20446_v7  ;;  %3883 = vmatprep.mubr.bf16.mxu0 %v20447_v34  ;;  %20451 = vst [vmem:[#allocation11_spill] sm:$0xff] %v15279_v62  ;;  %v1997_v34 = vcombine.high %v15260_v41, %v15260_v41  ;;  %v20452_v39 = vrot.slane %v15125_v58, 7  ;;  %v2245_v32 = vsel %vm15056_vm6, %v15210_v13, %v15198_v1  ;;  %v20454_v56 = vrot.slane %v15151_v28, 7 }
 0x185   :  { %v1780_v21 = vadd.f32 %v11714_v55, %v11620_v12  ;;  %4015 = vmatprep.mubr.bf16.mxu1 %v20448_v8  ;;  %v15276_v22 = vadd.f32 %v2235_v11, %v20449_v40  ;;  %v1998_v12 = vcombine.high %v15266_v61, %v15266_v61  ;;  %v1999_v55 = vcombine.high %v1777_v16, %v1777_v16 }
 0x186   :  { %v15289_v7 = vrot.slane %v1777_v16, %v14719_v25  ;;  %v11621_v11 = vpop.f32.mrb[72].mxu0  ;;  %v2242_v16 = vsel %vm15056_vm6, %v20453_v52, %v20452_v39  ;;  %v20455_v52 = vrot.slane %v15198_v1, 2  ;;  %v2286_v28 = vrot.slane %v1997_v34, 7  ;;  %v20463_v34 = vld [vmem:[#allocation17_spill] sm:$0xff] }
 0x187   :  { %20450 = vst [vmem:[#allocation10_spill] sm:$0xff] %v15276_v22  ;;  %v15292_v26 = vrot.slane %v1780_v21, %v14719_v25  ;;  %v11715_v29 = vpop.f32.mrb[72].mxu1  ;;  %v15296_v8 = vrot.slane %v1998_v12, 7  ;;  %v2016_v24 = vcombine.high %v1780_v21, %v1780_v21  ;;  %v11622_v40 = vpop.f32.mrb[73].mxu0  ;;  %v15305_v18 = vrot.slane %v1999_v55, %v14719_v25 }
 0x188   :  { %v11716_v50 = vpop.f32.mrb[73].mxu1  ;;  %v2014_v11 = vcombine.high %v15289_v7, %v15289_v7  ;;  %v11624_v29 = vpop.f32.mrb[74].mxu0  ;;  %v2248_v39 = vsel %vm15056_vm6, %v20455_v52, %v20454_v56  ;;  %v20456_v55 = vcombine.high %v14768_v6, %v14768_v6  ;;  %v10672_v1 = vrot.slane %v15266_v61, 9  ;;  %v20459_v6 = vld [vmem:[#allocation14_spill] sm:$0xff] }
 0x189   :  { %v11718_v21 = vpop.f32.mrb[74].mxu1  ;;  %v2031_v50 = vcombine.high %v15292_v26, %v15292_v26  ;;  %v11625_v58 = vpop.f32.mrb[75].mxu0  ;;  %v2015_v13 = vcombine.high %v15305_v18, %v15305_v18  ;;  %v2292_v56 = vrot.slane %v15296_v8, 2  ;;  %v15337_v52 = vrot.slane %v2016_v24, %v14719_v25 }
 0x18a   :  { %v11719_v40 = vpop.f32.mrb[75].mxu1  ;;  %v15325_v29 = vadd.f32 %v2242_v16, %v20456_v55  ;;  %v2282_v21 = vrot.slane %v15283_v47, 2  ;;  %v20458_v58 = vrot.slane %v15260_v41, 7  ;;  %v15332_v12 = vrot.slane %v2014_v11, 7  ;;  %v20460_v16 = vld [vmem:[#allocation15_spill] sm:$0xff]  ;;  %v20462_v11 = vld [vmem:[#allocation16_spill] sm:$0xff] }
 0x18b   :  { %3884 = vmatmul.mubr.bf16.gmra.mrb[180].mxu0 %v20459_v6  ;;  %v20461_v55 = vrot.slane %v15289_v7, 7  ;;  %v2303_v62 = vrot.slane %v15292_v26, 7  ;;  %v15349_v61 = vadd.f32 %v2245_v32, %v14757_v44  ;;  %v20465_v24 = vcombine.high %v14757_v44, %v14757_v44 }
 0x18c   :  { %20457 = vst [vmem:[#allocation12_spill] sm:$0xff] %v15325_v29  ;;  %v2285_v40 = vrot.slane %v20458_v58, 2  ;;  %4016 = vmatmul.mubr.bf16.gmra.mrb[180].mxu1 %v20460_v16  ;;  %3890 = vmatprep.mubr.bf16.mxu0 %v20462_v11  ;;  %v2298_v6 = vrot.slane %v15332_v12, 2  ;;  %v10673_v16 = vrot.slane %v2015_v13, 9  ;;  %v15357_v29 = vrot.slane %v2031_v50, 7 }
 0x18d   :  { %v15343_v58 = vrot.slane %v20461_v55, 2  ;;  %4022 = vmatprep.mubr.bf16.mxu1 %v20463_v34  ;;  %20464 = vst [vmem:[#allocation13_spill] sm:$0xff] %v15349_v61  ;;  %v15354_v22 = vadd.f32 %v2248_v39, %v20465_v24  ;;  %v20467_v55 = vrot.slane %v15158_v33, 7  ;;  %v2255_v44 = vsel %vm15056_vm6, %v15229_v5, %v15218_v4 }
 0x18e   :  { %v11627_v11 = vpop.f32.mrb[76].mxu0  ;;  %v20468_v32 = vrot.slane %v15201_v2, 7  ;;  %v20469_v39 = vrot.slane %v15218_v4, 2  ;;  %v20470_v33 = vcombine.high %v14779_v51, %v14779_v51  ;;  %v20474_v4 = vcombine.high %v14789_v14, %v14789_v14 }
 0x18f   :  { %20466 = vst [vmem:[#allocation14_spill] sm:$0xff] %v15354_v22  ;;  %v2252_v26 = vsel %vm15056_vm6, %v15223_v45, %v20467_v55  ;;  %v11721_v34 = vpop.f32.mrb[76].mxu1  ;;  %v20472_v45 = vrot.slane %v15188_v43, 9  ;;  %v11628_v55 = vpop.f32.mrb[77].mxu0  ;;  %v15385_v22 = vadd.f32 %v2255_v44, %v14789_v14  ;;  %v20476_v51 = vrot.slane %v15205_v63, 7 }
 0x190   :  { %v2258_v50 = vsel %vm15056_vm6, %v20469_v39, %v20468_v32  ;;  %v15377_v13 = vadd.f32 %v2252_v26, %v20470_v33  ;;  %v11722_v5 = vpop.f32.mrb[77].mxu1  ;;  %v20477_v26 = vrot.slane %v15236_v3, 2  ;;  %v11629_v33 = vadd.f32 %v11628_v55, %v11627_v11 }
 0x191   :  { %v2265_v24 = vsel %vm15056_vm6, %v20472_v45, %v15236_v3  ;;  %20473 = vst [vmem:[#allocation16_spill] sm:$0xff] %v15385_v22  ;;  %v15390_v32 = vadd.f32 %v2258_v50, %v20474_v4  ;;  %v11723_v45 = vadd.f32 %v11722_v5, %v11721_v34  ;;  %v11724_v44 = vpop.f32.mrb[78].mxu1  ;;  %v20479_v22 = vcombine.high %v14793_v46, %v14793_v46 }
 0x192   :  { %20471 = vst [vmem:[#allocation15_spill] sm:$0xff] %v15377_v13  ;;  %v2268_v43 = vsel %vm15056_vm6, %v20477_v26, %v20476_v51  ;;  %v15399_v39 = vadd.f32 %v2265_v24, %v14793_v46  ;;  %v11630_v13 = vpop.f32.mrb[78].mxu0  ;;  %v20481_v50 = vrot.slane %v15239_v59, 7  ;;  %v20482_v4 = vrot.slane %v15254_v48, 2  ;;  %v11725_v26 = vpop.f32.mrb[79].mxu1 }
 0x193   :  { %20475 = vst [vmem:[#allocation17_spill] sm:$0xff] %v15390_v32  ;;  %v15404_v14 = vadd.f32 %v2268_v43, %v20479_v22  ;;  %v11631_v51 = vpop.f32.mrb[79].mxu0  ;;  %v20483_v24 = vrot.slane %v15234_v17, 7  ;;  %v20484_v34 = vcombine.high %v14800_v23, %v14800_v23  ;;  %v20486_v22 = vrot.slane %v15260_v41, 7  ;;  %v13495_v41 = vld [vmem:[%s20246_s0 + $0xe0] ss:$16 sps:$4 sm:$0xff]  }
 0x194   :  { %20478 = vst [vmem:[#allocation41_spill] sm:$0xff] %v15399_v39  ;;  %v2274_v3 = vsel %vm15056_vm6, %v20482_v4, %v20481_v50  ;;  %v2287_v55 = vsel %vm15056_vm6, %v2285_v40, %v2286_v28  ;;  %v1791_v5 = vadd.f32 %v11723_v45, %v11629_v33  ;;  %v11632_v43 = vadd.f32 %v11631_v51, %v11630_v13 }
 0x195   :  { %20480 = vst [vmem:[#allocation42_spill] sm:$0xff] %v15404_v14  ;;  %v2278_v11 = vsel %vm15056_vm6, %v10671_v0, %v20483_v24  ;;  %v15419_v46 = vadd.f32 %v2274_v3, %v20484_v34  ;;  %v2284_v59 = vsel %vm15056_vm6, %v2282_v21, %v20486_v22  ;;  %v11726_v50 = vadd.f32 %v11725_v26, %v11724_v44  ;;  %v13496_v21 = vld [vmem:[%s20246_s0 + $0xe8] ss:$16 sps:$4 sm:$0xff]   ;;  %v13497_v3 = vld [vmem:[%s20246_s0 + $0x104] ss:$16 sps:$4 sm:$0xff]  }
 0x196   :  { %v20487_v4 = vcombine.high %v14804_v20, %v14804_v20  ;;  %v2299_v24 = vrot.slane %v15305_v18, 7  ;;  %3891 = vmatmul.mubr.bf16.gmra.mrb[184].mxu0 %v13495_v41  ;;  %4023 = vmatmul.mubr.bf16.gmra.mrb[184].mxu1 %v13496_v21  ;;  %v2291_v40 = vsel %vm15056_vm6, %v10672_v1, %v15296_v8  ;;  %v20489_v20 = vcombine.high %v14809_v57, %v14809_v57  ;;  %v13498_v8 = vld [vmem:[%s20246_s0 + $0x10c] ss:$16 sps:$4 sm:$0xff]  }
 0x197   :  { %20485 = vst [vmem:[#allocation43_spill] sm:$0xff] %v15419_v46  ;;  %v20491_v18 = vrot.slane %v14589_v10, %v14719_v25  ;;  %v2305_v33 = vrot.slane %v2303_v62, 2  ;;  %v2033_v45 = vcombine.high %v1791_v5, %v1791_v5  ;;  %v1794_v44 = vadd.f32 %v11726_v50, %v11632_v43  ;;  %3898 = vmatprep.mubr.bf16.mxu0 %v13497_v3  ;;  %v11727_v5 = vpop.f32.mrb[80].mxu1  ;;  %v20526_v46 = vld [vmem:[#allocation5_spill] sm:$0xff]  ;;  %v20527_v14 = vld [vmem:[#allocation6_spill] sm:$0xff] }
 0x198   :  { %v15430_v0 = vadd.f32 %v2278_v11, %v20487_v4  ;;  %v15445_v28 = vadd.f32 %v2284_v59, %v20489_v20  ;;  %4030 = vmatprep.mubr.bf16.mxu1 %v13498_v8  ;;  %v15459_v1 = vadd.f32 %v2291_v40, %v14812_v15  ;;  %v20494_v10 = vrot.slane %v15289_v7, 7 }
 0x199   :  { %v15450_v13 = vadd.f32 %v2287_v55, %v20491_v18  ;;  %v2297_v26 = vsel %vm15056_vm6, %v15343_v58, %v15332_v12  ;;  %v2300_v11 = vsel %vm15056_vm6, %v2298_v6, %v2299_v24  ;;  %v2304_v34 = vsel %vm15056_vm6, %v10673_v16, %v2303_v62  ;;  %v11633_v55 = vpop.f32.mrb[80].mxu0  ;;  %v11728_v62 = vpop.f32.mrb[81].mxu1 }
 0x19a   :  { %20488 = vst [vmem:[#allocation44_spill] sm:$0xff] %v15430_v0  ;;  %20490 = vst [vmem:[#allocation45_spill] sm:$0xff] %v15445_v28  ;;  %v2294_v51 = vsel %vm15056_vm6, %v2292_v56, %v20494_v10  ;;  %v2308_v22 = vrot.slane %v15357_v29, 2  ;;  %v2040_v59 = vrot.slane %v2033_v45, %v14719_v25  ;;  %v2049_v7 = vrot.slane %v1794_v44, %v14719_v25  ;;  %v11634_v6 = vpop.f32.mrb[81].mxu0  ;;  %v11730_v40 = vpop.f32.mrb[82].mxu1 }
 0x19b   :  { %20492 = vst [vmem:[#allocation46_spill] sm:$0xff] %v15450_v13  ;;  %20493 = vst [vmem:[#allocation47_spill] sm:$0xff] %v15459_v1  ;;  %v20495_v56 = vcombine.high %v14812_v15, %v14812_v15  ;;  %v20293_v58 = vrot.slane %v15337_v52, 7  ;;  %v15485_v16 = vadd.f32 %v2297_v26, %v14822_v36  ;;  %v20498_v50 = vcombine.high %v14822_v36, %v14822_v36  ;;  %v11636_v21 = vpop.f32.mrb[82].mxu0  ;;  %v11731_v10 = vpop.f32.mrb[83].mxu1 }
 0x19c   :  { %v2041_v24 = vcombine.high %v2040_v59, %v2040_v59  ;;  %v2042_v41 = vcombine.high %v1794_v44, %v1794_v44  ;;  %v2057_v15 = vcombine.high %v2049_v7, %v2049_v7  ;;  %v2307_v20 = vsel %vm15056_vm6, %v2305_v33, %v15357_v29  ;;  %v11637_v8 = vpop.f32.mrb[83].mxu0 }
 0x19d   :  { %v15479_v43 = vadd.f32 %v2294_v51, %v20495_v56  ;;  %20497 = vst [vmem:[#allocation49_spill] sm:$0xff] %v15485_v16  ;;  %v15490_v4 = vadd.f32 %v2300_v11, %v20498_v50  ;;  %v2319_v18 = vrot.slane %v2049_v7, 7  ;;  %v11635_v45 = vadd.f32 %v11634_v6, %v11633_v55  ;;  %v13502_v50 = vld [vmem:[%s20246_s0 + $0x12c] ss:$16 sps:$4 sm:$0xff]  }
 0x19e   :  { %v11729_v3 = vadd.f32 %v11728_v62, %v11727_v5  ;;  %v20500_v51 = vcombine.high %v14825_v54, %v14825_v54  ;;  %v20502_v26 = vrot.slane %v15007_v35, 7  ;;  %v1947_v11 = vcombine.high %v15201_v2, %v15201_v2  ;;  %v13499_v35 = vld [vmem:[%s20246_s0 + $0x100] ss:$16 sps:$4 sm:$0xff]  }
 0x19f   :  { %20496 = vst [vmem:[#allocation48_spill] sm:$0xff] %v15479_v43  ;;  %20499 = vst [vmem:[#allocation50_spill] sm:$0xff] %v15490_v4  ;;  %v2316_v56 = vrot.slane %v2041_v24, 7  ;;  %v2310_v29 = vsel %vm15056_vm6, %v2308_v22, %v20293_v58  ;;  %v15510_v33 = vrot.slane %v2057_v15, 7  ;;  %v11638_v55 = vadd.f32 %v11637_v8, %v11636_v21  ;;  %3899 = vmatmul.mubr.bf16.gmra.mrb[188].mxu0 %v13499_v35  ;;  %v13501_v22 = vld [vmem:[%s20246_s0 + $0x124] ss:$16 sps:$4 sm:$0xff]  }
 0x1a0   :  { %v15498_v36 = vadd.f32 %v2304_v34, %v20500_v51  ;;  %v15502_v44 = vrot.slane %v20502_v26, 2  ;;  %v1799_v7 = vadd.f32 %v11729_v3, %v11635_v45  ;;  %v11732_v54 = vadd.f32 %v11731_v10, %v11730_v40  ;;  %v13500_v34 = vld [vmem:[%s20246_s0 + $0x108] ss:$16 sps:$4 sm:$0xff]   ;;  %3906 = vmatprep.mubr.bf16.mxu0 %v13501_v22  ;;  %v11639_v10 = vpop.f32.mrb[84].mxu0  ;;  %v11733_v51 = vpop.f32.mrb[84].mxu1 }
 0x1a1   :  { %4031 = vmatmul.mubr.bf16.gmra.mrb[188].mxu1 %v13500_v34  ;;  %v10674_v5 = vrot.slane %v2040_v59, 9  ;;  %v2318_v6 = vrot.slane %v2316_v56, 2  ;;  %v2056_v62 = vrot.slane %v2042_v41, %v14719_v25  ;;  %v15526_v24 = vadd.f32 %v2307_v20, %v14852_v37  ;;  %v11640_v35 = vpop.f32.mrb[85].mxu0 }
 0x1a2   :  { %20501 = vst [vmem:[#allocation51_spill] sm:$0xff] %v15498_v36  ;;  %4038 = vmatprep.mubr.bf16.mxu1 %v13502_v50  ;;  %v2321_v15 = vrot.slane %v2319_v18, 2  ;;  %v15529_v21 = vrot.slane %v1799_v7, %v14719_v25  ;;  %v1802_v59 = vadd.f32 %v11732_v54, %v11638_v55  ;;  %v20504_v41 = vcombine.high %v14852_v37, %v14852_v37 }
 0x1a3   :  { %20503 = vst [vmem:[#allocation52_spill] sm:$0xff] %v15526_v24  ;;  %v20506_v45 = vrot.slane %v15042_v9, 7  ;;  %v2059_v8 = vcombine.high %v1799_v7, %v1799_v7  ;;  %v2317_v20 = vsel %vm15056_vm6, %v10674_v5, %v2316_v56  ;;  %v2320_v26 = vsel %vm15056_vm6, %v2318_v6, %v2319_v18  ;;  %v11734_v7 = vpop.f32.mrb[85].mxu1  ;;  %v11642_v5 = vpop.f32.mrb[86].mxu0 }
 0x1a4   :  { %v15534_v40 = vadd.f32 %v2310_v29, %v20504_v41  ;;  %v20507_v55 = vrot.slane %v15201_v2, 7  ;;  %v2324_v37 = vrot.slane %v15510_v33, 2  ;;  %v2074_v9 = vcombine.high %v15529_v21, %v15529_v21  ;;  %v11736_v50 = vpop.f32.mrb[86].mxu1 }
 0x1a5   :  { %v15538_v3 = vrot.slane %v20506_v45, 2  ;;  %v2076_v29 = vcombine.high %v1802_v59, %v1802_v59  ;;  %v15552_v34 = vrot.slane %v1802_v59, %v14719_v25  ;;  %v11641_v22 = vadd.f32 %v11640_v35, %v11639_v10  ;;  %v11643_v45 = vpop.f32.mrb[87].mxu0 }
 0x1a6   :  { %20505 = vst [vmem:[#allocation53_spill] sm:$0xff] %v15534_v40  ;;  %v15546_v54 = vrot.slane %v20507_v55, 2  ;;  %v11735_v56 = vadd.f32 %v11734_v7, %v11733_v51  ;;  %v15555_v18 = vadd.f32 %v2317_v20, %v14855_v31  ;;  %v15557_v2 = vrot.slane %v1947_v11, 7  ;;  %v11737_v55 = vpop.f32.mrb[87].mxu1  ;;  %v20520_v40 = vld [vmem:[#allocation24_spill] sm:$0xff] }
 0x1a7   :  { %v2058_v6 = vcombine.high %v2056_v62, %v2056_v62  ;;  %v2325_v41 = vrot.slane %v2056_v62, 7  ;;  %v2323_v12 = vsel %vm15056_vm6, %v2321_v15, %v15510_v33  ;;  %v15563_v59 = vrot.slane %v2059_v8, %v14719_v25  ;;  %v13503_v15 = vld [vmem:[%s20246_s0 + $0x120] ss:$16 sps:$4 sm:$0xff]   ;;  %v13504_v8 = vld [vmem:[%s20246_s0 + $0x128] ss:$16 sps:$4 sm:$0xff]  }
 0x1a8   :  { %20508 = vst [vmem:[#allocation54_spill] sm:$0xff] %v15555_v18  ;;  %v20294_v10 = vrot.slane %v15529_v21, 7  ;;  %v2091_v51 = vcombine.high %v15552_v34, %v15552_v34  ;;  %v1807_v20 = vadd.f32 %v11735_v56, %v11641_v22  ;;  %v20509_v11 = vrot.slane %v15205_v63, 7  ;;  %3907 = vmatmul.mubr.bf16.gmra.mrb[192].mxu0 %v13503_v15  ;;  %v13506_v56 = vld [vmem:[%s20246_s0 + $0x14c] ss:$16 sps:$4 sm:$0xff]  }
 0x1a9   :  { %v20510_v62 = vrot.slane %v15234_v17, 7  ;;  %v15577_v58 = vrot.slane %v2076_v29, %v14719_v25  ;;  %v11644_v33 = vadd.f32 %v11643_v45, %v11642_v5  ;;  %4039 = vmatmul.mubr.bf16.gmra.mrb[192].mxu1 %v13504_v8  ;;  %v15587_v17 = vrot.slane %v2074_v9, 7  ;;  %v13505_v29 = vld [vmem:[%s20246_s0 + $0x144] ss:$16 sps:$4 sm:$0xff]  }
 0x1aa   :  { %v15570_v35 = vrot.slane %v20509_v11, 2  ;;  %v2093_v22 = vcombine.high %v1807_v20, %v1807_v20  ;;  %3914 = vmatprep.mubr.bf16.mxu0 %v13505_v29  ;;  %4046 = vmatprep.mubr.bf16.mxu1 %v13506_v56  ;;  %v2326_v5 = vsel %vm15056_vm6, %v2324_v37, %v2325_v41  ;;  %v10675_v45 = vrot.slane %v2058_v6, 9  ;;  %v11739_v6 = vpop.f32.mrb[88].mxu1 }
 0x1ab   :  { %v15574_v7 = vrot.slane %v20510_v62, 2  ;;  %v11738_v11 = vadd.f32 %v11737_v55, %v11736_v50  ;;  %v20511_v9 = vcombine.high %v14855_v31, %v14855_v31  ;;  %v15603_v15 = vadd.f32 %v2323_v12, %v14869_v30  ;;  %v11645_v50 = vpop.f32.mrb[88].mxu0  ;;  %v11740_v55 = vpop.f32.mrb[89].mxu1 }
 0x1ac   :  { %v2331_v29 = vrot.slane %v20294_v10, 2  ;;  %v15609_v56 = vrot.slane %v2091_v51, 7  ;;  %v15612_v37 = vrot.slane %v2093_v22, %v14719_v25  ;;  %v2092_v31 = vcombine.high %v15577_v58, %v15577_v58  ;;  %v11646_v41 = vpop.f32.mrb[89].mxu0  ;;  %v11742_v18 = vpop.f32.mrb[90].mxu1 }
 0x1ad   :  { %v15600_v62 = vadd.f32 %v2320_v26, %v20511_v9  ;;  %20513 = vst [vmem:[#allocation56_spill] sm:$0xff] %v15603_v15  ;;  %v15617_v26 = vrot.slane %v1807_v20, %v14719_v25  ;;  %v1810_v12 = vadd.f32 %v11738_v11, %v11644_v33  ;;  %v20514_v9 = vcombine.high %v14869_v30, %v14869_v30  ;;  %v11648_v15 = vpop.f32.mrb[90].mxu0 }
 0x1ae   :  { %v11647_v10 = vadd.f32 %v11646_v41, %v11645_v50  ;;  %v2109_v20 = vcombine.high %v15612_v37, %v15612_v37  ;;  %v11649_v30 = vpop.f32.mrb[91].mxu0  ;;  %v15634_v63 = vrot.slane %v2092_v31, 7  ;;  %v13509_v31 = vld [vmem:[%s20246_s0 + $0x164] ss:$16 sps:$4 sm:$0xff]  }
 0x1af   :  { %20512 = vst [vmem:[#allocation55_spill] sm:$0xff] %v15600_v62  ;;  %v15622_v8 = vadd.f32 %v2326_v5, %v20514_v9  ;;  %v2110_v33 = vcombine.high %v1810_v12, %v1810_v12  ;;  %v15630_v11 = vrot.slane %v1810_v12, %v14719_v25  ;;  %v11741_v62 = vadd.f32 %v11740_v55, %v11739_v6  ;;  %v11743_v5 = vpop.f32.mrb[91].mxu1  ;;  %v13507_v6 = vld [vmem:[%s20246_s0 + $0x140] ss:$16 sps:$4 sm:$0xff]   ;;  %v13508_v12 = vld [vmem:[%s20246_s0 + $0x148] ss:$16 sps:$4 sm:$0xff]  }
 0x1b0   :  { %v11650_v22 = vadd.f32 %v11649_v30, %v11648_v15  ;;  %v2108_v50 = vcombine.high %v15617_v26, %v15617_v26  ;;  %3915 = vmatmul.mubr.bf16.gmra.mrb[196].mxu0 %v13507_v6  ;;  %v20517_v9 = vld [vmem:[#allocation22_spill] sm:$0xff] }
 0x1b1   :  { %20515 = vst [vmem:[#allocation57_spill] sm:$0xff] %v15622_v8  ;;  %v11744_v8 = vadd.f32 %v11743_v5, %v11742_v18  ;;  %v15639_v41 = vrot.slane %v2110_v33, %v14719_v25  ;;  %v1815_v24 = vadd.f32 %v11741_v62, %v11647_v10  ;;  %4047 = vmatmul.mubr.bf16.gmra.mrb[196].mxu1 %v13508_v12  ;;  %v13510_v10 = vld [vmem:[%s20246_s0 + $0x16c] ss:$16 sps:$4 sm:$0xff]   ;;  %v20516_v62 = vrot.slane %v15529_v21, 7 }
 0x1b2   :  { %3922 = vmatprep.mubr.bf16.mxu0 %v13509_v31  ;;  %4054 = vmatprep.mubr.bf16.mxu1 %v13510_v10  ;;  %v2333_v33 = vsel %vm15056_vm6, %v2331_v29, %v15587_v17  ;;  %v11651_v31 = vpop.f32.mrb[92].mxu0  ;;  %v11745_v29 = vpop.f32.mrb[92].mxu1  ;;  %v20518_v51 = vcombine.high %v20517_v9, %v20517_v9  ;;  %v10677_v1 = vrot.slane %v2108_v50, 9 }
 0x1b3   :  { %v1818_v15 = vadd.f32 %v11744_v8, %v11650_v22  ;;  %v2330_v55 = vsel %vm15056_vm6, %v10675_v45, %v20516_v62  ;;  %v15661_v8 = vrot.slane %v2109_v20, 7  ;;  %v2125_v22 = vcombine.high %v15630_v11, %v15630_v11  ;;  %v11652_v62 = vpop.f32.mrb[93].mxu0  ;;  %v11746_v18 = vpop.f32.mrb[93].mxu1 }
 0x1b4   :  { %v2126_v30 = vcombine.high %v15639_v41, %v15639_v41  ;;  %v2127_v6 = vcombine.high %v1815_v24, %v1815_v24  ;;  %v15669_v21 = vrot.slane %v1815_v24, %v14719_v25  ;;  %v2350_v20 = vrot.slane %v15634_v63, 2  ;;  %v11654_v16 = vpop.f32.mrb[94].mxu0  ;;  %v11748_v43 = vpop.f32.mrb[94].mxu1 }
 0x1b5   :  { %v2144_v12 = vcombine.high %v1818_v15, %v1818_v15  ;;  %v15672_v45 = vrot.slane %v1818_v15, %v14719_v25  ;;  %v15680_v5 = vadd.f32 %v2330_v55, %v20518_v51  ;;  %v15683_v24 = vadd.f32 %v2333_v33, %v20520_v40  ;;  %v11655_v33 = vpop.f32.mrb[95].mxu0  ;;  %v11749_v36 = vpop.f32.mrb[95].mxu1 }
 0x1b6   :  { %v15675_v10 = vrot.slane %v2126_v30, 7  ;;  %v15687_v15 = vrot.slane %v2127_v6, %v14719_v25  ;;  %v2142_v4 = vcombine.high %v15669_v21, %v15669_v21  ;;  %v11653_v55 = vadd.f32 %v11652_v62, %v11651_v31  ;;  %v13511_v31 = vld [vmem:[%s20246_s0 + $0x160] ss:$16 sps:$4 sm:$0xff]   ;;  %v13512_v62 = vld [vmem:[%s20246_s0 + $0x168] ss:$16 sps:$4 sm:$0xff]   ;;  %v11657_v32 = vpop.f32.mrb[96].mxu0 }
 0x1b7   :  { %20519 = vst [vmem:[#allocation22_spill] sm:$0xff] %v15680_v5  ;;  %20521 = vst [vmem:[#allocation24_spill] sm:$0xff] %v15683_v24  ;;  %v15693_v9 = vrot.slane %v2144_v12, %v14719_v25  ;;  %v2159_v51 = vcombine.high %v15672_v45, %v15672_v45  ;;  %v20522_v24 = vrot.slane %v15630_v11, 7  ;;  %v15702_v13 = vrot.slane %v2125_v22, 7 }
 0x1b8   :  { %v2143_v12 = vcombine.high %v15687_v15, %v15687_v15  ;;  %3923 = vmatmul.mubr.bf16.gmra.mrb[200].mxu0 %v13511_v31  ;;  %v20523_v22 = vrot.slane %v15563_v59, 7  ;;  %v20525_v30 = vrot.slane %v15669_v21, 7  ;;  %v15725_v28 = vrot.slane %v2142_v4, 7 }
 0x1b9   :  { %v15700_v5 = vrot.slane %v20522_v24, 2  ;;  %4055 = vmatmul.mubr.bf16.gmra.mrb[200].mxu1 %v13512_v62  ;;  %v20524_v24 = vrot.slane %v15587_v17, 2  ;;  %v11747_v0 = vadd.f32 %v11746_v18, %v11745_v29  ;;  %v11656_v31 = vadd.f32 %v11655_v33, %v11654_v16  ;;  %3930 = vmatprep.mubr.bf16.mxu0 %v20526_v46 }
 0x1ba   :  { %v15723_v6 = vrot.slane %v20525_v30, 2  ;;  %4062 = vmatprep.mubr.bf16.mxu1 %v20527_v14  ;;  %v15732_v39 = vrot.slane %v2159_v51, 7  ;;  %v11751_v30 = vpop.f32.mrb[96].mxu1  ;;  %v20528_v4 = vcombine.high %v20520_v40, %v20520_v40  ;;  %v20530_v16 = vrot.slane %v15552_v34, 9 }
 0x1bb   :  { %v2336_v50 = vsel %vm15056_vm6, %v20524_v24, %v20523_v22  ;;  %v11750_v22 = vadd.f32 %v11749_v36, %v11748_v43  ;;  %v1823_v24 = vadd.f32 %v11747_v0, %v11653_v55  ;;  %v20531_v33 = vrot.slane %v15577_v58, 7  ;;  %v11658_v36 = vpop.f32.mrb[97].mxu0  ;;  %v11752_v55 = vpop.f32.mrb[97].mxu1 }
 0x1bc   :  { %v15737_v18 = vadd.f32 %v2336_v50, %v20528_v4  ;;  %v2343_v29 = vsel %vm15056_vm6, %v20530_v16, %v15609_v56  ;;  %v20532_v51 = vrot.slane %v15609_v56, 2  ;;  %v20534_v50 = vcombine.high %v14893_v60, %v14893_v60 }
 0x1bd   :  { %v1826_v43 = vadd.f32 %v11750_v22, %v11656_v31  ;;  %v15751_v40 = vadd.f32 %v2343_v29, %v14893_v60  ;;  %v20536_v4 = vrot.slane %v15617_v26, 7  ;;  %v2161_v56 = vcombine.high %v1823_v24, %v1823_v24 }
 0x1be   :  { %20529 = vst [vmem:[#allocation58_spill] sm:$0xff] %v15737_v18  ;;  %v2346_v0 = vsel %vm15056_vm6, %v20532_v51, %v20531_v33  ;;  %v15763_v17 = vrot.slane %v1823_v24, %v14719_v25  ;;  %v11659_v31 = vadd.f32 %v11658_v36, %v11657_v32  ;;  %v11753_v22 = vadd.f32 %v11752_v55, %v11751_v30  ;;  %v11660_v33 = vpop.f32.mrb[98].mxu0  ;;  %v11754_v51 = vpop.f32.mrb[98].mxu1 }
 0x1bf   :  { %20533 = vst [vmem:[#allocation59_spill] sm:$0xff] %v15751_v40  ;;  %v15756_v34 = vadd.f32 %v2346_v0, %v20534_v50  ;;  %v2352_v16 = vsel %vm15056_vm6, %v2350_v20, %v20536_v4  ;;  %v2178_v29 = vcombine.high %v1826_v43, %v1826_v43  ;;  %v15766_v62 = vrot.slane %v1826_v43, %v14719_v25  ;;  %v11661_v60 = vpop.f32.mrb[99].mxu0  ;;  %v11755_v0 = vpop.f32.mrb[99].mxu1  ;;  %v20538_v20 = vld [vmem:[#allocation25_spill] sm:$0xff]  ;;  %v20542_v51 = vld [vmem:[#allocation7_spill] sm:$0xff] }
 0x1c0   :  { %v20537_v50 = vrot.slane %v15612_v37, 7  ;;  %v20539_v4 = vcombine.high %v20538_v20, %v20538_v20  ;;  %v20541_v32 = vrot.slane %v15672_v45, 7  ;;  %v15782_v36 = vrot.slane %v2161_v56, %v14719_v25  ;;  %3931 = vmatmul.mubr.bf16.gmra.mrb[204].mxu0 %v20542_v51  ;;  %v20543_v60 = vld [vmem:[#allocation8_spill] sm:$0xff]  ;;  %v11757_v14 = vpop.f32.mrb[100].mxu1 }
 0x1c1   :  { %20535 = vst [vmem:[#allocation60_spill] sm:$0xff] %v15756_v34  ;;  %v2176_v43 = vcombine.high %v15763_v17, %v15763_v17  ;;  %v1831_v55 = vadd.f32 %v11753_v22, %v11659_v31  ;;  %4063 = vmatmul.mubr.bf16.gmra.mrb[204].mxu1 %v20543_v60  ;;  %v20544_v56 = vcombine.high %v14908_v49, %v14908_v49  ;;  %v13514_v49 = vld [vmem:[%s20246_s0 + $0xc] ss:$16 sps:$4 sm:$0xff]   ;;  %v11758_v40 = vpop.f32.mrb[101].mxu1 }
 0x1c2   :  { %v2356_v26 = vsel %vm15056_vm6, %v10677_v1, %v20537_v50  ;;  %v15775_v24 = vadd.f32 %v2352_v16, %v20539_v4  ;;  %v15779_v30 = vrot.slane %v20541_v32, 2  ;;  %v15788_v1 = vrot.slane %v2178_v29, %v14719_v25  ;;  %v13513_v4 = vld [vmem:[%s20246_s0 + $0x4] ss:$16 sps:$4 sm:$0xff]   ;;  %4972 = vmatprep.mubr.bf16.mxu1 %v13514_v49  ;;  %v11663_v49 = vpop.f32.mrb[100].mxu0  ;;  %v11760_v14 = vpop.f32.mrb[102].mxu1  ;;  %v20551_v60 = vld [vmem:[#allocation18_spill] sm:$0xff] }
 0x1c3   :  { %v2193_v16 = vcombine.high %v15766_v62, %v15766_v62  ;;  %v15797_v0 = vadd.f32 %v2356_v26, %v20544_v56  ;;  %v2376_v50 = vrot.slane %v15725_v28, 2  ;;  %v2177_v31 = vcombine.high %v15782_v36, %v15782_v36  ;;  %4839 = vmatprep.mubr.bf16.mxu0 %v13513_v4  ;;  %v13322_v40 = vld [vmem:[%s20247_s1 + $0x580] sm:$0xff]  }
 0x1c4   :  { %20540 = vst [vmem:[#allocation25_spill] sm:$0xff] %v15775_v24  ;;  %v15802_v22 = vrot.slane %v2176_v43, 7  ;;  %v15805_v29 = vrot.slane %v1831_v55, %v14719_v25  ;;  %v10679_v26 = vrot.slane %v2143_v12, 9  ;;  %v2386_v32 = vrot.slane %v15732_v39, 2  ;;  %v11664_v24 = vpop.f32.mrb[101].mxu0  ;;  %v11761_v12 = vpop.f32.mrb[103].mxu1 }
 0x1c5   :  { %20545 = vst [vmem:[#allocation61_spill] sm:$0xff] %v15797_v0  ;;  %v2194_v43 = vcombine.high %v15788_v1, %v15788_v1  ;;  %v20546_v56 = vrot.slane %v15630_v11, 7  ;;  %v20547_v55 = vrot.slane %v15661_v8, 2  ;;  %v10680_v4 = vrot.slane %v15763_v17, 9 }
 0x1c6   :  { %v15824_v51 = vrot.slane %v2177_v31, 7  ;;  %v15827_v46 = vrot.slane %v2193_v16, 9  ;;  %v2365_v17 = vsel %vm15056_vm6, %v15700_v5, %v15702_v13  ;;  %v2396_v31 = vrot.slane %v15802_v22, 2  ;;  %v13321_v16 = vld [vmem:[%s20247_s1 + $0x500] sm:$0xff]   ;;  %v20549_v5 = vld [vmem:[#allocation27_spill] sm:$0xff] }
 0x1c7   :  { %v2362_v33 = vsel %vm15056_vm6, %v20547_v55, %v20546_v56  ;;  %v15830_v11 = vrot.slane %v2194_v43, 7  ;;  %v2202_v56 = vcombine.high %v15805_v29, %v15805_v29  ;;  %v11666_v55 = vpop.f32.mrb[102].mxu0  ;;  %v20548_v24 = vrot.slane %v15639_v41, 9  ;;  %v20553_v41 = vld [vmem:[#allocation28_spill] sm:$0xff] }
 0x1c8   :  { %v20550_v43 = vcombine.high %v20549_v5, %v20549_v5  ;;  %v2402_v55 = vrot.slane %v15824_v51, 2  ;;  %v2413_v14 = vrot.slane %v15805_v29, 7  ;;  %v11667_v0 = vpop.f32.mrb[103].mxu0  ;;  %v20552_v34 = vrot.slane %v20551_v60, %v14719_v25 }
 0x1c9   :  { %v2369_v13 = vsel %vm15056_vm6, %v20548_v24, %v15675_v10  ;;  %v13323_v24 = vld [vmem:[%s20247_s1 + $0x548] sm:$0xff]   ;;  %v20554_v29 = vrot.slane %v15669_v21, 7  ;;  %v20555_v0 = vrot.slane %v15675_v10, 2  ;;  %v20556_v12 = vrot.slane %v15687_v15, 7 }
 0x1ca   :  { %v15853_v49 = vadd.f32 %v2362_v33, %v20550_v43  ;;  %v15860_v18 = vadd.f32 %v2365_v17, %v20552_v34  ;;  %v15863_v61 = vadd.f32 %v2369_v13, %v20553_v41  ;;  %v13324_v33 = vld [vmem:[%s20247_s1 + $0x5c8] sm:$0xff]   ;;  %v2375_v34 = vsel %vm15056_vm6, %v15723_v6, %v15725_v28  ;;  %v15893_v43 = vld [vmem:[%s20246_s0] ss:$16 sps:$4 sm:$0xff]  }
 0x1cb   :  { %v2372_v60 = vsel %vm15056_vm6, %v20555_v0, %v20554_v29  ;;  %v2378_v17 = vsel %vm15056_vm6, %v2376_v50, %v20556_v12  ;;  %v20557_v13 = vrot.slane %v15672_v45, 7  ;;  %v2412_v10 = vrot.slane %v15830_v11, 2  ;;  %20558 = vst [vmem:[#allocation27_spill] sm:$0xff] %v15893_v43  ;;  %4840 = vmatmul.mubr.bf16.vlgmr.msra.gmra.mrb[208].mxu0 %v15893_v43  ;;  %v15899_v28 = vld [vmem:[%s20246_s0 + $0x8] ss:$16 sps:$4 sm:$0xff]   ;;  %v20561_v6 = vld [vmem:[#allocation29_spill] sm:$0xff] }
 0x1cc   :  { %20559 = vst [vmem:[#allocation18_spill] sm:$0xff] %v15899_v28  ;;  %4973 = vmatmul.mubr.bf16.vlgmr.msra.gmra.mrb[208].mxu1 %v15899_v28  ;;  %v20560_v45 = vcombine.high %v20553_v41, %v20553_v41  ;;  %v15908_v50 = vadd.f32 %v2375_v34, %v20561_v6  ;;  %v2416_v0 = vrot.slane %v2202_v56, 7  ;;  %12328 = vmatpush3.bf16.msra.mxu0 %v13321_v16  ;;  %v13325_v12 = vld [vmem:[%s20247_s1 + $0x508] sm:$0xff]   ;;  %v20563_v34 = vrot.slane %v15693_v9, 7  ;;  %v11873_v28 = vpop.f32.mrb[104].mxu1 }
 0x1cd   :  { %v2382_v21 = vsel %vm15056_vm6, %v10679_v26, %v20557_v13  ;;  %v20562_v26 = vcombine.high %v20561_v6, %v20561_v6  ;;  %12422 = vmatpush3.bf16.msra.mxu1 %v13322_v40  ;;  %v13326_v41 = vld [vmem:[%s20247_s1 + $0x588] sm:$0xff]   ;;  %v2415_v13 = vrot.slane %v2413_v14, 2  ;;  %12329 = vmatprep.subr.bf16.mxu0 %v13323_v24 }
 0x1ce   :  { %v15905_v15 = vadd.f32 %v2372_v60, %v20560_v45  ;;  %v2385_v60 = vsel %vm15056_vm6, %v15779_v30, %v15732_v39  ;;  %v2388_v56 = vsel %vm15056_vm6, %v2386_v32, %v20563_v34  ;;  %v20564_v16 = vld [vmem:[#allocation30_spill] sm:$0xff]  ;;  %v15937_v45 = vld [vmem:[%s20246_s0 + $0x24] ss:$16 sps:$4 sm:$0xff]   ;;  %12423 = vmatprep.subr.bf16.mxu1 %v13324_v33  ;;  %v20575_v33 = vrot.slane %v15788_v1, 7 }
 0x1cf   :  { %v15913_v29 = vadd.f32 %v2378_v17, %v20562_v26  ;;  %v20565_v40 = vcombine.high %v20564_v16, %v20564_v16  ;;  %20566 = vst [vmem:[#allocation28_spill] sm:$0xff] %v15937_v45  ;;  %4846 = vmatprep.mubr.bf16.mxu0 %v15937_v45  ;;  %v15943_v39 = vld [vmem:[%s20246_s0 + $0x2c] ss:$16 sps:$4 sm:$0xff]   ;;  %v13327_v30 = vld [vmem:[%s20247_s1 + $0x550] sm:$0xff]   ;;  %v2395_v16 = vsel %vm15056_vm6, %v10680_v4, %v15802_v22  ;;  %v11779_v45 = vpop.f32.mrb[104].mxu0 }
 0x1d0   :  { %20567 = vst [vmem:[#allocation29_spill] sm:$0xff] %v15943_v39  ;;  %4979 = vmatprep.mubr.bf16.mxu1 %v15943_v39  ;;  %v13328_v32 = vld [vmem:[%s20247_s1 + $0x5d0] sm:$0xff]   ;;  %v11780_v4 = vpop.f32.mrb[105].mxu0  ;;  %12330 = vmatpush3.bf16.msra.mxu0 %v13325_v12 }
 0x1d1   :  { %v15932_v17 = vadd.f32 %v2382_v21, %v20565_v40  ;;  %v20568_v21 = vld [vmem:[#allocation31_spill] sm:$0xff]  ;;  %v20570_v40 = vrot.slane %v15337_v52, 7  ;;  %12424 = vmatpush3.bf16.msra.mxu1 %v13326_v41  ;;  %12331 = vmatprep.subr.bf16.mxu0 %v13327_v30 }
 0x1d2   :  { %v15953_v6 = vadd.f32 %v2385_v60, %v20568_v21  ;;  %v20569_v26 = vcombine.high %v20568_v21, %v20568_v21  ;;  %v20571_v60 = vrot.slane %v15782_v36, 7  ;;  %v20572_v21 = vrot.slane %v15766_v62, 7  ;;  %12425 = vmatprep.subr.bf16.mxu1 %v13328_v32  ;;  %v20580_v12 = vld [vmem:[#allocation35_spill] sm:$0xff] }
 0x1d3   :  { %v15965_v39 = vrot.slane %v20570_v40, 2  ;;  %v20573_v40 = vcombine.high %v15028_v53, %v15028_v53  ;;  %v20581_v41 = vcombine.high %v20580_v12, %v20580_v12 }
 0x1d4   :  { %v15958_v34 = vadd.f32 %v2388_v56, %v20569_v26  ;;  %v2398_v43 = vsel %vm15056_vm6, %v2396_v31, %v20571_v60  ;;  %v15972_v56 = vadd.f32 %v2395_v16, %v15028_v53  ;;  %v2404_v22 = vsel %vm15056_vm6, %v2402_v55, %v20572_v21  ;;  %v11874_v26 = vpop.f32.mrb[105].mxu1 }
 0x1d5   :  { %v15981_v24 = vadd.f32 %v2398_v43, %v20573_v40  ;;  %v2408_v31 = vsel %vm15056_vm6, %v15827_v46, %v20575_v33  ;;  %v20576_v16 = vcombine.high %v15045_v19, %v15045_v19  ;;  %v2414_v55 = vsel %vm15056_vm6, %v2412_v10, %v2413_v14  ;;  %v11782_v40 = vpop.f32.mrb[106].mxu0 }
 0x1d6   :  { %v20577_v60 = vcombine.high %v15337_v52, %v15337_v52  ;;  %v11781_v43 = vadd.f32 %v11780_v4, %v11779_v45  ;;  %v11875_v21 = vadd.f32 %v11874_v26, %v11873_v28  ;;  %v20578_v46 = vcombine.high %v15037_v38, %v15037_v38  ;;  %v11783_v14 = vpop.f32.mrb[107].mxu0  ;;  %v13329_v52 = vld [vmem:[%s20247_s1 + $0x510] sm:$0xff]   ;;  %v20582_v4 = vld [vmem:[#allocation34_spill] sm:$0xff] }
 0x1d7   :  { %20574 = vst [vmem:[#allocation30_spill] sm:$0xff] %v15981_v24  ;;  %v15991_v62 = vadd.f32 %v2404_v22, %v20576_v16  ;;  %v11876_v24 = vpop.f32.mrb[106].mxu1  ;;  %v20579_v22 = vrot.slane %v15563_v59, 7  ;;  %v13330_v28 = vld [vmem:[%s20247_s1 + $0x590] sm:$0xff]   ;;  %v2417_v38 = vsel %vm15056_vm6, %v2415_v13, %v2416_v0  ;;  %v16020_v45 = vadd.f32 %v2414_v55, %v20581_v41  ;;  %12332 = vmatpush3.bf16.msra.mxu0 %v13329_v52 }
 0x1d8   :  { %v15998_v53 = vrot.slane %v20577_v60, 7  ;;  %v16003_v33 = vadd.f32 %v2408_v31, %v20578_v46  ;;  %v11877_v10 = vpop.f32.mrb[107].mxu1  ;;  %v2219_v30 = vsel %vm15056_vm6, %v15502_v44, %v20582_v4  ;;  %v2970_v32 = vadd.f32 %v11875_v21, %v11781_v43  ;;  %v13331_v60 = vld [vmem:[%s20247_s1 + $0x558] sm:$0xff]   ;;  %v16042_v44 = vld [vmem:[%s20246_s0 + $0x20] ss:$16 sps:$4 sm:$0xff]   ;;  %v20588_v21 = vld [vmem:[#allocation38_spill] sm:$0xff]  ;;  %12426 = vmatpush3.bf16.msra.mxu1 %v13330_v28 }
 0x1d9   :  { %v16007_v16 = vrot.slane %v20579_v22, 2  ;;  %v11784_v26 = vadd.f32 %v11783_v14, %v11782_v40  ;;  %v11878_v31 = vadd.f32 %v11877_v10, %v11876_v24  ;;  %v20583_v0 = vrot.slane %v14795_v42, %v14719_v25  ;;  %20585 = vst [vmem:[#allocation31_spill] sm:$0xff] %v16042_v44  ;;  %4847 = vmatmul.mubr.bf16.gmra.mrb[212].mxu0 %v16042_v44  ;;  %v16048_v24 = vld [vmem:[%s20246_s0 + $0x28] ss:$16 sps:$4 sm:$0xff]   ;;  %v16067_v41 = vld [vmem:[%s20246_s0 + $0x44] ss:$16 sps:$4 sm:$0xff]  }
 0x1da   :  { %v20584_v55 = vcombine.high %v15563_v59, %v15563_v59  ;;  %20586 = vst [vmem:[#allocation35_spill] sm:$0xff] %v16048_v24  ;;  %4980 = vmatmul.mubr.bf16.gmra.mrb[212].mxu1 %v16048_v24  ;;  %v13332_v42 = vld [vmem:[%s20247_s1 + $0x5d8] sm:$0xff]   ;;  %v20587_v59 = vld [vmem:[#allocation19_spill] sm:$0xff]  ;;  %v2229_v40 = vsel %vm15056_vm6, %v15538_v3, %v20588_v21  ;;  %v2261_v22 = vsel %vm15056_vm6, %v15546_v54, %v15557_v2  ;;  %20589 = vst [vmem:[#allocation34_spill] sm:$0xff] %v16067_v41  ;;  %v11879_v21 = vpop.f32.mrb[108].mxu1 }
 0x1db   :  { %v16032_v13 = vadd.f32 %v2417_v38, %v20583_v0  ;;  %v2484_v43 = vadd.f32 %v2219_v30, %v20587_v59  ;;  %v3088_v14 = vcombine.high %v2970_v32, %v2970_v32  ;;  %v3095_v10 = vrot.slane %v2970_v32, %v14719_v25  ;;  %4854 = vmatprep.mubr.bf16.mxu0 %v16067_v41  ;;  %v16073_v3 = vld [vmem:[%s20246_s0 + $0x4c] ss:$16 sps:$4 sm:$0xff]   ;;  %v20592_v32 = vld [vmem:[#allocation21_spill] sm:$0xff]  ;;  %v11785_v59 = vpop.f32.mrb[108].mxu0 }
 0x1dc   :  { %v16037_v46 = vrot.slane %v20584_v55, 7  ;;  %v2973_v38 = vadd.f32 %v11878_v31, %v11784_v26  ;;  %20590 = vst [vmem:[#allocation19_spill] sm:$0xff] %v16073_v3  ;;  %4987 = vmatprep.mubr.bf16.mxu1 %v16073_v3  ;;  %v13333_v54 = vld [vmem:[%s20247_s1 + $0x518] sm:$0xff]   ;;  %v16084_v26 = vadd.f32 %v2261_v22, %v20592_v32  ;;  %v2271_v31 = vsel %vm15056_vm6, %v15570_v35, %v15254_v48  ;;  %v11786_v22 = vpop.f32.mrb[109].mxu0 }
 0x1dd   :  { %v13334_v2 = vld [vmem:[%s20247_s1 + $0x598] sm:$0xff]   ;;  %v3102_v52 = vrot.slane %v3088_v14, %v14719_v25  ;;  %v3103_v28 = vcombine.high %v3095_v10, %v3095_v10  ;;  %12333 = vmatprep.subr.bf16.mxu0 %v13331_v60  ;;  %12427 = vmatprep.subr.bf16.mxu1 %v13332_v42  ;;  %v16096_v32 = vadd.f32 %v2271_v31, %v14800_v23  ;;  %v20594_v23 = vld [vmem:[#allocation37_spill] sm:$0xff]  ;;  %v20595_v3 = vrot.slane %v15577_v58, 7 }
 0x1de   :  { %v20591_v4 = vld [vmem:[#allocation20_spill] sm:$0xff]  ;;  %v3105_v0 = vcombine.high %v2973_v38, %v2973_v38  ;;  %v3112_v55 = vrot.slane %v2973_v38, %v14719_v25  ;;  %v2281_v48 = vsel %vm15056_vm6, %v15574_v7, %v15283_v47  ;;  %v2313_v35 = vsel %vm15056_vm6, %v15965_v39, %v15998_v53  ;;  %v11788_v47 = vpop.f32.mrb[110].mxu0  ;;  %v20596_v39 = vld [vmem:[#allocation39_spill] sm:$0xff]  ;;  %12334 = vmatpush3.bf16.msra.mxu0 %v13333_v54  ;;  %v13338_v54 = vld [vmem:[%s20247_s1 + $0x5a0] sm:$0xff]  }
 0x1df   :  { %v2487_v30 = vadd.f32 %v2229_v40, %v20591_v4  ;;  %v13335_v40 = vld [vmem:[%s20247_s1 + $0x560] sm:$0xff]   ;;  %v11880_v4 = vpop.f32.mrb[109].mxu1  ;;  %v2339_v60 = vsel %vm15056_vm6, %v16007_v16, %v16037_v46  ;;  %v3104_v14 = vcombine.high %v3102_v52, %v3102_v52  ;;  %v20593_v42 = vld [vmem:[#allocation36_spill] sm:$0xff]  ;;  %v16114_v38 = vadd.f32 %v3102_v52, %v20594_v23  ;;  %v11789_v16 = vpop.f32.mrb[111].mxu0  ;;  %12428 = vmatpush3.bf16.msra.mxu1 %v13334_v2  ;;  %v13339_v2 = vld [vmem:[%s20247_s1 + $0x568] sm:$0xff]  }
 0x1e0   :  { %v16111_v10 = vadd.f32 %v3103_v28, %v20593_v42  ;;  %v3119_v31 = vrot.slane %v3105_v0, %v14719_v25  ;;  %v11882_v7 = vpop.f32.mrb[110].mxu1  ;;  %v2347_v41 = vrot.slane %v20595_v3, 2  ;;  %v16120_v53 = vadd.f32 %v3112_v55, %v20596_v39  ;;  %v13336_v52 = vld [vmem:[%s20247_s1 + $0x5e0] sm:$0xff]   ;;  %v20598_v58 = vld [vmem:[#allocation40_spill] sm:$0xff]  ;;  %12335 = vmatprep.subr.bf16.mxu0 %v13335_v40 }
 0x1e1   :  { %v11787_v24 = vadd.f32 %v11786_v22, %v11785_v59  ;;  %v11881_v44 = vadd.f32 %v11880_v4, %v11879_v21  ;;  %v11883_v46 = vpop.f32.mrb[111].mxu1  ;;  %v13337_v28 = vld [vmem:[%s20247_s1 + $0x520] sm:$0xff]   ;;  %v11790_v55 = vadd.f32 %v11789_v16, %v11788_v47  ;;  %v20600_v59 = vrot.slane %v15612_v37, 7  ;;  %v16150_v40 = vld [vmem:[%s20246_s0 + $0x48] ss:$16 sps:$4 sm:$0xff]   ;;  %12429 = vmatprep.subr.bf16.mxu1 %v13336_v52 }
 0x1e2   :  { %20597 = vst [vmem:[#allocation38_spill] sm:$0xff] %v16120_v53  ;;  %v3120_v0 = vcombine.high %v3119_v31, %v3119_v31  ;;  %v16129_v3 = vadd.f32 %v3119_v31, %v20598_v58  ;;  %v11884_v42 = vadd.f32 %v11883_v46, %v11882_v7  ;;  %v16144_v4 = vld [vmem:[%s20246_s0 + $0x40] ss:$16 sps:$4 sm:$0xff]   ;;  %4988 = vmatmul.mubr.bf16.gmra.mrb[216].mxu1 %v16150_v40  ;;  %v13340_v37 = vld [vmem:[%s20247_s1 + $0x5e8] sm:$0xff]   ;;  %v16168_v7 = vld [vmem:[%s20246_s0 + $0x64] ss:$16 sps:$4 sm:$0xff]  }
 0x1e3   :  { %v16139_v21 = vrot.slane %v20600_v59, 2  ;;  %v2978_v22 = vadd.f32 %v11881_v44, %v11787_v24  ;;  %4855 = vmatmul.mubr.bf16.gmra.mrb[216].mxu0 %v16144_v4  ;;  %v16156_v23 = vadd.f32 %v3104_v14, %v2484_v43  ;;  %v16159_v44 = vadd.f32 %v2281_v48, %v14809_v57  ;;  %v16174_v43 = vld [vmem:[%s20246_s0 + $0x6c] ss:$16 sps:$4 sm:$0xff]   ;;  %v20605_v48 = vld [vmem:[#allocation23_spill] sm:$0xff]  ;;  %12430 = vmatpush3.bf16.msra.mxu1 %v13338_v54 }
 0x1e4   :  { %20599 = vst [vmem:[#allocation20_spill] sm:$0xff] %v16129_v3  ;;  %v20602_v24 = vrot.slane %v15693_v9, 7  ;;  %v2981_v47 = vadd.f32 %v11884_v42, %v11790_v55  ;;  %4862 = vmatprep.mubr.bf16.mxu0 %v16168_v7  ;;  %20603 = vst [vmem:[#allocation36_spill] sm:$0xff] %v16174_v43  ;;  %4995 = vmatprep.mubr.bf16.mxu1 %v16174_v43  ;;  %v16177_v57 = vadd.f32 %v3120_v0, %v2487_v30  ;;  %v13341_v55 = vld [vmem:[%s20247_s1 + $0x528] sm:$0xff]  }
 0x1e5   :  { %20601 = vst [vmem:[#allocation21_spill] sm:$0xff] %v16156_v23  ;;  %v16180_v14 = vadd.f32 %v2313_v35, %v20605_v48  ;;  %v20606_v39 = vcombine.high %v15693_v9, %v15693_v9  ;;  %v3121_v46 = vcombine.high %v2978_v22, %v2978_v22  ;;  %v3128_v58 = vrot.slane %v2978_v22, %v14719_v25  ;;  %v20607_v42 = vld [vmem:[#allocation26_spill] sm:$0xff]  ;;  %v11885_v48 = vpop.f32.mrb[112].mxu1  ;;  %v20609_v22 = vld [vmem:[#allocation9_spill] sm:$0xff] }
 0x1e6   :  { %v16163_v31 = vrot.slane %v20602_v24, 2  ;;  %20604 = vst [vmem:[#allocation37_spill] sm:$0xff] %v16177_v57  ;;  %12336 = vmatpush3.bf16.msra.mxu0 %v13337_v28  ;;  %v16192_v30 = vadd.f32 %v2339_v60, %v20607_v42  ;;  %v20608_v35 = vrot.slane %v15782_v36, 7  ;;  %v3138_v59 = vcombine.high %v2981_v47, %v2981_v47  ;;  %v11791_v24 = vpop.f32.mrb[112].mxu0  ;;  %v13342_v52 = vld [vmem:[%s20247_s1 + $0x5a8] sm:$0xff]   ;;  %12431 = vmatprep.subr.bf16.mxu1 %v13340_v37  ;;  %v20611_v57 = vld [vmem:[#allocation12_spill] sm:$0xff] }
 0x1e7   :  { %v16185_v16 = vrot.slane %v20606_v39, 7  ;;  %v3145_v9 = vrot.slane %v2981_v47, %v14719_v25  ;;  %12337 = vmatprep.subr.bf16.mxu0 %v13339_v2  ;;  %v2349_v60 = vsel %vm15056_vm6, %v2347_v41, %v15634_v63  ;;  %v3135_v28 = vrot.slane %v3121_v46, %v14719_v25  ;;  %v11792_v42 = vpop.f32.mrb[113].mxu0  ;;  %v11886_v47 = vpop.f32.mrb[113].mxu1  ;;  %v20613_v23 = vld [vmem:[#allocation10_spill] sm:$0xff]  ;;  %v13344_v37 = vld [vmem:[%s20247_s1 + $0x5f0] sm:$0xff]   ;;  %12432 = vmatpush3.bf16.msra.mxu1 %v13342_v52 }
 0x1e8   :  { %v16196_v0 = vrot.slane %v20608_v35, 2  ;;  %v3136_v36 = vcombine.high %v3128_v58, %v3128_v58  ;;  %v16207_v39 = vadd.f32 %v3128_v58, %v20609_v22  ;;  %v16210_v54 = vadd.f32 %v2349_v60, %v20538_v20  ;;  %v11794_v63 = vpop.f32.mrb[114].mxu0  ;;  %v11888_v41 = vpop.f32.mrb[114].mxu1  ;;  %v13343_v20 = vld [vmem:[%s20247_s1 + $0x570] sm:$0xff]   ;;  %v16253_v52 = vld [vmem:[%s20246_s0 + $0x68] ss:$16 sps:$4 sm:$0xff]   ;;  %12433 = vmatprep.subr.bf16.mxu1 %v13344_v37 }
 0x1e9   :  { %v3152_v2 = vrot.slane %v3138_v59, %v14719_v25  ;;  %v3153_v35 = vcombine.high %v3145_v9, %v3145_v9  ;;  %v16214_v3 = vadd.f32 %v3145_v9, %v20611_v57  ;;  %v11793_v53 = vadd.f32 %v11792_v42, %v11791_v24  ;;  %v11795_v22 = vpop.f32.mrb[115].mxu0  ;;  %v20614_v59 = vld [vmem:[#allocation13_spill] sm:$0xff]  ;;  %v20616_v9 = vld [vmem:[#allocation14_spill] sm:$0xff]  ;;  %v13345_v60 = vld [vmem:[%s20247_s1 + $0x530] sm:$0xff]  }
 0x1ea   :  { %20610 = vst [vmem:[#allocation39_spill] sm:$0xff] %v16207_v39  ;;  %v3137_v46 = vcombine.high %v3135_v28, %v3135_v28  ;;  %v16217_v43 = vadd.f32 %v3136_v36, %v20613_v23  ;;  %v11887_v58 = vadd.f32 %v11886_v47, %v11885_v48  ;;  %v11889_v39 = vpop.f32.mrb[115].mxu1  ;;  %12338 = vmatpush3.bf16.msra.mxu0 %v13341_v55  ;;  %v13346_v28 = vld [vmem:[%s20247_s1 + $0x5b0] sm:$0xff]  }
 0x1eb   :  { %20612 = vst [vmem:[#allocation40_spill] sm:$0xff] %v16214_v3  ;;  %v2359_v57 = vsel %vm15056_vm6, %v16139_v21, %v15661_v8  ;;  %v16230_v23 = vadd.f32 %v3153_v35, %v20614_v59  ;;  %v16233_v24 = vadd.f32 %v3152_v2, %v20616_v9  ;;  %v11796_v55 = vadd.f32 %v11795_v22, %v11794_v63  ;;  %v20618_v36 = vld [vmem:[#allocation11_spill] sm:$0xff]  ;;  %v16274_v63 = vld [vmem:[%s20246_s0 + $0x8c] ss:$16 sps:$4 sm:$0xff]  }
 0x1ec   :  { %v11890_v48 = vadd.f32 %v11889_v39, %v11888_v41  ;;  %v16242_v42 = vadd.f32 %v3137_v46, %v20618_v36  ;;  %v2986_v8 = vadd.f32 %v11887_v58, %v11793_v53  ;;  %v16247_v21 = vld [vmem:[%s20246_s0 + $0x60] ss:$16 sps:$4 sm:$0xff]   ;;  %4996 = vmatmul.mubr.bf16.gmra.mrb[220].mxu1 %v16253_v52  ;;  %v13347_v39 = vld [vmem:[%s20247_s1 + $0x578] sm:$0xff]   ;;  %v16263_v47 = vadd.f32 %v2359_v57, %v20549_v5  ;;  %v16268_v35 = vld [vmem:[%s20246_s0 + $0x84] ss:$16 sps:$4 sm:$0xff]  }
 0x1ed   :  { %20615 = vst [vmem:[#allocation23_spill] sm:$0xff] %v16230_v23  ;;  %20617 = vst [vmem:[#allocation26_spill] sm:$0xff] %v16233_v24  ;;  %4863 = vmatmul.mubr.bf16.gmra.mrb[220].mxu0 %v16247_v21  ;;  %v13348_v53 = vld [vmem:[%s20247_s1 + $0x5f8] sm:$0xff]   ;;  %5003 = vmatprep.mubr.bf16.mxu1 %v16274_v63  ;;  %v2391_v5 = vsel %vm15056_vm6, %v16163_v31, %v16185_v16  ;;  %v2401_v41 = vsel %vm15056_vm6, %v16196_v0, %v15824_v51  ;;  %v20619_v46 = vrot.slane %v15788_v1, 7  ;;  %v11797_v31 = vpop.f32.mrb[116].mxu0  ;;  %v11891_v16 = vpop.f32.mrb[116].mxu1 }
 0x1ee   :  { %v2989_v2 = vadd.f32 %v11890_v48, %v11796_v55  ;;  %4870 = vmatprep.mubr.bf16.mxu0 %v16268_v35  ;;  %v3154_v22 = vcombine.high %v2986_v8, %v2986_v8  ;;  %v3161_v57 = vrot.slane %v2986_v8, %v14719_v25  ;;  %12339 = vmatprep.subr.bf16.mxu0 %v13343_v20  ;;  %v20620_v59 = vld [vmem:[#allocation32_spill] sm:$0xff]  ;;  %v20621_v37 = vld [vmem:[#allocation15_spill] sm:$0xff]  ;;  %v11798_v8 = vpop.f32.mrb[117].mxu0 }
 0x1ef   :  { %v2409_v58 = vrot.slane %v20619_v46, 2  ;;  %v16289_v9 = vadd.f32 %v2391_v5, %v20620_v59  ;;  %12340 = vmatpush3.bf16.msra.mxu0 %v13345_v60  ;;  %12434 = vmatpush3.bf16.msra.mxu1 %v13346_v28  ;;  %v13349_v1 = vld [vmem:[%s20247_s1 + $0x538] sm:$0xff]   ;;  %v16296_v51 = vadd.f32 %v2401_v41, %v15045_v19  ;;  %v11892_v5 = vpop.f32.mrb[117].mxu1  ;;  %v11800_v59 = vpop.f32.mrb[118].mxu0 }
 0x1f0   :  { %v3171_v55 = vcombine.high %v2989_v2, %v2989_v2  ;;  %v3178_v48 = vrot.slane %v2989_v2, %v14719_v25  ;;  %v3168_v0 = vrot.slane %v3154_v22, %v14719_v25  ;;  %v3169_v20 = vcombine.high %v3161_v57, %v3161_v57  ;;  %12341 = vmatprep.subr.bf16.mxu0 %v13347_v39  ;;  %v11894_v24 = vpop.f32.mrb[118].mxu1  ;;  %v20622_v19 = vld [vmem:[#allocation16_spill] sm:$0xff]  ;;  %v20623_v22 = vld [vmem:[#allocation17_spill] sm:$0xff] }
 0x1f1   :  { %v16300_v36 = vadd.f32 %v3161_v57, %v20621_v37  ;;  %12435 = vmatprep.subr.bf16.mxu1 %v13348_v53  ;;  %v11799_v2 = vadd.f32 %v11798_v8, %v11797_v31  ;;  %v11893_v46 = vadd.f32 %v11892_v5, %v11891_v16  ;;  %v11801_v57 = vpop.f32.mrb[119].mxu0  ;;  %v11895_v37 = vpop.f32.mrb[119].mxu1  ;;  %v13350_v39 = vld [vmem:[%s20247_s1 + $0x5b8] sm:$0xff]   ;;  %v13351_v53 = vld [vmem:[%s20247_s1 + $0x640] sm:$0xff]  }
 0x1f2   :  { %v3185_v60 = vrot.slane %v3171_v55, %v14719_v25  ;;  %v3186_v28 = vcombine.high %v3178_v48, %v3178_v48  ;;  %v3170_v23 = vcombine.high %v3168_v0, %v3168_v0  ;;  %v16304_v41 = vadd.f32 %v3169_v20, %v20622_v19  ;;  %v20624_v31 = vld [vmem:[#allocation41_spill] sm:$0xff] }
 0x1f3   :  { %v16307_v3 = vadd.f32 %v3168_v0, %v20623_v22  ;;  %v2411_v55 = vsel %vm15056_vm6, %v2409_v58, %v15830_v11  ;;  %v20626_v0 = vld [vmem:[#allocation42_spill] sm:$0xff]  ;;  %v2994_v8 = vadd.f32 %v11893_v46, %v11799_v2  ;;  %12342 = vmatpush3.bf16.msra.mxu0 %v13349_v1  ;;  %v13352_v5 = vld [vmem:[%s20247_s1 + $0x6c0] sm:$0xff]   ;;  %v11802_v19 = vadd.f32 %v11801_v57, %v11800_v59  ;;  %v20631_v59 = vld [vmem:[#allocation43_spill] sm:$0xff] }
 0x1f4   :  { %v3187_v48 = vcombine.high %v3185_v60, %v3185_v60  ;;  %v16319_v16 = vadd.f32 %v3186_v28, %v20624_v31  ;;  %v16322_v20 = vadd.f32 %v3185_v60, %v20626_v0  ;;  %v11896_v22 = vadd.f32 %v11895_v37, %v11894_v24  ;;  %v16336_v11 = vld [vmem:[%s20246_s0 + $0x88] ss:$16 sps:$4 sm:$0xff]   ;;  %v16346_v60 = vld [vmem:[%s20246_s0 + $0xa4] ss:$16 sps:$4 sm:$0xff]   ;;  %v16352_v28 = vld [vmem:[%s20246_s0 + $0xac] ss:$16 sps:$4 sm:$0xff]   ;;  %12436 = vmatpush3.bf16.msra.mxu1 %v13350_v39 }
 0x1f5   :  { %4871 = vmatmul.mubr.bf16.gmra.mrb[224].mxu0 %v16330_v27  ;;  %5004 = vmatmul.mubr.bf16.gmra.mrb[224].mxu1 %v16336_v11  ;;  %v16340_v58 = vadd.f32 %v3170_v23, %v16084_v26  ;;  %v3188_v1 = vcombine.high %v2994_v8, %v2994_v8  ;;  %v3195_v24 = vrot.slane %v2994_v8, %v14719_v25  ;;  %v11803_v37 = vpop.f32.mrb[120].mxu0  ;;  %v11897_v31 = vpop.f32.mrb[120].mxu1 }
 0x1f6   :  { %20625 = vst [vmem:[#allocation9_spill] sm:$0xff] %v16319_v16  ;;  %20627 = vst [vmem:[#allocation12_spill] sm:$0xff] %v16322_v20  ;;  %4878 = vmatprep.mubr.bf16.mxu0 %v16346_v60  ;;  %5011 = vmatprep.mubr.bf16.mxu1 %v16352_v28  ;;  %v16356_v26 = vadd.f32 %v3187_v48, %v16096_v32  ;;  %v2997_v23 = vadd.f32 %v11896_v22, %v11802_v19  ;;  %v11804_v20 = vpop.f32.mrb[121].mxu0  ;;  %v11898_v32 = vpop.f32.mrb[121].mxu1  ;;  %v20633_v19 = vld [vmem:[#allocation44_spill] sm:$0xff] }
 0x1f7   :  { %20628 = vst [vmem:[#allocation10_spill] sm:$0xff] %v16340_v58  ;;  %20629 = vst [vmem:[#allocation13_spill] sm:$0xff] %v16352_v28  ;;  %12515 = vmatprep.subr.bf16.mxu0 %v13351_v53  ;;  %v16359_v2 = vadd.f32 %v2411_v55, %v20580_v12  ;;  %v3202_v46 = vrot.slane %v3188_v1, %v14719_v25  ;;  %v16363_v57 = vadd.f32 %v3195_v24, %v20631_v59  ;;  %v11806_v55 = vpop.f32.mrb[122].mxu0  ;;  %v11900_v22 = vpop.f32.mrb[122].mxu1  ;;  %v20634_v59 = vld [vmem:[#allocation45_spill] sm:$0xff] }
 0x1f8   :  { %20630 = vst [vmem:[#allocation14_spill] sm:$0xff] %v16356_v26  ;;  %12609 = vmatprep.subr.bf16.mxu1 %v13352_v5  ;;  %v3204_v0 = vcombine.high %v2997_v23, %v2997_v23  ;;  %v3211_v8 = vrot.slane %v2997_v23, %v14719_v25  ;;  %v11805_v53 = vadd.f32 %v11804_v20, %v11803_v37  ;;  %v11807_v5 = vpop.f32.mrb[123].mxu0  ;;  %v11901_v16 = vpop.f32.mrb[123].mxu1  ;;  %v16382_v37 = vld [vmem:[%s20246_s0 + $0xa0] ss:$16 sps:$4 sm:$0xff]  }
 0x1f9   :  { %20632 = vst [vmem:[#allocation11_spill] sm:$0xff] %v16363_v57  ;;  %v3203_v48 = vcombine.high %v3202_v46, %v3202_v46  ;;  %v16367_v39 = vadd.f32 %v3202_v46, %v20633_v19  ;;  %v11899_v12 = vadd.f32 %v11898_v32, %v11897_v31  ;;  %v11808_v23 = vadd.f32 %v11807_v5, %v11806_v55  ;;  %v20637_v19 = vld [vmem:[#allocation46_spill] sm:$0xff] }
 0x1fa   :  { %v3218_v1 = vrot.slane %v3204_v0, %v14719_v25  ;;  %v3219_v24 = vcombine.high %v3211_v8, %v3211_v8  ;;  %v16371_v26 = vadd.f32 %v3211_v8, %v20634_v59  ;;  %v11902_v58 = vadd.f32 %v11901_v16, %v11900_v22  ;;  %20639 = vst [vmem:[#allocation17_spill] sm:$0xff] %v16382_v37  ;;  %v16388_v31 = vld [vmem:[%s20246_s0 + $0xa8] ss:$16 sps:$4 sm:$0xff]   ;;  %v16395_v8 = vld [vmem:[%s20246_s0 + $0xc4] ss:$16 sps:$4 sm:$0xff]  }
 0x1fb   :  { %v3002_v57 = vadd.f32 %v11899_v12, %v11805_v53  ;;  %v16374_v28 = vadd.f32 %v3203_v48, %v16159_v44  ;;  %20640 = vst [vmem:[#allocation41_spill] sm:$0xff] %v16388_v31  ;;  %20641 = vst [vmem:[#allocation42_spill] sm:$0xff] %v16395_v8  ;;  %v16401_v32 = vld [vmem:[%s20246_s0 + $0xcc] ss:$16 sps:$4 sm:$0xff]   ;;  %v20643_v48 = vld [vmem:[#allocation47_spill] sm:$0xff] }
 0x1fc   :  { %20635 = vst [vmem:[#allocation32_spill] sm:$0xff] %v16371_v26  ;;  %v3220_v46 = vcombine.high %v3218_v1, %v3218_v1  ;;  %v16377_v20 = vadd.f32 %v3219_v24, %v20637_v19  ;;  %v3005_v0 = vadd.f32 %v11902_v58, %v11808_v23  ;;  %20642 = vst [vmem:[#allocation43_spill] sm:$0xff] %v16401_v32  ;;  %v20645_v12 = vld [vmem:[#allocation48_spill] sm:$0xff]  ;;  %v11809_v1 = vpop.f32.mrb[124].mxu0  ;;  %v11903_v24 = vpop.f32.mrb[124].mxu1  ;;  %v20647_v19 = vld [vmem:[#allocation49_spill] sm:$0xff] }
 0x1fd   :  { %20636 = vst [vmem:[#allocation15_spill] sm:$0xff] %v16374_v28  ;;  %4879 = vmatmul.mubr.bf16.gmra.mrb[228].mxu0 %v16382_v37  ;;  %5012 = vmatmul.mubr.bf16.gmra.mrb[228].mxu1 %v16388_v31  ;;  %v3221_v44 = vcombine.high %v3002_v57, %v3002_v57  ;;  %v3228_v16 = vrot.slane %v3002_v57, %v14719_v25  ;;  %v11810_v5 = vpop.f32.mrb[125].mxu0  ;;  %v11904_v23 = vpop.f32.mrb[125].mxu1  ;;  %v20649_v26 = vld [vmem:[#allocation50_spill] sm:$0xff] }
 0x1fe   :  { %20638 = vst [vmem:[#allocation16_spill] sm:$0xff] %v16377_v20  ;;  %4886 = vmatprep.mubr.bf16.mxu0 %v16395_v8  ;;  %5019 = vmatprep.mubr.bf16.mxu1 %v16401_v32  ;;  %v16405_v53 = vadd.f32 %v3220_v46, %v20643_v48  ;;  %v3237_v22 = vcombine.high %v3005_v0, %v3005_v0  ;;  %v11906_v48 = vpop.f32.mrb[126].mxu1  ;;  %v20655_v23 = vld [vmem:[#allocation52_spill] sm:$0xff]  ;;  %v20672_v8 = vld [vmem:[#allocation57_spill] sm:$0xff] }
 0x1ff   :  { %v3235_v57 = vrot.slane %v3221_v44, %v14719_v25  ;;  %v3236_v58 = vcombine.high %v3228_v16, %v3228_v16  ;;  %v16409_v55 = vadd.f32 %v3228_v16, %v20645_v12  ;;  %v3244_v59 = vrot.slane %v3005_v0, %v14719_v25  ;;  %v11812_v44 = vpop.f32.mrb[126].mxu0  ;;  %v20651_v16 = vld [vmem:[#allocation51_spill] sm:$0xff]  ;;  %v11907_v24 = vpop.f32.mrb[127].mxu1  ;;  %v20653_v0 = vld [vmem:[#allocation53_spill] sm:$0xff] }
 0x200   :  { %20644 = vst [vmem:[#allocation44_spill] sm:$0xff] %v16405_v53  ;;  %v3251_v46 = vrot.slane %v3237_v22, %v14719_v25  ;;  %v11813_v1 = vpop.f32.mrb[127].mxu0  ;;  %v16443_v22 = vld [vmem:[%s20246_s0 + $0xe4] ss:$16 sps:$4 sm:$0xff]  }
 0x201   :  { %20646 = vst [vmem:[#allocation45_spill] sm:$0xff] %v16409_v55  ;;  %v16413_v20 = vadd.f32 %v3236_v58, %v20647_v19  ;;  %v16416_v28 = vadd.f32 %v3235_v57, %v20649_v26  ;;  %v3252_v53 = vcombine.high %v3244_v59, %v3244_v59  ;;  %v16420_v12 = vadd.f32 %v3244_v59, %v20651_v16  ;;  %v16431_v26 = vld [vmem:[%s20246_s0 + $0xc0] ss:$16 sps:$4 sm:$0xff]   ;;  %v16437_v57 = vld [vmem:[%s20246_s0 + $0xc8] ss:$16 sps:$4 sm:$0xff]   ;;  %v11815_v19 = vpop.f32.mrb[128].mxu0 }
 0x202   :  { %v3253_v55 = vcombine.high %v3251_v46, %v3251_v46  ;;  %v16423_v5 = vadd.f32 %v3251_v46, %v20653_v0  ;;  %20657 = vst [vmem:[#allocation51_spill] sm:$0xff] %v16431_v26  ;;  %20658 = vst [vmem:[#allocation53_spill] sm:$0xff] %v16437_v57  ;;  %v11909_v46 = vpop.f32.mrb[128].mxu1  ;;  %v11816_v44 = vpop.f32.mrb[129].mxu0 }
 0x203   :  { %20648 = vst [vmem:[#allocation46_spill] sm:$0xff] %v16413_v20  ;;  %20650 = vst [vmem:[#allocation47_spill] sm:$0xff] %v16416_v28  ;;  %v16426_v58 = vadd.f32 %v3252_v53, %v20655_v23  ;;  %v16449_v53 = vld [vmem:[%s20246_s0 + $0xec] ss:$16 sps:$4 sm:$0xff]   ;;  %v11910_v48 = vpop.f32.mrb[129].mxu1  ;;  %v11817_v16 = vadd.f32 %v11816_v44, %v11815_v19  ;;  %v11818_v24 = vpop.f32.mrb[130].mxu0 }
 0x204   :  { %20652 = vst [vmem:[#allocation48_spill] sm:$0xff] %v16420_v12  ;;  %20654 = vst [vmem:[#allocation49_spill] sm:$0xff] %v16423_v5  ;;  %v16453_v59 = vadd.f32 %v3253_v55, %v16180_v14  ;;  %v11911_v1 = vadd.f32 %v11910_v48, %v11909_v46  ;;  %v11912_v0 = vpop.f32.mrb[130].mxu1  ;;  %v11819_v23 = vpop.f32.mrb[131].mxu0  ;;  %v16464_v14 = vld [vmem:[%s20246_s0 + $0xe8] ss:$16 sps:$4 sm:$0xff]  }
 0x205   :  { %20656 = vst [vmem:[#allocation50_spill] sm:$0xff] %v16426_v58  ;;  %4887 = vmatmul.mubr.bf16.gmra.mrb[232].mxu0 %v16431_v26  ;;  %5020 = vmatmul.mubr.bf16.gmra.mrb[232].mxu1 %v16437_v57  ;;  %20659 = vst [vmem:[#allocation52_spill] sm:$0xff] %v16443_v22  ;;  %v11913_v5 = vpop.f32.mrb[131].mxu1  ;;  %v11820_v12 = vadd.f32 %v11819_v23, %v11818_v24  ;;  %v16476_v46 = vld [vmem:[%s20246_s0 + $0x10c] ss:$16 sps:$4 sm:$0xff]  }
 0x206   :  { %4893 = vmatprep.mubr.bf16.mxu0 %v16443_v22  ;;  %20660 = vst [vmem:[#allocation62_spill] sm:$0xff] %v16449_v53  ;;  %5026 = vmatprep.mubr.bf16.mxu1 %v16449_v53  ;;  %20661 = vst [vmem:[#allocation63_spill] sm:$0xff] %v16453_v59  ;;  %v3016_v58 = vadd.f32 %v11911_v1, %v11817_v16  ;;  %v11914_v22 = vadd.f32 %v11913_v5, %v11912_v0  ;;  %v16458_v53 = vld [vmem:[%s20246_s0 + $0xe0] ss:$16 sps:$4 sm:$0xff]   ;;  %v16470_v5 = vld [vmem:[%s20246_s0 + $0x104] ss:$16 sps:$4 sm:$0xff]  }
 0x207   :  { %20662 = vst [vmem:[#allocation64_spill] sm:$0xff] %v16458_v53  ;;  %20663 = vst [vmem:[#allocation65_spill] sm:$0xff] %v16464_v14  ;;  %v20668_v28 = vld [vmem:[#allocation54_spill] sm:$0xff] }
 0x208   :  { %v3254_v55 = vcombine.high %v3016_v58, %v3016_v58  ;;  %v3019_v19 = vadd.f32 %v11914_v22, %v11820_v12  ;;  %20664 = vst [vmem:[#allocation66_spill] sm:$0xff] %v16470_v5  ;;  %20665 = vst [vmem:[#allocation67_spill] sm:$0xff] %v16476_v46  ;;  %v11821_v12 = vpop.f32.mrb[132].mxu0  ;;  %v11915_v22 = vpop.f32.mrb[132].mxu1 }
 0x209   :  { %v11822_v16 = vpop.f32.mrb[133].mxu0  ;;  %v11916_v1 = vpop.f32.mrb[133].mxu1 }
 0x20a   :  { %v3261_v44 = vrot.slane %v3254_v55, %v14719_v25  ;;  %v3263_v48 = vcombine.high %v3019_v19, %v3019_v19  ;;  %v3270_v58 = vrot.slane %v3019_v19, %v14719_v25  ;;  %v11918_v59 = vpop.f32.mrb[134].mxu1  ;;  %v11823_v57 = vadd.f32 %v11822_v16, %v11821_v12  ;;  %v20670_v19 = vld [vmem:[#allocation56_spill] sm:$0xff]  ;;  %v20678_v16 = vld [vmem:[#allocation22_spill] sm:$0xff] }
 0x20b   :  { %v11919_v55 = vpop.f32.mrb[135].mxu1 }
 0x20c   :  { %v3262_v24 = vcombine.high %v3261_v44, %v3261_v44  ;;  %v3277_v0 = vrot.slane %v3263_v48, %v14719_v25  ;;  %v3278_v23 = vcombine.high %v3270_v58, %v3270_v58  ;;  %v11920_v37 = vadd.f32 %v11919_v55, %v11918_v59 }
 0x20d   :  { %4894 = vmatmul.mubr.bf16.gmra.mrb[236].mxu0 %v16458_v53  ;;  %5027 = vmatmul.mubr.bf16.gmra.mrb[236].mxu1 %v16464_v14  ;;  %v11824_v53 = vpop.f32.mrb[134].mxu0 }
 0x20e   :  { %4901 = vmatprep.mubr.bf16.mxu0 %v16470_v5  ;;  %5034 = vmatprep.mubr.bf16.mxu1 %v16476_v46  ;;  %v20666_v5 = vld [vmem:[#allocation55_spill] sm:$0xff]  ;;  %v11917_v46 = vadd.f32 %v11916_v1, %v11915_v22  ;;  %v11825_v26 = vpop.f32.mrb[135].mxu0  ;;  %v16486_v20 = vadd.f32 %v3262_v24, %v20668_v28  ;;  %v16489_v32 = vadd.f32 %v3278_v23, %v20670_v19  ;;  %v16503_v28 = vld [vmem:[%s20246_s0 + $0x108] ss:$16 sps:$4 sm:$0xff]  }
 0x20f   :  { %v16483_v14 = vadd.f32 %v3270_v58, %v20666_v5  ;;  %v16492_v44 = vadd.f32 %v3277_v0, %v20672_v8  ;;  %v11826_v48 = vadd.f32 %v11825_v26, %v11824_v53  ;;  %v16497_v5 = vld [vmem:[%s20246_s0 + $0x100] ss:$16 sps:$4 sm:$0xff]   ;;  %20675 = vst [vmem:[#allocation69_spill] sm:$0xff] %v16503_v28  ;;  %v16509_v8 = vld [vmem:[%s20246_s0 + $0x124] ss:$16 sps:$4 sm:$0xff]   ;;  %v11921_v58 = vpop.f32.mrb[136].mxu1 }
 0x210   :  { %20669 = vst [vmem:[#allocation54_spill] sm:$0xff] %v16486_v20  ;;  %20671 = vst [vmem:[#allocation56_spill] sm:$0xff] %v16489_v32  ;;  %v3024_v31 = vadd.f32 %v11917_v46, %v11823_v57  ;;  %v16515_v26 = vld [vmem:[%s20246_s0 + $0x12c] ss:$16 sps:$4 sm:$0xff]   ;;  %v11827_v46 = vpop.f32.mrb[136].mxu0  ;;  %v11922_v23 = vpop.f32.mrb[137].mxu1 }
 0x211   :  { %20667 = vst [vmem:[#allocation55_spill] sm:$0xff] %v16483_v14  ;;  %20673 = vst [vmem:[#allocation57_spill] sm:$0xff] %v16492_v44  ;;  %v3027_v59 = vadd.f32 %v11920_v37, %v11826_v48  ;;  %v11828_v0 = vpop.f32.mrb[137].mxu0  ;;  %v11923_v44 = vadd.f32 %v11922_v23, %v11921_v58  ;;  %v11924_v14 = vpop.f32.mrb[138].mxu1  ;;  %v20681_v48 = vld [vmem:[#allocation58_spill] sm:$0xff] }
 0x212   :  { %20674 = vst [vmem:[#allocation68_spill] sm:$0xff] %v16497_v5  ;;  %20676 = vst [vmem:[#allocation70_spill] sm:$0xff] %v16509_v8  ;;  %v3279_v57 = vcombine.high %v3024_v31, %v3024_v31  ;;  %v3286_v53 = vrot.slane %v3024_v31, %v14719_v25  ;;  %v11829_v19 = vadd.f32 %v11828_v0, %v11827_v46  ;;  %v11830_v32 = vpop.f32.mrb[138].mxu0  ;;  %v20680_v31 = vld [vmem:[#allocation24_spill] sm:$0xff] }
 0x213   :  { %20677 = vst [vmem:[#allocation71_spill] sm:$0xff] %v16515_v26  ;;  %v3296_v24 = vcombine.high %v3027_v59, %v3027_v59  ;;  %v3303_v55 = vrot.slane %v3027_v59, %v14719_v25  ;;  %v20682_v46 = vld [vmem:[#allocation60_spill] sm:$0xff] }
 0x214   :  { %v3293_v12 = vrot.slane %v3279_v57, %v14719_v25  ;;  %v3294_v22 = vcombine.high %v3286_v53, %v3286_v53  ;;  %v16521_v1 = vadd.f32 %v3286_v53, %v20678_v16  ;;  %v11831_v53 = vpop.f32.mrb[139].mxu0  ;;  %v11925_v16 = vpop.f32.mrb[139].mxu1 }
 0x215   :  { %4902 = vmatmul.mubr.bf16.gmra.mrb[240].mxu0 %v16497_v5  ;;  %5035 = vmatmul.mubr.bf16.gmra.mrb[240].mxu1 %v16503_v28  ;;  %v3310_v57 = vrot.slane %v3296_v24, %v14719_v25  ;;  %v11832_v28 = vadd.f32 %v11831_v53, %v11830_v32  ;;  %v11926_v5 = vadd.f32 %v11925_v16, %v11924_v14  ;;  %v20685_v14 = vld [vmem:[#allocation59_spill] sm:$0xff] }
 0x216   :  { %4909 = vmatprep.mubr.bf16.mxu0 %v16509_v8  ;;  %5042 = vmatprep.mubr.bf16.mxu1 %v16515_v26  ;;  %20679 = vst [vmem:[#allocation22_spill] sm:$0xff] %v16521_v1  ;;  %v3295_v20 = vcombine.high %v3293_v12, %v3293_v12  ;;  %v16525_v37 = vadd.f32 %v3294_v22, %v20680_v31  ;;  %v16537_v22 = vld [vmem:[%s20246_s0 + $0x120] ss:$16 sps:$4 sm:$0xff]   ;;  %v11833_v31 = vpop.f32.mrb[140].mxu0 }
 0x217   :  { %v16528_v26 = vadd.f32 %v3293_v12, %v20681_v48  ;;  %v3311_v1 = vcombine.high %v3303_v55, %v3303_v55  ;;  %v3032_v8 = vadd.f32 %v11923_v44, %v11829_v19  ;;  %v3312_v59 = vcombine.high %v3310_v57, %v3310_v57  ;;  %v16543_v12 = vld [vmem:[%s20246_s0 + $0x128] ss:$16 sps:$4 sm:$0xff]   ;;  %v16556_v55 = vld [vmem:[%s20246_s0 + $0x144] ss:$16 sps:$4 sm:$0xff]   ;;  %v16562_v19 = vld [vmem:[%s20246_s0 + $0x14c] ss:$16 sps:$4 sm:$0xff]  }
 0x218   :  { %v16532_v58 = vadd.f32 %v3310_v57, %v20682_v46  ;;  %v16547_v32 = vadd.f32 %v3295_v20, %v16192_v30  ;;  %v3035_v23 = vadd.f32 %v11926_v5, %v11832_v28  ;;  %20687 = vst [vmem:[#allocation59_spill] sm:$0xff] %v16556_v55  ;;  %20688 = vst [vmem:[#allocation72_spill] sm:$0xff] %v16562_v19  ;;  %v20690_v5 = vld [vmem:[#allocation25_spill] sm:$0xff]  ;;  %v11927_v48 = vpop.f32.mrb[140].mxu1  ;;  %v11834_v57 = vpop.f32.mrb[141].mxu0 }
 0x219   :  { %v16550_v44 = vadd.f32 %v3311_v1, %v20685_v14  ;;  %v3313_v24 = vcombine.high %v3032_v8, %v3032_v8  ;;  %v3320_v0 = vrot.slane %v3032_v8, %v14719_v25  ;;  %v16566_v30 = vadd.f32 %v3312_v59, %v16210_v54  ;;  %v11928_v53 = vpop.f32.mrb[141].mxu1  ;;  %v20692_v46 = vld [vmem:[#allocation61_spill] sm:$0xff]  ;;  %v11836_v59 = vpop.f32.mrb[142].mxu0 }
 0x21a   :  { %20683 = vst [vmem:[#allocation24_spill] sm:$0xff] %v16532_v58  ;;  %20684 = vst [vmem:[#allocation58_spill] sm:$0xff] %v16547_v32  ;;  %v3329_v8 = vcombine.high %v3035_v23, %v3035_v23  ;;  %v3336_v1 = vrot.slane %v3035_v23, %v14719_v25 }
 0x21b   :  { %20686 = vst [vmem:[#allocation60_spill] sm:$0xff] %v16550_v44  ;;  %20689 = vst [vmem:[#allocation73_spill] sm:$0xff] %v16566_v30  ;;  %v3327_v20 = vrot.slane %v3313_v24, %v14719_v25  ;;  %v16570_v28 = vadd.f32 %v3320_v0, %v20690_v5  ;;  %v11930_v30 = vpop.f32.mrb[142].mxu1  ;;  %v11835_v0 = vadd.f32 %v11834_v57, %v11833_v31  ;;  %v11837_v44 = vpop.f32.mrb[143].mxu0 }
 0x21c   :  { %v3343_v58 = vrot.slane %v3329_v8, %v14719_v25  ;;  %v3344_v54 = vcombine.high %v3336_v1, %v3336_v1  ;;  %v16578_v24 = vadd.f32 %v3336_v1, %v15853_v49  ;;  %v11929_v5 = vadd.f32 %v11928_v53, %v11927_v48  ;;  %v11931_v23 = vpop.f32.mrb[143].mxu1  ;;  %v16586_v8 = vld [vmem:[%s20246_s0 + $0x140] ss:$16 sps:$4 sm:$0xff]   ;;  %v16592_v49 = vld [vmem:[%s20246_s0 + $0x148] ss:$16 sps:$4 sm:$0xff]  }
 0x21d   :  { %4910 = vmatmul.mubr.bf16.gmra.mrb[244].mxu0 %v16537_v22  ;;  %5043 = vmatmul.mubr.bf16.gmra.mrb[244].mxu1 %v16543_v12  ;;  %20691 = vst [vmem:[#allocation25_spill] sm:$0xff] %v16570_v28  ;;  %v3328_v16 = vcombine.high %v3327_v20, %v3327_v20  ;;  %v16574_v14 = vadd.f32 %v3327_v20, %v20692_v46  ;;  %v16610_v1 = vld [vmem:[%s20246_s0 + $0x16c] ss:$16 sps:$4 sm:$0xff]  }
 0x21e   :  { %4917 = vmatprep.mubr.bf16.mxu0 %v16556_v55  ;;  %5050 = vmatprep.mubr.bf16.mxu1 %v16562_v19  ;;  %v3345_v28 = vcombine.high %v3343_v58, %v3343_v58  ;;  %v16581_v32 = vadd.f32 %v3344_v54, %v15860_v18  ;;  %v11838_v19 = vadd.f32 %v11837_v44, %v11836_v59 }
 0x21f   :  { %v11932_v55 = vadd.f32 %v11931_v23, %v11930_v30  ;;  %v3040_v20 = vadd.f32 %v11929_v5, %v11835_v0  ;;  %v16596_v18 = vadd.f32 %v3328_v16, %v16263_v47  ;;  %v16604_v30 = vld [vmem:[%s20246_s0 + $0x164] ss:$16 sps:$4 sm:$0xff]  }
 0x220   :  { %20693 = vst [vmem:[#allocation61_spill] sm:$0xff] %v16581_v32  ;;  %v16599_v58 = vadd.f32 %v3345_v28, %v15863_v61  ;;  %v11933_v28 = vpop.f32.mrb[144].mxu1 }
 0x221   :  { %v3043_v44 = vadd.f32 %v11932_v55, %v11838_v19  ;;  %v3346_v47 = vcombine.high %v3040_v20, %v3040_v20  ;;  %v3353_v31 = vrot.slane %v3040_v20, %v14719_v25  ;;  %v11839_v19 = vpop.f32.mrb[144].mxu0  ;;  %v11934_v46 = vpop.f32.mrb[145].mxu1 }
 0x222   :  { %20694 = vst [vmem:[#allocation74_spill] sm:$0xff] %v16599_v58  ;;  %v11840_v16 = vpop.f32.mrb[145].mxu0  ;;  %v11936_v20 = vpop.f32.mrb[146].mxu1  ;;  %v11935_v58 = vadd.f32 %v11934_v46, %v11933_v28 }
 0x223   :  { %v3362_v61 = vcombine.high %v3043_v44, %v3043_v44  ;;  %v3369_v55 = vrot.slane %v3043_v44, %v14719_v25  ;;  %v3360_v48 = vrot.slane %v3346_v47, %v14719_v25  ;;  %v3361_v57 = vcombine.high %v3353_v31, %v3353_v31  ;;  %v11842_v23 = vpop.f32.mrb[146].mxu0 }
 0x224   :  { %v16617_v53 = vadd.f32 %v3353_v31, %v15905_v15  ;;  %v11841_v5 = vadd.f32 %v11840_v16, %v11839_v19  ;;  %v11843_v15 = vpop.f32.mrb[147].mxu0  ;;  %v11937_v31 = vpop.f32.mrb[147].mxu1 }
 0x225   :  { %4918 = vmatmul.mubr.bf16.gmra.mrb[248].mxu0 %v16586_v8  ;;  %5051 = vmatmul.mubr.bf16.gmra.mrb[248].mxu1 %v16592_v49  ;;  %v3376_v54 = vrot.slane %v3362_v61, %v14719_v25  ;;  %v3377_v59 = vcombine.high %v3369_v55, %v3369_v55  ;;  %v16621_v0 = vadd.f32 %v3369_v55, %v15932_v17  ;;  %v11845_v16 = vpop.f32.mrb[148].mxu0  ;;  %v11939_v46 = vpop.f32.mrb[148].mxu1 }
 0x226   :  { %4925 = vmatprep.mubr.bf16.mxu0 %v16604_v30  ;;  %5058 = vmatprep.mubr.bf16.mxu1 %v16610_v1  ;;  %20695 = vst [vmem:[#allocation75_spill] sm:$0xff] %v16617_v53  ;;  %v16624_v44 = vadd.f32 %v3361_v57, %v15908_v50  ;;  %v16627_v47 = vadd.f32 %v3360_v48, %v15913_v29  ;;  %v16638_v50 = vld [vmem:[%s20246_s0 + $0x160] ss:$16 sps:$4 sm:$0xff]   ;;  %v16644_v29 = vld [vmem:[%s20246_s0 + $0x168] ss:$16 sps:$4 sm:$0xff]  }
 0x227   :  { %20696 = vst [vmem:[#allocation76_spill] sm:$0xff] %v16621_v0  ;;  %v3378_v53 = vcombine.high %v3376_v54, %v3376_v54  ;;  %v16630_v32 = vadd.f32 %v3377_v59, %v15953_v6  ;;  %v16633_v61 = vadd.f32 %v3376_v54, %v15958_v34  ;;  %v11844_v17 = vadd.f32 %v11843_v15, %v11842_v23  ;;  %v20699_v6 = vld [vmem:[#allocation5_spill] sm:$0xff]  ;;  %v20700_v34 = vld [vmem:[#allocation6_spill] sm:$0xff]  ;;  %v11940_v15 = vpop.f32.mrb[149].mxu1 }
 0x228   :  { %v3048_v55 = vadd.f32 %v11935_v58, %v11841_v5  ;;  %v11938_v19 = vadd.f32 %v11937_v31, %v11936_v20  ;;  %v11846_v20 = vpop.f32.mrb[149].mxu0  ;;  %v11942_v0 = vpop.f32.mrb[150].mxu1 }
 0x229   :  { %20697 = vst [vmem:[#allocation77_spill] sm:$0xff] %v16630_v32  ;;  %20698 = vst [vmem:[#allocation78_spill] sm:$0xff] %v16633_v61  ;;  %v16650_v58 = vadd.f32 %v3378_v53, %v16289_v9  ;;  %v11847_v31 = vadd.f32 %v11846_v20, %v11845_v16  ;;  %v11941_v61 = vadd.f32 %v11940_v15, %v11939_v46  ;;  %v11848_v32 = vpop.f32.mrb[150].mxu0  ;;  %v20705_v0 = vld [vmem:[#allocation8_spill] sm:$0xff] }
 0x22a   :  { %v3379_v28 = vcombine.high %v3048_v55, %v3048_v55  ;;  %v3386_v48 = vrot.slane %v3048_v55, %v14719_v25  ;;  %v3051_v57 = vadd.f32 %v11938_v19, %v11844_v17  ;;  %v20702_v55 = vld [vmem:[#allocation30_spill] sm:$0xff]  ;;  %v20704_v32 = vld [vmem:[#allocation7_spill] sm:$0xff] }
 0x22b   :  { %20701 = vst [vmem:[#allocation79_spill] sm:$0xff] %v16650_v58 }
 0x22c   :  { %v3393_v54 = vrot.slane %v3379_v28, %v14719_v25  ;;  %v3394_v59 = vcombine.high %v3386_v48, %v3386_v48  ;;  %v3396_v5 = vcombine.high %v3051_v57, %v3051_v57  ;;  %v3403_v23 = vrot.slane %v3051_v57, %v14719_v25  ;;  %v11849_v28 = vpop.f32.mrb[151].mxu0  ;;  %v11943_v48 = vpop.f32.mrb[151].mxu1 }
 0x22d   :  { %4926 = vmatmul.mubr.bf16.gmra.mrb[252].mxu0 %v16638_v50  ;;  %5059 = vmatmul.mubr.bf16.gmra.mrb[252].mxu1 %v16644_v29  ;;  %v3056_v57 = vadd.f32 %v11941_v61, %v11847_v31  ;;  %v20708_v28 = vld [vmem:[#allocation27_spill] sm:$0xff]  ;;  %v20709_v48 = vld [vmem:[#allocation18_spill] sm:$0xff] }
 0x22e   :  { %4933 = vmatprep.mubr.bf16.mxu0 %v20699_v6  ;;  %5066 = vmatprep.mubr.bf16.mxu1 %v20700_v34  ;;  %v3395_v9 = vcombine.high %v3393_v54, %v3393_v54  ;;  %v16656_v53 = vadd.f32 %v3394_v59, %v15972_v56  ;;  %v16659_v17 = vadd.f32 %v3393_v54, %v20702_v55  ;;  %v16677_v54 = vld [vmem:[%s20246_s0 + $0x4] ss:$16 sps:$4 sm:$0xff]   ;;  %v11851_v59 = vpop.f32.mrb[152].mxu0 }
 0x22f   :  { %v3410_v19 = vrot.slane %v3396_v5, %v14719_v25  ;;  %v16663_v58 = vadd.f32 %v3403_v23, %v15991_v62  ;;  %v3418_v46 = vrot.slane %v3056_v57, %v14719_v25  ;;  %v16683_v62 = vld [vmem:[%s20246_s0 + $0xc] ss:$16 sps:$4 sm:$0xff]   ;;  %v11945_v5 = vpop.f32.mrb[152].mxu1  ;;  %v11852_v23 = vpop.f32.mrb[153].mxu0  ;;  %v13353_v55 = vld [vmem:[%s20247_s1 + $0x600] sm:$0xff]  }
 0x230   :  { %v16671_v56 = vadd.f32 %v3395_v9, %v16296_v51  ;;  %v11946_v20 = vpop.f32.mrb[153].mxu1  ;;  %v11854_v31 = vpop.f32.mrb[154].mxu0  ;;  %v13357_v57 = vld [vmem:[%s20247_s1 + $0x608] sm:$0xff]   ;;  %v20711_v59 = vld [vmem:[#allocation29_spill] sm:$0xff]  ;;  %v13359_v5 = vld [vmem:[%s20247_s1 + $0x650] sm:$0xff]  }
 0x231   :  { %v3411_v34 = vcombine.high %v3410_v19, %v3410_v19  ;;  %v16666_v16 = vadd.f32 %v3410_v19, %v16003_v33  ;;  %v3419_v51 = vcombine.high %v3418_v46, %v3418_v46  ;;  %v16690_v61 = vadd.f32 %v3418_v46, %v16020_v45  ;;  %v11948_v9 = vpop.f32.mrb[154].mxu1  ;;  %v13355_v19 = vld [vmem:[%s20247_s1 + $0x648] sm:$0xff]   ;;  %v13360_v23 = vld [vmem:[%s20247_s1 + $0x6d0] sm:$0xff]  }
 0x232   :  { %v11949_v45 = vpop.f32.mrb[155].mxu1  ;;  %v13358_v46 = vld [vmem:[%s20247_s1 + $0x688] sm:$0xff]  }
 0x233   :  { %20703 = vst [vmem:[#allocation30_spill] sm:$0xff] %v16666_v16  ;;  %v16687_v33 = vadd.f32 %v3411_v34, %v16359_v2  ;;  %v16693_v15 = vadd.f32 %v3419_v51, %v16032_v13  ;;  %v13354_v2 = vld [vmem:[%s20247_s1 + $0x680] sm:$0xff]   ;;  %v11855_v34 = vpop.f32.mrb[155].mxu0  ;;  %v13356_v13 = vld [vmem:[%s20247_s1 + $0x6c8] sm:$0xff]   ;;  %v20710_v51 = vld [vmem:[#allocation28_spill] sm:$0xff]  ;;  %v12061_v31 = vpop.f32.mrb[156].mxu1 }
 0x234   :  { %v11967_v20 = vpop.f32.mrb[156].mxu0  ;;  %v20715_v31 = vld [vmem:[#allocation19_spill] sm:$0xff] }
 0x235   :  { %4934 = vmatmul.mubr.bf16.gmra.mrb[0].mxu0 %v20704_v32  ;;  %5067 = vmatmul.mubr.bf16.gmra.mrb[0].mxu1 %v20705_v0  ;;  %20706 = vst [vmem:[#allocation80_spill] sm:$0xff] %v16687_v33  ;;  %20707 = vst [vmem:[#allocation81_spill] sm:$0xff] %v16693_v15  ;;  %v11968_v9 = vpop.f32.mrb[157].mxu0  ;;  %v20714_v20 = vld [vmem:[#allocation34_spill] sm:$0xff] }
 0x236   :  { %6075 = vmatprep.mubr.bf16.mxu0 %v16677_v54  ;;  %6207 = vmatprep.mubr.bf16.mxu1 %v16683_v62  ;;  %v13365_v9 = vld [vmem:[%s20247_s1 + $0x618] sm:$0xff]  }
 0x23d   :  { %6076 = vmatmul.mubr.bf16.vlgmr.msra.gmra.mrb[4].mxu0 %v20708_v28  ;;  %6208 = vmatmul.mubr.bf16.vlgmr.msra.gmra.mrb[4].mxu1 %v20709_v48  ;;  %v13361_v48 = vld [vmem:[%s20247_s1 + $0x610] sm:$0xff]  }
 0x23e   :  { %12516 = vmatpush3.bf16.msra.mxu0 %v13353_v55  ;;  %12610 = vmatpush3.bf16.msra.mxu1 %v13354_v2  ;;  %v12062_v55 = vpop.f32.mrb[157].mxu1  ;;  %v11970_v2 = vpop.f32.mrb[158].mxu0 }
 0x23f   :  { %6082 = vmatprep.mubr.bf16.mxu0 %v20710_v51  ;;  %6214 = vmatprep.mubr.bf16.mxu1 %v20711_v59  ;;  %v12064_v34 = vpop.f32.mrb[158].mxu1  ;;  %v11971_v45 = vpop.f32.mrb[159].mxu0  ;;  %v13362_v51 = vld [vmem:[%s20247_s1 + $0x690] sm:$0xff]   ;;  %v13363_v59 = vld [vmem:[%s20247_s1 + $0x658] sm:$0xff]  }
 0x240   :  { %12517 = vmatprep.subr.bf16.mxu0 %v13355_v19  ;;  %12611 = vmatprep.subr.bf16.mxu1 %v13356_v13  ;;  %v12065_v28 = vpop.f32.mrb[159].mxu1  ;;  %v11972_v19 = vadd.f32 %v11971_v45, %v11970_v2  ;;  %v13366_v55 = vld [vmem:[%s20247_s1 + $0x698] sm:$0xff]   ;;  %v11973_v45 = vpop.f32.mrb[160].mxu0 }
 0x241   :  { %v12066_v13 = vadd.f32 %v12065_v28, %v12064_v34  ;;  %v12067_v28 = vpop.f32.mrb[160].mxu1 }
 0x242   :  { %12518 = vmatpush3.bf16.msra.mxu0 %v13357_v57  ;;  %12612 = vmatpush3.bf16.msra.mxu1 %v13358_v46  ;;  %v13364_v57 = vld [vmem:[%s20247_s1 + $0x6d8] sm:$0xff]   ;;  %v20712_v46 = vld [vmem:[#allocation31_spill] sm:$0xff] }
 0x243   :  { %12519 = vmatprep.subr.bf16.mxu0 %v13359_v5  ;;  %12613 = vmatprep.subr.bf16.mxu1 %v13360_v23  ;;  %v20713_v5 = vld [vmem:[#allocation35_spill] sm:$0xff]  ;;  %v3974_v23 = vadd.f32 %v12066_v13, %v11972_v19  ;;  %v12068_v19 = vpop.f32.mrb[161].mxu1 }
 0x244   :  { %v12070_v33 = vpop.f32.mrb[162].mxu1 }
 0x245   :  { %6083 = vmatmul.mubr.bf16.gmra.mrb[8].mxu0 %v20712_v46  ;;  %6215 = vmatmul.mubr.bf16.gmra.mrb[8].mxu1 %v20713_v5  ;;  %v4090_v2 = vcombine.high %v3974_v23, %v3974_v23  ;;  %v4097_v34 = vrot.slane %v3974_v23, %v14719_v25  ;;  %v12071_v16 = vpop.f32.mrb[163].mxu1 }
 0x246   :  { %6090 = vmatprep.mubr.bf16.mxu0 %v20714_v20  ;;  %6222 = vmatprep.mubr.bf16.mxu1 %v20715_v31  ;;  %v12069_v20 = vadd.f32 %v12068_v19, %v12067_v28  ;;  %v20718_v19 = vld [vmem:[#allocation36_spill] sm:$0xff] }
 0x247   :  { %12520 = vmatpush3.bf16.msra.mxu0 %v13361_v48  ;;  %12614 = vmatpush3.bf16.msra.mxu1 %v13362_v51  ;;  %v13367_v48 = vld [vmem:[%s20247_s1 + $0x660] sm:$0xff]   ;;  %v11974_v51 = vpop.f32.mrb[161].mxu0  ;;  %v4104_v13 = vrot.slane %v4090_v2, %v14719_v25  ;;  %v4105_v46 = vcombine.high %v4097_v34, %v4097_v34 }
 0x248   :  { %12521 = vmatprep.subr.bf16.mxu0 %v13363_v59  ;;  %12615 = vmatprep.subr.bf16.mxu1 %v13364_v57  ;;  %v11975_v5 = vadd.f32 %v11974_v51, %v11973_v45  ;;  %v11976_v31 = vpop.f32.mrb[162].mxu0  ;;  %v13368_v59 = vld [vmem:[%s20247_s1 + $0x6e0] sm:$0xff]   ;;  %v12072_v51 = vadd.f32 %v12071_v16, %v12070_v33  ;;  %v20721_v16 = vld [vmem:[#allocation38_spill] sm:$0xff] }
 0x249   :  { %v11977_v15 = vpop.f32.mrb[163].mxu0  ;;  %v13369_v57 = vld [vmem:[%s20247_s1 + $0x620] sm:$0xff]   ;;  %v4106_v23 = vcombine.high %v4104_v13, %v4104_v13  ;;  %v16757_v2 = vadd.f32 %v4105_v46, %v16111_v10  ;;  %v16760_v34 = vadd.f32 %v4104_v13, %v16114_v38  ;;  %v13372_v10 = vld [vmem:[%s20247_s1 + $0x6e8] sm:$0xff]  }
 0x24a   :  { %v3979_v45 = vadd.f32 %v12069_v20, %v11975_v5  ;;  %v11978_v28 = vadd.f32 %v11977_v15, %v11976_v31  ;;  %v20719_v13 = vld [vmem:[#allocation21_spill] sm:$0xff]  ;;  %v11979_v5 = vpop.f32.mrb[164].mxu0  ;;  %v12073_v20 = vpop.f32.mrb[164].mxu1  ;;  %v13375_v31 = vld [vmem:[%s20247_s1 + $0x670] sm:$0xff]  }
 0x24b   :  { %12522 = vmatpush3.bf16.msra.mxu0 %v13365_v9  ;;  %12616 = vmatpush3.bf16.msra.mxu1 %v13366_v55  ;;  %20716 = vst [vmem:[#allocation27_spill] sm:$0xff] %v16757_v2  ;;  %20717 = vst [vmem:[#allocation18_spill] sm:$0xff] %v16760_v34  ;;  %v13370_v9 = vld [vmem:[%s20247_s1 + $0x6a0] sm:$0xff]   ;;  %v13371_v55 = vld [vmem:[%s20247_s1 + $0x668] sm:$0xff]   ;;  %v16777_v46 = vadd.f32 %v4106_v23, %v20719_v13  ;;  %v11980_v23 = vpop.f32.mrb[165].mxu0 }
 0x24c   :  { %12523 = vmatprep.subr.bf16.mxu0 %v13367_v48  ;;  %v4107_v38 = vcombine.high %v3979_v45, %v3979_v45  ;;  %v4114_v48 = vrot.slane %v3979_v45, %v14719_v25  ;;  %v3982_v15 = vadd.f32 %v12072_v51, %v11978_v28  ;;  %12617 = vmatprep.subr.bf16.mxu1 %v13368_v59  ;;  %v12074_v45 = vpop.f32.mrb[165].mxu1  ;;  %v20723_v51 = vld [vmem:[#allocation20_spill] sm:$0xff] }
 0x24d   :  { %6091 = vmatmul.mubr.bf16.gmra.mrb[12].mxu0 %v16144_v4  ;;  %6223 = vmatmul.mubr.bf16.gmra.mrb[12].mxu1 %v16150_v40  ;;  %20720 = vst [vmem:[#allocation28_spill] sm:$0xff] %v16777_v46  ;;  %v13373_v4 = vld [vmem:[%s20247_s1 + $0x628] sm:$0xff]   ;;  %v20724_v46 = vld [vmem:[#allocation39_spill] sm:$0xff] }
 0x24e   :  { %6098 = vmatprep.mubr.bf16.mxu0 %v16168_v7  ;;  %6230 = vmatprep.mubr.bf16.mxu1 %v20718_v19  ;;  %v4121_v40 = vrot.slane %v4107_v38, %v14719_v25  ;;  %v16784_v33 = vadd.f32 %v4114_v48, %v20721_v16  ;;  %v13374_v7 = vld [vmem:[%s20247_s1 + $0x6a8] sm:$0xff]   ;;  %v4123_v59 = vcombine.high %v3982_v15, %v3982_v15  ;;  %v11982_v48 = vpop.f32.mrb[166].mxu0  ;;  %v12076_v19 = vpop.f32.mrb[166].mxu1 }
 0x24f   :  { %12524 = vmatpush3.bf16.msra.mxu0 %v13369_v57  ;;  %12618 = vmatpush3.bf16.msra.mxu1 %v13370_v9  ;;  %v4130_v57 = vrot.slane %v3982_v15, %v14719_v25  ;;  %v11981_v9 = vadd.f32 %v11980_v23, %v11979_v5  ;;  %v11983_v34 = vpop.f32.mrb[167].mxu0  ;;  %v12077_v2 = vpop.f32.mrb[167].mxu1  ;;  %v13377_v15 = vld [vmem:[%s20247_s1 + $0x630] sm:$0xff]  }
 0x250   :  { %20722 = vst [vmem:[#allocation29_spill] sm:$0xff] %v16784_v33  ;;  %12525 = vmatprep.subr.bf16.mxu0 %v13371_v55  ;;  %12619 = vmatprep.subr.bf16.mxu1 %v13372_v10  ;;  %v4122_v28 = vcombine.high %v4121_v40, %v4121_v40  ;;  %v16794_v38 = vadd.f32 %v4121_v40, %v20723_v51  ;;  %v13376_v10 = vld [vmem:[%s20247_s1 + $0x6f0] sm:$0xff]   ;;  %v20726_v51 = vld [vmem:[#allocation40_spill] sm:$0xff] }
 0x251   :  { %v12075_v55 = vadd.f32 %v12074_v45, %v12073_v20  ;;  %v4137_v13 = vrot.slane %v4123_v59, %v14719_v25  ;;  %v4138_v16 = vcombine.high %v4130_v57, %v4130_v57  ;;  %v16798_v33 = vadd.f32 %v4130_v57, %v20724_v46  ;;  %v13378_v46 = vld [vmem:[%s20247_s1 + $0x6b0] sm:$0xff]   ;;  %v13379_v57 = vld [vmem:[%s20247_s1 + $0x678] sm:$0xff]  }
 0x252   :  { %v11984_v5 = vadd.f32 %v11983_v34, %v11982_v48  ;;  %v12078_v20 = vadd.f32 %v12077_v2, %v12076_v19  ;;  %v13380_v2 = vld [vmem:[%s20247_s1 + $0x6f8] sm:$0xff]   ;;  %v20725_v34 = vld [vmem:[#allocation37_spill] sm:$0xff]  ;;  %v11985_v48 = vpop.f32.mrb[168].mxu0 }
 0x253   :  { %12526 = vmatpush3.bf16.msra.mxu0 %v13373_v4  ;;  %v3987_v40 = vadd.f32 %v12075_v55, %v11981_v9  ;;  %12620 = vmatpush3.bf16.msra.mxu1 %v13374_v7  ;;  %v4139_v59 = vcombine.high %v4137_v13, %v4137_v13  ;;  %v16810_v4 = vadd.f32 %v4138_v16, %v16217_v43  ;;  %v11986_v13 = vpop.f32.mrb[169].mxu0 }
 0x254   :  { %12527 = vmatprep.subr.bf16.mxu0 %v13375_v31  ;;  %v16821_v7 = vadd.f32 %v4122_v28, %v20725_v34  ;;  %v3990_v43 = vadd.f32 %v12078_v20, %v11984_v5  ;;  %12621 = vmatprep.subr.bf16.mxu1 %v13376_v10  ;;  %v11987_v20 = vadd.f32 %v11986_v13, %v11985_v48  ;;  %v20730_v13 = vld [vmem:[#allocation10_spill] sm:$0xff] }
 0x255   :  { %6099 = vmatmul.mubr.bf16.gmra.mrb[16].mxu0 %v16247_v21  ;;  %6231 = vmatmul.mubr.bf16.gmra.mrb[16].mxu1 %v16253_v52  ;;  %v4140_v31 = vcombine.high %v3987_v40, %v3987_v40  ;;  %v4147_v23 = vrot.slane %v3987_v40, %v14719_v25  ;;  %v13381_v21 = vld [vmem:[%s20247_s1 + $0x638] sm:$0xff]   ;;  %v16830_v52 = vadd.f32 %v4139_v59, %v16242_v42  ;;  %v20727_v42 = vld [vmem:[#allocation23_spill] sm:$0xff] }
 0x256   :  { %6106 = vmatprep.mubr.bf16.mxu0 %v16268_v35  ;;  %6238 = vmatprep.mubr.bf16.mxu1 %v16274_v63  ;;  %v4156_v55 = vcombine.high %v3990_v43, %v3990_v43  ;;  %v12079_v35 = vpop.f32.mrb[168].mxu1  ;;  %v13382_v63 = vld [vmem:[%s20247_s1 + $0x6b8] sm:$0xff]   ;;  %v4163_v19 = vrot.slane %v3990_v43, %v14719_v25 }
 0x257   :  { %12528 = vmatpush3.bf16.msra.mxu0 %v13377_v15  ;;  %v4154_v45 = vrot.slane %v4140_v31, %v14719_v25  ;;  %v4155_v28 = vcombine.high %v4147_v23, %v4147_v23  ;;  %v16834_v9 = vadd.f32 %v4147_v23, %v20726_v51  ;;  %12622 = vmatpush3.bf16.msra.mxu1 %v13378_v46  ;;  %v12080_v16 = vpop.f32.mrb[169].mxu1  ;;  %v20728_v15 = vld [vmem:[#allocation26_spill] sm:$0xff]  ;;  %v11988_v46 = vpop.f32.mrb[170].mxu0 }
 0x258   :  { %12529 = vmatprep.subr.bf16.mxu0 %v13379_v57  ;;  %12623 = vmatprep.subr.bf16.mxu1 %v13380_v2  ;;  %v4170_v5 = vrot.slane %v4156_v55, %v14719_v25  ;;  %v12082_v59 = vpop.f32.mrb[170].mxu1  ;;  %v4171_v34 = vcombine.high %v4163_v19, %v4163_v19  ;;  %v16848_v31 = vadd.f32 %v4163_v19, %v16300_v36  ;;  %v11989_v43 = vpop.f32.mrb[171].mxu0  ;;  %v13383_v57 = vld [vmem:[%s20247_s1 + $0x740] sm:$0xff]  }
 0x259   :  { %v16841_v10 = vadd.f32 %v4155_v28, %v20727_v42  ;;  %v16844_v40 = vadd.f32 %v4154_v45, %v20728_v15  ;;  %v12081_v23 = vadd.f32 %v12080_v16, %v12079_v35  ;;  %v12083_v51 = vpop.f32.mrb[171].mxu1  ;;  %v13384_v2 = vld [vmem:[%s20247_s1 + $0x7c0] sm:$0xff]   ;;  %v11990_v55 = vadd.f32 %v11989_v43, %v11988_v46  ;;  %v11991_v15 = vpop.f32.mrb[172].mxu0 }
 0x25a   :  { %v4172_v45 = vcombine.high %v4170_v5, %v4170_v5  ;;  %v16857_v28 = vadd.f32 %v4170_v5, %v16307_v3  ;;  %v12084_v48 = vadd.f32 %v12083_v51, %v12082_v59  ;;  %v16860_v36 = vadd.f32 %v4171_v34, %v16304_v41  ;;  %v20729_v19 = vld [vmem:[#allocation13_spill] sm:$0xff]  ;;  %v20731_v59 = vld [vmem:[#allocation11_spill] sm:$0xff] }
 0x25b   :  { %12530 = vmatpush3.bf16.msra.mxu0 %v13381_v21  ;;  %12624 = vmatpush3.bf16.msra.mxu1 %v13382_v63  ;;  %v3995_v35 = vadd.f32 %v12081_v23, %v11987_v20  ;;  %v11992_v20 = vpop.f32.mrb[173].mxu0 }
 0x25c   :  { %v3998_v21 = vadd.f32 %v12084_v48, %v11990_v55  ;;  %v16867_v16 = vadd.f32 %v4172_v45, %v20730_v13  ;;  %12703 = vmatprep.subr.bf16.mxu0 %v13383_v57  ;;  %12797 = vmatprep.subr.bf16.mxu1 %v13384_v2  ;;  %v11993_v23 = vadd.f32 %v11992_v20, %v11991_v15  ;;  %v11994_v51 = vpop.f32.mrb[174].mxu0  ;;  %v20733_v45 = vld [vmem:[#allocation9_spill] sm:$0xff]  ;;  %v20734_v48 = vld [vmem:[#allocation12_spill] sm:$0xff]  ;;  %v20739_v20 = vld [vmem:[#allocation14_spill] sm:$0xff] }
 0x25d   :  { %6107 = vmatmul.mubr.bf16.gmra.mrb[20].mxu0 %v16330_v27  ;;  %6239 = vmatmul.mubr.bf16.gmra.mrb[20].mxu1 %v16336_v11  ;;  %v4173_v3 = vcombine.high %v3995_v35, %v3995_v35  ;;  %v4180_v42 = vrot.slane %v3995_v35, %v14719_v25  ;;  %v12085_v27 = vpop.f32.mrb[172].mxu1  ;;  %v20737_v15 = vld [vmem:[#allocation17_spill] sm:$0xff] }
 0x25e   :  { %6114 = vmatprep.mubr.bf16.mxu0 %v16346_v60  ;;  %6246 = vmatprep.mubr.bf16.mxu1 %v20729_v19  ;;  %v4190_v41 = vcombine.high %v3998_v21, %v3998_v21  ;;  %v4197_v63 = vrot.slane %v3998_v21, %v14719_v25  ;;  %v12086_v60 = vpop.f32.mrb[173].mxu1  ;;  %v11995_v21 = vpop.f32.mrb[175].mxu0 }
 0x25f   :  { %v4187_v11 = vrot.slane %v4173_v3, %v14719_v25  ;;  %v4188_v5 = vcombine.high %v4180_v42, %v4180_v42  ;;  %v12087_v43 = vadd.f32 %v12086_v60, %v12085_v27  ;;  %v12088_v57 = vpop.f32.mrb[174].mxu1  ;;  %v20738_v27 = vld [vmem:[#allocation41_spill] sm:$0xff] }
 0x260   :  { %v4204_v46 = vrot.slane %v4190_v41, %v14719_v25  ;;  %v16874_v34 = vadd.f32 %v4197_v63, %v20731_v59  ;;  %v12089_v19 = vpop.f32.mrb[175].mxu1  ;;  %v11996_v41 = vadd.f32 %v11995_v21, %v11994_v51  ;;  %v20741_v59 = vld [vmem:[#allocation42_spill] sm:$0xff]  ;;  %v20745_v51 = vld [vmem:[#allocation32_spill] sm:$0xff]  ;;  %v11997_v21 = vpop.f32.mrb[176].mxu0 }
 0x261   :  { %v4189_v2 = vcombine.high %v4187_v11, %v4187_v11  ;;  %v16877_v55 = vadd.f32 %v4188_v5, %v20733_v45  ;;  %v16880_v35 = vadd.f32 %v4187_v11, %v20734_v48  ;;  %v4003_v42 = vadd.f32 %v12087_v43, %v11993_v23  ;;  %v20742_v45 = vld [vmem:[#allocation43_spill] sm:$0xff] }
 0x262   :  { %20732 = vst [vmem:[#allocation31_spill] sm:$0xff] %v16874_v34  ;;  %v4205_v13 = vcombine.high %v4204_v46, %v4204_v46  ;;  %v16883_v3 = vadd.f32 %v4204_v46, %v16367_v39  ;;  %v12090_v63 = vadd.f32 %v12089_v19, %v12088_v57  ;;  %v20743_v48 = vld [vmem:[#allocation15_spill] sm:$0xff] }
 0x263   :  { %20735 = vst [vmem:[#allocation35_spill] sm:$0xff] %v16880_v35  ;;  %v16888_v60 = vadd.f32 %v4189_v2, %v20739_v20  ;;  %v4206_v5 = vcombine.high %v4003_v42, %v4003_v42  ;;  %v4213_v11 = vrot.slane %v4003_v42, %v14719_v25  ;;  %v12091_v2 = vpop.f32.mrb[176].mxu1  ;;  %v11998_v42 = vpop.f32.mrb[177].mxu0 }
 0x264   :  { %20736 = vst [vmem:[#allocation34_spill] sm:$0xff] %v16883_v3  ;;  %v16894_v39 = vadd.f32 %v4205_v13, %v20743_v48  ;;  %v4006_v46 = vadd.f32 %v12090_v63, %v11996_v41  ;;  %v11999_v13 = vadd.f32 %v11998_v42, %v11997_v21  ;;  %v12000_v41 = vpop.f32.mrb[178].mxu0  ;;  %v20757_v42 = vld [vmem:[#allocation53_spill] sm:$0xff] }
 0x265   :  { %6115 = vmatmul.mubr.bf16.gmra.mrb[24].mxu0 %v20737_v15  ;;  %6247 = vmatmul.mubr.bf16.gmra.mrb[24].mxu1 %v20738_v27  ;;  %20740 = vst [vmem:[#allocation19_spill] sm:$0xff] %v16888_v60  ;;  %v4220_v23 = vrot.slane %v4206_v5, %v14719_v25  ;;  %v4221_v43 = vcombine.high %v4213_v11, %v4213_v11  ;;  %v12092_v27 = vpop.f32.mrb[177].mxu1 }
 0x266   :  { %6122 = vmatprep.mubr.bf16.mxu0 %v20741_v59  ;;  %6254 = vmatprep.mubr.bf16.mxu1 %v20742_v45  ;;  %20744 = vst [vmem:[#allocation36_spill] sm:$0xff] %v16894_v39  ;;  %v16898_v57 = vadd.f32 %v4213_v11, %v20745_v51  ;;  %v4223_v19 = vcombine.high %v4006_v46, %v4006_v46  ;;  %v20747_v59 = vld [vmem:[#allocation16_spill] sm:$0xff]  ;;  %v12094_v63 = vpop.f32.mrb[178].mxu1  ;;  %v20748_v11 = vld [vmem:[#allocation45_spill] sm:$0xff] }
 0x267   :  { %v4230_v15 = vrot.slane %v4006_v46, %v14719_v25  ;;  %v4222_v20 = vcombine.high %v4220_v23, %v4220_v23  ;;  %v16902_v45 = vadd.f32 %v4221_v43, %v20747_v59  ;;  %v12093_v48 = vadd.f32 %v12092_v27, %v12091_v2  ;;  %v12095_v3 = vpop.f32.mrb[179].mxu1  ;;  %v20750_v46 = vld [vmem:[#allocation44_spill] sm:$0xff]  ;;  %v20752_v23 = vld [vmem:[#allocation46_spill] sm:$0xff]  ;;  %v20754_v43 = vld [vmem:[#allocation47_spill] sm:$0xff] }
 0x268   :  { %20746 = vst [vmem:[#allocation21_spill] sm:$0xff] %v16898_v57  ;;  %v4237_v5 = vrot.slane %v4223_v19, %v14719_v25  ;;  %v12001_v57 = vpop.f32.mrb[179].mxu0  ;;  %v20756_v2 = vld [vmem:[#allocation51_spill] sm:$0xff]  ;;  %v20758_v27 = vld [vmem:[#allocation52_spill] sm:$0xff]  ;;  %v20759_v3 = vld [vmem:[#allocation62_spill] sm:$0xff] }
 0x269   :  { %v4238_v39 = vcombine.high %v4230_v15, %v4230_v15  ;;  %v16906_v51 = vadd.f32 %v4230_v15, %v20748_v11  ;;  %v4011_v34 = vadd.f32 %v12093_v48, %v11999_v13  ;;  %v16909_v60 = vadd.f32 %v4222_v20, %v20750_v46  ;;  %v20760_v59 = vld [vmem:[#allocation48_spill] sm:$0xff]  ;;  %v12003_v13 = vpop.f32.mrb[180].mxu0  ;;  %v12097_v48 = vpop.f32.mrb[180].mxu1  ;;  %v20762_v11 = vld [vmem:[#allocation50_spill] sm:$0xff] }
 0x26a   :  { %v16915_v21 = vadd.f32 %v4237_v5, %v20754_v43  ;;  %v12004_v41 = vpop.f32.mrb[181].mxu0  ;;  %v12098_v63 = vpop.f32.mrb[181].mxu1  ;;  %v20769_v13 = vld [vmem:[#allocation65_spill] sm:$0xff] }
 0x26b   :  { %20749 = vst [vmem:[#allocation38_spill] sm:$0xff] %v16906_v51  ;;  %20751 = vst [vmem:[#allocation20_spill] sm:$0xff] %v16909_v60  ;;  %v16912_v35 = vadd.f32 %v4238_v39, %v20752_v23  ;;  %v4239_v19 = vcombine.high %v4011_v34, %v4011_v34  ;;  %v4246_v15 = vrot.slane %v4011_v34, %v14719_v25  ;;  %v20764_v23 = vld [vmem:[#allocation49_spill] sm:$0xff]  ;;  %v12006_v43 = vpop.f32.mrb[182].mxu0  ;;  %v20770_v41 = vld [vmem:[#allocation66_spill] sm:$0xff] }
 0x26c   :  { %20755 = vst [vmem:[#allocation37_spill] sm:$0xff] %v16915_v21  ;;  %v20766_v21 = vld [vmem:[#allocation63_spill] sm:$0xff] }
 0x26d   :  { %20753 = vst [vmem:[#allocation39_spill] sm:$0xff] %v16912_v35  ;;  %6123 = vmatmul.mubr.bf16.gmra.mrb[28].mxu0 %v20756_v2  ;;  %6255 = vmatmul.mubr.bf16.gmra.mrb[28].mxu1 %v20757_v42  ;;  %v4253_v57 = vrot.slane %v4239_v19, %v14719_v25  ;;  %v4254_v20 = vcombine.high %v4246_v15, %v4246_v15  ;;  %v12100_v2 = vpop.f32.mrb[182].mxu1  ;;  %v12007_v42 = vpop.f32.mrb[183].mxu0  ;;  %v20774_v35 = vld [vmem:[#allocation70_spill] sm:$0xff] }
 0x26e   :  { %6128 = vmatprep.mubr.bf16.mxu0 %v20758_v27  ;;  %6260 = vmatprep.mubr.bf16.mxu1 %v20759_v3  ;;  %v16924_v39 = vadd.f32 %v4246_v15, %v20760_v59  ;;  %v12101_v27 = vpop.f32.mrb[183].mxu1  ;;  %v12008_v19 = vadd.f32 %v12007_v42, %v12006_v43  ;;  %v20768_v59 = vld [vmem:[#allocation64_spill] sm:$0xff]  ;;  %v12009_v63 = vpop.f32.mrb[184].mxu0 }
 0x26f   :  { %v4255_v5 = vcombine.high %v4253_v57, %v4253_v57  ;;  %v16927_v46 = vadd.f32 %v4254_v20, %v20762_v11  ;;  %v16930_v34 = vadd.f32 %v4253_v57, %v20764_v23  ;;  %v12102_v3 = vadd.f32 %v12101_v27, %v12100_v2  ;;  %v20771_v20 = vld [vmem:[#allocation67_spill] sm:$0xff]  ;;  %v12103_v11 = vpop.f32.mrb[184].mxu1  ;;  %v12010_v23 = vpop.f32.mrb[185].mxu0 }
 0x270   :  { %20761 = vst [vmem:[#allocation40_spill] sm:$0xff] %v16924_v39  ;;  %v12011_v2 = vadd.f32 %v12010_v23, %v12009_v63 }
 0x271   :  { %20763 = vst [vmem:[#allocation23_spill] sm:$0xff] %v16927_v46  ;;  %20765 = vst [vmem:[#allocation26_spill] sm:$0xff] %v16930_v34  ;;  %v16933_v15 = vadd.f32 %v4255_v5, %v20766_v21  ;;  %v4020_v48 = vadd.f32 %v12102_v3, %v12008_v19  ;;  %v12104_v34 = vpop.f32.mrb[185].mxu1  ;;  %v12012_v21 = vpop.f32.mrb[186].mxu0 }
 0x272   :  { %v12105_v42 = vadd.f32 %v12104_v34, %v12103_v11  ;;  %v12106_v5 = vpop.f32.mrb[186].mxu1  ;;  %v12013_v27 = vpop.f32.mrb[187].mxu0  ;;  %v20776_v34 = vld [vmem:[#allocation54_spill] sm:$0xff] }
 0x273   :  { %20767 = vst [vmem:[#allocation13_spill] sm:$0xff] %v16933_v15  ;;  %v4256_v57 = vcombine.high %v4020_v48, %v4020_v48  ;;  %v12014_v19 = vadd.f32 %v12013_v27, %v12012_v21  ;;  %v12015_v21 = vpop.f32.mrb[188].mxu0 }
 0x275   :  { %6129 = vmatmul.mubr.bf16.gmra.mrb[32].mxu0 %v20768_v59  ;;  %6261 = vmatmul.mubr.bf16.gmra.mrb[32].mxu1 %v20769_v13  ;;  %v4263_v43 = vrot.slane %v4256_v57, %v14719_v25  ;;  %v12107_v59 = vpop.f32.mrb[187].mxu1  ;;  %v4025_v13 = vadd.f32 %v12105_v42, %v12011_v2  ;;  %v20775_v57 = vld [vmem:[#allocation71_spill] sm:$0xff] }
 0x276   :  { %6136 = vmatprep.mubr.bf16.mxu0 %v20770_v41  ;;  %6268 = vmatprep.mubr.bf16.mxu1 %v20771_v20  ;;  %v12108_v3 = vadd.f32 %v12107_v59, %v12106_v5  ;;  %v20772_v41 = vld [vmem:[#allocation68_spill] sm:$0xff]  ;;  %v20773_v20 = vld [vmem:[#allocation69_spill] sm:$0xff]  ;;  %v12109_v5 = vpop.f32.mrb[188].mxu1  ;;  %v12016_v59 = vpop.f32.mrb[189].mxu0 }
 0x277   :  { %v4264_v15 = vcombine.high %v4263_v43, %v4263_v43  ;;  %v4265_v48 = vcombine.high %v4025_v13, %v4025_v13  ;;  %v4272_v46 = vrot.slane %v4025_v13, %v14719_v25  ;;  %v20778_v43 = vld [vmem:[#allocation55_spill] sm:$0xff]  ;;  %v12110_v13 = vpop.f32.mrb[189].mxu1 }
 0x278   :  { %v4028_v39 = vadd.f32 %v12108_v3, %v12014_v19  ;;  %v20780_v19 = vld [vmem:[#allocation56_spill] sm:$0xff]  ;;  %v20781_v3 = vld [vmem:[#allocation57_spill] sm:$0xff] }
 0x279   :  { %v16946_v63 = vadd.f32 %v4264_v15, %v20776_v34  ;;  %v4279_v11 = vrot.slane %v4265_v48, %v14719_v25  ;;  %v4280_v23 = vcombine.high %v4272_v46, %v4272_v46  ;;  %v16950_v2 = vadd.f32 %v4272_v46, %v20778_v43  ;;  %v12018_v48 = vpop.f32.mrb[190].mxu0  ;;  %v20782_v34 = vld [vmem:[#allocation22_spill] sm:$0xff] }
 0x27a   :  { %v4281_v42 = vcombine.high %v4028_v39, %v4028_v39  ;;  %v4288_v27 = vrot.slane %v4028_v39, %v14719_v25 }
 0x27b   :  { %20777 = vst [vmem:[#allocation10_spill] sm:$0xff] %v16946_v63  ;;  %20779 = vst [vmem:[#allocation11_spill] sm:$0xff] %v16950_v2  ;;  %v12111_v2 = vadd.f32 %v12110_v13, %v12109_v5  ;;  %v12019_v63 = vpop.f32.mrb[191].mxu0  ;;  %v20785_v5 = vld [vmem:[#allocation72_spill] sm:$0xff] }
 0x27c   :  { %v4295_v15 = vrot.slane %v4281_v42, %v14719_v25  ;;  %v4296_v46 = vcombine.high %v4288_v27, %v4288_v27  ;;  %v16961_v43 = vadd.f32 %v4288_v27, %v20782_v34  ;;  %v20784_v27 = vld [vmem:[#allocation59_spill] sm:$0xff] }
 0x27d   :  { %6137 = vmatmul.mubr.bf16.gmra.mrb[36].mxu0 %v20772_v41  ;;  %6269 = vmatmul.mubr.bf16.gmra.mrb[36].mxu1 %v20773_v20  ;;  %v16957_v41 = vadd.f32 %v4279_v11, %v20781_v3  ;;  %v12017_v20 = vadd.f32 %v12016_v59, %v12015_v21  ;;  %v20786_v59 = vld [vmem:[#allocation58_spill] sm:$0xff] }
 0x27e   :  { %6144 = vmatprep.mubr.bf16.mxu0 %v20774_v35  ;;  %6276 = vmatprep.mubr.bf16.mxu1 %v20775_v57  ;;  %v16954_v35 = vadd.f32 %v4280_v23, %v20780_v19  ;;  %v12112_v57 = vpop.f32.mrb[190].mxu1  ;;  %v4297_v51 = vcombine.high %v4295_v15, %v4295_v15  ;;  %v16964_v60 = vadd.f32 %v4295_v15, %v16528_v26  ;;  %v12021_v15 = vpop.f32.mrb[192].mxu0 }
 0x27f   :  { %v12113_v39 = vpop.f32.mrb[191].mxu1  ;;  %v12020_v23 = vadd.f32 %v12019_v63, %v12018_v48  ;;  %v16967_v11 = vadd.f32 %v4296_v46, %v16525_v37  ;;  %v4033_v42 = vadd.f32 %v12111_v2, %v12017_v20  ;;  %v20788_v46 = vld [vmem:[#allocation25_spill] sm:$0xff] }
 0x280   :  { %20783 = vst [vmem:[#allocation9_spill] sm:$0xff] %v16964_v60  ;;  %v12114_v19 = vadd.f32 %v12113_v39, %v12112_v57  ;;  %v16974_v13 = vadd.f32 %v4297_v51, %v20786_v59  ;;  %v12115_v2 = vpop.f32.mrb[192].mxu1 }
 0x281   :  { %v4298_v26 = vcombine.high %v4033_v42, %v4033_v42  ;;  %v4305_v63 = vrot.slane %v4033_v42, %v14719_v25  ;;  %v12116_v48 = vpop.f32.mrb[193].mxu1 }
 0x282   :  { %v4036_v21 = vadd.f32 %v12114_v19, %v12020_v23  ;;  %20787 = vst [vmem:[#allocation12_spill] sm:$0xff] %v16974_v13  ;;  %v12117_v39 = vadd.f32 %v12116_v48, %v12115_v2  ;;  %v12118_v19 = vpop.f32.mrb[194].mxu1 }
 0x283   :  { %v4313_v20 = vcombine.high %v4305_v63, %v4305_v63  ;;  %v12119_v63 = vpop.f32.mrb[195].mxu1 }
 0x284   :  { %v4315_v3 = vcombine.high %v4036_v21, %v4036_v21  ;;  %v4322_v37 = vrot.slane %v4036_v21, %v14719_v25  ;;  %v20791_v21 = vld [vmem:[#allocation24_spill] sm:$0xff] }
 0x285   :  { %6145 = vmatmul.mubr.bf16.gmra.mrb[40].mxu0 %v16537_v22  ;;  %6277 = vmatmul.mubr.bf16.gmra.mrb[40].mxu1 %v16543_v12  ;;  %v4312_v22 = vrot.slane %v4298_v26, %v14719_v25  ;;  %v12022_v12 = vpop.f32.mrb[193].mxu0 }
 0x286   :  { %6152 = vmatprep.mubr.bf16.mxu0 %v20784_v27  ;;  %6284 = vmatprep.mubr.bf16.mxu1 %v20785_v5  ;;  %v4329_v57 = vrot.slane %v4315_v3, %v14719_v25  ;;  %v16981_v34 = vadd.f32 %v4322_v37, %v20788_v46  ;;  %v12023_v51 = vadd.f32 %v12022_v12, %v12021_v15  ;;  %v12024_v23 = vpop.f32.mrb[194].mxu0  ;;  %v20790_v27 = vld [vmem:[#allocation60_spill] sm:$0xff]  ;;  %v20793_v15 = vld [vmem:[#allocation73_spill] sm:$0xff] }
 0x287   :  { %v4314_v42 = vcombine.high %v4312_v22, %v4312_v22  ;;  %v16984_v5 = vadd.f32 %v4313_v20, %v20790_v27  ;;  %v16987_v59 = vadd.f32 %v4312_v22, %v20791_v21  ;;  %v12025_v26 = vpop.f32.mrb[195].mxu0  ;;  %v12120_v46 = vadd.f32 %v12119_v63, %v12118_v19  ;;  %v20797_v27 = vld [vmem:[#allocation61_spill] sm:$0xff] }
 0x288   :  { %20789 = vst [vmem:[#allocation17_spill] sm:$0xff] %v16981_v34  ;;  %v4330_v13 = vcombine.high %v4329_v57, %v4329_v57  ;;  %v16990_v60 = vadd.f32 %v4329_v57, %v16574_v14  ;;  %v4041_v3 = vadd.f32 %v12117_v39, %v12023_v51  ;;  %v12026_v37 = vadd.f32 %v12025_v26, %v12024_v23  ;;  %v12121_v51 = vpop.f32.mrb[196].mxu1 }
 0x289   :  { %v16995_v2 = vadd.f32 %v4314_v42, %v20793_v15  ;;  %v12122_v42 = vpop.f32.mrb[197].mxu1 }
 0x28a   :  { %20792 = vst [vmem:[#allocation41_spill] sm:$0xff] %v16990_v60  ;;  %v4331_v20 = vcombine.high %v4041_v3, %v4041_v3  ;;  %v4338_v22 = vrot.slane %v4041_v3, %v14719_v25  ;;  %v17001_v14 = vadd.f32 %v4330_v13, %v16596_v18  ;;  %v4044_v12 = vadd.f32 %v12120_v46, %v12026_v37  ;;  %v12124_v26 = vpop.f32.mrb[198].mxu1 }
 0x28b   :  { %20794 = vst [vmem:[#allocation14_spill] sm:$0xff] %v16995_v2  ;;  %v12123_v13 = vadd.f32 %v12122_v42, %v12121_v51  ;;  %v12125_v15 = vpop.f32.mrb[199].mxu1 }
 0x28c   :  { %20795 = vst [vmem:[#allocation42_spill] sm:$0xff] %v17001_v14  ;;  %v4345_v48 = vrot.slane %v4331_v20, %v14719_v25  ;;  %v4346_v57 = vcombine.high %v4338_v22, %v4338_v22  ;;  %v4348_v39 = vcombine.high %v4044_v12, %v4044_v12  ;;  %v4355_v23 = vrot.slane %v4044_v12, %v14719_v25 }
 0x28d   :  { %6153 = vmatmul.mubr.bf16.gmra.mrb[44].mxu0 %v16586_v8  ;;  %6285 = vmatmul.mubr.bf16.gmra.mrb[44].mxu1 %v16592_v49  ;;  %v17005_v8 = vadd.f32 %v4338_v22, %v16578_v24  ;;  %v12027_v49 = vpop.f32.mrb[196].mxu0  ;;  %v20799_v24 = vld [vmem:[#allocation75_spill] sm:$0xff]  ;;  %v12126_v12 = vadd.f32 %v12125_v15, %v12124_v26  ;;  %v20808_v26 = vld [vmem:[#allocation77_spill] sm:$0xff] }
 0x28e   :  { %6160 = vmatprep.mubr.bf16.mxu0 %v16604_v30  ;;  %6292 = vmatprep.mubr.bf16.mxu1 %v16610_v1  ;;  %v12028_v19 = vpop.f32.mrb[197].mxu0  ;;  %v4347_v30 = vcombine.high %v4345_v48, %v4345_v48  ;;  %v17009_v1 = vadd.f32 %v4346_v57, %v20797_v27  ;;  %v4362_v63 = vrot.slane %v4348_v39, %v14719_v25 }
 0x28f   :  { %20796 = vst [vmem:[#allocation43_spill] sm:$0xff] %v17005_v8  ;;  %v12029_v18 = vadd.f32 %v12028_v19, %v12027_v49  ;;  %v12030_v21 = vpop.f32.mrb[198].mxu0  ;;  %v4363_v3 = vcombine.high %v4355_v23, %v4355_v23  ;;  %v17013_v37 = vadd.f32 %v4355_v23, %v20799_v24  ;;  %v20801_v8 = vld [vmem:[#allocation74_spill] sm:$0xff] }
 0x290   :  { %20798 = vst [vmem:[#allocation15_spill] sm:$0xff] %v17009_v1  ;;  %v12031_v46 = vpop.f32.mrb[199].mxu0  ;;  %v17016_v48 = vadd.f32 %v4347_v30, %v20801_v8  ;;  %v17022_v49 = vadd.f32 %v4362_v63, %v16627_v47  ;;  %v20805_v19 = vld [vmem:[#allocation6_spill] sm:$0xff]  ;;  %v13587_v1 = vld [vmem:[%s20246_s0 + $0xc0] ss:$16 sps:$4 sm:$0xff]  }
 0x291   :  { %20800 = vst [vmem:[#allocation32_spill] sm:$0xff] %v17013_v37  ;;  %v4049_v20 = vadd.f32 %v12123_v13, %v12029_v18  ;;  %v12032_v22 = vadd.f32 %v12031_v46, %v12030_v21  ;;  %v17019_v57 = vadd.f32 %v4363_v3, %v16624_v44  ;;  %v20806_v44 = vld [vmem:[#allocation76_spill] sm:$0xff]  ;;  %v12033_v27 = vpop.f32.mrb[200].mxu0  ;;  %v12127_v18 = vpop.f32.mrb[200].mxu1  ;;  %v20810_v3 = vld [vmem:[#allocation78_spill] sm:$0xff] }
 0x292   :  { %20802 = vst [vmem:[#allocation16_spill] sm:$0xff] %v17016_v48  ;;  %20804 = vst [vmem:[#allocation44_spill] sm:$0xff] %v17022_v49  ;;  %v12128_v13 = vpop.f32.mrb[201].mxu1 }
 0x293   :  { %20803 = vst [vmem:[#allocation45_spill] sm:$0xff] %v17019_v57  ;;  %v4364_v51 = vcombine.high %v4049_v20, %v4049_v20  ;;  %v4371_v39 = vrot.slane %v4049_v20, %v14719_v25  ;;  %v4052_v23 = vadd.f32 %v12126_v12, %v12032_v22  ;;  %v12130_v20 = vpop.f32.mrb[202].mxu1 }
 0x295   :  { %6161 = vmatmul.mubr.bf16.gmra.mrb[48].mxu0 %v16638_v50  ;;  %6293 = vmatmul.mubr.bf16.gmra.mrb[48].mxu1 %v16644_v29  ;;  %v4378_v8 = vrot.slane %v4364_v51, %v14719_v25  ;;  %v4379_v42 = vcombine.high %v4371_v39, %v4371_v39  ;;  %v17031_v30 = vadd.f32 %v4371_v39, %v20806_v44  ;;  %v12034_v29 = vpop.f32.mrb[201].mxu0  ;;  %v12131_v44 = vpop.f32.mrb[203].mxu1 }
 0x296   :  { %6168 = vmatprep.mubr.bf16.mxu0 %v20699_v6  ;;  %6300 = vmatprep.mubr.bf16.mxu1 %v20805_v19  ;;  %v4381_v47 = vcombine.high %v4052_v23, %v4052_v23  ;;  %v4388_v50 = vrot.slane %v4052_v23, %v14719_v25  ;;  %v12036_v15 = vpop.f32.mrb[202].mxu0  ;;  %v12035_v12 = vadd.f32 %v12034_v29, %v12033_v27 }
 0x297   :  { %20807 = vst [vmem:[#allocation46_spill] sm:$0xff] %v17031_v30  ;;  %v4380_v21 = vcombine.high %v4378_v8, %v4378_v8  ;;  %v17035_v63 = vadd.f32 %v4379_v42, %v20808_v26  ;;  %v17038_v24 = vadd.f32 %v4378_v8, %v20810_v3  ;;  %v12129_v51 = vadd.f32 %v12128_v13, %v12127_v18  ;;  %v12037_v39 = vpop.f32.mrb[203].mxu0  ;;  %v12133_v26 = vpop.f32.mrb[204].mxu1 }
 0x298   :  { %v4395_v46 = vrot.slane %v4381_v47, %v14719_v25  ;;  %v4396_v22 = vcombine.high %v4388_v50, %v4388_v50  ;;  %v12038_v49 = vadd.f32 %v12037_v39, %v12036_v15  ;;  %v12132_v57 = vadd.f32 %v12131_v44, %v12130_v20  ;;  %v20814_v47 = vld [vmem:[#allocation79_spill] sm:$0xff]  ;;  %v12039_v13 = vpop.f32.mrb[204].mxu0  ;;  %v13386_v15 = vld [vmem:[%s20247_s1 + $0x780] sm:$0xff]  }
 0x299   :  { %20809 = vst [vmem:[#allocation47_spill] sm:$0xff] %v17035_v63  ;;  %20811 = vst [vmem:[#allocation51_spill] sm:$0xff] %v17038_v24  ;;  %v4057_v8 = vadd.f32 %v12129_v51, %v12035_v12  ;;  %v17050_v50 = vadd.f32 %v4380_v21, %v20814_v47  ;;  %v20821_v39 = vld [vmem:[#allocation81_spill] sm:$0xff]  ;;  %v13390_v13 = vld [vmem:[%s20247_s1 + $0x788] sm:$0xff]  }
 0x29a   :  { %v4397_v30 = vcombine.high %v4395_v46, %v4395_v46  ;;  %v17042_v23 = vadd.f32 %v4395_v46, %v16659_v17  ;;  %v17045_v42 = vadd.f32 %v4396_v22, %v16656_v53  ;;  %v4060_v27 = vadd.f32 %v12132_v57, %v12038_v49  ;;  %v12040_v57 = vpop.f32.mrb[205].mxu0  ;;  %v12134_v49 = vpop.f32.mrb[205].mxu1  ;;  %v13385_v46 = vld [vmem:[%s20247_s1 + $0x700] sm:$0xff]   ;;  %v20819_v22 = vld [vmem:[#allocation30_spill] sm:$0xff] }
 0x29b   :  { %20815 = vst [vmem:[#allocation62_spill] sm:$0xff] %v17050_v50  ;;  %v4398_v18 = vcombine.high %v4057_v8, %v4057_v8  ;;  %v4405_v53 = vrot.slane %v4057_v8, %v14719_v25  ;;  %v13388_v8 = vld [vmem:[%s20247_s1 + $0x7c8] sm:$0xff]   ;;  %v13563_v47 = vld [vmem:[%s20246_s0] ss:$16 sps:$4 sm:$0xff]   ;;  %v13565_v26 = vld [vmem:[%s20246_s0 + $0x24] ss:$16 sps:$4 sm:$0xff]  }
 0x29c   :  { %20812 = vst [vmem:[#allocation53_spill] sm:$0xff] %v17042_v23  ;;  %20813 = vst [vmem:[#allocation52_spill] sm:$0xff] %v17045_v42  ;;  %v17055_v17 = vadd.f32 %v4397_v30, %v16671_v56  ;;  %v4420_v29 = vrot.slane %v4060_v27, %v14719_v25  ;;  %v12042_v56 = vpop.f32.mrb[206].mxu0  ;;  %v12136_v30 = vpop.f32.mrb[206].mxu1  ;;  %v13564_v27 = vld [vmem:[%s20246_s0 + $0x8] ss:$16 sps:$4 sm:$0xff]  }
 0x29d   :  { %6169 = vmatmul.mubr.bf16.gmra.mrb[52].mxu0 %v20704_v32  ;;  %6301 = vmatmul.mubr.bf16.gmra.mrb[52].mxu1 %v20705_v0  ;;  %v4412_v3 = vrot.slane %v4398_v18, %v14719_v25  ;;  %v17061_v21 = vadd.f32 %v4405_v53, %v16663_v58  ;;  %v12043_v12 = vpop.f32.mrb[207].mxu0  ;;  %v12137_v51 = vpop.f32.mrb[207].mxu1  ;;  %v20823_v18 = vld [vmem:[#allocation80_spill] sm:$0xff]  ;;  %v13391_v57 = vld [vmem:[%s20247_s1 + $0x750] sm:$0xff]  }
 0x29e   :  { %7077 = vmatprep.mubr.bf16.mxu0 %v16677_v54  ;;  %7209 = vmatprep.mubr.bf16.mxu1 %v16683_v62  ;;  %20816 = vst [vmem:[#allocation48_spill] sm:$0xff] %v17055_v17  ;;  %v4421_v54 = vcombine.high %v4420_v29, %v4420_v29  ;;  %v17064_v62 = vadd.f32 %v4420_v29, %v16690_v61  ;;  %v13387_v61 = vld [vmem:[%s20247_s1 + $0x748] sm:$0xff]   ;;  %v13392_v49 = vld [vmem:[%s20247_s1 + $0x7d0] sm:$0xff]  }
 0x29f   :  { %20817 = vst [vmem:[#allocation50_spill] sm:$0xff] %v17061_v21  ;;  %v4413_v20 = vcombine.high %v4412_v3, %v4412_v3  ;;  %v17073_v58 = vadd.f32 %v4412_v3, %v20819_v22  ;;  %v13389_v29 = vld [vmem:[%s20247_s1 + $0x708] sm:$0xff]   ;;  %v12249_v56 = vpop.f32.mrb[208].mxu1  ;;  %v13393_v51 = vld [vmem:[%s20247_s1 + $0x710] sm:$0xff]  }
 0x2a0   :  { %20818 = vst [vmem:[#allocation49_spill] sm:$0xff] %v17064_v62  ;;  %v17076_v44 = vadd.f32 %v4421_v54, %v20821_v39  ;;  %v13566_v3 = vld [vmem:[%s20246_s0 + $0x2c] ss:$16 sps:$4 sm:$0xff]   ;;  %v12155_v54 = vpop.f32.mrb[208].mxu0  ;;  %v13394_v39 = vld [vmem:[%s20247_s1 + $0x790] sm:$0xff]  }
 0x2a1   :  { %20820 = vst [vmem:[#allocation63_spill] sm:$0xff] %v17073_v58  ;;  %v17091_v53 = vadd.f32 %v4413_v20, %v20823_v18  ;;  %v12156_v30 = vpop.f32.mrb[209].mxu0  ;;  %v13567_v18 = vld [vmem:[%s20246_s0 + $0x20] ss:$16 sps:$4 sm:$0xff]  }
 0x2a2   :  { %20822 = vst [vmem:[#allocation64_spill] sm:$0xff] %v17076_v44 }
 0x2a3   :  { %20824 = vst [vmem:[#allocation65_spill] sm:$0xff] %v17091_v53 }
 0x2a5   :  { %7078 = vmatmul.mubr.bf16.vlgmr.msra.gmra.mrb[56].mxu0 %v13563_v47  ;;  %7210 = vmatmul.mubr.bf16.vlgmr.msra.gmra.mrb[56].mxu1 %v13564_v27  ;;  %v13395_v47 = vld [vmem:[%s20247_s1 + $0x758] sm:$0xff]  }
 0x2a6   :  { %12704 = vmatpush3.bf16.msra.mxu0 %v13385_v46  ;;  %12798 = vmatpush3.bf16.msra.mxu1 %v13386_v15  ;;  %v12250_v46 = vpop.f32.mrb[209].mxu1  ;;  %v12158_v15 = vpop.f32.mrb[210].mxu0  ;;  %v13396_v27 = vld [vmem:[%s20247_s1 + $0x7d8] sm:$0xff]  }
 0x2a7   :  { %7083 = vmatprep.mubr.bf16.mxu0 %v13565_v26  ;;  %7215 = vmatprep.mubr.bf16.mxu1 %v13566_v3  ;;  %v12252_v20 = vpop.f32.mrb[210].mxu1  ;;  %v12159_v22 = vpop.f32.mrb[211].mxu0  ;;  %v13569_v26 = vld [vmem:[%s20246_s0 + $0x44] ss:$16 sps:$4 sm:$0xff]   ;;  %v13570_v3 = vld [vmem:[%s20246_s0 + $0x4c] ss:$16 sps:$4 sm:$0xff]  }
 0x2a8   :  { %12705 = vmatprep.subr.bf16.mxu0 %v13387_v61  ;;  %12799 = vmatprep.subr.bf16.mxu1 %v13388_v8  ;;  %v12253_v12 = vpop.f32.mrb[211].mxu1  ;;  %v12160_v61 = vadd.f32 %v12159_v22, %v12158_v15  ;;  %v13399_v15 = vld [vmem:[%s20247_s1 + $0x760] sm:$0xff]  }
 0x2a9   :  { %v12254_v8 = vadd.f32 %v12253_v12, %v12252_v20  ;;  %v13400_v20 = vld [vmem:[%s20247_s1 + $0x7e0] sm:$0xff]  }
 0x2aa   :  { %12706 = vmatpush3.bf16.msra.mxu0 %v13389_v29  ;;  %12800 = vmatpush3.bf16.msra.mxu1 %v13390_v13  ;;  %v13568_v29 = vld [vmem:[%s20246_s0 + $0x28] ss:$16 sps:$4 sm:$0xff]  }
 0x2ab   :  { %12707 = vmatprep.subr.bf16.mxu0 %v13391_v57  ;;  %12801 = vmatprep.subr.bf16.mxu1 %v13392_v49  ;;  %v4977_v13 = vadd.f32 %v12254_v8, %v12160_v61  ;;  %v13397_v57 = vld [vmem:[%s20247_s1 + $0x718] sm:$0xff]  }
 0x2ac   :  { %v13398_v49 = vld [vmem:[%s20247_s1 + $0x798] sm:$0xff]   ;;  %v12161_v30 = vpop.f32.mrb[212].mxu0 }
 0x2ad   :  { %7084 = vmatmul.mubr.bf16.gmra.mrb[60].mxu0 %v13567_v18  ;;  %7216 = vmatmul.mubr.bf16.gmra.mrb[60].mxu1 %v13568_v29  ;;  %v5095_v54 = vcombine.high %v4977_v13, %v4977_v13  ;;  %v5102_v56 = vrot.slane %v4977_v13, %v14719_v25  ;;  %v12255_v46 = vpop.f32.mrb[212].mxu1  ;;  %v12162_v22 = vpop.f32.mrb[213].mxu0 }
 0x2ae   :  { %7091 = vmatprep.mubr.bf16.mxu0 %v13569_v26  ;;  %7223 = vmatprep.mubr.bf16.mxu1 %v13570_v3  ;;  %v12256_v12 = vpop.f32.mrb[213].mxu1  ;;  %v12163_v61 = vadd.f32 %v12162_v22, %v12161_v30  ;;  %v12164_v18 = vpop.f32.mrb[214].mxu0  ;;  %v13402_v26 = vld [vmem:[%s20247_s1 + $0x7a0] sm:$0xff]   ;;  %v13403_v30 = vld [vmem:[%s20247_s1 + $0x768] sm:$0xff]  }
 0x2af   :  { %12708 = vmatpush3.bf16.msra.mxu0 %v13393_v51  ;;  %12802 = vmatpush3.bf16.msra.mxu1 %v13394_v39  ;;  %v5109_v51 = vrot.slane %v5095_v54, %v14719_v25  ;;  %v5110_v39 = vcombine.high %v5102_v56, %v5102_v56  ;;  %v12257_v8 = vadd.f32 %v12256_v12, %v12255_v46  ;;  %v12258_v29 = vpop.f32.mrb[214].mxu1  ;;  %v12165_v13 = vpop.f32.mrb[215].mxu0  ;;  %v13571_v22 = vld [vmem:[%s20246_s0 + $0x40] ss:$16 sps:$4 sm:$0xff]  }
 0x2b0   :  { %12709 = vmatprep.subr.bf16.mxu0 %v13395_v47  ;;  %12803 = vmatprep.subr.bf16.mxu1 %v13396_v27  ;;  %v12259_v47 = vpop.f32.mrb[215].mxu1  ;;  %v13401_v27 = vld [vmem:[%s20247_s1 + $0x720] sm:$0xff]  }
 0x2b1   :  { %v5111_v3 = vcombine.high %v5109_v51, %v5109_v51  ;;  %v10970_v44 = vrot.slane %v5110_v39, 9  ;;  %v5452_v54 = vrot.slane %v5109_v51, 7  ;;  %v4982_v56 = vadd.f32 %v12257_v8, %v12163_v61  ;;  %v13573_v61 = vld [vmem:[%s20246_s0 + $0x64] ss:$16 sps:$4 sm:$0xff]   ;;  %v13574_v8 = vld [vmem:[%s20246_s0 + $0x6c] ss:$16 sps:$4 sm:$0xff]  }
 0x2b2   :  { %v12260_v46 = vadd.f32 %v12259_v47, %v12258_v29  ;;  %v13405_v29 = vld [vmem:[%s20247_s1 + $0x728] sm:$0xff]  }
 0x2b3   :  { %12710 = vmatpush3.bf16.msra.mxu0 %v13397_v57  ;;  %12804 = vmatpush3.bf16.msra.mxu1 %v13398_v49  ;;  %v13404_v57 = vld [vmem:[%s20247_s1 + $0x7e8] sm:$0xff]   ;;  %v12166_v49 = vadd.f32 %v12165_v13, %v12164_v18  ;;  %v17167_v12 = vrot.slane %v5111_v3, 7  ;;  %v5112_v51 = vcombine.high %v4982_v56, %v4982_v56  ;;  %v17170_v39 = vrot.slane %v4982_v56, %v14719_v25 }
 0x2b4   :  { %12711 = vmatprep.subr.bf16.mxu0 %v13399_v15  ;;  %12805 = vmatprep.subr.bf16.mxu1 %v13400_v20  ;;  %v13572_v15 = vld [vmem:[%s20246_s0 + $0x48] ss:$16 sps:$4 sm:$0xff]   ;;  %v5454_v20 = vrot.slane %v5452_v54, 2  ;;  %v5453_v3 = vsel %vm15056_vm6, %v10970_v44, %v5452_v54 }
 0x2b5   :  { %7092 = vmatmul.mubr.bf16.gmra.mrb[64].mxu0 %v13571_v22  ;;  %7224 = vmatmul.mubr.bf16.gmra.mrb[64].mxu1 %v13572_v15  ;;  %v17178_v18 = vadd.f32 %v12260_v46, %v12166_v49  ;;  %v13406_v13 = vld [vmem:[%s20247_s1 + $0x7a8] sm:$0xff]   ;;  %v5126_v56 = vrot.slane %v5112_v51, %v14719_v25  ;;  %v5127_v22 = vcombine.high %v17170_v39, %v17170_v39  ;;  %v13407_v46 = vld [vmem:[%s20247_s1 + $0x770] sm:$0xff]   ;;  %v20830_v21 = vrot.slane %v17170_v39, 7 }
 0x2b6   :  { %7099 = vmatprep.mubr.bf16.mxu0 %v13573_v61  ;;  %7231 = vmatprep.mubr.bf16.mxu1 %v13574_v8  ;;  %v13408_v15 = vld [vmem:[%s20247_s1 + $0x7f0] sm:$0xff]   ;;  %v5456_v44 = vsel %vm15056_vm6, %v5454_v20, %v17167_v12  ;;  %v20828_v49 = vld [vmem:[#allocation18_spill] sm:$0xff] }
 0x2b7   :  { %12712 = vmatpush3.bf16.msra.mxu0 %v13401_v27  ;;  %12806 = vmatpush3.bf16.msra.mxu1 %v13402_v26  ;;  %v12167_v27 = vpop.f32.mrb[216].mxu0  ;;  %v12261_v26 = vpop.f32.mrb[216].mxu1  ;;  %v20826_v61 = vld [vmem:[#allocation27_spill] sm:$0xff]  ;;  %v5129_v62 = vcombine.high %v17178_v18, %v17178_v18  ;;  %v5460_v17 = vrot.slane %v20830_v21, 2  ;;  %v5461_v23 = vrot.slane %v5127_v22, 7  ;;  %v5136_v20 = vrot.slane %v17178_v18, %v14719_v25  ;;  %v13411_v18 = vld [vmem:[%s20247_s1 + $0x778] sm:$0xff]  }
 0x2b8   :  { %12713 = vmatprep.subr.bf16.mxu0 %v13403_v30  ;;  %12807 = vmatprep.subr.bf16.mxu1 %v13404_v57  ;;  %v12168_v54 = vpop.f32.mrb[217].mxu0  ;;  %v12262_v51 = vpop.f32.mrb[217].mxu1  ;;  %v17202_v8 = vadd.f32 %v5453_v3, %v20826_v61  ;;  %v17205_v30 = vadd.f32 %v5456_v44, %v20828_v49  ;;  %v5128_v57 = vcombine.high %v5126_v56, %v5126_v56  ;;  %v13409_v49 = vld [vmem:[%s20247_s1 + $0x730] sm:$0xff]  }
 0x2b9   :  { %v12170_v53 = vpop.f32.mrb[218].mxu0  ;;  %v12264_v58 = vpop.f32.mrb[218].mxu1  ;;  %v12169_v42 = vadd.f32 %v12168_v54, %v12167_v27  ;;  %v13410_v44 = vld [vmem:[%s20247_s1 + $0x7b0] sm:$0xff]   ;;  %v12263_v24 = vadd.f32 %v12262_v51, %v12261_v26  ;;  %v13576_v27 = vld [vmem:[%s20246_s0 + $0x68] ss:$16 sps:$4 sm:$0xff]   ;;  %v5144_v54 = vcombine.high %v5136_v20, %v5136_v20  ;;  %v5468_v51 = vrot.slane %v5136_v20, 7 }
 0x2ba   :  { %20827 = vst [vmem:[#allocation66_spill] sm:$0xff] %v17202_v8  ;;  %20829 = vst [vmem:[#allocation67_spill] sm:$0xff] %v17205_v30  ;;  %v12171_v50 = vpop.f32.mrb[219].mxu0  ;;  %v12265_v3 = vpop.f32.mrb[219].mxu1  ;;  %v5465_v61 = vrot.slane %v5128_v57, 7  ;;  %v5462_v57 = vsel %vm15056_vm6, %v5460_v17, %v5461_v23  ;;  %v20831_v23 = vrot.slane %v17170_v39, 7 }
 0x2bb   :  { %12714 = vmatpush3.bf16.msra.mxu0 %v13405_v29  ;;  %12808 = vmatpush3.bf16.msra.mxu1 %v13406_v13  ;;  %v12172_v21 = vadd.f32 %v12171_v50, %v12170_v53  ;;  %v12266_v22 = vadd.f32 %v12265_v3, %v12264_v58  ;;  %v10971_v29 = vrot.slane %v5126_v56, 9  ;;  %v13575_v13 = vld [vmem:[%s20246_s0 + $0x60] ss:$16 sps:$4 sm:$0xff]   ;;  %v13412_v50 = vld [vmem:[%s20247_s1 + $0x7f8] sm:$0xff]   ;;  %v4990_v53 = vadd.f32 %v12263_v24, %v12169_v42  ;;  %v13577_v56 = vld [vmem:[%s20246_s0 + $0x84] ss:$16 sps:$4 sm:$0xff]  }
 0x2bc   :  { %12715 = vmatprep.subr.bf16.mxu0 %v13407_v46  ;;  %12809 = vmatprep.subr.bf16.mxu1 %v13408_v15  ;;  %v5467_v58 = vrot.slane %v5465_v61, 2  ;;  %v13578_v46 = vld [vmem:[%s20246_s0 + $0x8c] ss:$16 sps:$4 sm:$0xff]   ;;  %v5457_v15 = vrot.slane %v17167_v12, 2  ;;  %v17249_v12 = vrot.slane %v5129_v62, %v14719_v25  ;;  %v20832_v62 = vld [vmem:[#allocation29_spill] sm:$0xff]  ;;  %v5471_v30 = vrot.slane %v5144_v54, 7 }
 0x2bd   :  { %7100 = vmatmul.mubr.bf16.gmra.mrb[68].mxu0 %v13575_v13  ;;  %7232 = vmatmul.mubr.bf16.gmra.mrb[68].mxu1 %v13576_v27  ;;  %v4993_v26 = vadd.f32 %v12266_v22, %v12172_v21  ;;  %v13413_v24 = vld [vmem:[%s20247_s1 + $0x738] sm:$0xff]   ;;  %v5466_v3 = vsel %vm15056_vm6, %v10971_v29, %v5465_v61  ;;  %v13416_v21 = vld [vmem:[%s20247_s1 + $0x8c0] sm:$0xff]   ;;  %v17262_v61 = vadd.f32 %v5462_v57, %v20832_v62 }
 0x2be   :  { %7107 = vmatprep.mubr.bf16.mxu0 %v13577_v56  ;;  %7239 = vmatprep.mubr.bf16.mxu1 %v13578_v46  ;;  %v13414_v42 = vld [vmem:[%s20247_s1 + $0x7b8] sm:$0xff]   ;;  %v5459_v17 = vsel %vm15056_vm6, %v5457_v15, %v20831_v23  ;;  %v5469_v29 = vsel %vm15056_vm6, %v5467_v58, %v5468_v51  ;;  %v5146_v27 = vcombine.high %v4990_v53, %v4990_v53  ;;  %v5470_v15 = vrot.slane %v5468_v51, 2 }
 0x2bf   :  { %12716 = vmatpush3.bf16.msra.mxu0 %v13409_v49  ;;  %12810 = vmatpush3.bf16.msra.mxu1 %v13410_v44  ;;  %v12267_v49 = vpop.f32.mrb[220].mxu1  ;;  %v13415_v44 = vld [vmem:[%s20247_s1 + $0x840] sm:$0xff]   ;;  %20833 = vst [vmem:[#allocation68_spill] sm:$0xff] %v17262_v61  ;;  %v5163_v63 = vcombine.high %v4993_v26, %v4993_v26  ;;  %v17270_v57 = vrot.slane %v4990_v53, %v14719_v25  ;;  %v13580_v51 = vld [vmem:[%s20246_s0 + $0x88] ss:$16 sps:$4 sm:$0xff]   ;;  %v5474_v53 = vrot.slane %v17249_v12, 7 }
 0x2c0   :  { %v12173_v20 = vpop.f32.mrb[220].mxu0  ;;  %12717 = vmatprep.subr.bf16.mxu0 %v13411_v18  ;;  %v12268_v13 = vpop.f32.mrb[221].mxu1  ;;  %12811 = vmatprep.subr.bf16.mxu1 %v13412_v50  ;;  %v17265_v18 = vadd.f32 %v5466_v3, %v16794_v38  ;;  %v5145_v38 = vcombine.high %v17249_v12, %v17249_v12  ;;  %v17275_v58 = vrot.slane %v4993_v26, %v14719_v25  ;;  %v13579_v3 = vld [vmem:[%s20246_s0 + $0x80] ss:$16 sps:$4 sm:$0xff]   ;;  %v5473_v26 = vrot.slane %v5471_v30, 2  ;;  %v20835_v23 = vld [vmem:[#allocation28_spill] sm:$0xff] }
 0x2c1   :  { %v12174_v22 = vpop.f32.mrb[221].mxu0  ;;  %v12270_v46 = vpop.f32.mrb[222].mxu1  ;;  %v12269_v8 = vadd.f32 %v12268_v13, %v12267_v49  ;;  %v17294_v49 = vrot.slane %v5163_v63, %v14719_v25  ;;  %v5161_v12 = vcombine.high %v17270_v57, %v17270_v57  ;;  %v17299_v62 = vadd.f32 %v5459_v17, %v20835_v23 }
 0x2c2   :  { %20834 = vst [vmem:[#allocation69_spill] sm:$0xff] %v17265_v18  ;;  %v12176_v56 = vpop.f32.mrb[222].mxu0  ;;  %v12175_v50 = vadd.f32 %v12174_v22, %v12173_v20  ;;  %v12271_v37 = vpop.f32.mrb[223].mxu1  ;;  %v17291_v20 = vrot.slane %v5146_v27, %v14719_v25  ;;  %v5178_v63 = vcombine.high %v17275_v58, %v17275_v58  ;;  %v5475_v18 = vsel %vm15056_vm6, %v5473_v26, %v5474_v53  ;;  %v13583_v53 = vld [vmem:[%s20246_s0 + $0xa0] ss:$16 sps:$4 sm:$0xff]  }
 0x2c3   :  { %v12177_v39 = vpop.f32.mrb[223].mxu0  ;;  %12718 = vmatpush3.bf16.msra.mxu0 %v13413_v24  ;;  %12812 = vmatpush3.bf16.msra.mxu1 %v13414_v42  ;;  %v13581_v42 = vld [vmem:[%s20246_s0 + $0xa4] ss:$16 sps:$4 sm:$0xff]   ;;  %20836 = vst [vmem:[#allocation70_spill] sm:$0xff] %v17299_v62 }
 0x2c4   :  { %12891 = vmatprep.subr.bf16.mxu0 %v13415_v44  ;;  %12985 = vmatprep.subr.bf16.mxu1 %v13416_v21  ;;  %v4998_v54 = vadd.f32 %v12269_v8, %v12175_v50  ;;  %v12178_v24 = vadd.f32 %v12177_v39, %v12176_v56  ;;  %v13582_v8 = vld [vmem:[%s20246_s0 + $0xac] ss:$16 sps:$4 sm:$0xff]   ;;  %v12272_v21 = vadd.f32 %v12271_v37, %v12270_v46  ;;  %v17303_v50 = vrot.slane %v5145_v38, 9 }
 0x2c5   :  { %7108 = vmatmul.mubr.bf16.gmra.mrb[72].mxu0 %v13579_v3  ;;  %7240 = vmatmul.mubr.bf16.gmra.mrb[72].mxu1 %v13580_v51  ;;  %v5472_v56 = vsel %vm15056_vm6, %v5470_v15, %v5471_v30  ;;  %v17309_v51 = vadd.f32 %v5469_v29, %v16821_v7  ;;  %v5179_v38 = vcombine.high %v17294_v49, %v17294_v49  ;;  %v17336_v26 = vrot.slane %v5178_v63, 7 }
 0x2c6   :  { %7115 = vmatprep.mubr.bf16.mxu0 %v13581_v42  ;;  %7247 = vmatprep.mubr.bf16.mxu1 %v13582_v8  ;;  %v5180_v44 = vcombine.high %v4998_v54, %v4998_v54  ;;  %v5001_v46 = vadd.f32 %v12272_v21, %v12178_v24  ;;  %v17320_v7 = vadd.f32 %v5472_v56, %v16798_v33  ;;  %v13584_v33 = vld [vmem:[%s20246_s0 + $0xa8] ss:$16 sps:$4 sm:$0xff]   ;;  %v13585_v56 = vld [vmem:[%s20246_s0 + $0xc4] ss:$16 sps:$4 sm:$0xff]  }
 0x2c7   :  { %20837 = vst [vmem:[#allocation71_spill] sm:$0xff] %v17309_v51  ;;  %v5162_v29 = vcombine.high %v17291_v20, %v17291_v20 }
 0x2c8   :  { %v12179_v22 = vpop.f32.mrb[224].mxu0  ;;  %v12273_v13 = vpop.f32.mrb[224].mxu1  ;;  %v17313_v17 = vrot.slane %v5180_v44, %v14719_v25  ;;  %20838 = vst [vmem:[#allocation54_spill] sm:$0xff] %v17320_v7  ;;  %v17324_v44 = vrot.slane %v5161_v12, 7  ;;  %v5197_v24 = vcombine.high %v5001_v46, %v5001_v46 }
 0x2c9   :  { %v12180_v39 = vpop.f32.mrb[225].mxu0  ;;  %v12274_v3 = vpop.f32.mrb[225].mxu1 }
 0x2ca   :  { %v12181_v42 = vadd.f32 %v12180_v39, %v12179_v22  ;;  %v12182_v30 = vpop.f32.mrb[226].mxu0  ;;  %v12276_v15 = vpop.f32.mrb[226].mxu1  ;;  %v12275_v8 = vadd.f32 %v12274_v3, %v12273_v13  ;;  %v20325_v22 = vrot.slane %v17291_v20, 7  ;;  %v17328_v39 = vrot.slane %v4998_v54, %v14719_v25 }
 0x2cb   :  { %v12183_v23 = vpop.f32.mrb[227].mxu0  ;;  %v12277_v27 = vpop.f32.mrb[227].mxu1  ;;  %v5196_v12 = vcombine.high %v17313_v17, %v17313_v17  ;;  %v17341_v54 = vrot.slane %v5001_v46, %v14719_v25  ;;  %v17356_v46 = vrot.slane %v5197_v24, %v14719_v25 }
 0x2cc   :  { %v12184_v21 = vadd.f32 %v12183_v23, %v12182_v30  ;;  %v5006_v13 = vadd.f32 %v12275_v8, %v12181_v42  ;;  %v12278_v3 = vadd.f32 %v12277_v27, %v12276_v15  ;;  %v13586_v27 = vld [vmem:[%s20246_s0 + $0xcc] ss:$16 sps:$4 sm:$0xff]   ;;  %v17350_v42 = vadd.f32 %v5475_v18, %v16810_v4 }
 0x2cd   :  { %7116 = vmatmul.mubr.bf16.gmra.mrb[76].mxu0 %v13583_v53  ;;  %7248 = vmatmul.mubr.bf16.gmra.mrb[76].mxu1 %v13584_v33  ;;  %v17353_v30 = vrot.slane %v5179_v38, 7  ;;  %v20840_v8 = vrot.slane %v17270_v57, 7  ;;  %v5483_v53 = vrot.slane %v17324_v44, 2  ;;  %v17368_v38 = vrot.slane %v20325_v22, 2 }
 0x2ce   :  { %7123 = vmatprep.mubr.bf16.mxu0 %v13585_v56  ;;  %7255 = vmatprep.mubr.bf16.mxu1 %v13586_v27  ;;  %20839 = vst [vmem:[#allocation55_spill] sm:$0xff] %v17350_v42  ;;  %v5009_v15 = vadd.f32 %v12278_v3, %v12184_v21  ;;  %v5214_v33 = vcombine.high %v5006_v13, %v5006_v13  ;;  %v17370_v27 = vrot.slane %v5162_v29, 7  ;;  %v17375_v37 = vrot.slane %v5196_v12, 7 }
 0x2cf   :  { %v17360_v23 = vrot.slane %v20840_v8, 2  ;;  %v17364_v56 = vrot.slane %v5006_v13, %v14719_v25  ;;  %v5195_v24 = vcombine.high %v17328_v39, %v17328_v39  ;;  %v20841_v29 = vrot.slane %v17294_v49, 7 }
 0x2d0   :  { %v12185_v4 = vpop.f32.mrb[228].mxu0  ;;  %v12279_v18 = vpop.f32.mrb[228].mxu1  ;;  %v5213_v21 = vcombine.high %v17356_v46, %v17356_v46  ;;  %v5212_v13 = vcombine.high %v17341_v54, %v17341_v54 }
 0x2d1   :  { %v12186_v3 = vpop.f32.mrb[229].mxu0  ;;  %v12280_v8 = vpop.f32.mrb[229].mxu1  ;;  %v17381_v61 = vrot.slane %v20841_v29, 2  ;;  %v17395_v29 = vrot.slane %v5009_v15, %v14719_v25  ;;  %v17405_v14 = vrot.slane %v5195_v24, 9 }
 0x2d2   :  { %v12187_v63 = vadd.f32 %v12186_v3, %v12185_v4  ;;  %v12281_v42 = vadd.f32 %v12280_v8, %v12279_v18  ;;  %v12188_v7 = vpop.f32.mrb[230].mxu0  ;;  %v12282_v51 = vpop.f32.mrb[230].mxu1  ;;  %v17389_v4 = vrot.slane %v5214_v33, %v14719_v25  ;;  %v5229_v18 = vcombine.high %v17364_v56, %v17364_v56  ;;  %v13588_v33 = vld [vmem:[%s20246_s0 + $0xc8] ss:$16 sps:$4 sm:$0xff]  }
 0x2d3   :  { %v12189_v48 = vpop.f32.mrb[231].mxu0  ;;  %v12283_v12 = vpop.f32.mrb[231].mxu1  ;;  %v5231_v3 = vcombine.high %v5009_v15, %v5009_v15  ;;  %v20842_v8 = vrot.slane %v17313_v17, 7  ;;  %v17422_v15 = vrot.slane %v5213_v21, 7 }
 0x2d4   :  { %v17397_v62 = vadd.f32 %v12281_v42, %v12187_v63  ;;  %v12190_v22 = vadd.f32 %v12189_v48, %v12188_v7  ;;  %v20843_v48 = vrot.slane %v17341_v54, 7  ;;  %v13590_v63 = vld [vmem:[%s20246_s0 + $0xec] ss:$16 sps:$4 sm:$0xff]   ;;  %v17430_v42 = vrot.slane %v5212_v13, 7 }
 0x2d5   :  { %7124 = vmatmul.mubr.bf16.gmra.mrb[80].mxu0 %v13587_v1  ;;  %7256 = vmatmul.mubr.bf16.gmra.mrb[80].mxu1 %v13588_v33  ;;  %v17409_v60 = vrot.slane %v20842_v8, 2  ;;  %v13589_v1 = vld [vmem:[%s20246_s0 + $0xe4] ss:$16 sps:$4 sm:$0xff]   ;;  %v12284_v8 = vadd.f32 %v12283_v12, %v12282_v51  ;;  %v20844_v33 = vrot.slane %v17270_v57, 7  ;;  %v5230_v34 = vcombine.high %v17389_v4, %v17389_v4 }
 0x2d6   :  { %v17414_v7 = vrot.slane %v20843_v48, 2  ;;  %7130 = vmatprep.mubr.bf16.mxu0 %v13589_v1  ;;  %7262 = vmatprep.mubr.bf16.mxu1 %v13590_v63  ;;  %v5482_v51 = vsel %vm15056_vm6, %v17360_v23, %v17324_v44  ;;  %v17439_v21 = vrot.slane %v5229_v18, 7  ;;  %v17442_v57 = vrot.slane %v5231_v3, %v14719_v25 }
 0x2d7   :  { %v5479_v48 = vsel %vm15056_vm6, %v17303_v50, %v20844_v33  ;;  %v5246_v50 = vcombine.high %v17395_v29, %v17395_v29  ;;  %v17446_v13 = vadd.f32 %v12284_v8, %v12190_v22  ;;  %v5488_v44 = vsel %vm15056_vm6, %v17368_v38, %v17370_v27 }
 0x2d8   :  { %v12191_v2 = vpop.f32.mrb[232].mxu0  ;;  %v12285_v63 = vpop.f32.mrb[232].mxu1  ;;  %v17457_v23 = vadd.f32 %v5479_v48, %v16830_v52  ;;  %v17460_v22 = vadd.f32 %v5482_v51, %v16834_v9  ;;  %v5519_v18 = vrot.slane %v17422_v15, 2  ;;  %v20847_v3 = vrot.slane %v17364_v56, 7 }
 0x2d9   :  { %v12192_v12 = vpop.f32.mrb[233].mxu0  ;;  %v12286_v33 = vpop.f32.mrb[233].mxu1  ;;  %v20845_v63 = vrot.slane %v17291_v20, 7  ;;  %v5526_v20 = vrot.slane %v17389_v4, 7  ;;  %v17474_v9 = vadd.f32 %v5488_v44, %v16844_v40  ;;  %v5525_v48 = vrot.slane %v17439_v21, 2 }
 0x2da   :  { %v12194_v1 = vpop.f32.mrb[234].mxu0  ;;  %v12288_v2 = vpop.f32.mrb[234].mxu1  ;;  %20846 = vst [vmem:[#allocation56_spill] sm:$0xff] %v17460_v22  ;;  %v17465_v8 = vrot.slane %v20847_v3, 2  ;;  %v17477_v51 = vrot.slane %v5230_v34, 9  ;;  %v5530_v3 = vrot.slane %v17395_v29, 7 }
 0x2db   :  { %v5485_v24 = vsel %vm15056_vm6, %v5483_v53, %v20845_v63  ;;  %v5248_v53 = vcombine.high %v17397_v62, %v17397_v62  ;;  %v12195_v12 = vpop.f32.mrb[235].mxu0  ;;  %v12289_v33 = vpop.f32.mrb[235].mxu1  ;;  %20849 = vst [vmem:[#allocation22_spill] sm:$0xff] %v17474_v9  ;;  %v5247_v63 = vcombine.high %v17442_v57, %v17442_v57  ;;  %v17488_v40 = vrot.slane %v5246_v50, 7  ;;  %v13593_v34 = vld [vmem:[%s20246_s0 + $0x104] ss:$16 sps:$4 sm:$0xff]  }
 0x2dc   :  { %v12196_v38 = vadd.f32 %v12195_v12, %v12194_v1  ;;  %v12290_v27 = vadd.f32 %v12289_v33, %v12288_v2  ;;  %v17471_v52 = vadd.f32 %v5485_v24, %v16841_v10  ;;  %v13591_v1 = vld [vmem:[%s20246_s0 + $0xe0] ss:$16 sps:$4 sm:$0xff]   ;;  %v13592_v10 = vld [vmem:[%s20246_s0 + $0xe8] ss:$16 sps:$4 sm:$0xff]   ;;  %v13594_v2 = vld [vmem:[%s20246_s0 + $0x10c] ss:$16 sps:$4 sm:$0xff]  }
 0x2dd   :  { %7131 = vmatmul.mubr.bf16.gmra.mrb[84].mxu0 %v13591_v1  ;;  %7263 = vmatmul.mubr.bf16.gmra.mrb[84].mxu1 %v13592_v10  ;;  %v20850_v44 = vrot.slane %v17275_v58, 9  ;;  %v20851_v50 = vrot.slane %v17294_v49, 7  ;;  %v20852_v33 = vrot.slane %v17336_v26, 2  ;;  %v5498_v1 = vsel %vm15056_vm6, %v17381_v61, %v17353_v30 }
 0x2de   :  { %20848 = vst [vmem:[#allocation57_spill] sm:$0xff] %v17471_v52  ;;  %v5024_v24 = vadd.f32 %v12290_v27, %v12196_v38  ;;  %7137 = vmatprep.mubr.bf16.mxu0 %v13593_v34  ;;  %7269 = vmatprep.mubr.bf16.mxu1 %v13594_v2  ;;  %v17509_v27 = vrot.slane %v17397_v62, %v14719_v25  ;;  %v20856_v62 = vrot.slane %v17328_v39, 7  ;;  %v5532_v4 = vrot.slane %v5530_v3, 2 }
 0x2df   :  { %v5492_v12 = vsel %vm15056_vm6, %v20850_v44, %v17336_v26  ;;  %v5495_v38 = vsel %vm15056_vm6, %v20852_v33, %v20851_v50  ;;  %v17522_v49 = vrot.slane %v5248_v53, %v14719_v25  ;;  %v17525_v2 = vadd.f32 %v5498_v1, %v16857_v28 }
 0x2e0   :  { %v17516_v58 = vadd.f32 %v5492_v12, %v16848_v31  ;;  %v17519_v10 = vadd.f32 %v5495_v38, %v16860_v36  ;;  %v12197_v26 = vpop.f32.mrb[236].mxu0  ;;  %v12291_v34 = vpop.f32.mrb[236].mxu1  ;;  %v20857_v44 = vrot.slane %v17353_v30, 2  ;;  %v20858_v31 = vrot.slane %v17313_v17, 7 }
 0x2e1   :  { %20855 = vst [vmem:[#allocation58_spill] sm:$0xff] %v17525_v2  ;;  %v12198_v53 = vpop.f32.mrb[237].mxu0  ;;  %v12292_v12 = vpop.f32.mrb[237].mxu1  ;;  %v5508_v28 = vsel %vm15056_vm6, %v17409_v60, %v17375_v37  ;;  %v20861_v50 = vrot.slane %v17341_v54, 7  ;;  %v20862_v17 = vrot.slane %v17375_v37, 2  ;;  %v5272_v33 = vcombine.high %v5024_v24, %v5024_v24  ;;  %v20866_v24 = vld [vmem:[#allocation19_spill] sm:$0xff] }
 0x2e2   :  { %20853 = vst [vmem:[#allocation59_spill] sm:$0xff] %v17516_v58  ;;  %20854 = vst [vmem:[#allocation72_spill] sm:$0xff] %v17519_v10  ;;  %v5501_v61 = vsel %vm15056_vm6, %v20857_v44, %v20856_v62  ;;  %v5505_v36 = vsel %vm15056_vm6, %v17405_v14, %v20858_v31  ;;  %v12199_v38 = vadd.f32 %v12198_v53, %v12197_v26  ;;  %v12200_v62 = vpop.f32.mrb[238].mxu0  ;;  %v12294_v44 = vpop.f32.mrb[238].mxu1  ;;  %v20863_v31 = vld [vmem:[#allocation35_spill] sm:$0xff]  ;;  %v20865_v37 = vrot.slane %v17356_v46, 9 }
 0x2e3   :  { %v17543_v39 = vadd.f32 %v5501_v61, %v16867_v16  ;;  %v17546_v30 = vadd.f32 %v5505_v36, %v16877_v55  ;;  %v5511_v14 = vsel %vm15056_vm6, %v20862_v17, %v20861_v50  ;;  %v12293_v1 = vadd.f32 %v12292_v12, %v12291_v34  ;;  %v12201_v16 = vpop.f32.mrb[239].mxu0  ;;  %v12295_v61 = vpop.f32.mrb[239].mxu1  ;;  %v13595_v46 = vld [vmem:[%s20246_s0 + $0x100] ss:$16 sps:$4 sm:$0xff]   ;;  %v20871_v50 = vld [vmem:[#allocation34_spill] sm:$0xff] }
 0x2e4   :  { %v17555_v60 = vadd.f32 %v5508_v28, %v20863_v31  ;;  %v5514_v55 = vsel %vm15056_vm6, %v17414_v7, %v17430_v42  ;;  %v5518_v54 = vsel %vm15056_vm6, %v20865_v37, %v17422_v15  ;;  %v17567_v26 = vadd.f32 %v5511_v14, %v20866_v24  ;;  %v20869_v15 = vld [vmem:[#allocation31_spill] sm:$0xff]  ;;  %v13598_v31 = vld [vmem:[%s20246_s0 + $0x12c] ss:$16 sps:$4 sm:$0xff]  }
 0x2e5   :  { %20859 = vst [vmem:[#allocation25_spill] sm:$0xff] %v17543_v39  ;;  %20860 = vst [vmem:[#allocation60_spill] sm:$0xff] %v17546_v30  ;;  %v20868_v34 = vrot.slane %v17364_v56, 7  ;;  %v5263_v53 = vcombine.high %v17509_v27, %v17509_v27  ;;  %v5029_v12 = vadd.f32 %v12293_v1, %v12199_v38  ;;  %v12202_v28 = vadd.f32 %v12201_v16, %v12200_v62  ;;  %v13596_v56 = vld [vmem:[%s20246_s0 + $0x108] ss:$16 sps:$4 sm:$0xff]  }
 0x2e6   :  { %20864 = vst [vmem:[#allocation24_spill] sm:$0xff] %v17555_v60  ;;  %20867 = vst [vmem:[#allocation73_spill] sm:$0xff] %v17567_v26  ;;  %v12296_v42 = vadd.f32 %v12295_v61, %v12294_v44  ;;  %v5536_v7 = vrot.slane %v17442_v57, 7  ;;  %7138 = vmatmul.mubr.bf16.gmra.mrb[88].mxu0 %v13595_v46  ;;  %7270 = vmatmul.mubr.bf16.gmra.mrb[88].mxu1 %v13596_v56  ;;  %v17586_v17 = vadd.f32 %v5518_v54, %v20871_v50  ;;  %v13597_v44 = vld [vmem:[%s20246_s0 + $0x124] ss:$16 sps:$4 sm:$0xff]  }
 0x2e7   :  { %v5521_v36 = vsel %vm15056_vm6, %v5519_v18, %v20868_v34  ;;  %v17583_v18 = vadd.f32 %v5514_v55, %v20869_v15  ;;  %v5524_v14 = vsel %vm15056_vm6, %v17465_v8, %v17439_v21  ;;  %v5264_v38 = vcombine.high %v17522_v49, %v17522_v49  ;;  %7145 = vmatprep.mubr.bf16.mxu0 %v13597_v44  ;;  %v20875_v61 = vld [vmem:[#allocation21_spill] sm:$0xff] }
 0x2e8   :  { %20872 = vst [vmem:[#allocation75_spill] sm:$0xff] %v17586_v17  ;;  %v17595_v1 = vrot.slane %v5272_v33, %v14719_v25  ;;  %v5032_v62 = vadd.f32 %v12296_v42, %v12202_v28  ;;  %7277 = vmatprep.mubr.bf16.mxu1 %v13598_v31  ;;  %v5527_v8 = vsel %vm15056_vm6, %v5525_v48, %v5526_v20  ;;  %v20873_v33 = vld [vmem:[#allocation36_spill] sm:$0xff]  ;;  %v12203_v48 = vpop.f32.mrb[240].mxu0  ;;  %v12297_v24 = vpop.f32.mrb[240].mxu1  ;;  %v5535_v34 = vrot.slane %v17488_v40, 2 }
 0x2e9   :  { %20870 = vst [vmem:[#allocation61_spill] sm:$0xff] %v17583_v18  ;;  %v17610_v16 = vadd.f32 %v5521_v36, %v20873_v33  ;;  %v17613_v55 = vadd.f32 %v5524_v14, %v20875_v61  ;;  %v5531_v37 = vsel %vm15056_vm6, %v17477_v51, %v5530_v3  ;;  %v5281_v54 = vcombine.high %v5029_v12, %v5029_v12  ;;  %v12204_v42 = vpop.f32.mrb[241].mxu0  ;;  %v12298_v46 = vpop.f32.mrb[241].mxu1  ;;  %v20882_v33 = vld [vmem:[#allocation39_spill] sm:$0xff]  ;;  %v20891_v17 = vld [vmem:[#allocation40_spill] sm:$0xff] }
 0x2ea   :  { %v17623_v21 = vrot.slane %v5029_v12, %v14719_v25  ;;  %v5298_v20 = vcombine.high %v5032_v62, %v5032_v62  ;;  %v5538_v36 = vrot.slane %v5536_v7, 2  ;;  %v17626_v28 = vrot.slane %v5263_v53, 7  ;;  %v12206_v15 = vpop.f32.mrb[242].mxu0  ;;  %v12300_v50 = vpop.f32.mrb[242].mxu1  ;;  %v13607_v30 = vld [vmem:[%s20246_s0 + $0x160] ss:$16 sps:$4 sm:$0xff]  }
 0x2eb   :  { %20874 = vst [vmem:[#allocation74_spill] sm:$0xff] %v17610_v16  ;;  %20876 = vst [vmem:[#allocation76_spill] sm:$0xff] %v17613_v55  ;;  %v17629_v56 = vadd.f32 %v5527_v8, %v16902_v45  ;;  %v5539_v29 = vrot.slane %v5247_v63, 7  ;;  %v20326_v3 = vrot.slane %v17522_v49, 7  ;;  %v5271_v12 = vrot.slane %v17446_v13, %v14719_v25  ;;  %v12207_v57 = vpop.f32.mrb[243].mxu0  ;;  %v12301_v63 = vpop.f32.mrb[243].mxu1 }
 0x2ec   :  { %v17638_v53 = vrot.slane %v5264_v38, 7  ;;  %v5280_v14 = vcombine.high %v17595_v1, %v17595_v1  ;;  %v17643_v45 = vrot.slane %v5032_v62, %v14719_v25  ;;  %v12205_v44 = vadd.f32 %v12204_v42, %v12203_v48  ;;  %v13599_v1 = vld [vmem:[%s20246_s0 + $0x120] ss:$16 sps:$4 sm:$0xff]   ;;  %v13600_v62 = vld [vmem:[%s20246_s0 + $0x128] ss:$16 sps:$4 sm:$0xff]  }
 0x2ed   :  { %20877 = vst [vmem:[#allocation77_spill] sm:$0xff] %v17629_v56  ;;  %v17646_v31 = vrot.slane %v5281_v54, %v14719_v25  ;;  %v5296_v8 = vcombine.high %v17623_v21, %v17623_v21  ;;  %v17651_v13 = vrot.slane %v5298_v20, %v14719_v25  ;;  %v12299_v38 = vadd.f32 %v12298_v46, %v12297_v24  ;;  %v13601_v46 = vld [vmem:[%s20246_s0 + $0x144] ss:$16 sps:$4 sm:$0xff]  }
 0x2ee   :  { %v12208_v61 = vadd.f32 %v12207_v57, %v12206_v15  ;;  %7146 = vmatmul.mubr.bf16.gmra.mrb[92].mxu0 %v13599_v1  ;;  %7278 = vmatmul.mubr.bf16.gmra.mrb[92].mxu1 %v13600_v62  ;;  %v5534_v54 = vsel %vm15056_vm6, %v5532_v4, %v17488_v40  ;;  %v5537_v20 = vsel %vm15056_vm6, %v5535_v34, %v5536_v7  ;;  %v17667_v48 = vrot.slane %v20326_v3, 2  ;;  %v13602_v15 = vld [vmem:[%s20246_s0 + $0x14c] ss:$16 sps:$4 sm:$0xff]  }
 0x2ef   :  { %v5037_v24 = vadd.f32 %v12299_v38, %v12205_v44  ;;  %v12302_v42 = vadd.f32 %v12301_v63, %v12300_v50  ;;  %7153 = vmatprep.mubr.bf16.mxu0 %v13601_v46  ;;  %7285 = vmatprep.mubr.bf16.mxu1 %v13602_v15  ;;  %v5540_v40 = vsel %vm15056_vm6, %v5538_v36, %v5539_v29  ;;  %v17678_v4 = vrot.slane %v5271_v12, 7  ;;  %v20878_v50 = vld [vmem:[#allocation20_spill] sm:$0xff]  ;;  %v20880_v46 = vld [vmem:[#allocation38_spill] sm:$0xff] }
 0x2f0   :  { %v5313_v34 = vcombine.high %v17643_v45, %v17643_v45  ;;  %v17683_v44 = vadd.f32 %v5531_v37, %v20878_v50  ;;  %v5314_v63 = vcombine.high %v17651_v13, %v17651_v13  ;;  %v12209_v1 = vpop.f32.mrb[244].mxu0  ;;  %v12303_v62 = vpop.f32.mrb[244].mxu1  ;;  %v17689_v36 = vadd.f32 %v5534_v54, %v20880_v46  ;;  %v20884_v37 = vld [vmem:[#allocation37_spill] sm:$0xff] }
 0x2f1   :  { %v5040_v38 = vadd.f32 %v12302_v42, %v12208_v61  ;;  %v17691_v29 = vrot.slane %v5296_v8, 7  ;;  %v5315_v12 = vcombine.high %v5037_v24, %v5037_v24  ;;  %v12210_v15 = vpop.f32.mrb[245].mxu0  ;;  %v12304_v7 = vpop.f32.mrb[245].mxu1  ;;  %v17694_v3 = vadd.f32 %v5537_v20, %v20882_v33 }
 0x2f2   :  { %20879 = vst [vmem:[#allocation78_spill] sm:$0xff] %v17683_v44  ;;  %20881 = vst [vmem:[#allocation79_spill] sm:$0xff] %v17689_v36  ;;  %v17697_v50 = vadd.f32 %v5540_v40, %v20884_v37  ;;  %v17699_v51 = vrot.slane %v5280_v14, 9  ;;  %v5297_v61 = vcombine.high %v17646_v31, %v17646_v31  ;;  %v12212_v46 = vpop.f32.mrb[246].mxu0  ;;  %v12306_v8 = vpop.f32.mrb[246].mxu1  ;;  %v17704_v57 = vrot.slane %v5313_v34, 7 }
 0x2f3   :  { %20883 = vst [vmem:[#allocation30_spill] sm:$0xff] %v17694_v3  ;;  %v5332_v54 = vcombine.high %v5040_v38, %v5040_v38  ;;  %v20327_v36 = vrot.slane %v17651_v13, 7  ;;  %v12211_v44 = vadd.f32 %v12210_v15, %v12209_v1  ;;  %v12305_v33 = vadd.f32 %v12304_v7, %v12303_v62  ;;  %v12213_v20 = vpop.f32.mrb[247].mxu0  ;;  %v12307_v3 = vpop.f32.mrb[247].mxu1  ;;  %v13603_v62 = vld [vmem:[%s20246_s0 + $0x140] ss:$16 sps:$4 sm:$0xff]  }
 0x2f4   :  { %20885 = vst [vmem:[#allocation81_spill] sm:$0xff] %v17697_v50  ;;  %v20886_v40 = vrot.slane %v17623_v21, 7  ;;  %v17712_v50 = vrot.slane %v5314_v63, 7  ;;  %v17715_v42 = vrot.slane %v5037_v24, %v14719_v25  ;;  %v17719_v56 = vrot.slane %v5315_v12, %v14719_v25  ;;  %v13604_v63 = vld [vmem:[%s20246_s0 + $0x148] ss:$16 sps:$4 sm:$0xff]  }
 0x2f5   :  { %v5045_v1 = vadd.f32 %v12305_v33, %v12211_v44  ;;  %v12214_v7 = vadd.f32 %v12213_v20, %v12212_v46  ;;  %v20887_v24 = vrot.slane %v17646_v31, 7  ;;  %v17734_v12 = vrot.slane %v5332_v54, %v14719_v25  ;;  %v13605_v44 = vld [vmem:[%s20246_s0 + $0x164] ss:$16 sps:$4 sm:$0xff]   ;;  %v13606_v46 = vld [vmem:[%s20246_s0 + $0x16c] ss:$16 sps:$4 sm:$0xff]  }
 0x2f6   :  { %v17709_v14 = vrot.slane %v20886_v40, 2  ;;  %7154 = vmatmul.mubr.bf16.gmra.mrb[96].mxu0 %v13603_v62  ;;  %7286 = vmatmul.mubr.bf16.gmra.mrb[96].mxu1 %v13604_v63  ;;  %v17731_v40 = vrot.slane %v5297_v61, 7  ;;  %v20888_v33 = vrot.slane %v17509_v27, 9  ;;  %v17750_v54 = vrot.slane %v20327_v36, 2 }
 0x2f7   :  { %v17729_v15 = vrot.slane %v20887_v24, 2  ;;  %7161 = vmatprep.mubr.bf16.mxu0 %v13605_v44  ;;  %7293 = vmatprep.mubr.bf16.mxu1 %v13606_v46  ;;  %v17753_v62 = vrot.slane %v5040_v38, %v14719_v25  ;;  %v17756_v63 = vrot.slane %v5045_v1, %v14719_v25  ;;  %v5330_v27 = vcombine.high %v17715_v42, %v17715_v42 }
 0x2f8   :  { %v5544_v61 = vsel %vm15056_vm6, %v20888_v33, %v17626_v28  ;;  %v12308_v46 = vadd.f32 %v12307_v3, %v12306_v8  ;;  %v12215_v33 = vpop.f32.mrb[248].mxu0  ;;  %v12309_v20 = vpop.f32.mrb[248].mxu1  ;;  %v5331_v36 = vcombine.high %v17719_v56, %v17719_v56  ;;  %v5349_v37 = vcombine.high %v5045_v1, %v5045_v1 }
 0x2f9   :  { %v12216_v34 = vpop.f32.mrb[249].mxu0  ;;  %v12310_v38 = vpop.f32.mrb[249].mxu1  ;;  %v20889_v55 = vrot.slane %v17522_v49, 7  ;;  %v20890_v16 = vrot.slane %v17626_v28, 2  ;;  %v17771_v18 = vadd.f32 %v5544_v61, %v20891_v17  ;;  %v5348_v3 = vcombine.high %v17734_v12, %v17734_v12 }
 0x2fa   :  { %v5048_v8 = vadd.f32 %v12308_v46, %v12214_v7  ;;  %v12217_v44 = vadd.f32 %v12216_v34, %v12215_v33  ;;  %v12311_v60 = vadd.f32 %v12310_v38, %v12309_v20  ;;  %v12218_v26 = vpop.f32.mrb[250].mxu0  ;;  %v12312_v1 = vpop.f32.mrb[250].mxu1  ;;  %v5347_v49 = vcombine.high %v17753_v62, %v17753_v62 }
 0x2fb   :  { %v5547_v24 = vsel %vm15056_vm6, %v20890_v16, %v20889_v55  ;;  %20892 = vst [vmem:[#allocation80_spill] sm:$0xff] %v17771_v18  ;;  %v5364_v28 = vcombine.high %v17756_v63, %v17756_v63  ;;  %v12219_v16 = vpop.f32.mrb[251].mxu0  ;;  %v12313_v55 = vpop.f32.mrb[251].mxu1  ;;  %v5550_v17 = vsel %vm15056_vm6, %v17667_v48, %v17638_v53  ;;  %v20330_v46 = vrot.slane %v17753_v62, 7  ;;  %v13608_v48 = vld [vmem:[%s20246_s0 + $0x168] ss:$16 sps:$4 sm:$0xff]  }
 0x2fc   :  { %v5366_v7 = vcombine.high %v5048_v8, %v5048_v8  ;;  %v17785_v34 = vrot.slane %v5048_v8, %v14719_v25  ;;  %v5053_v61 = vadd.f32 %v12311_v60, %v12217_v44  ;;  %v12220_v20 = vadd.f32 %v12219_v16, %v12218_v26  ;;  %v20893_v8 = vld [vmem:[#allocation23_spill] sm:$0xff]  ;;  %v20895_v16 = vld [vmem:[#allocation26_spill] sm:$0xff] }
 0x2fd   :  { %v17789_v33 = vrot.slane %v5349_v37, %v14719_v25  ;;  %v12314_v38 = vadd.f32 %v12313_v55, %v12312_v1  ;;  %v17798_v18 = vadd.f32 %v5547_v24, %v20893_v8  ;;  %v17800_v60 = vrot.slane %v5331_v36, 7 }
 0x2fe   :  { %7162 = vmatmul.mubr.bf16.gmra.mrb[100].mxu0 %v13607_v30  ;;  %7294 = vmatmul.mubr.bf16.gmra.mrb[100].mxu1 %v13608_v48  ;;  %v17802_v26 = vrot.slane %v5348_v3, 7  ;;  %v17806_v44 = vrot.slane %v5366_v7, %v14719_v25  ;;  %v5381_v30 = vcombine.high %v17785_v34, %v17785_v34  ;;  %v17813_v24 = vadd.f32 %v5550_v17, %v20895_v16 }
 0x2ff   :  { %20894 = vst [vmem:[#allocation27_spill] sm:$0xff] %v17798_v18  ;;  %7169 = vmatprep.mubr.bf16.mxu0 %v20699_v6  ;;  %7301 = vmatprep.mubr.bf16.mxu1 %v20805_v19  ;;  %v5056_v1 = vadd.f32 %v12314_v38, %v12220_v20  ;;  %v20897_v36 = vrot.slane %v17638_v53, 2  ;;  %v17820_v55 = vrot.slane %v5330_v27, 9  ;;  %v20898_v7 = vrot.slane %v17719_v56, 7 }
 0x300   :  { %20896 = vst [vmem:[#allocation18_spill] sm:$0xff] %v17813_v24  ;;  %v17827_v37 = vrot.slane %v5364_v28, 7  ;;  %v12221_v20 = vpop.f32.mrb[252].mxu0  ;;  %v12315_v38 = vpop.f32.mrb[252].mxu1  ;;  %v17831_v17 = vrot.slane %v20330_v46, 2  ;;  %v5365_v53 = vcombine.high %v17789_v33, %v17789_v33  ;;  %v17837_v27 = vrot.slane %v5053_v61, %v14719_v25 }
 0x301   :  { %v5553_v3 = vsel %vm15056_vm6, %v20897_v36, %v17678_v4  ;;  %v17824_v48 = vrot.slane %v20898_v7, 2  ;;  %v12222_v16 = vpop.f32.mrb[253].mxu0  ;;  %v12316_v36 = vpop.f32.mrb[253].mxu1  ;;  %v17840_v28 = vrot.slane %v5347_v49, 7  ;;  %v5383_v19 = vcombine.high %v5053_v61, %v5053_v61 }
 0x302   :  { %v12224_v6 = vpop.f32.mrb[254].mxu0  ;;  %v12318_v46 = vpop.f32.mrb[254].mxu1  ;;  %v20899_v24 = vrot.slane %v17756_v63, 7  ;;  %v17848_v39 = vrot.slane %v5381_v30, 7  ;;  %v20332_v2 = vrot.slane %v17806_v44, 7  ;;  %v5400_v7 = vcombine.high %v5056_v1, %v5056_v1 }
 0x303   :  { %v12225_v58 = vpop.f32.mrb[255].mxu0  ;;  %v12319_v10 = vpop.f32.mrb[255].mxu1  ;;  %v12223_v9 = vadd.f32 %v12222_v16, %v12221_v20  ;;  %v12317_v8 = vadd.f32 %v12316_v36, %v12315_v38  ;;  %v17852_v61 = vrot.slane %v5365_v53, 9  ;;  %v5382_v52 = vcombine.high %v17806_v44, %v17806_v44  ;;  %v13609_v16 = vld [vmem:[%s20246_s0 + $0x4] ss:$16 sps:$4 sm:$0xff]  }
 0x304   :  { %v17845_v18 = vrot.slane %v20899_v24, 2  ;;  %v20900_v24 = vrot.slane %v17785_v34, 7  ;;  %v5398_v30 = vcombine.high %v17837_v27, %v17837_v27  ;;  %v17865_v49 = vrot.slane %v5383_v19, %v14719_v25  ;;  %v13610_v36 = vld [vmem:[%s20246_s0 + $0xc] ss:$16 sps:$4 sm:$0xff]   ;;  %v20901_v20 = vld [vmem:[#allocation13_spill] sm:$0xff] }
 0x305   :  { %v5061_v38 = vadd.f32 %v12317_v8, %v12223_v9  ;;  %v12226_v53 = vadd.f32 %v12225_v58, %v12224_v6  ;;  %v17877_v19 = vrot.slane %v20332_v2, 2  ;;  %v12320_v4 = vadd.f32 %v12319_v10, %v12318_v46 }
 0x306   :  { %v17858_v22 = vrot.slane %v20900_v24, 2  ;;  %7170 = vmatmul.mubr.bf16.gmra.mrb[104].mxu0 %v20704_v32  ;;  %7302 = vmatmul.mubr.bf16.gmra.mrb[104].mxu1 %v20705_v0  ;;  %v17880_v9 = vadd.f32 %v5553_v3, %v20901_v20  ;;  %v17883_v6 = vrot.slane %v5056_v1, %v14719_v25  ;;  %v17886_v58 = vrot.slane %v5400_v7, %v14719_v25 }
 0x307   :  { %8079 = vmatprep.mubr.bf16.mxu0 %v13609_v16  ;;  %8211 = vmatprep.mubr.bf16.mxu1 %v13610_v36  ;;  %v5417_v8 = vcombine.high %v5061_v38, %v5061_v38  ;;  %v20902_v36 = vrot.slane %v17623_v21, 7  ;;  %v17893_v2 = vrot.slane %v5398_v30, 7  ;;  %v17896_v10 = vrot.slane %v5061_v38, %v14719_v25  ;;  %v13418_v38 = vld [vmem:[%s20247_s1 + $0x880] sm:$0xff]   ;;  %v20906_v21 = vld [vmem:[#allocation11_spill] sm:$0xff] }
 0x308   :  { %v12227_v16 = vpop.f32.mrb[0].mxu0  ;;  %v12321_v0 = vpop.f32.mrb[0].mxu1  ;;  %v5064_v46 = vadd.f32 %v12320_v4, %v12226_v53  ;;  %v5560_v7 = vsel %vm15056_vm6, %v17709_v14, %v17691_v29  ;;  %v13417_v4 = vld [vmem:[%s20247_s1 + $0x800] sm:$0xff]   ;;  %v20903_v14 = vrot.slane %v17646_v31, 7  ;;  %v20904_v53 = vrot.slane %v17691_v29, 2 }
 0x309   :  { %v5557_v24 = vsel %vm15056_vm6, %v17699_v51, %v20902_v36  ;;  %v12228_v1 = vpop.f32.mrb[1].mxu0  ;;  %v12322_v3 = vpop.f32.mrb[1].mxu1  ;;  %v5399_v0 = vcombine.high %v17865_v49, %v17865_v49  ;;  %v17906_v51 = vrot.slane %v5417_v8, %v14719_v25  ;;  %v17928_v32 = vadd.f32 %v5560_v7, %v20906_v21  ;;  %v17952_v21 = vld [vmem:[%s20246_s0] ss:$16 sps:$4 sm:$0xff]  }
 0x30a   :  { %v12230_v30 = vpop.f32.mrb[2].mxu0  ;;  %v12324_v20 = vpop.f32.mrb[2].mxu1  ;;  %v5563_v16 = vsel %vm15056_vm6, %v20904_v53, %v20903_v14  ;;  %v5434_v36 = vcombine.high %v5064_v46, %v5064_v46  ;;  %v5566_v3 = vsel %vm15056_vm6, %v17729_v15, %v17731_v40  ;;  %v17930_v31 = vrot.slane %v5382_v52, 7  ;;  %v13419_v15 = vld [vmem:[%s20247_s1 + $0x848] sm:$0xff]   ;;  %20907 = vst [vmem:[#allocation29_spill] sm:$0xff] %v17952_v21 }
 0x30b   :  { %v12231_v8 = vpop.f32.mrb[3].mxu0  ;;  %v12325_v1 = vpop.f32.mrb[3].mxu1  ;;  %v20905_v30 = vld [vmem:[#allocation10_spill] sm:$0xff]  ;;  %v5415_v29 = vcombine.high %v17883_v6, %v17883_v6  ;;  %v5416_v14 = vcombine.high %v17886_v58, %v17886_v58  ;;  %v17947_v7 = vrot.slane %v5064_v46, %v14719_v25  ;;  %v20910_v46 = vrot.slane %v17865_v49, 7 }
 0x30c   :  { %v17925_v20 = vadd.f32 %v5557_v24, %v20905_v30  ;;  %v13420_v40 = vld [vmem:[%s20247_s1 + $0x8c8] sm:$0xff]   ;;  %v17962_v1 = vadd.f32 %v5563_v16, %v16954_v35  ;;  %v17975_v24 = vadd.f32 %v5566_v3, %v16957_v41  ;;  %v20912_v35 = vrot.slane %v17643_v45, 9  ;;  %v17998_v45 = vld [vmem:[%s20246_s0 + $0x24] ss:$16 sps:$4 sm:$0xff]  }
 0x30d   :  { %v17958_v8 = vld [vmem:[%s20246_s0 + $0x8] ss:$16 sps:$4 sm:$0xff]   ;;  %v17966_v30 = vrot.slane %v20910_v46, 2  ;;  %v17993_v41 = vrot.slane %v5434_v36, %v14719_v25  ;;  %20915 = vst [vmem:[#allocation31_spill] sm:$0xff] %v17998_v45  ;;  %v5576_v36 = vsel %vm15056_vm6, %v17750_v54, %v17712_v50  ;;  %v18017_v3 = vrot.slane %v5415_v29, 9 }
 0x30e   :  { %8080 = vmatmul.mubr.bf16.vlgmr.msra.gmra.mrb[108].mxu0 %v17952_v21  ;;  %20908 = vst [vmem:[#allocation28_spill] sm:$0xff] %v17958_v8  ;;  %8212 = vmatmul.mubr.bf16.vlgmr.msra.gmra.mrb[108].mxu1 %v17958_v8  ;;  %20909 = vst [vmem:[#allocation35_spill] sm:$0xff] %v17962_v1  ;;  %v13421_v53 = vld [vmem:[%s20247_s1 + $0x808] sm:$0xff]   ;;  %v5570_v16 = vsel %vm15056_vm6, %v20912_v35, %v17704_v57  ;;  %v17988_v8 = vrot.slane %v5399_v0, 7  ;;  %v13424_v0 = vld [vmem:[%s20247_s1 + $0x8d0] sm:$0xff]   ;;  %v20918_v29 = vrot.slane %v17715_v42, 7 }
 0x30f   :  { %12892 = vmatpush3.bf16.msra.mxu0 %v13417_v4  ;;  %12986 = vmatpush3.bf16.msra.mxu1 %v13418_v38  ;;  %v13422_v52 = vld [vmem:[%s20247_s1 + $0x888] sm:$0xff]   ;;  %20911 = vst [vmem:[#allocation19_spill] sm:$0xff] %v17975_v24  ;;  %v20913_v4 = vrot.slane %v17651_v13, 7  ;;  %v20914_v38 = vrot.slane %v17704_v57, 2  ;;  %v13423_v57 = vld [vmem:[%s20247_s1 + $0x850] sm:$0xff]  }
 0x310   :  { %8085 = vmatprep.mubr.bf16.mxu0 %v17998_v45  ;;  %v18004_v13 = vld [vmem:[%s20246_s0 + $0x2c] ss:$16 sps:$4 sm:$0xff]   ;;  %v12343_v35 = vpop.f32.mrb[4].mxu0  ;;  %12893 = vmatprep.subr.bf16.mxu0 %v13419_v15 }
 0x311   :  { %v5573_v46 = vsel %vm15056_vm6, %v20914_v38, %v20913_v4  ;;  %20916 = vst [vmem:[#allocation34_spill] sm:$0xff] %v18004_v13  ;;  %8217 = vmatprep.mubr.bf16.mxu1 %v18004_v13  ;;  %v12437_v4 = vpop.f32.mrb[4].mxu1  ;;  %12987 = vmatprep.subr.bf16.mxu1 %v13420_v40  ;;  %v18020_v38 = vadd.f32 %v5570_v16, %v16961_v43  ;;  %v20917_v13 = vld [vmem:[#allocation9_spill] sm:$0xff]  ;;  %v12344_v1 = vpop.f32.mrb[5].mxu0  ;;  %v20919_v35 = vrot.slane %v17712_v50, 2  ;;  %v20920_v43 = vrot.slane %v17719_v56, 7 }
 0x312   :  { %v18023_v21 = vadd.f32 %v5573_v46, %v16967_v11  ;;  %v18026_v45 = vadd.f32 %v5576_v36, %v20917_v13  ;;  %v12438_v54 = vpop.f32.mrb[5].mxu1  ;;  %v5586_v40 = vsel %vm15056_vm6, %v17824_v48, %v17800_v60  ;;  %v20338_v1 = vrot.slane %v17886_v58, 7  ;;  %v12346_v16 = vpop.f32.mrb[6].mxu0  ;;  %v20921_v50 = vld [vmem:[#allocation12_spill] sm:$0xff]  ;;  %v13425_v48 = vld [vmem:[%s20247_s1 + $0x810] sm:$0xff]  }
 0x313   :  { %v5579_v15 = vsel %vm15056_vm6, %v20919_v35, %v20918_v29  ;;  %v5583_v11 = vsel %vm15056_vm6, %v17820_v55, %v20920_v43  ;;  %v12440_v42 = vpop.f32.mrb[6].mxu1  ;;  %12894 = vmatpush3.bf16.msra.mxu0 %v13421_v53  ;;  %12988 = vmatpush3.bf16.msra.mxu1 %v13422_v52  ;;  %v18053_v13 = vadd.f32 %v5586_v40, %v16987_v59  ;;  %v18055_v55 = vrot.slane %v5416_v14, 7  ;;  %v12347_v36 = vpop.f32.mrb[7].mxu0  ;;  %v13426_v53 = vld [vmem:[%s20247_s1 + $0x890] sm:$0xff]   ;;  %v20925_v35 = vld [vmem:[#allocation14_spill] sm:$0xff]  ;;  %v20927_v40 = vld [vmem:[#allocation41_spill] sm:$0xff] }
 0x314   :  { %v18047_v46 = vadd.f32 %v5579_v15, %v20921_v50  ;;  %v18050_v56 = vadd.f32 %v5583_v11, %v16984_v5  ;;  %v12441_v4 = vpop.f32.mrb[7].mxu1  ;;  %12895 = vmatprep.subr.bf16.mxu0 %v13423_v57  ;;  %12989 = vmatprep.subr.bf16.mxu1 %v13424_v0  ;;  %v20922_v5 = vrot.slane %v17753_v62, 7  ;;  %v20923_v52 = vrot.slane %v17800_v60, 2  ;;  %v13427_v62 = vld [vmem:[%s20247_s1 + $0x858] sm:$0xff]   ;;  %v18094_v43 = vld [vmem:[%s20246_s0 + $0x20] ss:$16 sps:$4 sm:$0xff]  }
 0x315   :  { %v5592_v14 = vsel %vm15056_vm6, %v17831_v17, %v17840_v28  ;;  %v20924_v57 = vrot.slane %v17734_v12, 9  ;;  %v12348_v54 = vadd.f32 %v12347_v36, %v12346_v16  ;;  %v12442_v29 = vadd.f32 %v12441_v4, %v12440_v42  ;;  %v13428_v60 = vld [vmem:[%s20247_s1 + $0x8d8] sm:$0xff]   ;;  %v20926_v17 = vld [vmem:[#allocation17_spill] sm:$0xff] }
 0x316   :  { %v5589_v59 = vsel %vm15056_vm6, %v20923_v52, %v20922_v5  ;;  %v18088_v28 = vadd.f32 %v5592_v14, %v20926_v17  ;;  %8086 = vmatmul.mubr.bf16.gmra.mrb[112].mxu0 %v18094_v43  ;;  %v18100_v11 = vld [vmem:[%s20246_s0 + $0x28] ss:$16 sps:$4 sm:$0xff]   ;;  %v20928_v42 = vrot.slane %v17756_v63, 7  ;;  %v20929_v50 = vrot.slane %v17802_v26, 2  ;;  %v18129_v63 = vld [vmem:[%s20246_s0 + $0x4c] ss:$16 sps:$4 sm:$0xff]  }
 0x317   :  { %v5596_v0 = vsel %vm15056_vm6, %v20924_v57, %v17802_v26  ;;  %v18085_v15 = vadd.f32 %v5589_v59, %v20925_v35  ;;  %8218 = vmatmul.mubr.bf16.gmra.mrb[112].mxu1 %v18100_v11  ;;  %v5602_v4 = vsel %vm15056_vm6, %v17845_v18, %v17827_v37  ;;  %v18118_v5 = vrot.slane %v20338_v1, 2  ;;  %v18123_v59 = vld [vmem:[%s20246_s0 + $0x44] ss:$16 sps:$4 sm:$0xff]   ;;  %20931 = vst [vmem:[#allocation21_spill] sm:$0xff] %v18129_v63  ;;  %v20934_v57 = vld [vmem:[#allocation42_spill] sm:$0xff]  ;;  %v20943_v1 = vld [vmem:[#allocation44_spill] sm:$0xff] }
 0x318   :  { %v18104_v16 = vadd.f32 %v5596_v0, %v20927_v40  ;;  %v5599_v36 = vsel %vm15056_vm6, %v20929_v50, %v20928_v42  ;;  %v6212_v52 = vadd.f32 %v12442_v29, %v12348_v54  ;;  %20930 = vst [vmem:[#allocation36_spill] sm:$0xff] %v18123_v59  ;;  %8093 = vmatprep.mubr.bf16.mxu0 %v18123_v59  ;;  %v20932_v18 = vrot.slane %v17789_v33, 7  ;;  %v13429_v29 = vld [vmem:[%s20247_s1 + $0x818] sm:$0xff]   ;;  %v20935_v35 = vld [vmem:[#allocation43_spill] sm:$0xff] }
 0x319   :  { %8225 = vmatprep.mubr.bf16.mxu1 %v18129_v63  ;;  %v20933_v26 = vrot.slane %v17827_v37, 2  ;;  %v18139_v0 = vadd.f32 %v5599_v36, %v20934_v57  ;;  %v20339_v54 = vrot.slane %v17896_v10, 7  ;;  %12896 = vmatpush3.bf16.msra.mxu0 %v13425_v48  ;;  %v13430_v33 = vld [vmem:[%s20247_s1 + $0x898] sm:$0xff]   ;;  %v18149_v37 = vadd.f32 %v5602_v4, %v20935_v35  ;;  %v20936_v17 = vld [vmem:[#allocation15_spill] sm:$0xff]  ;;  %v12349_v36 = vpop.f32.mrb[8].mxu0  ;;  %v13431_v4 = vld [vmem:[%s20247_s1 + $0x860] sm:$0xff]  }
 0x31a   :  { %12990 = vmatpush3.bf16.msra.mxu1 %v13426_v53  ;;  %v20937_v42 = vrot.slane %v17785_v34, 7  ;;  %v6328_v50 = vcombine.high %v6212_v52, %v6212_v52  ;;  %12897 = vmatprep.subr.bf16.mxu0 %v13427_v62  ;;  %v5612_v34 = vsel %vm15056_vm6, %v17858_v22, %v17848_v39  ;;  %v5618_v62 = vsel %vm15056_vm6, %v17877_v19, %v17930_v31  ;;  %v20942_v22 = vld [vmem:[#allocation45_spill] sm:$0xff] }
 0x31b   :  { %v5605_v14 = vsel %vm15056_vm6, %v20933_v26, %v20932_v18  ;;  %v12443_v18 = vpop.f32.mrb[8].mxu1  ;;  %12991 = vmatprep.subr.bf16.mxu1 %v13428_v60  ;;  %v20938_v26 = vrot.slane %v17806_v44, 7  ;;  %v20940_v60 = vld [vmem:[#allocation16_spill] sm:$0xff]  ;;  %v18188_v12 = vadd.f32 %v5618_v62, %v20943_v1  ;;  %v18192_v19 = vrot.slane %v20339_v54, 2 }
 0x31c   :  { %v18152_v40 = vadd.f32 %v5605_v14, %v20936_v17  ;;  %v5609_v48 = vsel %vm15056_vm6, %v17852_v61, %v20937_v42  ;;  %v20939_v61 = vrot.slane %v17848_v39, 2  ;;  %v12350_v14 = vpop.f32.mrb[9].mxu0  ;;  %v12444_v57 = vpop.f32.mrb[9].mxu1  ;;  %v20941_v17 = vld [vmem:[#allocation32_spill] sm:$0xff]  ;;  %v6335_v39 = vrot.slane %v6328_v50, %v14719_v25  ;;  %v13433_v50 = vld [vmem:[%s20247_s1 + $0x820] sm:$0xff]  }
 0x31d   :  { %v18178_v35 = vadd.f32 %v5609_v48, %v20940_v60  ;;  %v18181_v42 = vadd.f32 %v5612_v34, %v20941_v17  ;;  %v12351_v53 = vadd.f32 %v12350_v14, %v12349_v36  ;;  %v12446_v24 = vpop.f32.mrb[10].mxu1  ;;  %12898 = vmatpush3.bf16.msra.mxu0 %v13429_v29  ;;  %v13432_v34 = vld [vmem:[%s20247_s1 + $0x8e0] sm:$0xff]   ;;  %v20944_v1 = vrot.slane %v17837_v27, 9 }
 0x31e   :  { %v5615_v52 = vsel %vm15056_vm6, %v20939_v61, %v20938_v26  ;;  %v12445_v26 = vadd.f32 %v12444_v57, %v12443_v18  ;;  %v12352_v61 = vpop.f32.mrb[10].mxu0  ;;  %v12447_v48 = vpop.f32.mrb[11].mxu1  ;;  %12992 = vmatpush3.bf16.msra.mxu1 %v13430_v33  ;;  %v20945_v18 = vrot.slane %v17865_v49, 7  ;;  %v5628_v33 = vsel %vm15056_vm6, %v17966_v30, %v17988_v8  ;;  %v20947_v57 = vld [vmem:[#allocation66_spill] sm:$0xff]  ;;  %12899 = vmatprep.subr.bf16.mxu0 %v13431_v4  ;;  %v13434_v49 = vld [vmem:[%s20247_s1 + $0x8a0] sm:$0xff]  }
 0x31f   :  { %v18184_v44 = vadd.f32 %v5615_v52, %v20942_v22  ;;  %v12353_v31 = vpop.f32.mrb[11].mxu0  ;;  %v5622_v36 = vsel %vm15056_vm6, %v20944_v1, %v17893_v2  ;;  %v20946_v52 = vrot.slane %v17893_v2, 2  ;;  %v6336_v14 = vcombine.high %v6335_v39, %v6335_v39  ;;  %v13435_v2 = vld [vmem:[%s20247_s1 + $0x868] sm:$0xff]   ;;  %v20954_v1 = vld [vmem:[#allocation67_spill] sm:$0xff]  ;;  %12993 = vmatprep.subr.bf16.mxu1 %v13432_v34 }
 0x320   :  { %v18216_v62 = vadd.f32 %v6335_v39, %v20947_v57  ;;  %v6217_v27 = vadd.f32 %v12445_v26, %v12351_v53  ;;  %v12354_v60 = vadd.f32 %v12353_v31, %v12352_v61  ;;  %v20949_v17 = vcombine.high %v17896_v10, %v17896_v10  ;;  %v18232_v53 = vld [vmem:[%s20246_s0 + $0x40] ss:$16 sps:$4 sm:$0xff]   ;;  %v18238_v4 = vld [vmem:[%s20246_s0 + $0x48] ss:$16 sps:$4 sm:$0xff]  }
 0x321   :  { %v5625_v29 = vsel %vm15056_vm6, %v20946_v52, %v20945_v18  ;;  %v12448_v30 = vadd.f32 %v12447_v48, %v12446_v24  ;;  %20950 = vst [vmem:[#allocation38_spill] sm:$0xff] %v18232_v53  ;;  %8094 = vmatmul.mubr.bf16.gmra.mrb[116].mxu0 %v18232_v53  ;;  %20951 = vst [vmem:[#allocation39_spill] sm:$0xff] %v18238_v4  ;;  %8226 = vmatmul.mubr.bf16.gmra.mrb[116].mxu1 %v18238_v4  ;;  %v13436_v39 = vld [vmem:[%s20247_s1 + $0x8e8] sm:$0xff]   ;;  %v20953_v61 = vld [vmem:[#allocation47_spill] sm:$0xff]  ;;  %v20960_v48 = vrot.slane %v17988_v8, 2 }
 0x322   :  { %20948 = vst [vmem:[#allocation20_spill] sm:$0xff] %v18216_v62  ;;  %v18227_v22 = vrot.slane %v20949_v17, 7  ;;  %v20952_v26 = vld [vmem:[#allocation46_spill] sm:$0xff]  ;;  %v18248_v31 = vadd.f32 %v5625_v29, %v20953_v61  ;;  %v18252_v18 = vadd.f32 %v6336_v14, %v20954_v1  ;;  %v6337_v52 = vcombine.high %v6217_v27, %v6217_v27  ;;  %v18258_v17 = vld [vmem:[%s20246_s0 + $0x64] ss:$16 sps:$4 sm:$0xff]   ;;  %12900 = vmatpush3.bf16.msra.mxu0 %v13433_v50 }
 0x323   :  { %v18245_v24 = vadd.f32 %v5622_v36, %v20952_v26  ;;  %v6344_v57 = vrot.slane %v6217_v27, %v14719_v25  ;;  %20956 = vst [vmem:[#allocation40_spill] sm:$0xff] %v18258_v17  ;;  %8101 = vmatprep.mubr.bf16.mxu0 %v18258_v17  ;;  %v18264_v36 = vld [vmem:[%s20246_s0 + $0x6c] ss:$16 sps:$4 sm:$0xff]   ;;  %v6220_v14 = vadd.f32 %v12448_v30, %v12354_v60  ;;  %v20958_v26 = vld [vmem:[#allocation51_spill] sm:$0xff]  ;;  %v20959_v1 = vrot.slane %v17883_v6, 7 }
 0x324   :  { %20955 = vst [vmem:[#allocation37_spill] sm:$0xff] %v18252_v18  ;;  %20957 = vst [vmem:[#allocation23_spill] sm:$0xff] %v18264_v36  ;;  %8233 = vmatprep.mubr.bf16.mxu1 %v18264_v36  ;;  %v13437_v27 = vld [vmem:[%s20247_s1 + $0x828] sm:$0xff]   ;;  %v18272_v61 = vadd.f32 %v5628_v33, %v20958_v26  ;;  %v20961_v29 = vcombine.high %v17906_v51, %v17906_v51  ;;  %v6351_v34 = vrot.slane %v6337_v52, %v14719_v25  ;;  %v12355_v33 = vpop.f32.mrb[12].mxu0  ;;  %v12449_v26 = vpop.f32.mrb[12].mxu1  ;;  %v20967_v4 = vld [vmem:[#allocation71_spill] sm:$0xff] }
 0x325   :  { %v5631_v54 = vsel %vm15056_vm6, %v20960_v48, %v20959_v1  ;;  %v6352_v50 = vcombine.high %v6344_v57, %v6344_v57  ;;  %v20962_v30 = vld [vmem:[#allocation70_spill] sm:$0xff]  ;;  %12994 = vmatpush3.bf16.msra.mxu1 %v13434_v49  ;;  %12901 = vmatprep.subr.bf16.mxu0 %v13435_v2  ;;  %v6354_v8 = vcombine.high %v6220_v14, %v6220_v14  ;;  %v12356_v1 = vpop.f32.mrb[13].mxu0  ;;  %v20964_v52 = vrot.slane %v17886_v58, 7 }
 0x326   :  { %v18283_v60 = vrot.slane %v20961_v29, 7  ;;  %v18287_v18 = vadd.f32 %v6344_v57, %v20962_v30  ;;  %v13438_v6 = vld [vmem:[%s20247_s1 + $0x8a8] sm:$0xff]   ;;  %v6361_v48 = vrot.slane %v6220_v14, %v14719_v25  ;;  %v12450_v29 = vpop.f32.mrb[13].mxu1  ;;  %12995 = vmatprep.subr.bf16.mxu1 %v13436_v39  ;;  %v5638_v49 = vsel %vm15056_vm6, %v18118_v5, %v18055_v55  ;;  %v20965_v30 = vld [vmem:[#allocation68_spill] sm:$0xff]  ;;  %v12358_v36 = vpop.f32.mrb[14].mxu0  ;;  %12902 = vmatpush3.bf16.msra.mxu0 %v13437_v27  ;;  %v13439_v5 = vld [vmem:[%s20247_s1 + $0x870] sm:$0xff]  }
 0x327   :  { %v5635_v57 = vsel %vm15056_vm6, %v18017_v3, %v20964_v52  ;;  %v6353_v2 = vcombine.high %v6351_v34, %v6351_v34  ;;  %v12357_v62 = vadd.f32 %v12356_v1, %v12355_v33  ;;  %v12451_v14 = vadd.f32 %v12450_v29, %v12449_v26  ;;  %v12452_v17 = vpop.f32.mrb[14].mxu1  ;;  %v12359_v3 = vpop.f32.mrb[15].mxu0  ;;  %v13440_v34 = vld [vmem:[%s20247_s1 + $0x8f0] sm:$0xff]   ;;  %v20970_v26 = vld [vmem:[#allocation69_spill] sm:$0xff]  ;;  %12903 = vmatprep.subr.bf16.mxu0 %v13439_v5 }
 0x328   :  { %20963 = vst [vmem:[#allocation26_spill] sm:$0xff] %v18287_v18  ;;  %v18303_v18 = vadd.f32 %v6352_v50, %v20965_v30  ;;  %v6368_v39 = vrot.slane %v6354_v8, %v14719_v25  ;;  %v6369_v58 = vcombine.high %v6361_v48, %v6361_v48  ;;  %v18307_v53 = vadd.f32 %v6361_v48, %v20967_v4  ;;  %v12453_v52 = vpop.f32.mrb[15].mxu1  ;;  %v20969_v50 = vld [vmem:[#allocation62_spill] sm:$0xff]  ;;  %v13441_v27 = vld [vmem:[%s20247_s1 + $0x830] sm:$0xff]  }
 0x329   :  { %v18316_v33 = vadd.f32 %v5631_v54, %v20969_v50  ;;  %v18319_v8 = vadd.f32 %v6353_v2, %v20970_v26  ;;  %v6225_v1 = vadd.f32 %v12451_v14, %v12357_v62  ;;  %v12360_v4 = vadd.f32 %v12359_v3, %v12358_v36  ;;  %12996 = vmatpush3.bf16.msra.mxu1 %v13438_v6  ;;  %v20975_v54 = vld [vmem:[#allocation55_spill] sm:$0xff]  ;;  %v20979_v36 = vld [vmem:[#allocation52_spill] sm:$0xff] }
 0x32a   :  { %20966 = vst [vmem:[#allocation13_spill] sm:$0xff] %v18303_v18  ;;  %20968 = vst [vmem:[#allocation10_spill] sm:$0xff] %v18307_v53  ;;  %v12454_v48 = vadd.f32 %v12453_v52, %v12452_v17  ;;  %v20972_v29 = vcombine.high %v17947_v7, %v17947_v7  ;;  %v20973_v53 = vld [vmem:[#allocation54_spill] sm:$0xff]  ;;  %v18333_v50 = vadd.f32 %v6368_v39, %v20975_v54  ;;  %v18338_v62 = vld [vmem:[%s20246_s0 + $0x60] ss:$16 sps:$4 sm:$0xff]   ;;  %v20980_v14 = vrot.slane %v17947_v7, 7 }
 0x32b   :  { %20971 = vst [vmem:[#allocation11_spill] sm:$0xff] %v18319_v8  ;;  %v18330_v18 = vadd.f32 %v6369_v58, %v20973_v53  ;;  %20977 = vst [vmem:[#allocation14_spill] sm:$0xff] %v18338_v62  ;;  %8102 = vmatmul.mubr.bf16.gmra.mrb[120].mxu0 %v18338_v62  ;;  %v18344_v17 = vld [vmem:[%s20246_s0 + $0x68] ss:$16 sps:$4 sm:$0xff]   ;;  %v13442_v53 = vld [vmem:[%s20247_s1 + $0x8b0] sm:$0xff]   ;;  %v18351_v6 = vadd.f32 %v5635_v57, %v20979_v36  ;;  %v6370_v58 = vcombine.high %v6225_v1, %v6225_v1 }
 0x32c   :  { %v18327_v30 = vrot.slane %v20972_v29, 7  ;;  %20976 = vst [vmem:[#allocation12_spill] sm:$0xff] %v18333_v50  ;;  %20978 = vst [vmem:[#allocation17_spill] sm:$0xff] %v18344_v17  ;;  %8234 = vmatmul.mubr.bf16.gmra.mrb[120].mxu1 %v18344_v17  ;;  %v13443_v2 = vld [vmem:[%s20247_s1 + $0x878] sm:$0xff]   ;;  %v18358_v39 = vrot.slane %v20980_v14, 2  ;;  %v6377_v3 = vrot.slane %v6225_v1, %v14719_v25  ;;  %v6228_v52 = vadd.f32 %v12454_v48, %v12360_v4  ;;  %v20983_v4 = vld [vmem:[#allocation53_spill] sm:$0xff] }
 0x32d   :  { %20974 = vst [vmem:[#allocation9_spill] sm:$0xff] %v18330_v18  ;;  %v18364_v26 = vld [vmem:[%s20246_s0 + $0x84] ss:$16 sps:$4 sm:$0xff]   ;;  %v18370_v57 = vld [vmem:[%s20246_s0 + $0x8c] ss:$16 sps:$4 sm:$0xff]   ;;  %v5649_v1 = vrot.slane %v18283_v60, 2  ;;  %12997 = vmatprep.subr.bf16.mxu1 %v13440_v34  ;;  %v18378_v48 = vadd.f32 %v5638_v49, %v20983_v4  ;;  %v5644_v50 = vsel %vm15056_vm6, %v18192_v19, %v18227_v22  ;;  %v6384_v18 = vrot.slane %v6370_v58, %v14719_v25 }
 0x32e   :  { %20981 = vst [vmem:[#allocation41_spill] sm:$0xff] %v18364_v26  ;;  %8109 = vmatprep.mubr.bf16.mxu0 %v18364_v26  ;;  %20982 = vst [vmem:[#allocation42_spill] sm:$0xff] %v18370_v57  ;;  %8241 = vmatprep.mubr.bf16.mxu1 %v18370_v57  ;;  %v13444_v29 = vld [vmem:[%s20247_s1 + $0x8f8] sm:$0xff]   ;;  %v20984_v54 = vrot.slane %v17896_v10, 7  ;;  %v20985_v36 = vrot.slane %v18055_v55, 2  ;;  %v6385_v57 = vcombine.high %v6377_v3, %v6377_v3  ;;  %v12361_v34 = vpop.f32.mrb[16].mxu0 }
 0x32f   :  { %v18392_v5 = vadd.f32 %v6377_v3, %v17457_v23  ;;  %v6387_v49 = vcombine.high %v6228_v52, %v6228_v52  ;;  %v12455_v4 = vpop.f32.mrb[16].mxu1  ;;  %12904 = vmatpush3.bf16.msra.mxu0 %v13441_v27  ;;  %v13445_v10 = vld [vmem:[%s20247_s1 + $0x838] sm:$0xff]   ;;  %v5655_v55 = vrot.slane %v18327_v30, 2  ;;  %12998 = vmatpush3.bf16.msra.mxu1 %v13442_v53  ;;  %v20987_v23 = vrot.slane %v17906_v51, 9  ;;  %v20990_v8 = vld [vmem:[#allocation57_spill] sm:$0xff] }
 0x330   :  { %v5641_v14 = vsel %vm15056_vm6, %v20985_v36, %v20984_v54  ;;  %v6394_v54 = vrot.slane %v6228_v52, %v14719_v25  ;;  %v12362_v36 = vpop.f32.mrb[17].mxu0  ;;  %v12456_v19 = vpop.f32.mrb[17].mxu1  ;;  %12905 = vmatprep.subr.bf16.mxu0 %v13443_v2  ;;  %v20988_v58 = vld [vmem:[#allocation48_spill] sm:$0xff]  ;;  %v6386_v3 = vcombine.high %v6384_v18, %v6384_v18  ;;  %v18411_v17 = vadd.f32 %v6384_v18, %v20990_v8 }
 0x331   :  { %20986 = vst [vmem:[#allocation43_spill] sm:$0xff] %v18392_v5  ;;  %v5648_v22 = vsel %vm15056_vm6, %v20987_v23, %v18283_v60  ;;  %v18405_v27 = vadd.f32 %v5641_v14, %v20988_v58  ;;  %v20989_v5 = vld [vmem:[#allocation56_spill] sm:$0xff]  ;;  %v6401_v52 = vrot.slane %v6387_v49, %v14719_v25  ;;  %v12364_v53 = vpop.f32.mrb[18].mxu0  ;;  %v12458_v2 = vpop.f32.mrb[18].mxu1  ;;  %12999 = vmatprep.subr.bf16.mxu1 %v13444_v29  ;;  %v20991_v23 = vld [vmem:[#allocation50_spill] sm:$0xff] }
 0x332   :  { %v18408_v26 = vadd.f32 %v6385_v57, %v20989_v5  ;;  %v6402_v62 = vcombine.high %v6394_v54, %v6394_v54  ;;  %v12363_v51 = vadd.f32 %v12362_v36, %v12361_v34  ;;  %v12457_v63 = vadd.f32 %v12456_v19, %v12455_v4  ;;  %v12365_v59 = vpop.f32.mrb[19].mxu0  ;;  %v12459_v60 = vpop.f32.mrb[19].mxu1  ;;  %v13446_v57 = vld [vmem:[%s20247_s1 + $0x8b8] sm:$0xff]   ;;  %v20992_v5 = vld [vmem:[#allocation22_spill] sm:$0xff]  ;;  %v20996_v34 = vld [vmem:[#allocation59_spill] sm:$0xff] }
 0x333   :  { %v18415_v14 = vadd.f32 %v5644_v50, %v20991_v23  ;;  %v18421_v18 = vadd.f32 %v6386_v3, %v20992_v5  ;;  %v6403_v8 = vcombine.high %v6401_v52, %v6401_v52  ;;  %v20994_v49 = vld [vmem:[#allocation72_spill] sm:$0xff]  ;;  %v12366_v29 = vadd.f32 %v12365_v59, %v12364_v53  ;;  %12906 = vmatpush3.bf16.msra.mxu0 %v13445_v10  ;;  %v18432_v50 = vld [vmem:[%s20246_s0 + $0x80] ss:$16 sps:$4 sm:$0xff]  }
 0x334   :  { %v18424_v58 = vadd.f32 %v6401_v52, %v20994_v49  ;;  %v18427_v4 = vadd.f32 %v6402_v62, %v20996_v34  ;;  %v6233_v54 = vadd.f32 %v12457_v63, %v12363_v51  ;;  %v12460_v36 = vadd.f32 %v12459_v60, %v12458_v2  ;;  %8110 = vmatmul.mubr.bf16.gmra.mrb[124].mxu0 %v18432_v50  ;;  %v18438_v19 = vld [vmem:[%s20246_s0 + $0x88] ss:$16 sps:$4 sm:$0xff]   ;;  %v18448_v63 = vld [vmem:[%s20246_s0 + $0xa4] ss:$16 sps:$4 sm:$0xff]   ;;  %v18454_v3 = vld [vmem:[%s20246_s0 + $0xac] ss:$16 sps:$4 sm:$0xff]  }
 0x335   :  { %20993 = vst [vmem:[#allocation15_spill] sm:$0xff] %v18421_v18  ;;  %8242 = vmatmul.mubr.bf16.gmra.mrb[124].mxu1 %v18438_v19  ;;  %v5656_v59 = vrot.slane %v17993_v41, 7  ;;  %v20998_v62 = vld [vmem:[#allocation58_spill] sm:$0xff]  ;;  %8117 = vmatprep.mubr.bf16.mxu0 %v18448_v63  ;;  %21000 = vst [vmem:[#allocation44_spill] sm:$0xff] %v18454_v3  ;;  %v21001_v52 = vld [vmem:[#allocation63_spill] sm:$0xff]  ;;  %v21002_v41 = vrot.slane %v17947_v7, 7  ;;  %v5654_v5 = vsel %vm15056_vm6, %v18358_v39, %v18327_v30 }
 0x336   :  { %20995 = vst [vmem:[#allocation16_spill] sm:$0xff] %v18424_v58  ;;  %20997 = vst [vmem:[#allocation32_spill] sm:$0xff] %v18427_v4  ;;  %v18443_v10 = vadd.f32 %v6403_v8, %v20998_v62  ;;  %8249 = vmatprep.mubr.bf16.mxu1 %v18454_v3  ;;  %v18458_v53 = vadd.f32 %v5648_v22, %v21001_v52  ;;  %v6404_v51 = vcombine.high %v6233_v54, %v6233_v54  ;;  %v12367_v8 = vpop.f32.mrb[20].mxu0  ;;  %v12461_v49 = vpop.f32.mrb[20].mxu1  ;;  %v21003_v34 = vld [vmem:[#allocation65_spill] sm:$0xff] }
 0x337   :  { %v5651_v2 = vsel %vm15056_vm6, %v5649_v1, %v21002_v41  ;;  %v6411_v60 = vrot.slane %v6233_v54, %v14719_v25  ;;  %v6236_v23 = vadd.f32 %v12460_v36, %v12366_v29  ;;  %13000 = vmatpush3.bf16.msra.mxu1 %v13446_v57  ;;  %v5657_v22 = vsel %vm15056_vm6, %v5655_v55, %v5656_v59  ;;  %v21004_v62 = vld [vmem:[#allocation49_spill] sm:$0xff]  ;;  %v12368_v30 = vpop.f32.mrb[21].mxu0  ;;  %v12462_v39 = vpop.f32.mrb[21].mxu1  ;;  %v21007_v59 = vld [vmem:[#allocation64_spill] sm:$0xff] }
 0x338   :  { %20999 = vst [vmem:[#allocation45_spill] sm:$0xff] %v18443_v10  ;;  %v18472_v7 = vadd.f32 %v5651_v2, %v21003_v34  ;;  %v18475_v1 = vadd.f32 %v5654_v5, %v21004_v62  ;;  %v6418_v54 = vrot.slane %v6404_v51, %v14719_v25  ;;  %v21005_v29 = vld [vmem:[#allocation25_spill] sm:$0xff]  ;;  %v12369_v41 = vadd.f32 %v12368_v30, %v12367_v8  ;;  %v12370_v47 = vpop.f32.mrb[22].mxu0  ;;  %v12464_v55 = vpop.f32.mrb[22].mxu1  ;;  %v21008_v5 = vld [vmem:[#allocation60_spill] sm:$0xff] }
 0x339   :  { %v18479_v57 = vadd.f32 %v6411_v60, %v21005_v29  ;;  %v6420_v36 = vcombine.high %v6236_v23, %v6236_v23  ;;  %v6427_v52 = vrot.slane %v6236_v23, %v14719_v25  ;;  %v12463_v10 = vadd.f32 %v12462_v39, %v12461_v49  ;;  %v12371_v29 = vpop.f32.mrb[23].mxu0  ;;  %v21010_v58 = vld [vmem:[#allocation73_spill] sm:$0xff]  ;;  %v21012_v30 = vld [vmem:[#allocation24_spill] sm:$0xff] }
 0x33a   :  { %v18483_v2 = vadd.f32 %v5657_v22, %v21007_v59  ;;  %v6419_v34 = vcombine.high %v6418_v54, %v6418_v54  ;;  %v18486_v62 = vadd.f32 %v6418_v54, %v21008_v5  ;;  %v12372_v8 = vadd.f32 %v12371_v29, %v12370_v47  ;;  %v21014_v59 = vld [vmem:[#allocation61_spill] sm:$0xff]  ;;  %v21022_v5 = vld [vmem:[#allocation74_spill] sm:$0xff]  ;;  %v12373_v29 = vpop.f32.mrb[24].mxu0 }
 0x33b   :  { %21006 = vst [vmem:[#allocation66_spill] sm:$0xff] %v18479_v57  ;;  %v6434_v51 = vrot.slane %v6420_v36, %v14719_v25  ;;  %v6435_v60 = vcombine.high %v6427_v52, %v6427_v52  ;;  %v12465_v57 = vpop.f32.mrb[23].mxu1  ;;  %v18490_v23 = vadd.f32 %v6427_v52, %v21010_v58  ;;  %v6241_v4 = vadd.f32 %v12463_v10, %v12369_v41  ;;  %v18501_v54 = vld [vmem:[%s20246_s0 + $0xa0] ss:$16 sps:$4 sm:$0xff]   ;;  %v18507_v58 = vld [vmem:[%s20246_s0 + $0xa8] ss:$16 sps:$4 sm:$0xff]  }
 0x33c   :  { %21009 = vst [vmem:[#allocation46_spill] sm:$0xff] %v18486_v62  ;;  %v12466_v49 = vadd.f32 %v12465_v57, %v12464_v55  ;;  %v18493_v39 = vadd.f32 %v6419_v34, %v21012_v30  ;;  %21016 = vst [vmem:[#allocation70_spill] sm:$0xff] %v18501_v54  ;;  %8118 = vmatmul.mubr.bf16.gmra.mrb[128].mxu0 %v18501_v54  ;;  %v18514_v36 = vld [vmem:[%s20246_s0 + $0xc4] ss:$16 sps:$4 sm:$0xff]   ;;  %v18520_v52 = vld [vmem:[%s20246_s0 + $0xcc] ss:$16 sps:$4 sm:$0xff]  }
 0x33d   :  { %21011 = vst [vmem:[#allocation47_spill] sm:$0xff] %v18490_v23  ;;  %v6436_v22 = vcombine.high %v6434_v51, %v6434_v51  ;;  %v18496_v18 = vadd.f32 %v6435_v60, %v21014_v59  ;;  %21017 = vst [vmem:[#allocation68_spill] sm:$0xff] %v18507_v58  ;;  %8250 = vmatmul.mubr.bf16.gmra.mrb[128].mxu1 %v18507_v58  ;;  %v6437_v47 = vcombine.high %v6241_v4, %v6241_v4  ;;  %v21020_v41 = vld [vmem:[#allocation75_spill] sm:$0xff]  ;;  %v12374_v30 = vpop.f32.mrb[25].mxu0  ;;  %v21028_v62 = vld [vmem:[#allocation30_spill] sm:$0xff] }
 0x33e   :  { %21013 = vst [vmem:[#allocation67_spill] sm:$0xff] %v18493_v39  ;;  %v6444_v10 = vrot.slane %v6241_v4, %v14719_v25  ;;  %v6244_v57 = vadd.f32 %v12466_v49, %v12372_v8  ;;  %21018 = vst [vmem:[#allocation71_spill] sm:$0xff] %v18514_v36  ;;  %8125 = vmatprep.mubr.bf16.mxu0 %v18514_v36  ;;  %8257 = vmatprep.mubr.bf16.mxu1 %v18520_v52  ;;  %v12467_v8 = vpop.f32.mrb[24].mxu1  ;;  %v21025_v39 = vld [vmem:[#allocation77_spill] sm:$0xff] }
 0x33f   :  { %21015 = vst [vmem:[#allocation51_spill] sm:$0xff] %v18496_v18  ;;  %21019 = vst [vmem:[#allocation62_spill] sm:$0xff] %v18520_v52  ;;  %v18524_v55 = vadd.f32 %v6436_v22, %v21020_v41  ;;  %v6451_v4 = vrot.slane %v6437_v47, %v14719_v25  ;;  %v12468_v59 = vpop.f32.mrb[25].mxu1  ;;  %v21024_v18 = vld [vmem:[#allocation76_spill] sm:$0xff]  ;;  %v12375_v47 = vadd.f32 %v12374_v30, %v12373_v29  ;;  %v12376_v41 = vpop.f32.mrb[26].mxu0 }
 0x340   :  { %v6452_v34 = vcombine.high %v6444_v10, %v6444_v10  ;;  %v18528_v51 = vadd.f32 %v6444_v10, %v21022_v5  ;;  %v6453_v60 = vcombine.high %v6244_v57, %v6244_v57  ;;  %v6460_v49 = vrot.slane %v6244_v57, %v14719_v25  ;;  %v21026_v5 = vld [vmem:[#allocation78_spill] sm:$0xff]  ;;  %v12377_v58 = vpop.f32.mrb[27].mxu0  ;;  %v18550_v29 = vld [vmem:[%s20246_s0 + $0xc0] ss:$16 sps:$4 sm:$0xff]  }
 0x341   :  { %21021 = vst [vmem:[#allocation69_spill] sm:$0xff] %v18524_v55  ;;  %v18535_v52 = vadd.f32 %v6451_v4, %v21025_v39  ;;  %v12470_v55 = vpop.f32.mrb[26].mxu1  ;;  %v12469_v36 = vadd.f32 %v12468_v59, %v12467_v8  ;;  %v21030_v39 = vld [vmem:[#allocation79_spill] sm:$0xff]  ;;  %v18556_v8 = vld [vmem:[%s20246_s0 + $0xc8] ss:$16 sps:$4 sm:$0xff]  }
 0x342   :  { %21023 = vst [vmem:[#allocation54_spill] sm:$0xff] %v18528_v51  ;;  %v18532_v23 = vadd.f32 %v6452_v34, %v21024_v18  ;;  %v6467_v22 = vrot.slane %v6453_v60, %v14719_v25  ;;  %v6468_v10 = vcombine.high %v6460_v49, %v6460_v49  ;;  %v18539_v51 = vadd.f32 %v6460_v49, %v21026_v5  ;;  %v12471_v57 = vpop.f32.mrb[27].mxu1  ;;  %v18571_v49 = vld [vmem:[%s20246_s0 + $0xec] ss:$16 sps:$4 sm:$0xff]  }
 0x343   :  { %v12378_v18 = vadd.f32 %v12377_v58, %v12376_v41  ;;  %v12472_v34 = vadd.f32 %v12471_v57, %v12470_v55  ;;  %v6249_v60 = vadd.f32 %v12469_v36, %v12375_v47  ;;  %21032 = vst [vmem:[#allocation48_spill] sm:$0xff] %v18556_v8  ;;  %v18565_v36 = vld [vmem:[%s20246_s0 + $0xe4] ss:$16 sps:$4 sm:$0xff]   ;;  %21036 = vst [vmem:[#allocation50_spill] sm:$0xff] %v18571_v49  ;;  %v12473_v47 = vpop.f32.mrb[28].mxu1 }
 0x344   :  { %21027 = vst [vmem:[#allocation55_spill] sm:$0xff] %v18539_v51  ;;  %v6469_v54 = vcombine.high %v6467_v22, %v6467_v22  ;;  %v18542_v3 = vadd.f32 %v6467_v22, %v21028_v62  ;;  %v18545_v4 = vadd.f32 %v6468_v10, %v21030_v39  ;;  %8126 = vmatmul.mubr.bf16.gmra.mrb[132].mxu0 %v18550_v29  ;;  %v21033_v62 = vld [vmem:[#allocation81_spill] sm:$0xff]  ;;  %21035 = vst [vmem:[#allocation57_spill] sm:$0xff] %v18565_v36  ;;  %v12379_v22 = vpop.f32.mrb[28].mxu0  ;;  %v12474_v57 = vpop.f32.mrb[29].mxu1  ;;  %v21042_v47 = vld [vmem:[#allocation18_spill] sm:$0xff] }
 0x345   :  { %8258 = vmatmul.mubr.bf16.gmra.mrb[132].mxu1 %v18556_v8  ;;  %v6252_v55 = vadd.f32 %v12472_v34, %v12378_v18  ;;  %8132 = vmatprep.mubr.bf16.mxu0 %v18565_v36  ;;  %v6470_v30 = vcombine.high %v6249_v60, %v6249_v60  ;;  %v6477_v59 = vrot.slane %v6249_v60, %v14719_v25  ;;  %v12380_v5 = vpop.f32.mrb[29].mxu0  ;;  %v12476_v39 = vpop.f32.mrb[30].mxu1 }
 0x346   :  { %21029 = vst [vmem:[#allocation52_spill] sm:$0xff] %v18542_v3  ;;  %21031 = vst [vmem:[#allocation53_spill] sm:$0xff] %v18545_v4  ;;  %v18560_v58 = vadd.f32 %v6469_v54, %v21033_v62  ;;  %8264 = vmatprep.mubr.bf16.mxu1 %v18571_v49  ;;  %v12382_v34 = vpop.f32.mrb[30].mxu0  ;;  %v21040_v4 = vld [vmem:[#allocation27_spill] sm:$0xff]  ;;  %v12477_v22 = vpop.f32.mrb[31].mxu1 }
 0x347   :  { %v6493_v54 = vrot.slane %v6252_v55, %v14719_v25  ;;  %v6484_v41 = vrot.slane %v6470_v30, %v14719_v25  ;;  %v6485_v10 = vcombine.high %v6477_v59, %v6477_v59  ;;  %v12383_v55 = vpop.f32.mrb[31].mxu0  ;;  %v18592_v30 = vld [vmem:[%s20246_s0 + $0xe0] ss:$16 sps:$4 sm:$0xff]  }
 0x348   :  { %21034 = vst [vmem:[#allocation56_spill] sm:$0xff] %v18560_v58  ;;  %v21038_v58 = vld [vmem:[#allocation80_spill] sm:$0xff]  ;;  %21044 = vst [vmem:[#allocation63_spill] sm:$0xff] %v18592_v30  ;;  %v12385_v59 = vpop.f32.mrb[32].mxu0  ;;  %v21054_v49 = vld [vmem:[#allocation19_spill] sm:$0xff] }
 0x349   :  { %v18578_v18 = vadd.f32 %v6493_v54, %v17880_v9  ;;  %v6486_v62 = vcombine.high %v6484_v41, %v6484_v41  ;;  %v18581_v3 = vadd.f32 %v6485_v10, %v21038_v58  ;;  %v18584_v60 = vadd.f32 %v6484_v41, %v21040_v4  ;;  %v18598_v9 = vld [vmem:[%s20246_s0 + $0xe8] ss:$16 sps:$4 sm:$0xff]   ;;  %v18604_v4 = vld [vmem:[%s20246_s0 + $0x104] ss:$16 sps:$4 sm:$0xff]   ;;  %v18610_v58 = vld [vmem:[%s20246_s0 + $0x10c] ss:$16 sps:$4 sm:$0xff]  }
 0x34a   :  { %21045 = vst [vmem:[#allocation65_spill] sm:$0xff] %v18598_v9  ;;  %21046 = vst [vmem:[#allocation49_spill] sm:$0xff] %v18604_v4  ;;  %v12479_v54 = vpop.f32.mrb[32].mxu1  ;;  %v12386_v41 = vpop.f32.mrb[33].mxu0 }
 0x34b   :  { %21037 = vst [vmem:[#allocation22_spill] sm:$0xff] %v18578_v18  ;;  %21039 = vst [vmem:[#allocation72_spill] sm:$0xff] %v18581_v3  ;;  %v18587_v51 = vadd.f32 %v6486_v62, %v21042_v47  ;;  %v12480_v10 = vpop.f32.mrb[33].mxu1  ;;  %v12387_v5 = vadd.f32 %v12386_v41, %v12385_v59  ;;  %v12388_v34 = vpop.f32.mrb[34].mxu0 }
 0x34c   :  { %21041 = vst [vmem:[#allocation59_spill] sm:$0xff] %v18584_v60  ;;  %8133 = vmatmul.mubr.bf16.gmra.mrb[136].mxu0 %v18592_v30  ;;  %21047 = vst [vmem:[#allocation25_spill] sm:$0xff] %v18610_v58  ;;  %v12481_v57 = vadd.f32 %v12480_v10, %v12479_v54  ;;  %v12482_v39 = vpop.f32.mrb[34].mxu1  ;;  %v12389_v62 = vpop.f32.mrb[35].mxu0  ;;  %v18629_v10 = vld [vmem:[%s20246_s0 + $0x124] ss:$16 sps:$4 sm:$0xff]  }
 0x34d   :  { %21043 = vst [vmem:[#allocation58_spill] sm:$0xff] %v18587_v51  ;;  %8265 = vmatmul.mubr.bf16.gmra.mrb[136].mxu1 %v18598_v9  ;;  %8139 = vmatprep.mubr.bf16.mxu0 %v18604_v4  ;;  %v12483_v55 = vpop.f32.mrb[35].mxu1  ;;  %v12390_v47 = vadd.f32 %v12389_v62, %v12388_v34  ;;  %v18616_v51 = vld [vmem:[%s20246_s0 + $0x100] ss:$16 sps:$4 sm:$0xff]   ;;  %21050 = vst [vmem:[#allocation73_spill] sm:$0xff] %v18629_v10 }
 0x34e   :  { %8271 = vmatprep.mubr.bf16.mxu1 %v18610_v58  ;;  %v6263_v22 = vadd.f32 %v12481_v57, %v12387_v5  ;;  %v12484_v18 = vadd.f32 %v12483_v55, %v12482_v39  ;;  %21048 = vst [vmem:[#allocation64_spill] sm:$0xff] %v18616_v51  ;;  %v18622_v58 = vld [vmem:[%s20246_s0 + $0x108] ss:$16 sps:$4 sm:$0xff]   ;;  %v18635_v5 = vld [vmem:[%s20246_s0 + $0x12c] ss:$16 sps:$4 sm:$0xff]   ;;  %v21053_v4 = vld [vmem:[#allocation35_spill] sm:$0xff] }
 0x34f   :  { %21049 = vst [vmem:[#allocation60_spill] sm:$0xff] %v18622_v58  ;;  %21051 = vst [vmem:[#allocation24_spill] sm:$0xff] %v18635_v5 }
 0x350   :  { %v6494_v59 = vcombine.high %v6263_v22, %v6263_v22  ;;  %v6501_v54 = vrot.slane %v6263_v22, %v14719_v25  ;;  %v6266_v41 = vadd.f32 %v12484_v18, %v12390_v47  ;;  %v12391_v62 = vpop.f32.mrb[36].mxu0  ;;  %v12485_v55 = vpop.f32.mrb[36].mxu1 }
 0x351   :  { %v12392_v47 = vpop.f32.mrb[37].mxu0 }
 0x352   :  { %v6508_v57 = vrot.slane %v6494_v59, %v14719_v25  ;;  %v6509_v34 = vcombine.high %v6501_v54, %v6501_v54  ;;  %v18640_v39 = vadd.f32 %v6501_v54, %v17925_v20  ;;  %v6511_v18 = vcombine.high %v6266_v41, %v6266_v41 }
 0x353   :  { %v6518_v22 = vrot.slane %v6266_v41, %v14719_v25  ;;  %v12393_v54 = vadd.f32 %v12392_v47, %v12391_v62 }
 0x354   :  { %8140 = vmatmul.mubr.bf16.gmra.mrb[140].mxu0 %v18616_v51  ;;  %21052 = vst [vmem:[#allocation61_spill] sm:$0xff] %v18640_v39  ;;  %v18644_v51 = vadd.f32 %v6509_v34, %v17928_v32  ;;  %v18647_v9 = vadd.f32 %v6508_v57, %v21053_v4  ;;  %v6525_v59 = vrot.slane %v6511_v18, %v14719_v25  ;;  %v18662_v18 = vld [vmem:[%s20246_s0 + $0x120] ss:$16 sps:$4 sm:$0xff]  }
 0x355   :  { %8272 = vmatmul.mubr.bf16.gmra.mrb[140].mxu1 %v18622_v58  ;;  %8147 = vmatprep.mubr.bf16.mxu0 %v18629_v10  ;;  %v12486_v10 = vpop.f32.mrb[37].mxu1  ;;  %v6510_v58 = vcombine.high %v6508_v57, %v6508_v57  ;;  %v6526_v20 = vcombine.high %v6518_v22, %v6518_v22 }
 0x356   :  { %8279 = vmatprep.mubr.bf16.mxu1 %v18635_v5  ;;  %v12394_v5 = vpop.f32.mrb[38].mxu0  ;;  %v12488_v30 = vpop.f32.mrb[38].mxu1  ;;  %v12487_v39 = vadd.f32 %v12486_v10, %v12485_v55  ;;  %v6527_v36 = vcombine.high %v6525_v59, %v6525_v59  ;;  %v18654_v8 = vadd.f32 %v6525_v59, %v18023_v21 }
 0x357   :  { %v12395_v60 = vpop.f32.mrb[39].mxu0  ;;  %v12489_v3 = vpop.f32.mrb[39].mxu1  ;;  %v18651_v41 = vadd.f32 %v6510_v58, %v21054_v49  ;;  %v18657_v4 = vadd.f32 %v6526_v20, %v18020_v38  ;;  %v18668_v49 = vld [vmem:[%s20246_s0 + $0x128] ss:$16 sps:$4 sm:$0xff]   ;;  %v18677_v38 = vld [vmem:[%s20246_s0 + $0x144] ss:$16 sps:$4 sm:$0xff]  }
 0x358   :  { %21055 = vst [vmem:[#allocation75_spill] sm:$0xff] %v18654_v8  ;;  %v12396_v32 = vadd.f32 %v12395_v60, %v12394_v5  ;;  %v6271_v57 = vadd.f32 %v12487_v39, %v12393_v54  ;;  %v12490_v34 = vadd.f32 %v12489_v3, %v12488_v30  ;;  %v18672_v21 = vadd.f32 %v6527_v36, %v18026_v45  ;;  %v18683_v3 = vld [vmem:[%s20246_s0 + $0x14c] ss:$16 sps:$4 sm:$0xff]   ;;  %v12397_v45 = vpop.f32.mrb[40].mxu0  ;;  %v12491_v36 = vpop.f32.mrb[40].mxu1 }
 0x359   :  { %v12398_v55 = vpop.f32.mrb[41].mxu0  ;;  %v12492_v22 = vpop.f32.mrb[41].mxu1 }
 0x35a   :  { %21056 = vst [vmem:[#allocation74_spill] sm:$0xff] %v18672_v21  ;;  %v6528_v60 = vcombine.high %v6271_v57, %v6271_v57  ;;  %v6535_v30 = vrot.slane %v6271_v57, %v14719_v25  ;;  %v6274_v58 = vadd.f32 %v12490_v34, %v12396_v32  ;;  %v12399_v47 = vadd.f32 %v12398_v55, %v12397_v45  ;;  %v12400_v20 = vpop.f32.mrb[42].mxu0  ;;  %v12494_v54 = vpop.f32.mrb[42].mxu1 }
 0x35b   :  { %v12493_v59 = vadd.f32 %v12492_v22, %v12491_v36  ;;  %v12495_v8 = vpop.f32.mrb[43].mxu1 }
 0x35c   :  { %8148 = vmatmul.mubr.bf16.gmra.mrb[144].mxu0 %v18662_v18  ;;  %v6542_v10 = vrot.slane %v6528_v60, %v14719_v25  ;;  %v18689_v5 = vadd.f32 %v6535_v30, %v18047_v46  ;;  %v6544_v39 = vcombine.high %v6274_v58, %v6274_v58  ;;  %v6551_v62 = vrot.slane %v6274_v58, %v14719_v25  ;;  %v12401_v60 = vpop.f32.mrb[43].mxu0 }
 0x35d   :  { %8280 = vmatmul.mubr.bf16.gmra.mrb[144].mxu1 %v18668_v49  ;;  %8155 = vmatprep.mubr.bf16.mxu0 %v18677_v38  ;;  %v6279_v30 = vadd.f32 %v12493_v59, %v12399_v47  ;;  %v12402_v58 = vadd.f32 %v12401_v60, %v12400_v20 }
 0x35e   :  { %8287 = vmatprep.mubr.bf16.mxu1 %v18683_v3  ;;  %21057 = vst [vmem:[#allocation76_spill] sm:$0xff] %v18689_v5  ;;  %v6543_v21 = vcombine.high %v6542_v10, %v6542_v10  ;;  %v18693_v57 = vadd.f32 %v6542_v10, %v18050_v56  ;;  %v6558_v32 = vrot.slane %v6544_v39, %v14719_v25  ;;  %v18708_v56 = vld [vmem:[%s20246_s0 + $0x140] ss:$16 sps:$4 sm:$0xff]   ;;  %v18727_v10 = vld [vmem:[%s20246_s0 + $0x16c] ss:$16 sps:$4 sm:$0xff]  }
 0x35f   :  { %v6559_v34 = vcombine.high %v6551_v62, %v6551_v62  ;;  %v18697_v46 = vadd.f32 %v6551_v62, %v18085_v15  ;;  %v12496_v5 = vadd.f32 %v12495_v8, %v12494_v54  ;;  %v18714_v15 = vld [vmem:[%s20246_s0 + $0x148] ss:$16 sps:$4 sm:$0xff]   ;;  %v6568_v8 = vrot.slane %v6279_v30, %v14719_v25 }
 0x360   :  { %v18700_v45 = vadd.f32 %v6543_v21, %v18053_v13  ;;  %v6560_v36 = vcombine.high %v6558_v32, %v6558_v32  ;;  %v6561_v13 = vcombine.high %v6279_v30, %v6279_v30  ;;  %v12403_v59 = vpop.f32.mrb[44].mxu0  ;;  %v12497_v20 = vpop.f32.mrb[44].mxu1 }
 0x361   :  { %21058 = vst [vmem:[#allocation77_spill] sm:$0xff] %v18697_v46  ;;  %v18703_v55 = vadd.f32 %v6559_v34, %v18088_v28  ;;  %v6282_v21 = vadd.f32 %v12496_v5, %v12402_v58  ;;  %v18721_v28 = vld [vmem:[%s20246_s0 + $0x164] ss:$16 sps:$4 sm:$0xff]   ;;  %v6576_v5 = vcombine.high %v6568_v8, %v6568_v8  ;;  %v18735_v22 = vadd.f32 %v6568_v8, %v18139_v0  ;;  %v12404_v32 = vpop.f32.mrb[45].mxu0  ;;  %v12498_v34 = vpop.f32.mrb[45].mxu1 }
 0x362   :  { %v18731_v39 = vadd.f32 %v6560_v36, %v18104_v16  ;;  %v6575_v62 = vrot.slane %v6561_v13, %v14719_v25  ;;  %v12405_v58 = vadd.f32 %v12404_v32, %v12403_v59  ;;  %v12406_v36 = vpop.f32.mrb[46].mxu0  ;;  %v12500_v13 = vpop.f32.mrb[46].mxu1 }
 0x363   :  { %21059 = vst [vmem:[#allocation78_spill] sm:$0xff] %v18703_v55  ;;  %21061 = vst [vmem:[#allocation79_spill] sm:$0xff] %v18735_v22  ;;  %v6577_v47 = vcombine.high %v6282_v21, %v6282_v21  ;;  %v6584_v54 = vrot.slane %v6282_v21, %v14719_v25  ;;  %v18739_v60 = vadd.f32 %v6576_v5, %v18149_v37  ;;  %v12407_v22 = vpop.f32.mrb[47].mxu0  ;;  %v12501_v21 = vpop.f32.mrb[47].mxu1 }
 0x364   :  { %8156 = vmatmul.mubr.bf16.gmra.mrb[148].mxu0 %v18708_v56  ;;  %21060 = vst [vmem:[#allocation30_spill] sm:$0xff] %v18731_v39  ;;  %v18742_v30 = vadd.f32 %v6575_v62, %v18152_v40  ;;  %v12499_v39 = vadd.f32 %v12498_v34, %v12497_v20  ;;  %v12408_v37 = vadd.f32 %v12407_v22, %v12406_v36  ;;  %v21066_v22 = vld [vmem:[#allocation5_spill] sm:$0xff] }
 0x365   :  { %8288 = vmatmul.mubr.bf16.gmra.mrb[148].mxu1 %v18714_v15  ;;  %8163 = vmatprep.mubr.bf16.mxu0 %v18721_v28  ;;  %v6591_v16 = vrot.slane %v6577_v47, %v14719_v25  ;;  %v6592_v0 = vcombine.high %v6584_v54, %v6584_v54  ;;  %v18746_v8 = vadd.f32 %v6584_v54, %v18178_v35  ;;  %v18757_v47 = vld [vmem:[%s20246_s0 + $0x160] ss:$16 sps:$4 sm:$0xff]   ;;  %v18763_v35 = vld [vmem:[%s20246_s0 + $0x168] ss:$16 sps:$4 sm:$0xff]  }
 0x366   :  { %8295 = vmatprep.mubr.bf16.mxu1 %v18727_v10  ;;  %v12502_v5 = vadd.f32 %v12501_v21, %v12500_v13  ;;  %v6287_v62 = vadd.f32 %v12499_v39, %v12405_v58  ;;  %v21067_v39 = vld [vmem:[#allocation6_spill] sm:$0xff] }
 0x367   :  { %21062 = vst [vmem:[#allocation81_spill] sm:$0xff] %v18746_v8  ;;  %v6593_v55 = vcombine.high %v6591_v16, %v6591_v16  ;;  %v18749_v46 = vadd.f32 %v6591_v16, %v18184_v44  ;;  %v18752_v40 = vadd.f32 %v6592_v0, %v18181_v42 }
 0x368   :  { %v6290_v42 = vadd.f32 %v12502_v5, %v12408_v37  ;;  %v6594_v59 = vcombine.high %v6287_v62, %v6287_v62  ;;  %v6601_v20 = vrot.slane %v6287_v62, %v14719_v25  ;;  %v12409_v34 = vpop.f32.mrb[48].mxu0  ;;  %v12503_v16 = vpop.f32.mrb[48].mxu1 }
 0x369   :  { %21063 = vst [vmem:[#allocation80_spill] sm:$0xff] %v18749_v46  ;;  %21064 = vst [vmem:[#allocation27_spill] sm:$0xff] %v18752_v40  ;;  %v18767_v44 = vadd.f32 %v6593_v55, %v18188_v12  ;;  %v12410_v13 = vpop.f32.mrb[49].mxu0  ;;  %v12504_v0 = vpop.f32.mrb[49].mxu1 }
 0x36a   :  { %v6611_v54 = vcombine.high %v6290_v42, %v6290_v42  ;;  %v6618_v32 = vrot.slane %v6290_v42, %v14719_v25  ;;  %v6608_v58 = vrot.slane %v6594_v59, %v14719_v25  ;;  %v6609_v36 = vcombine.high %v6601_v20, %v6601_v20  ;;  %v12412_v5 = vpop.f32.mrb[50].mxu0 }
 0x36b   :  { %21065 = vst [vmem:[#allocation18_spill] sm:$0xff] %v18767_v44  ;;  %v12411_v21 = vadd.f32 %v12410_v13, %v12409_v34  ;;  %v12505_v37 = vadd.f32 %v12504_v0, %v12503_v16  ;;  %v12506_v44 = vpop.f32.mrb[50].mxu1  ;;  %v12413_v59 = vpop.f32.mrb[51].mxu0  ;;  %v21068_v16 = vld [vmem:[#allocation7_spill] sm:$0xff]  ;;  %v21069_v13 = vld [vmem:[#allocation8_spill] sm:$0xff] }
 0x36c   :  { %8164 = vmatmul.mubr.bf16.gmra.mrb[152].mxu0 %v18757_v47  ;;  %v6625_v12 = vrot.slane %v6611_v54, %v14719_v25  ;;  %v18776_v55 = vadd.f32 %v6618_v32, %v18316_v33  ;;  %v6610_v62 = vcombine.high %v6608_v58, %v6608_v58  ;;  %v18779_v46 = vadd.f32 %v6609_v36, %v18245_v24  ;;  %v12507_v20 = vpop.f32.mrb[51].mxu1 }
 0x36d   :  { %8296 = vmatmul.mubr.bf16.gmra.mrb[152].mxu1 %v18763_v35  ;;  %8171 = vmatprep.mubr.bf16.mxu0 %v21066_v22  ;;  %v18782_v42 = vadd.f32 %v6608_v58, %v18248_v31  ;;  %v6295_v54 = vadd.f32 %v12505_v37, %v12411_v21  ;;  %v12414_v33 = vadd.f32 %v12413_v59, %v12412_v5 }
 0x36e   :  { %8303 = vmatprep.mubr.bf16.mxu1 %v21067_v39  ;;  %v6626_v40 = vcombine.high %v6625_v12, %v6625_v12  ;;  %v18785_v8 = vadd.f32 %v6625_v12, %v18351_v6  ;;  %v18788_v32 = vadd.f32 %v6610_v62, %v18272_v61  ;;  %v12508_v34 = vadd.f32 %v12507_v20, %v12506_v44  ;;  %v13657_v6 = vld [vmem:[%s20246_s0 + $0x4] ss:$16 sps:$4 sm:$0xff]   ;;  %v13658_v61 = vld [vmem:[%s20246_s0 + $0xc] ss:$16 sps:$4 sm:$0xff]  }
 0x36f   :  { %v6627_v31 = vcombine.high %v6295_v54, %v6295_v54  ;;  %v6634_v58 = vrot.slane %v6295_v54, %v14719_v25 }
 0x370   :  { %v18793_v24 = vadd.f32 %v6626_v40, %v18378_v48  ;;  %v6298_v44 = vadd.f32 %v12508_v34, %v12414_v33  ;;  %v12415_v40 = vpop.f32.mrb[52].mxu0  ;;  %v12509_v12 = vpop.f32.mrb[52].mxu1 }
 0x371   :  { %v6641_v36 = vrot.slane %v6627_v31, %v14719_v25  ;;  %v6642_v0 = vcombine.high %v6634_v58, %v6634_v58  ;;  %v18804_v48 = vadd.f32 %v6634_v58, %v18405_v27  ;;  %v12416_v5 = vpop.f32.mrb[53].mxu0  ;;  %v12510_v62 = vpop.f32.mrb[53].mxu1  ;;  %v21077_v40 = vld [vmem:[#allocation31_spill] sm:$0xff]  ;;  %v21078_v12 = vld [vmem:[#allocation34_spill] sm:$0xff] }
 0x372   :  { %v6644_v21 = vcombine.high %v6298_v44, %v6298_v44  ;;  %v6651_v37 = vrot.slane %v6298_v44, %v14719_v25  ;;  %v12418_v54 = vpop.f32.mrb[54].mxu0 }
 0x373   :  { %v6643_v59 = vcombine.high %v6641_v36, %v6641_v36  ;;  %v18808_v20 = vadd.f32 %v6642_v0, %v18415_v14  ;;  %v12419_v27 = vpop.f32.mrb[55].mxu0  ;;  %v21075_v14 = vld [vmem:[#allocation29_spill] sm:$0xff]  ;;  %v21076_v0 = vld [vmem:[#allocation28_spill] sm:$0xff] }
 0x374   :  { %8172 = vmatmul.mubr.bf16.gmra.mrb[156].mxu0 %v21068_v16  ;;  %v6658_v33 = vrot.slane %v6644_v21, %v14719_v25  ;;  %v6659_v34 = vcombine.high %v6651_v37, %v6651_v37  ;;  %v18812_v31 = vadd.f32 %v6651_v37, %v18472_v7  ;;  %v21080_v54 = vld [vmem:[#allocation21_spill] sm:$0xff] }
 0x375   :  { %8304 = vmatmul.mubr.bf16.gmra.mrb[156].mxu1 %v21069_v13  ;;  %9297 = vmatprep.mubr.bf16.mxu0 %v13657_v6  ;;  %21070 = vst [vmem:[#allocation35_spill] sm:$0xff] %v18808_v20  ;;  %v12512_v6 = vpop.f32.mrb[54].mxu1  ;;  %v21092_v20 = vld [vmem:[#allocation17_spill] sm:$0xff] }
 0x376   :  { %9429 = vmatprep.mubr.bf16.mxu1 %v13658_v61  ;;  %21071 = vst [vmem:[#allocation19_spill] sm:$0xff] %v18812_v31  ;;  %v12513_v58 = vpop.f32.mrb[55].mxu1  ;;  %v18815_v61 = vadd.f32 %v6643_v59, %v18458_v53  ;;  %v18818_v44 = vadd.f32 %v6659_v34, %v18475_v1  ;;  %v18821_v36 = vadd.f32 %v6658_v33, %v18483_v2  ;;  %v21079_v2 = vld [vmem:[#allocation36_spill] sm:$0xff]  ;;  %v21089_v31 = vld [vmem:[#allocation13_spill] sm:$0xff] }
 0x378   :  { %21072 = vst [vmem:[#allocation5_spill] sm:$0xff] %v18815_v61  ;;  %21073 = vst [vmem:[#allocation6_spill] sm:$0xff] %v18818_v44  ;;  %v12531_v7 = vpop.f32.mrb[56].mxu0  ;;  %v12625_v21 = vpop.f32.mrb[56].mxu1 }
 0x379   :  { %21074 = vst [vmem:[#allocation7_spill] sm:$0xff] %v18821_v36  ;;  %v12532_v37 = vpop.f32.mrb[57].mxu0  ;;  %v12626_v5 = vpop.f32.mrb[57].mxu1 }
 0x37a   :  { %v12534_v53 = vpop.f32.mrb[58].mxu0  ;;  %v12628_v62 = vpop.f32.mrb[58].mxu1 }
 0x37b   :  { %v12535_v59 = vpop.f32.mrb[59].mxu0  ;;  %v12629_v1 = vpop.f32.mrb[59].mxu1 }
 0x37c   :  { %9298 = vmatmul.mubr.bf16.vlgmr.msra.gmra.mrb[160].mxu0 %v21075_v14  ;;  %v21083_v59 = vld [vmem:[#allocation40_spill] sm:$0xff]  ;;  %v21084_v1 = vld [vmem:[#allocation23_spill] sm:$0xff] }
 0x37d   :  { %9430 = vmatmul.mubr.bf16.vlgmr.msra.gmra.mrb[160].mxu1 %v21076_v0  ;;  %9303 = vmatprep.mubr.bf16.mxu0 %v21077_v40 }
 0x37e   :  { %9435 = vmatprep.mubr.bf16.mxu1 %v21078_v12 }
 0x380   :  { %v12537_v6 = vpop.f32.mrb[60].mxu0  ;;  %v12631_v33 = vpop.f32.mrb[60].mxu1 }
 0x381   :  { %v12538_v34 = vpop.f32.mrb[61].mxu0  ;;  %v12632_v27 = vpop.f32.mrb[61].mxu1 }
 0x382   :  { %v12539_v58 = vadd.f32 %v12538_v34, %v12537_v6  ;;  %v12633_v14 = vadd.f32 %v12632_v27, %v12631_v33  ;;  %v12540_v0 = vpop.f32.mrb[62].mxu0  ;;  %v12634_v40 = vpop.f32.mrb[62].mxu1 }
 0x383   :  { %v12541_v12 = vpop.f32.mrb[63].mxu0  ;;  %v12635_v7 = vpop.f32.mrb[63].mxu1 }
 0x384   :  { %9304 = vmatmul.mubr.bf16.gmra.mrb[164].mxu0 %v18094_v43  ;;  %v7218_v21 = vadd.f32 %v12633_v14, %v12539_v58  ;;  %v12542_v37 = vadd.f32 %v12541_v12, %v12540_v0  ;;  %v12636_v5 = vadd.f32 %v12635_v7, %v12634_v40  ;;  %v21081_v43 = vld [vmem:[#allocation38_spill] sm:$0xff]  ;;  %v21085_v0 = vld [vmem:[#allocation20_spill] sm:$0xff] }
 0x385   :  { %9436 = vmatmul.mubr.bf16.gmra.mrb[164].mxu1 %v18100_v11  ;;  %9311 = vmatprep.mubr.bf16.mxu0 %v21079_v2  ;;  %v21082_v11 = vld [vmem:[#allocation39_spill] sm:$0xff] }
 0x386   :  { %9443 = vmatprep.mubr.bf16.mxu1 %v21080_v54  ;;  %v7330_v53 = vcombine.high %v7218_v21, %v7218_v21  ;;  %v7221_v62 = vadd.f32 %v12636_v5, %v12542_v37  ;;  %v21087_v5 = vld [vmem:[#allocation26_spill] sm:$0xff] }
 0x388   :  { %v7337_v2 = vrot.slane %v7330_v53, %v14719_v25  ;;  %v7339_v54 = vcombine.high %v7221_v62, %v7221_v62  ;;  %v7346_v6 = vrot.slane %v7221_v62, %v14719_v25  ;;  %v12543_v33 = vpop.f32.mrb[64].mxu0  ;;  %v12637_v34 = vpop.f32.mrb[64].mxu1 }
 0x389   :  { %v12544_v27 = vpop.f32.mrb[65].mxu0  ;;  %v12638_v58 = vpop.f32.mrb[65].mxu1 }
 0x38a   :  { %v7338_v14 = vcombine.high %v7337_v2, %v7337_v2  ;;  %v18838_v40 = vadd.f32 %v7337_v2, %v21085_v0  ;;  %v7353_v12 = vrot.slane %v7339_v54, %v14719_v25  ;;  %v7354_v7 = vcombine.high %v7346_v6, %v7346_v6  ;;  %v12546_v21 = vpop.f32.mrb[66].mxu0  ;;  %v12640_v37 = vpop.f32.mrb[66].mxu1 }
 0x38b   :  { %v12639_v53 = vadd.f32 %v12638_v58, %v12637_v34  ;;  %v12641_v62 = vpop.f32.mrb[67].mxu1  ;;  %v21096_v34 = vld [vmem:[#allocation42_spill] sm:$0xff] }
 0x38c   :  { %9312 = vmatmul.mubr.bf16.gmra.mrb[168].mxu0 %v21081_v43  ;;  %21086 = vst [vmem:[#allocation8_spill] sm:$0xff] %v18838_v40  ;;  %v18842_v43 = vadd.f32 %v7346_v6, %v21087_v5  ;;  %v7355_v44 = vcombine.high %v7353_v12, %v7353_v12  ;;  %v18848_v61 = vadd.f32 %v7354_v7, %v21089_v31  ;;  %v21091_v40 = vld [vmem:[#allocation14_spill] sm:$0xff]  ;;  %v21093_v6 = vld [vmem:[#allocation11_spill] sm:$0xff] }
 0x38d   :  { %9444 = vmatmul.mubr.bf16.gmra.mrb[168].mxu1 %v21082_v11  ;;  %9319 = vmatprep.mubr.bf16.mxu0 %v21083_v59  ;;  %v12545_v11 = vadd.f32 %v12544_v27, %v12543_v33  ;;  %v12547_v59 = vpop.f32.mrb[67].mxu0  ;;  %v12642_v54 = vadd.f32 %v12641_v62, %v12640_v37  ;;  %v21095_v33 = vld [vmem:[#allocation41_spill] sm:$0xff]  ;;  %v21097_v37 = vld [vmem:[#allocation10_spill] sm:$0xff] }
 0x38e   :  { %9451 = vmatprep.mubr.bf16.mxu1 %v21084_v1  ;;  %v21088_v1 = vld [vmem:[#allocation37_spill] sm:$0xff]  ;;  %21090 = vst [vmem:[#allocation29_spill] sm:$0xff] %v18848_v61  ;;  %v12548_v2 = vadd.f32 %v12547_v59, %v12546_v21  ;;  %v18853_v5 = vadd.f32 %v7355_v44, %v21093_v6 }
 0x38f   :  { %v18845_v36 = vadd.f32 %v7338_v14, %v21088_v1  ;;  %v7226_v0 = vadd.f32 %v12639_v53, %v12545_v11 }
 0x390   :  { %21094 = vst [vmem:[#allocation28_spill] sm:$0xff] %v18853_v5  ;;  %v7229_v14 = vadd.f32 %v12642_v54, %v12548_v2  ;;  %v12549_v31 = vpop.f32.mrb[68].mxu0  ;;  %v12643_v12 = vpop.f32.mrb[68].mxu1  ;;  %v21100_v2 = vld [vmem:[#allocation12_spill] sm:$0xff] }
 0x391   :  { %v7356_v27 = vcombine.high %v7226_v0, %v7226_v0  ;;  %v7363_v58 = vrot.slane %v7226_v0, %v14719_v25  ;;  %v12550_v11 = vpop.f32.mrb[69].mxu0  ;;  %v12644_v44 = vpop.f32.mrb[69].mxu1 }
 0x392   :  { %v7379_v53 = vrot.slane %v7229_v14, %v14719_v25  ;;  %v12551_v59 = vadd.f32 %v12550_v11, %v12549_v31  ;;  %v12645_v62 = vadd.f32 %v12644_v44, %v12643_v12  ;;  %v12552_v1 = vpop.f32.mrb[70].mxu0  ;;  %v12646_v6 = vpop.f32.mrb[70].mxu1 }
 0x393   :  { %v7370_v7 = vrot.slane %v7356_v27, %v14719_v25  ;;  %v7371_v21 = vcombine.high %v7363_v58, %v7363_v58  ;;  %v12553_v27 = vpop.f32.mrb[71].mxu0 }
 0x394   :  { %9320 = vmatmul.mubr.bf16.gmra.mrb[172].mxu0 %v21091_v40  ;;  %v18860_v40 = vadd.f32 %v7363_v58, %v21097_v37  ;;  %v12647_v58 = vpop.f32.mrb[71].mxu1  ;;  %v7387_v37 = vcombine.high %v7379_v53, %v7379_v53  ;;  %v7234_v61 = vadd.f32 %v12645_v62, %v12551_v59 }
 0x395   :  { %9452 = vmatmul.mubr.bf16.gmra.mrb[172].mxu1 %v21092_v20  ;;  %9327 = vmatprep.mubr.bf16.mxu0 %v21095_v33  ;;  %v7372_v20 = vcombine.high %v7229_v14, %v7229_v14  ;;  %v21099_v33 = vld [vmem:[#allocation9_spill] sm:$0xff]  ;;  %v18867_v54 = vadd.f32 %v7370_v7, %v21100_v2  ;;  %v12554_v14 = vadd.f32 %v12553_v27, %v12552_v1 }
 0x396   :  { %9459 = vmatprep.mubr.bf16.mxu1 %v21096_v34  ;;  %21098 = vst [vmem:[#allocation31_spill] sm:$0xff] %v18860_v40  ;;  %v18864_v0 = vadd.f32 %v7371_v21, %v21099_v33  ;;  %v21101_v40 = vld [vmem:[#allocation43_spill] sm:$0xff]  ;;  %v12648_v11 = vadd.f32 %v12647_v58, %v12646_v6  ;;  %v18879_v7 = vadd.f32 %v7387_v37, %v18408_v26 }
 0x397   :  { %v7386_v34 = vrot.slane %v7372_v20, %v14719_v25  ;;  %v18871_v5 = vadd.f32 %v7379_v53, %v21101_v40  ;;  %v7389_v21 = vcombine.high %v7234_v61, %v7234_v61  ;;  %v7396_v20 = vrot.slane %v7234_v61, %v14719_v25  ;;  %v21104_v40 = vld [vmem:[#allocation44_spill] sm:$0xff]  ;;  %v21105_v53 = vld [vmem:[#allocation15_spill] sm:$0xff] }
 0x398   :  { %21103 = vst [vmem:[#allocation36_spill] sm:$0xff] %v18879_v7  ;;  %v7237_v44 = vadd.f32 %v12648_v11, %v12554_v14  ;;  %v12649_v1 = vpop.f32.mrb[72].mxu1  ;;  %v21107_v61 = vld [vmem:[#allocation32_spill] sm:$0xff]  ;;  %v21109_v11 = vld [vmem:[#allocation66_spill] sm:$0xff] }
 0x399   :  { %v7388_v31 = vcombine.high %v7386_v34, %v7386_v34  ;;  %v18874_v12 = vadd.f32 %v7386_v34, %v18411_v17  ;;  %v7403_v17 = vrot.slane %v7389_v21, %v14719_v25  ;;  %v7404_v62 = vcombine.high %v7396_v20, %v7396_v20  ;;  %v12650_v33 = vpop.f32.mrb[73].mxu1 }
 0x39a   :  { %v7413_v26 = vrot.slane %v7237_v44, %v14719_v25  ;;  %v12652_v14 = vpop.f32.mrb[74].mxu1  ;;  %v12651_v20 = vadd.f32 %v12650_v33, %v12649_v1  ;;  %v21118_v1 = vld [vmem:[#allocation62_spill] sm:$0xff] }
 0x39b   :  { %21102 = vst [vmem:[#allocation34_spill] sm:$0xff] %v18874_v12  ;;  %v18885_v59 = vadd.f32 %v7388_v31, %v21105_v53  ;;  %v7405_v2 = vcombine.high %v7403_v17, %v7403_v17  ;;  %v18890_v34 = vadd.f32 %v7404_v62, %v21107_v61  ;;  %v21111_v12 = vld [vmem:[#allocation45_spill] sm:$0xff]  ;;  %v21113_v61 = vld [vmem:[#allocation46_spill] sm:$0xff] }
 0x39c   :  { %9328 = vmatmul.mubr.bf16.gmra.mrb[176].mxu0 %v18432_v50  ;;  %v12555_v50 = vpop.f32.mrb[72].mxu0  ;;  %v18897_v21 = vadd.f32 %v7413_v26, %v21109_v11  ;;  %v21117_v26 = vld [vmem:[#allocation71_spill] sm:$0xff] }
 0x39d   :  { %9460 = vmatmul.mubr.bf16.gmra.mrb[176].mxu1 %v18438_v19  ;;  %9335 = vmatprep.mubr.bf16.mxu0 %v18448_v63  ;;  %21106 = vst [vmem:[#allocation21_spill] sm:$0xff] %v18885_v59  ;;  %v7406_v19 = vcombine.high %v7237_v44, %v7237_v44  ;;  %v12556_v6 = vpop.f32.mrb[73].mxu0  ;;  %v21108_v63 = vld [vmem:[#allocation16_spill] sm:$0xff]  ;;  %v12653_v44 = vpop.f32.mrb[75].mxu1  ;;  %v18900_v7 = vadd.f32 %v7405_v2, %v21111_v12 }
 0x39e   :  { %9467 = vmatprep.mubr.bf16.mxu1 %v21104_v40  ;;  %v18893_v27 = vadd.f32 %v7403_v17, %v21108_v63  ;;  %v12557_v58 = vadd.f32 %v12556_v6, %v12555_v50  ;;  %v12558_v37 = vpop.f32.mrb[74].mxu0  ;;  %21110 = vst [vmem:[#allocation38_spill] sm:$0xff] %v18897_v21  ;;  %v12654_v59 = vadd.f32 %v12653_v44, %v12652_v14  ;;  %v21115_v6 = vld [vmem:[#allocation70_spill] sm:$0xff]  ;;  %v21116_v63 = vld [vmem:[#allocation68_spill] sm:$0xff]  ;;  %v21119_v14 = vld [vmem:[#allocation67_spill] sm:$0xff] }
 0x39f   :  { %v7420_v31 = vrot.slane %v7406_v19, %v14719_v25  ;;  %v12559_v40 = vpop.f32.mrb[75].mxu0  ;;  %21112 = vst [vmem:[#allocation39_spill] sm:$0xff] %v18900_v7  ;;  %v21121_v44 = vld [vmem:[#allocation47_spill] sm:$0xff] }
 0x3a0   :  { %v12560_v53 = vadd.f32 %v12559_v40, %v12558_v37  ;;  %v7242_v50 = vadd.f32 %v12651_v20, %v12557_v58  ;;  %v12561_v11 = vpop.f32.mrb[76].mxu0  ;;  %v12655_v58 = vpop.f32.mrb[76].mxu1 }
 0x3a1   :  { %v7421_v62 = vcombine.high %v7420_v31, %v7420_v31  ;;  %v18903_v17 = vadd.f32 %v7420_v31, %v21113_v61  ;;  %v12656_v61 = vpop.f32.mrb[77].mxu1 }
 0x3a2   :  { %v7245_v19 = vadd.f32 %v12654_v59, %v12560_v53  ;;  %v7422_v33 = vcombine.high %v7242_v50, %v7242_v50  ;;  %v7429_v37 = vrot.slane %v7242_v50, %v14719_v25  ;;  %v12562_v53 = vpop.f32.mrb[77].mxu0  ;;  %v21123_v50 = vld [vmem:[#allocation54_spill] sm:$0xff] }
 0x3a3   :  { %21114 = vst [vmem:[#allocation40_spill] sm:$0xff] %v18903_v17  ;;  %v18911_v12 = vadd.f32 %v7421_v62, %v21119_v14  ;;  %v12563_v62 = vadd.f32 %v12562_v53, %v12561_v11  ;;  %v12658_v14 = vpop.f32.mrb[78].mxu1 }
 0x3a4   :  { %9336 = vmatmul.mubr.bf16.gmra.mrb[180].mxu0 %v21115_v6  ;;  %v7439_v2 = vcombine.high %v7245_v19, %v7245_v19  ;;  %v7446_v31 = vrot.slane %v7245_v19, %v14719_v25  ;;  %v7436_v20 = vrot.slane %v7422_v33, %v14719_v25  ;;  %v7437_v40 = vcombine.high %v7429_v37, %v7429_v37  ;;  %v12659_v7 = vpop.f32.mrb[79].mxu1 }
 0x3a5   :  { %9468 = vmatmul.mubr.bf16.gmra.mrb[180].mxu1 %v21116_v63  ;;  %9343 = vmatprep.mubr.bf16.mxu0 %v21117_v26  ;;  %21120 = vst [vmem:[#allocation23_spill] sm:$0xff] %v18911_v12  ;;  %v18916_v59 = vadd.f32 %v7429_v37, %v21121_v44  ;;  %v21125_v12 = vld [vmem:[#allocation51_spill] sm:$0xff]  ;;  %v12657_v33 = vadd.f32 %v12656_v61, %v12655_v58  ;;  %v21130_v58 = vld [vmem:[#allocation57_spill] sm:$0xff] }
 0x3a6   :  { %9475 = vmatprep.mubr.bf16.mxu1 %v21118_v1  ;;  %v7453_v6 = vrot.slane %v7439_v2, %v14719_v25  ;;  %v7454_v63 = vcombine.high %v7446_v31, %v7446_v31  ;;  %v18920_v26 = vadd.f32 %v7446_v31, %v21123_v50  ;;  %v12564_v1 = vpop.f32.mrb[78].mxu0  ;;  %v7438_v19 = vcombine.high %v7436_v20, %v7436_v20  ;;  %v21128_v31 = vld [vmem:[#allocation69_spill] sm:$0xff]  ;;  %v21129_v20 = vld [vmem:[#allocation48_spill] sm:$0xff] }
 0x3a7   :  { %21122 = vst [vmem:[#allocation20_spill] sm:$0xff] %v18916_v59  ;;  %v18923_v17 = vadd.f32 %v7437_v40, %v21125_v12  ;;  %v12565_v21 = vpop.f32.mrb[79].mxu0  ;;  %v12660_v59 = vadd.f32 %v12659_v7, %v12658_v14  ;;  %v7250_v11 = vadd.f32 %v12657_v33, %v12563_v62  ;;  %v21131_v40 = vld [vmem:[#allocation50_spill] sm:$0xff]  ;;  %v21132_v62 = vld [vmem:[#allocation55_spill] sm:$0xff] }
 0x3a8   :  { %21124 = vst [vmem:[#allocation26_spill] sm:$0xff] %v18920_v26  ;;  %v18926_v37 = vadd.f32 %v7454_v63, %v18532_v23  ;;  %v18929_v44 = vadd.f32 %v7453_v6, %v18535_v52  ;;  %v12566_v2 = vadd.f32 %v12565_v21, %v12564_v1  ;;  %v18932_v50 = vadd.f32 %v7438_v19, %v21128_v31  ;;  %v12567_v7 = vpop.f32.mrb[80].mxu0  ;;  %v12661_v61 = vpop.f32.mrb[80].mxu1  ;;  %v21137_v26 = vld [vmem:[#allocation59_spill] sm:$0xff] }
 0x3a9   :  { %v7455_v23 = vcombine.high %v7250_v11, %v7250_v11  ;;  %v7462_v53 = vrot.slane %v7250_v11, %v14719_v25  ;;  %v12568_v1 = vpop.f32.mrb[81].mxu0 }
 0x3aa   :  { %21126 = vst [vmem:[#allocation37_spill] sm:$0xff] %v18926_v37  ;;  %21127 = vst [vmem:[#allocation13_spill] sm:$0xff] %v18929_v44  ;;  %v7253_v12 = vadd.f32 %v12660_v59, %v12566_v2  ;;  %v12662_v59 = vpop.f32.mrb[81].mxu1  ;;  %v12569_v33 = vadd.f32 %v12568_v1, %v12567_v7  ;;  %v12570_v31 = vpop.f32.mrb[82].mxu0  ;;  %v21139_v7 = vld [vmem:[#allocation63_spill] sm:$0xff]  ;;  %v21141_v1 = vld [vmem:[#allocation56_spill] sm:$0xff] }
 0x3ab   :  { %v7469_v6 = vrot.slane %v7455_v23, %v14719_v25  ;;  %v7470_v63 = vcombine.high %v7462_v53, %v7462_v53  ;;  %v12663_v2 = vadd.f32 %v12662_v59, %v12661_v61  ;;  %v12664_v11 = vpop.f32.mrb[82].mxu1  ;;  %v12571_v23 = vpop.f32.mrb[83].mxu0  ;;  %v21140_v61 = vld [vmem:[#allocation65_spill] sm:$0xff]  ;;  %v21144_v31 = vld [vmem:[#allocation58_spill] sm:$0xff] }
 0x3ac   :  { %9344 = vmatmul.mubr.bf16.gmra.mrb[184].mxu0 %v18550_v29  ;;  %v7472_v52 = vcombine.high %v7253_v12, %v7253_v12  ;;  %v7479_v21 = vrot.slane %v7253_v12, %v14719_v25  ;;  %v18942_v29 = vadd.f32 %v7462_v53, %v21132_v62  ;;  %v12665_v37 = vpop.f32.mrb[83].mxu1  ;;  %v21136_v62 = vld [vmem:[#allocation72_spill] sm:$0xff]  ;;  %v21142_v59 = vld [vmem:[#allocation49_spill] sm:$0xff]  ;;  %v21146_v11 = vld [vmem:[#allocation22_spill] sm:$0xff] }
 0x3ad   :  { %9476 = vmatmul.mubr.bf16.gmra.mrb[184].mxu1 %v21129_v20  ;;  %9350 = vmatprep.mubr.bf16.mxu0 %v21130_v58  ;;  %v7471_v20 = vcombine.high %v7469_v6, %v7469_v6  ;;  %v21134_v58 = vld [vmem:[#allocation53_spill] sm:$0xff] }
 0x3ae   :  { %9482 = vmatprep.mubr.bf16.mxu1 %v21131_v40  ;;  %21133 = vst [vmem:[#allocation14_spill] sm:$0xff] %v18942_v29  ;;  %v7486_v14 = vrot.slane %v7472_v52, %v14719_v25  ;;  %v7487_v19 = vcombine.high %v7479_v21, %v7479_v21  ;;  %v18946_v12 = vadd.f32 %v7470_v63, %v21134_v58  ;;  %v21135_v40 = vld [vmem:[#allocation52_spill] sm:$0xff]  ;;  %v21143_v37 = vld [vmem:[#allocation25_spill] sm:$0xff] }
 0x3af   :  { %v18949_v44 = vadd.f32 %v7469_v6, %v21135_v40  ;;  %v7258_v21 = vadd.f32 %v12663_v2, %v12569_v33  ;;  %v18960_v63 = vadd.f32 %v7471_v20, %v21141_v1  ;;  %v21149_v1 = vld [vmem:[#allocation60_spill] sm:$0xff] }
 0x3b0   :  { %v7488_v53 = vcombine.high %v7486_v14, %v7486_v14  ;;  %v18952_v29 = vadd.f32 %v7487_v19, %v21136_v62  ;;  %v18955_v52 = vadd.f32 %v7486_v14, %v21137_v26  ;;  %v12573_v14 = vpop.f32.mrb[84].mxu0  ;;  %v12667_v33 = vpop.f32.mrb[84].mxu1 }
 0x3b1   :  { %v7495_v6 = vrot.slane %v7258_v21, %v14719_v25  ;;  %v12574_v2 = vpop.f32.mrb[85].mxu0  ;;  %v12668_v58 = vpop.f32.mrb[85].mxu1 }
 0x3b2   :  { %21138 = vst [vmem:[#allocation17_spill] sm:$0xff] %v18955_v52  ;;  %v18966_v19 = vadd.f32 %v7488_v53, %v21144_v31  ;;  %v12576_v40 = vpop.f32.mrb[86].mxu0  ;;  %v12670_v23 = vpop.f32.mrb[86].mxu1  ;;  %v21150_v53 = vld [vmem:[#allocation73_spill] sm:$0xff] }
 0x3b3   :  { %v18969_v26 = vadd.f32 %v7495_v6, %v21146_v11  ;;  %v12577_v20 = vpop.f32.mrb[87].mxu0  ;;  %v12671_v62 = vpop.f32.mrb[87].mxu1 }
 0x3b4   :  { %9351 = vmatmul.mubr.bf16.gmra.mrb[188].mxu0 %v21139_v7  ;;  %21145 = vst [vmem:[#allocation11_spill] sm:$0xff] %v18966_v19  ;;  %v12578_v7 = vadd.f32 %v12577_v20, %v12576_v40  ;;  %v12672_v21 = vadd.f32 %v12671_v62, %v12670_v23  ;;  %v21152_v23 = vld [vmem:[#allocation61_spill] sm:$0xff] }
 0x3b5   :  { %9483 = vmatmul.mubr.bf16.gmra.mrb[188].mxu1 %v21140_v61  ;;  %9357 = vmatprep.mubr.bf16.mxu0 %v21142_v59  ;;  %21147 = vst [vmem:[#allocation41_spill] sm:$0xff] %v18969_v26  ;;  %v21148_v61 = vld [vmem:[#allocation64_spill] sm:$0xff] }
 0x3b6   :  { %9489 = vmatprep.mubr.bf16.mxu1 %v21143_v37  ;;  %v7267_v59 = vadd.f32 %v12672_v21, %v12578_v7  ;;  %v21151_v37 = vld [vmem:[#allocation24_spill] sm:$0xff] }
 0x3b8   :  { %v7496_v6 = vcombine.high %v7267_v59, %v7267_v59  ;;  %v7503_v31 = vrot.slane %v7267_v59, %v14719_v25 }
 0x3b9   :  { %v12579_v11 = vpop.f32.mrb[88].mxu0  ;;  %v12673_v14 = vpop.f32.mrb[88].mxu1 }
 0x3ba   :  { %v12580_v33 = vpop.f32.mrb[89].mxu0  ;;  %v12674_v2 = vpop.f32.mrb[89].mxu1  ;;  %v7510_v58 = vrot.slane %v7496_v6, %v14719_v25  ;;  %v7511_v40 = vcombine.high %v7503_v31, %v7503_v31  ;;  %v18978_v20 = vadd.f32 %v7503_v31, %v21152_v23 }
 0x3bb   :  { %v12581_v62 = vadd.f32 %v12580_v33, %v12579_v11  ;;  %v12676_v7 = vpop.f32.mrb[90].mxu1  ;;  %v12675_v21 = vadd.f32 %v12674_v2, %v12673_v14 }
 0x3bc   :  { %9358 = vmatmul.mubr.bf16.gmra.mrb[192].mxu0 %v21148_v61  ;;  %v12582_v61 = vpop.f32.mrb[90].mxu0  ;;  %v18981_v26 = vadd.f32 %v7511_v40, %v18644_v51  ;;  %v18984_v59 = vadd.f32 %v7510_v58, %v18647_v9 }
 0x3bd   :  { %9490 = vmatmul.mubr.bf16.gmra.mrb[192].mxu1 %v21149_v1  ;;  %9365 = vmatprep.mubr.bf16.mxu0 %v21150_v53  ;;  %v12583_v1 = vpop.f32.mrb[91].mxu0  ;;  %v12677_v53 = vpop.f32.mrb[91].mxu1  ;;  %v7272_v52 = vadd.f32 %v12675_v21, %v12581_v62 }
 0x3be   :  { %9497 = vmatprep.mubr.bf16.mxu1 %v21151_v37  ;;  %v7512_v37 = vcombine.high %v7510_v58, %v7510_v58  ;;  %v12584_v19 = vadd.f32 %v12583_v1, %v12582_v61  ;;  %v12678_v6 = vadd.f32 %v12677_v53, %v12676_v7 }
 0x3bf   :  { %v7513_v11 = vcombine.high %v7272_v52, %v7272_v52  ;;  %v7520_v51 = vrot.slane %v7272_v52, %v14719_v25  ;;  %v21154_v52 = vld [vmem:[#allocation75_spill] sm:$0xff] }
 0x3c0   :  { %v18991_v31 = vadd.f32 %v7512_v37, %v18651_v41  ;;  %v7275_v14 = vadd.f32 %v12678_v6, %v12584_v19  ;;  %v21156_v37 = vld [vmem:[#allocation76_spill] sm:$0xff] }
 0x3c1   :  { %v12585_v9 = vpop.f32.mrb[92].mxu0  ;;  %v12679_v33 = vpop.f32.mrb[92].mxu1  ;;  %v7527_v2 = vrot.slane %v7513_v11, %v14719_v25  ;;  %v7528_v58 = vcombine.high %v7520_v51, %v7520_v51 }
 0x3c2   :  { %v7530_v40 = vcombine.high %v7275_v14, %v7275_v14  ;;  %v12680_v23 = vpop.f32.mrb[93].mxu1 }
 0x3c3   :  { %v12681_v62 = vadd.f32 %v12680_v23, %v12679_v33  ;;  %v12682_v61 = vpop.f32.mrb[94].mxu1  ;;  %v7529_v41 = vcombine.high %v7527_v2, %v7527_v2  ;;  %v18997_v7 = vadd.f32 %v7528_v58, %v18657_v4  ;;  %v19000_v19 = vadd.f32 %v7527_v2, %v21154_v52  ;;  %v21159_v4 = vld [vmem:[#allocation74_spill] sm:$0xff] }
 0x3c4   :  { %9366 = vmatmul.mubr.bf16.gmra.mrb[196].mxu0 %v18662_v18  ;;  %v7537_v18 = vrot.slane %v7275_v14, %v14719_v25  ;;  %v7544_v21 = vrot.slane %v7530_v40, %v14719_v25  ;;  %v12683_v53 = vpop.f32.mrb[95].mxu1 }
 0x3c5   :  { %9498 = vmatmul.mubr.bf16.gmra.mrb[196].mxu1 %v18668_v49  ;;  %9373 = vmatprep.mubr.bf16.mxu0 %v18677_v38  ;;  %v12586_v49 = vpop.f32.mrb[93].mxu0  ;;  %21153 = vst [vmem:[#allocation42_spill] sm:$0xff] %v18997_v7  ;;  %21155 = vst [vmem:[#allocation10_spill] sm:$0xff] %v19000_v19  ;;  %v12684_v14 = vadd.f32 %v12683_v53, %v12682_v61  ;;  %v19012_v2 = vadd.f32 %v7529_v41, %v21159_v4 }
 0x3c6   :  { %9505 = vmatprep.mubr.bf16.mxu1 %v18683_v3  ;;  %v12587_v38 = vadd.f32 %v12586_v49, %v12585_v9  ;;  %v12588_v3 = vpop.f32.mrb[94].mxu0  ;;  %v19004_v6 = vadd.f32 %v7537_v18, %v21156_v37  ;;  %v7545_v9 = vcombine.high %v7544_v21, %v7544_v21  ;;  %v19007_v33 = vadd.f32 %v7544_v21, %v18693_v57 }
 0x3c7   :  { %v12589_v1 = vpop.f32.mrb[95].mxu0  ;;  %21160 = vst [vmem:[#allocation43_spill] sm:$0xff] %v19012_v2 }
 0x3c8   :  { %21157 = vst [vmem:[#allocation9_spill] sm:$0xff] %v19004_v6  ;;  %v7280_v11 = vadd.f32 %v12681_v62, %v12587_v38  ;;  %v12590_v51 = vadd.f32 %v12589_v1, %v12588_v3  ;;  %21158 = vst [vmem:[#allocation12_spill] sm:$0xff] %v19007_v33  ;;  %v19018_v18 = vadd.f32 %v7545_v9, %v18700_v45 }
 0x3c9   :  { %v12591_v62 = vpop.f32.mrb[96].mxu0  ;;  %v12685_v3 = vpop.f32.mrb[96].mxu1 }
 0x3ca   :  { %v7546_v58 = vcombine.high %v7280_v11, %v7280_v11  ;;  %v7553_v40 = vrot.slane %v7280_v11, %v14719_v25  ;;  %v7283_v49 = vadd.f32 %v12684_v14, %v12590_v51  ;;  %21161 = vst [vmem:[#allocation44_spill] sm:$0xff] %v19018_v18  ;;  %v12592_v41 = vpop.f32.mrb[97].mxu0  ;;  %v12686_v52 = vpop.f32.mrb[97].mxu1  ;;  %v21166_v51 = vld [vmem:[#allocation79_spill] sm:$0xff] }
 0x3cb   :  { %v12594_v53 = vpop.f32.mrb[98].mxu0  ;;  %v12688_v37 = vpop.f32.mrb[98].mxu1  ;;  %v12687_v9 = vadd.f32 %v12686_v52, %v12685_v3 }
 0x3cc   :  { %9374 = vmatmul.mubr.bf16.gmra.mrb[200].mxu0 %v18708_v56  ;;  %v7560_v57 = vrot.slane %v7546_v58, %v14719_v25  ;;  %v7561_v23 = vcombine.high %v7553_v40, %v7553_v40  ;;  %v21162_v56 = vld [vmem:[#allocation77_spill] sm:$0xff]  ;;  %v7570_v61 = vrot.slane %v7283_v49, %v14719_v25  ;;  %v12595_v4 = vpop.f32.mrb[99].mxu0  ;;  %v12689_v58 = vpop.f32.mrb[99].mxu1 }
 0x3cd   :  { %9506 = vmatmul.mubr.bf16.gmra.mrb[200].mxu1 %v18714_v15  ;;  %9381 = vmatprep.mubr.bf16.mxu0 %v18721_v28  ;;  %v19022_v38 = vadd.f32 %v7553_v40, %v21162_v56  ;;  %v7563_v15 = vcombine.high %v7283_v49, %v7283_v49  ;;  %v21164_v28 = vld [vmem:[#allocation78_spill] sm:$0xff]  ;;  %v12690_v56 = vadd.f32 %v12689_v58, %v12688_v37  ;;  %v21174_v58 = vld [vmem:[#allocation27_spill] sm:$0xff] }
 0x3ce   :  { %9513 = vmatprep.mubr.bf16.mxu1 %v18727_v10  ;;  %v7562_v21 = vcombine.high %v7560_v57, %v7560_v57  ;;  %v19026_v1 = vadd.f32 %v7561_v23, %v21164_v28  ;;  %v12593_v10 = vadd.f32 %v12592_v41, %v12591_v62  ;;  %v7578_v11 = vcombine.high %v7570_v61, %v7570_v61  ;;  %v21168_v40 = vld [vmem:[#allocation30_spill] sm:$0xff] }
 0x3cf   :  { %21163 = vst [vmem:[#allocation15_spill] sm:$0xff] %v19022_v38  ;;  %v7577_v45 = vrot.slane %v7563_v15, %v14719_v25  ;;  %v19030_v14 = vadd.f32 %v7570_v61, %v21166_v51  ;;  %v12596_v23 = vadd.f32 %v12595_v4, %v12594_v53 }
 0x3d0   :  { %21165 = vst [vmem:[#allocation32_spill] sm:$0xff] %v19026_v1  ;;  %v19033_v49 = vadd.f32 %v7562_v21, %v21168_v40  ;;  %v19039_v15 = vadd.f32 %v7578_v11, %v18739_v60  ;;  %v7288_v62 = vadd.f32 %v12687_v9, %v12593_v10  ;;  %v21172_v10 = vld [vmem:[#allocation81_spill] sm:$0xff] }
 0x3d1   :  { %21167 = vst [vmem:[#allocation16_spill] sm:$0xff] %v19030_v14  ;;  %v19036_v57 = vadd.f32 %v7577_v45, %v18742_v30  ;;  %v7291_v61 = vadd.f32 %v12690_v56, %v12596_v23  ;;  %v12597_v21 = vpop.f32.mrb[100].mxu0  ;;  %v12691_v28 = vpop.f32.mrb[100].mxu1  ;;  %v21176_v23 = vld [vmem:[#allocation80_spill] sm:$0xff] }
 0x3d2   :  { %21169 = vst [vmem:[#allocation66_spill] sm:$0xff] %v19033_v49  ;;  %21171 = vst [vmem:[#allocation46_spill] sm:$0xff] %v19039_v15  ;;  %v7579_v3 = vcombine.high %v7288_v62, %v7288_v62  ;;  %v7586_v41 = vrot.slane %v7288_v62, %v14719_v25  ;;  %v12692_v53 = vpop.f32.mrb[101].mxu1 }
 0x3d3   :  { %21170 = vst [vmem:[#allocation45_spill] sm:$0xff] %v19036_v57  ;;  %v7596_v30 = vcombine.high %v7291_v61, %v7291_v61  ;;  %v7603_v52 = vrot.slane %v7291_v61, %v14719_v25  ;;  %v12693_v11 = vadd.f32 %v12692_v53, %v12691_v28  ;;  %v12694_v9 = vpop.f32.mrb[102].mxu1 }
 0x3d4   :  { %9382 = vmatmul.mubr.bf16.gmra.mrb[204].mxu0 %v18757_v47  ;;  %v7593_v60 = vrot.slane %v7579_v3, %v14719_v25  ;;  %v7594_v45 = vcombine.high %v7586_v41, %v7586_v41  ;;  %v19049_v47 = vadd.f32 %v7586_v41, %v21172_v10  ;;  %v12695_v61 = vpop.f32.mrb[103].mxu1 }
 0x3d5   :  { %9514 = vmatmul.mubr.bf16.gmra.mrb[204].mxu1 %v18763_v35  ;;  %9389 = vmatprep.mubr.bf16.mxu0 %v21066_v22  ;;  %v12598_v35 = vpop.f32.mrb[101].mxu0  ;;  %v7610_v22 = vrot.slane %v7596_v30, %v14719_v25  ;;  %v7611_v37 = vcombine.high %v7603_v52, %v7603_v52  ;;  %v12696_v28 = vadd.f32 %v12695_v61, %v12694_v9 }
 0x3d6   :  { %9521 = vmatprep.mubr.bf16.mxu1 %v21067_v39  ;;  %21173 = vst [vmem:[#allocation70_spill] sm:$0xff] %v19049_v47  ;;  %v12599_v39 = vadd.f32 %v12598_v35, %v12597_v21  ;;  %v12600_v51 = vpop.f32.mrb[102].mxu0  ;;  %v7595_v4 = vcombine.high %v7593_v60, %v7593_v60  ;;  %v19053_v40 = vadd.f32 %v7594_v45, %v21174_v58  ;;  %v21180_v45 = vld [vmem:[#allocation18_spill] sm:$0xff] }
 0x3d7   :  { %v19056_v56 = vadd.f32 %v7593_v60, %v21176_v23  ;;  %v12601_v62 = vpop.f32.mrb[103].mxu0  ;;  %v7612_v3 = vcombine.high %v7610_v22, %v7610_v22  ;;  %v19059_v41 = vadd.f32 %v7611_v37, %v18779_v46  ;;  %v19062_v30 = vadd.f32 %v7610_v22, %v18782_v42 }
 0x3d8   :  { %21175 = vst [vmem:[#allocation68_spill] sm:$0xff] %v19053_v40  ;;  %v7296_v52 = vadd.f32 %v12693_v11, %v12599_v39  ;;  %v12602_v21 = vadd.f32 %v12601_v62, %v12600_v51  ;;  %v19067_v10 = vadd.f32 %v7595_v4, %v21180_v45 }
 0x3d9   :  { %21177 = vst [vmem:[#allocation71_spill] sm:$0xff] %v19056_v56  ;;  %21178 = vst [vmem:[#allocation62_spill] sm:$0xff] %v19059_v41  ;;  %v19071_v53 = vadd.f32 %v7612_v3, %v18788_v32  ;;  %v12603_v37 = vpop.f32.mrb[104].mxu0  ;;  %v12697_v39 = vpop.f32.mrb[104].mxu1 }
 0x3da   :  { %21179 = vst [vmem:[#allocation67_spill] sm:$0xff] %v19062_v30  ;;  %21181 = vst [vmem:[#allocation47_spill] sm:$0xff] %v19067_v10  ;;  %v7613_v60 = vcombine.high %v7296_v52, %v7296_v52  ;;  %v7620_v35 = vrot.slane %v7296_v52, %v14719_v25  ;;  %v7299_v46 = vadd.f32 %v12696_v28, %v12602_v21  ;;  %v12604_v11 = vpop.f32.mrb[105].mxu0  ;;  %v12698_v51 = vpop.f32.mrb[105].mxu1 }
 0x3db   :  { %21182 = vst [vmem:[#allocation54_spill] sm:$0xff] %v19071_v53  ;;  %v12605_v58 = vadd.f32 %v12604_v11, %v12603_v37  ;;  %v12699_v32 = vadd.f32 %v12698_v51, %v12697_v39  ;;  %v12606_v23 = vpop.f32.mrb[106].mxu0  ;;  %v12700_v62 = vpop.f32.mrb[106].mxu1  ;;  %v21189_v37 = vld [vmem:[#allocation5_spill] sm:$0xff] }
 0x3dc   :  { %9390 = vmatmul.mubr.bf16.gmra.mrb[208].mxu0 %v21068_v16  ;;  %v7627_v42 = vrot.slane %v7613_v60, %v14719_v25  ;;  %v19075_v22 = vadd.f32 %v7620_v35, %v18776_v55  ;;  %v7629_v16 = vcombine.high %v7299_v46, %v7299_v46  ;;  %v12607_v52 = vpop.f32.mrb[107].mxu0  ;;  %v12701_v21 = vpop.f32.mrb[107].mxu1  ;;  %v21187_v35 = vld [vmem:[#allocation35_spill] sm:$0xff] }
 0x3dd   :  { %9522 = vmatmul.mubr.bf16.gmra.mrb[208].mxu1 %v21069_v13  ;;  %v7636_v13 = vrot.slane %v7299_v46, %v14719_v25  ;;  %v7304_v28 = vadd.f32 %v12699_v32, %v12605_v58  ;;  %v21193_v32 = vld [vmem:[#allocation6_spill] sm:$0xff]  ;;  %v21195_v62 = vld [vmem:[#allocation7_spill] sm:$0xff] }
 0x3de   :  { %21183 = vst [vmem:[#allocation51_spill] sm:$0xff] %v19075_v22  ;;  %v7628_v9 = vcombine.high %v7627_v42, %v7627_v42  ;;  %v19079_v4 = vadd.f32 %v7627_v42, %v18785_v8  ;;  %v7643_v61 = vrot.slane %v7629_v16, %v14719_v25 }
 0x3df   :  { %v7644_v3 = vcombine.high %v7636_v13, %v7636_v13  ;;  %v19083_v55 = vadd.f32 %v7636_v13, %v18804_v48  ;;  %v7646_v46 = vcombine.high %v7304_v28, %v7304_v28  ;;  %v7653_v42 = vrot.slane %v7304_v28, %v14719_v25  ;;  %v21191_v13 = vld [vmem:[#allocation19_spill] sm:$0xff] }
 0x3e0   :  { %21184 = vst [vmem:[#allocation69_spill] sm:$0xff] %v19079_v4  ;;  %v19086_v45 = vadd.f32 %v7628_v9, %v18793_v24  ;;  %v7645_v60 = vcombine.high %v7643_v61, %v7643_v61 }
 0x3e1   :  { %21185 = vst [vmem:[#allocation48_spill] sm:$0xff] %v19083_v55  ;;  %v19089_v8 = vadd.f32 %v7644_v3, %v21187_v35  ;;  %v7660_v16 = vrot.slane %v7646_v46, %v14719_v25  ;;  %v7661_v48 = vcombine.high %v7653_v42, %v7653_v42  ;;  %v19097_v11 = vadd.f32 %v7653_v42, %v21191_v13  ;;  %v12719_v51 = vpop.f32.mrb[108].mxu0  ;;  %v12813_v58 = vpop.f32.mrb[108].mxu1  ;;  %v11386_v46 = vld [vmem:[%s20248_s2] ss:$0 sm:$0xff]  ;;  %s13684_s2 = smov [#allocation2]  }
 0x3e2   :  { %21186 = vst [vmem:[#allocation57_spill] sm:$0xff] %v19086_v45  ;;  %v19093_v39 = vadd.f32 %v7645_v60, %v21189_v37  ;;  %v12720_v24 = vpop.f32.mrb[109].mxu0  ;;  %v12814_v9 = vpop.f32.mrb[109].mxu1  ;;  %s10475_s30 = sshll.u32 %s13684_s2, 4  ;;  %s10476_s30 = int_to_ptr.vmem [resolvable:$true] %s10475_s30 }
 0x3e3   :  { %21188 = vst [vmem:[#allocation50_spill] sm:$0xff] %v19089_v8  ;;  %21192 = vst [vmem:[#allocation53_spill] sm:$0xff] %v19097_v11  ;;  %v19100_v23 = vadd.f32 %v7661_v48, %v21193_v32  ;;  %v19103_v61 = vadd.f32 %v7660_v16, %v21195_v62  ;;  %v12722_v3 = vpop.f32.mrb[110].mxu0  ;;  %v12816_v52 = vpop.f32.mrb[110].mxu1  ;;  %v10016_v16 = vcombine.high %v11386_v46, %v11386_v46  ;;  %s13659_s4 = scalar_lea.vmem %s10476_s30, 2048  ;;  %p13664_p1 = scmp.lt.s32.totalorder %s10476_s30, %s10476_s30 }
 0x3e4   :  { %21190 = vst [vmem:[#allocation55_spill] sm:$0xff] %v19093_v39  ;;  %v12723_v21 = vpop.f32.mrb[111].mxu0  ;;  %v12817_v28 = vpop.f32.mrb[111].mxu1  ;;  %p13660_p0 = scmp.ne.s32.totalorder %s10476_s30, %s13659_s4  ;;  %p13665_p2 = scmp.lt.s32.totalorder %s13659_s4, %s13659_s4 }
 0x3e5   :  { %21194 = vst [vmem:[#allocation52_spill] sm:$0xff] %v19100_v23  ;;  %21196 = vst [vmem:[#allocation72_spill] sm:$0xff] %v19103_v61  ;;  %v19109_v28 = vrot.slane %v11386_v46, %v14719_v25  ;;  %v19112_v61 = vrot.slane %v10016_v16, %v14719_v25 }
 0x3e6   :  { %p13666_p3 = por %p13665_p2, %p13664_p1 }
 0x3e7   :  { %21197 = vst [vmem:[#allocation59_spill] sm:$0xff] %v19109_v28  ;;  %21198 = vst [vmem:[#allocation63_spill] sm:$0xff] %v19112_v61  ;;  %v19119_v46 = vcombine.high %v19109_v28, %v19109_v28 }
 0x3e8   :  { %p13667_p4 = pnand %p13666_p3, %p13660_p0 }
 0x3e9   :  { %v12725_v60 = vpop.f32.mrb[112].mxu0  ;;  %21199 = vst [vmem:[#allocation65_spill] sm:$0xff] %v19119_v46 }
 0x3ea   :  { %v12819_v35 = vpop.f32.mrb[112].mxu1  ;;  %v12726_v42 = vpop.f32.mrb[113].mxu0 }
 0x3eb   :  { %v12820_v37 = vpop.f32.mrb[113].mxu1  ;;  %v12727_v13 = vadd.f32 %v12726_v42, %v12725_v60  ;;  %v12728_v58 = vpop.f32.mrb[114].mxu0 }
 0x3ec   :  { %v12821_v51 = vadd.f32 %v12820_v37, %v12819_v35  ;;  %v12822_v48 = vpop.f32.mrb[114].mxu1  ;;  %v12729_v24 = vpop.f32.mrb[115].mxu0 }
 0x3ed   :  { %v12823_v9 = vpop.f32.mrb[115].mxu1  ;;  %v12730_v62 = vadd.f32 %v12729_v24, %v12728_v58 }
 0x3ee   :  { %v8220_v32 = vadd.f32 %v12821_v51, %v12727_v13  ;;  %v12824_v3 = vadd.f32 %v12823_v9, %v12822_v48 }
 0x3f0   :  { %v8332_v52 = vcombine.high %v8220_v32, %v8220_v32  ;;  %v8223_v21 = vadd.f32 %v12824_v3, %v12730_v62 }
 0x3f2   :  { %v8339_v23 = vrot.slane %v8332_v52, %v14719_v25  ;;  %v8341_v60 = vcombine.high %v8223_v21, %v8223_v21  ;;  %v8348_v35 = vrot.slane %v8223_v21, %v14719_v25  ;;  %v19123_v52 = vcombine.high %v19112_v61, %v19112_v61  ;;  %v21202_v61 = vld [vmem:[#allocation8_spill] sm:$0xff] }
 0x3f4   :  { %v12731_v42 = vpop.f32.mrb[116].mxu0  ;;  %v12825_v37 = vpop.f32.mrb[116].mxu1  ;;  %v8340_v13 = vcombine.high %v8339_v23, %v8339_v23  ;;  %v8355_v51 = vrot.slane %v8341_v60, %v14719_v25  ;;  %v8356_v58 = vcombine.high %v8348_v35, %v8348_v35  ;;  %v8677_v9 = vrot.slane %v8348_v35, 7  ;;  %21200 = vst [vmem:[#allocation56_spill] sm:$0xff] %v19123_v52 }
 0x3f5   :  { %v12732_v11 = vpop.f32.mrb[117].mxu0  ;;  %v12826_v39 = vpop.f32.mrb[117].mxu1  ;;  %v11274_v21 = vrot.slane %v8339_v23, 9 }
 0x3f6   :  { %v12734_v48 = vpop.f32.mrb[118].mxu0  ;;  %v12828_v24 = vpop.f32.mrb[118].mxu1  ;;  %v12733_v16 = vadd.f32 %v12732_v11, %v12731_v42  ;;  %v12827_v32 = vadd.f32 %v12826_v39, %v12825_v37  ;;  %v8674_v8 = vrot.slane %v8340_v13, 7  ;;  %v8357_v55 = vcombine.high %v8355_v51, %v8355_v51 }
 0x3f7   :  { %v12735_v62 = vpop.f32.mrb[119].mxu0  ;;  %v12829_v3 = vpop.f32.mrb[119].mxu1  ;;  %v8680_v60 = vrot.slane %v8356_v58, 7  ;;  %v8679_v45 = vrot.slane %v8677_v9, 2  ;;  %v8683_v46 = vrot.slane %v8355_v51, 7 }
 0x3f8   :  { %v8228_v4 = vadd.f32 %v12827_v32, %v12733_v16  ;;  %v12736_v22 = vadd.f32 %v12735_v62, %v12734_v48  ;;  %v12830_v53 = vadd.f32 %v12829_v3, %v12828_v24  ;;  %v8676_v30 = vrot.slane %v8674_v8, 2 }
 0x3f9   :  { %v8682_v28 = vrot.slane %v8680_v60, 2  ;;  %v8675_v39 = vsel %vm15056_vm6, %v11274_v21, %v8674_v8  ;;  %v11275_v23 = vrot.slane %v8357_v55, 9  ;;  %v8681_v24 = vsel %vm15056_vm6, %v8679_v45, %v8680_v60 }
 0x3fa   :  { %v8358_v11 = vcombine.high %v8228_v4, %v8228_v4  ;;  %v8365_v42 = vrot.slane %v8228_v4, %v14719_v25  ;;  %v8231_v37 = vadd.f32 %v12830_v53, %v12736_v22  ;;  %v19129_v52 = vadd.f32 %v8675_v39, %v21202_v61 }
 0x3fb   :  { %v8678_v48 = vsel %vm15056_vm6, %v8676_v30, %v8677_v9  ;;  %v8684_v51 = vsel %vm15056_vm6, %v8682_v28, %v8683_v46 }
 0x3fc   :  { %21203 = vst [vmem:[#allocation49_spill] sm:$0xff] %v19129_v52  ;;  %v19138_v8 = vrot.slane %v8358_v11, %v14719_v25  ;;  %v8373_v4 = vcombine.high %v8365_v42, %v8365_v42  ;;  %v8687_v53 = vrot.slane %v8365_v42, 7  ;;  %v8375_v22 = vcombine.high %v8231_v37, %v8231_v37 }
 0x3fd   :  { %v19141_v55 = vrot.slane %v8231_v37, %v14719_v25  ;;  %v19144_v45 = vadd.f32 %v8678_v48, %v18845_v36 }
 0x3fe   :  { %v12737_v13 = vpop.f32.mrb[120].mxu0  ;;  %v8374_v28 = vcombine.high %v19138_v8, %v19138_v8  ;;  %v19148_v46 = vrot.slane %v8687_v53, 2  ;;  %v19150_v3 = vrot.slane %v8373_v4, 7  ;;  %v8693_v21 = vrot.slane %v19138_v8, 7 }
 0x3ff   :  { %v12831_v58 = vpop.f32.mrb[120].mxu1  ;;  %v12738_v61 = vpop.f32.mrb[121].mxu0  ;;  %21204 = vst [vmem:[#allocation25_spill] sm:$0xff] %v19144_v45  ;;  %v19154_v11 = vrot.slane %v8375_v22, %v14719_v25  ;;  %v8390_v42 = vcombine.high %v19141_v55, %v19141_v55 }
 0x400   :  { %v12832_v16 = vpop.f32.mrb[121].mxu1  ;;  %v12739_v32 = vadd.f32 %v12738_v61, %v12737_v13  ;;  %v12740_v30 = vpop.f32.mrb[122].mxu0  ;;  %v8692_v13 = vrot.slane %v19150_v3, 2  ;;  %v19162_v48 = vrot.slane %v8374_v28, 7 }
 0x401   :  { %v12833_v62 = vadd.f32 %v12832_v16, %v12831_v58  ;;  %v12834_v9 = vpop.f32.mrb[122].mxu1  ;;  %v12741_v60 = vpop.f32.mrb[123].mxu0  ;;  %v19160_v58 = vrot.slane %v8693_v21, 2  ;;  %v8391_v8 = vcombine.high %v19154_v11, %v19154_v11  ;;  %v19166_v61 = vrot.slane %v8390_v42, 7 }
 0x402   :  { %v12835_v39 = vpop.f32.mrb[123].mxu1  ;;  %v12742_v4 = vadd.f32 %v12741_v60, %v12740_v30  ;;  %v20373_v22 = vrot.slane %v19154_v11, 7 }
 0x403   :  { %v8236_v37 = vadd.f32 %v12833_v62, %v12739_v32  ;;  %v12836_v36 = vadd.f32 %v12835_v39, %v12834_v9  ;;  %v19173_v32 = vadd.f32 %v8681_v24, %v18842_v43  ;;  %v21206_v62 = vld [vmem:[#allocation29_spill] sm:$0xff]  ;;  %v19183_v60 = vrot.slane %v8391_v8, 7 }
 0x404   :  { %v19176_v45 = vadd.f32 %v8684_v51, %v21206_v62  ;;  %v19181_v28 = vrot.slane %v20373_v22, 2  ;;  %v8688_v62 = vsel %vm15056_vm6, %v11275_v23, %v8687_v53 }
 0x405   :  { %v8392_v16 = vcombine.high %v8236_v37, %v8236_v37  ;;  %v19170_v52 = vrot.slane %v8236_v37, %v14719_v25  ;;  %21205 = vst [vmem:[#allocation58_spill] sm:$0xff] %v19173_v32  ;;  %v8239_v51 = vadd.f32 %v12836_v36, %v12742_v4 }
 0x406   :  { %21207 = vst [vmem:[#allocation22_spill] sm:$0xff] %v19176_v45 }
 0x407   :  { %v19186_v42 = vrot.slane %v8392_v16, %v14719_v25  ;;  %v12743_v37 = vpop.f32.mrb[124].mxu0  ;;  %v8407_v43 = vcombine.high %v19170_v52, %v19170_v52  ;;  %v8409_v56 = vcombine.high %v8239_v51, %v8239_v51  ;;  %v19200_v36 = vrot.slane %v8239_v51, %v14719_v25 }
 0x408   :  { %v12837_v41 = vpop.f32.mrb[124].mxu1  ;;  %v12744_v9 = vpop.f32.mrb[125].mxu0 }
 0x409   :  { %v12838_v39 = vpop.f32.mrb[125].mxu1  ;;  %v8408_v8 = vcombine.high %v19186_v42, %v19186_v42  ;;  %v20375_v16 = vrot.slane %v19186_v42, 7  ;;  %v12745_v22 = vadd.f32 %v12744_v9, %v12743_v37  ;;  %v12746_v45 = vpop.f32.mrb[126].mxu0  ;;  %v19197_v10 = vrot.slane %v8407_v43, 9 }
 0x40a   :  { %v12840_v32 = vpop.f32.mrb[126].mxu1  ;;  %v12839_v4 = vadd.f32 %v12838_v39, %v12837_v41  ;;  %v12747_v24 = vpop.f32.mrb[127].mxu0  ;;  %v19209_v37 = vrot.slane %v8409_v56, %v14719_v25  ;;  %v8424_v43 = vcombine.high %v19200_v36, %v19200_v36  ;;  %v20374_v51 = vrot.slane %v19200_v36, 7 }
 0x40b   :  { %v12841_v40 = vpop.f32.mrb[127].mxu1  ;;  %v19204_v23 = vrot.slane %v20375_v16, 2  ;;  %v19206_v53 = vrot.slane %v8408_v8, 7  ;;  %v12748_v30 = vadd.f32 %v12747_v24, %v12746_v45  ;;  %v8691_v8 = vsel %vm15056_vm6, %v19148_v46, %v19150_v3 }
 0x40c   :  { %v12842_v47 = vadd.f32 %v12841_v40, %v12840_v32  ;;  %v8244_v9 = vadd.f32 %v12839_v4, %v12745_v22  ;;  %v8694_v40 = vsel %vm15056_vm6, %v8692_v13, %v8693_v21  ;;  %v8425_v56 = vcombine.high %v19209_v37, %v19209_v37  ;;  %v21208_v22 = vld [vmem:[#allocation28_spill] sm:$0xff] }
 0x40d   :  { %v19225_v45 = vrot.slane %v20374_v51, 2  ;;  %v19227_v32 = vrot.slane %v8424_v43, 7  ;;  %v8697_v43 = vsel %vm15056_vm6, %v19160_v58, %v19162_v48  ;;  %v19243_v51 = vadd.f32 %v8688_v62, %v21208_v22 }
 0x40e   :  { %v8247_v39 = vadd.f32 %v12842_v47, %v12748_v30  ;;  %v8426_v47 = vcombine.high %v8244_v9, %v8244_v9  ;;  %v19231_v30 = vrot.slane %v8244_v9, %v14719_v25  ;;  %v19236_v13 = vrot.slane %v8425_v56, 7  ;;  %v21210_v9 = vld [vmem:[#allocation31_spill] sm:$0xff] }
 0x40f   :  { %v12749_v3 = vpop.f32.mrb[128].mxu0  ;;  %21209 = vst [vmem:[#allocation64_spill] sm:$0xff] %v19243_v51  ;;  %v19246_v16 = vadd.f32 %v8691_v8, %v21210_v9  ;;  %v19290_v7 = vadd.f32 %v8694_v40, %v18864_v0  ;;  %v21225_v38 = vrot.slane %v19206_v53, 2 }
 0x410   :  { %v8443_v24 = vcombine.high %v8247_v39, %v8247_v39  ;;  %v19234_v46 = vrot.slane %v8247_v39, %v14719_v25  ;;  %v12843_v21 = vpop.f32.mrb[128].mxu1  ;;  %v12750_v4 = vpop.f32.mrb[129].mxu0  ;;  %v19249_v39 = vrot.slane %v8426_v47, %v14719_v25  ;;  %v8441_v56 = vcombine.high %v19231_v30, %v19231_v30 }
 0x411   :  { %v12844_v41 = vpop.f32.mrb[129].mxu1  ;;  %21211 = vst [vmem:[#allocation60_spill] sm:$0xff] %v19246_v16  ;;  %v20376_v57 = vrot.slane %v19231_v30, 7  ;;  %v12752_v14 = vpop.f32.mrb[130].mxu0  ;;  %v12751_v8 = vadd.f32 %v12750_v4, %v12749_v3 }
 0x412   :  { %v19255_v15 = vrot.slane %v8443_v24, %v14719_v25  ;;  %v12846_v49 = vpop.f32.mrb[130].mxu1  ;;  %v8458_v48 = vcombine.high %v19234_v46, %v19234_v46  ;;  %v20377_v62 = vrot.slane %v19234_v46, 7  ;;  %v12753_v22 = vpop.f32.mrb[131].mxu0  ;;  %v8442_v9 = vcombine.high %v19249_v39, %v19249_v39 }
 0x413   :  { %v12847_v47 = vpop.f32.mrb[131].mxu1  ;;  %v19265_v16 = vrot.slane %v20376_v57, 2  ;;  %v19267_v24 = vrot.slane %v8441_v56, 7  ;;  %v12845_v57 = vadd.f32 %v12844_v41, %v12843_v21  ;;  %v12754_v56 = vadd.f32 %v12753_v22, %v12752_v14 }
 0x414   :  { %v8459_v58 = vcombine.high %v19255_v15, %v19255_v15  ;;  %v19274_v1 = vrot.slane %v20377_v62, 2  ;;  %v19276_v3 = vrot.slane %v8458_v48, 7  ;;  %v20380_v4 = vrot.slane %v19255_v15, 7 }
 0x415   :  { %v19280_v18 = vrot.slane %v8442_v9, 9  ;;  %v12848_v62 = vadd.f32 %v12847_v47, %v12846_v49  ;;  %v8252_v2 = vadd.f32 %v12845_v57, %v12751_v8  ;;  %v19293_v9 = vadd.f32 %v8697_v43, %v18867_v54 }
 0x416   :  { %v19285_v51 = vrot.slane %v20380_v4, 2  ;;  %v19287_v6 = vrot.slane %v8459_v58, 7  ;;  %v21212_v14 = vrot.slane %v19141_v55, 9  ;;  %v21213_v49 = vrot.slane %v19154_v11, 7 }
 0x417   :  { %v12755_v48 = vpop.f32.mrb[132].mxu0  ;;  %v8255_v21 = vadd.f32 %v12848_v62, %v12754_v56  ;;  %v21214_v57 = vrot.slane %v19166_v61, 2  ;;  %v8707_v54 = vsel %vm15056_vm6, %v19181_v28, %v19183_v60  ;;  %v8460_v40 = vcombine.high %v8252_v2, %v8252_v2  ;;  %v21216_v28 = vld [vmem:[#allocation34_spill] sm:$0xff] }
 0x418   :  { %v12849_v19 = vpop.f32.mrb[132].mxu1  ;;  %v8701_v41 = vsel %vm15056_vm6, %v21212_v14, %v19166_v61  ;;  %v12756_v22 = vpop.f32.mrb[133].mxu0  ;;  %v19314_v43 = vrot.slane %v8252_v2, %v14719_v25  ;;  %v21220_v2 = vld [vmem:[#allocation21_spill] sm:$0xff] }
 0x419   :  { %v12850_v58 = vpop.f32.mrb[133].mxu1  ;;  %v8704_v0 = vsel %vm15056_vm6, %v21214_v57, %v21213_v49  ;;  %v19311_v55 = vadd.f32 %v8701_v41, %v18871_v5  ;;  %v12757_v62 = vadd.f32 %v12756_v22, %v12755_v48  ;;  %v12758_v11 = vpop.f32.mrb[134].mxu0  ;;  %v8477_v61 = vcombine.high %v8255_v21, %v8255_v21  ;;  %v21215_v57 = vld [vmem:[#allocation36_spill] sm:$0xff] }
 0x41a   :  { %v12851_v8 = vadd.f32 %v12850_v58, %v12849_v19  ;;  %v12852_v47 = vpop.f32.mrb[134].mxu1  ;;  %v19317_v56 = vrot.slane %v8255_v21, %v14719_v25  ;;  %v12759_v14 = vpop.f32.mrb[135].mxu0  ;;  %v19320_v33 = vadd.f32 %v8704_v0, %v21215_v57  ;;  %v19323_v5 = vadd.f32 %v8707_v54, %v21216_v28 }
 0x41b   :  { %v12853_v49 = vpop.f32.mrb[135].mxu1  ;;  %v19326_v41 = vrot.slane %v8460_v40, %v14719_v25  ;;  %v8475_v19 = vcombine.high %v19314_v43, %v19314_v43  ;;  %v19332_v21 = vrot.slane %v8477_v61, %v14719_v25  ;;  %v21217_v0 = vrot.slane %v19170_v52, 7 }
 0x41c   :  { %v8260_v48 = vadd.f32 %v12851_v8, %v12757_v62  ;;  %v8492_v22 = vcombine.high %v19317_v56, %v19317_v56  ;;  %v21218_v54 = vrot.slane %v19183_v60, 2  ;;  %v21219_v60 = vrot.slane %v19186_v42, 7 }
 0x41d   :  { %v8476_v11 = vcombine.high %v19326_v41, %v19326_v41  ;;  %v19345_v47 = vrot.slane %v8475_v19, 7  ;;  %v20378_v62 = vrot.slane %v19326_v41, 7  ;;  %v8493_v61 = vcombine.high %v19332_v21, %v19332_v21 }
 0x41e   :  { %v8710_v40 = vsel %vm15056_vm6, %v21218_v54, %v21217_v0  ;;  %v19349_v8 = vrot.slane %v8260_v48, %v14719_v25  ;;  %v19353_v14 = vrot.slane %v8492_v22, 9  ;;  %v20379_v52 = vrot.slane %v19332_v21, 7 }
 0x41f   :  { %v8714_v49 = vsel %vm15056_vm6, %v19197_v10, %v21219_v60  ;;  %v19364_v28 = vrot.slane %v20378_v62, 2  ;;  %v19366_v19 = vrot.slane %v8476_v11, 7  ;;  %v12761_v22 = vpop.f32.mrb[136].mxu0  ;;  %v19374_v54 = vrot.slane %v8493_v61, 7 }
 0x420   :  { %v8501_v48 = vcombine.high %v19349_v8, %v19349_v8  ;;  %v12855_v0 = vpop.f32.mrb[136].mxu1  ;;  %v19372_v42 = vrot.slane %v20379_v52, 2  ;;  %v20381_v10 = vrot.slane %v19349_v8, 7  ;;  %v12762_v60 = vpop.f32.mrb[137].mxu0  ;;  %v8717_v11 = vsel %vm15056_vm6, %v19204_v23, %v19206_v53  ;;  %v21229_v53 = vld [vmem:[#allocation38_spill] sm:$0xff] }
 0x421   :  { %v12856_v58 = vpop.f32.mrb[137].mxu1  ;;  %v12764_v22 = vpop.f32.mrb[138].mxu0  ;;  %v19385_v52 = vadd.f32 %v8710_v40, %v21220_v2  ;;  %v19388_v61 = vadd.f32 %v8714_v49, %v18890_v34  ;;  %v19396_v57 = vadd.f32 %v8717_v11, %v18893_v27  ;;  %v8723_v49 = vsel %vm15056_vm6, %v19225_v45, %v19227_v32  ;;  %v21227_v11 = vld [vmem:[#allocation39_spill] sm:$0xff] }
 0x422   :  { %v19382_v62 = vrot.slane %v8501_v48, 7  ;;  %v12858_v0 = vpop.f32.mrb[138].mxu1  ;;  %v19393_v58 = vrot.slane %v20381_v10, 2  ;;  %v12765_v4 = vpop.f32.mrb[139].mxu0  ;;  %v21224_v48 = vrot.slane %v19200_v36, 7  ;;  %v21226_v60 = vrot.slane %v19209_v37, 9 }
 0x423   :  { %21221 = vst [vmem:[#allocation73_spill] sm:$0xff] %v19385_v52  ;;  %21222 = vst [vmem:[#allocation24_spill] sm:$0xff] %v19388_v61  ;;  %v12859_v23 = vpop.f32.mrb[139].mxu1  ;;  %v12766_v34 = vadd.f32 %v12765_v4, %v12764_v22  ;;  %v19417_v10 = vadd.f32 %v8723_v49, %v21229_v53  ;;  %v21233_v22 = vrot.slane %v19231_v30, 7  ;;  %v8733_v32 = vsel %vm15056_vm6, %v19265_v16, %v19267_v24 }
 0x424   :  { %21223 = vst [vmem:[#allocation61_spill] sm:$0xff] %v19396_v57  ;;  %v8720_v2 = vsel %vm15056_vm6, %v21225_v38, %v21224_v48  ;;  %v12860_v40 = vadd.f32 %v12859_v23, %v12858_v0  ;;  %v8727_v27 = vsel %vm15056_vm6, %v21226_v60, %v19236_v13  ;;  %v21231_v38 = vld [vmem:[#allocation40_spill] sm:$0xff]  ;;  %v21234_v0 = vrot.slane %v19236_v13, 2 }
 0x425   :  { %v19414_v36 = vadd.f32 %v8720_v2, %v21227_v11  ;;  %21230 = vst [vmem:[#allocation76_spill] sm:$0xff] %v19417_v10  ;;  %v19420_v4 = vadd.f32 %v8727_v27, %v21231_v38  ;;  %v21235_v60 = vrot.slane %v19249_v39, 7  ;;  %v21236_v23 = vrot.slane %v19267_v24, 2  ;;  %v21237_v2 = vld [vmem:[#allocation23_spill] sm:$0xff]  ;;  %v21239_v13 = vld [vmem:[#allocation20_spill] sm:$0xff] }
 0x426   :  { %v8730_v45 = vsel %vm15056_vm6, %v21234_v0, %v21233_v22  ;;  %v8269_v37 = vadd.f32 %v12860_v40, %v12766_v34  ;;  %v19442_v49 = vadd.f32 %v8733_v32, %v21239_v13  ;;  %v21242_v40 = vrot.slane %v19234_v46, 7  ;;  %v21248_v32 = vld [vmem:[#allocation37_spill] sm:$0xff] }
 0x427   :  { %21228 = vst [vmem:[#allocation75_spill] sm:$0xff] %v19414_v36  ;;  %21232 = vst [vmem:[#allocation74_spill] sm:$0xff] %v19420_v4  ;;  %v8736_v48 = vsel %vm15056_vm6, %v21236_v23, %v21235_v60  ;;  %v19439_v30 = vadd.f32 %v8730_v45, %v21237_v2  ;;  %v8743_v39 = vsel %vm15056_vm6, %v19274_v1, %v19276_v3  ;;  %v12767_v11 = vpop.f32.mrb[140].mxu0  ;;  %v21244_v38 = vrot.slane %v19276_v3, 2  ;;  %v21246_v45 = vld [vmem:[#allocation26_spill] sm:$0xff]  ;;  %v21250_v3 = vld [vmem:[#allocation13_spill] sm:$0xff] }
 0x428   :  { %21240 = vst [vmem:[#allocation78_spill] sm:$0xff] %v19442_v49  ;;  %v19445_v34 = vadd.f32 %v8736_v48, %v18923_v17  ;;  %v8740_v16 = vsel %vm15056_vm6, %v19280_v18, %v21242_v40  ;;  %v8502_v24 = vcombine.high %v8269_v37, %v8269_v37  ;;  %v19457_v27 = vrot.slane %v8269_v37, %v14719_v25  ;;  %v12861_v53 = vpop.f32.mrb[140].mxu1  ;;  %v12768_v22 = vpop.f32.mrb[141].mxu0 }
 0x429   :  { %21238 = vst [vmem:[#allocation77_spill] sm:$0xff] %v19439_v30  ;;  %v21243_v17 = vrot.slane %v19255_v15, 7  ;;  %v8749_v18 = vsel %vm15056_vm6, %v19285_v51, %v19287_v6  ;;  %v12862_v1 = vpop.f32.mrb[141].mxu1  ;;  %v19470_v0 = vadd.f32 %v8740_v16, %v18932_v50  ;;  %v19473_v37 = vadd.f32 %v8743_v39, %v21246_v45  ;;  %v12770_v50 = vpop.f32.mrb[142].mxu0  ;;  %v21255_v45 = vld [vmem:[#allocation14_spill] sm:$0xff] }
 0x42a   :  { %21241 = vst [vmem:[#allocation79_spill] sm:$0xff] %v19445_v34  ;;  %v19479_v60 = vadd.f32 %v8749_v18, %v21250_v3  ;;  %v19482_v23 = vrot.slane %v8502_v24, %v14719_v25  ;;  %v8517_v6 = vcombine.high %v19457_v27, %v19457_v27  ;;  %v12769_v48 = vadd.f32 %v12768_v22, %v12767_v11  ;;  %v12864_v2 = vpop.f32.mrb[142].mxu1  ;;  %v12771_v40 = vpop.f32.mrb[143].mxu0 }
 0x42b   :  { %v8746_v46 = vsel %vm15056_vm6, %v21244_v38, %v21243_v17  ;;  %21245 = vst [vmem:[#allocation30_spill] sm:$0xff] %v19470_v0  ;;  %21247 = vst [vmem:[#allocation81_spill] sm:$0xff] %v19473_v37  ;;  %v12863_v13 = vadd.f32 %v12862_v1, %v12861_v53  ;;  %v12865_v16 = vpop.f32.mrb[143].mxu1  ;;  %v21252_v39 = vrot.slane %v19314_v43, 9  ;;  %v21253_v24 = vrot.slane %v19326_v41, 7 }
 0x42c   :  { %v19476_v15 = vadd.f32 %v8746_v46, %v21248_v32  ;;  %21251 = vst [vmem:[#allocation80_spill] sm:$0xff] %v19479_v60  ;;  %v21254_v38 = vrot.slane %v19345_v47, 2  ;;  %v8759_v11 = vsel %vm15056_vm6, %v19364_v28, %v19366_v19  ;;  %v8518_v53 = vcombine.high %v19482_v23, %v19482_v23 }
 0x42d   :  { %v8753_v17 = vsel %vm15056_vm6, %v21252_v39, %v19345_v47  ;;  %v19504_v18 = vrot.slane %v8517_v6, 7  ;;  %v20382_v43 = vrot.slane %v19482_v23, 7  ;;  %v12772_v22 = vadd.f32 %v12771_v40, %v12770_v50 }
 0x42e   :  { %21249 = vst [vmem:[#allocation27_spill] sm:$0xff] %v19476_v15  ;;  %v8756_v46 = vsel %vm15056_vm6, %v21254_v38, %v21253_v24  ;;  %v8274_v1 = vadd.f32 %v12863_v13, %v12769_v48  ;;  %v12866_v41 = vadd.f32 %v12865_v16, %v12864_v2  ;;  %v19508_v47 = vadd.f32 %v8753_v17, %v21255_v45 }
 0x42f   :  { %v19511_v32 = vadd.f32 %v8756_v46, %v18946_v12  ;;  %v19516_v28 = vrot.slane %v20382_v43, 2  ;;  %v19518_v39 = vrot.slane %v8518_v53, 7  ;;  %v19521_v6 = vadd.f32 %v8759_v11, %v18949_v44  ;;  %v12773_v17 = vpop.f32.mrb[144].mxu0 }
 0x430   :  { %21256 = vst [vmem:[#allocation18_spill] sm:$0xff] %v19508_v47  ;;  %v8519_v50 = vcombine.high %v8274_v1, %v8274_v1  ;;  %v19524_v48 = vrot.slane %v8274_v1, %v14719_v25  ;;  %v8277_v2 = vadd.f32 %v12866_v41, %v12772_v22  ;;  %v21259_v13 = vrot.slane %v19317_v56, 7  ;;  %v12867_v24 = vpop.f32.mrb[144].mxu1  ;;  %v12774_v22 = vpop.f32.mrb[145].mxu0 }
 0x431   :  { %21257 = vst [vmem:[#allocation35_spill] sm:$0xff] %v19511_v32  ;;  %21258 = vst [vmem:[#allocation5_spill] sm:$0xff] %v19521_v6  ;;  %v21260_v12 = vrot.slane %v19366_v19, 2  ;;  %v21261_v38 = vrot.slane %v19332_v21, 7  ;;  %v8769_v56 = vsel %vm15056_vm6, %v19372_v42, %v19374_v54  ;;  %v12868_v1 = vpop.f32.mrb[145].mxu1  ;;  %v12775_v41 = vadd.f32 %v12774_v22, %v12773_v17  ;;  %v12776_v42 = vpop.f32.mrb[146].mxu0 }
 0x432   :  { %v19546_v46 = vrot.slane %v8519_v50, %v14719_v25  ;;  %v8534_v11 = vcombine.high %v19524_v48, %v19524_v48  ;;  %v8536_v53 = vcombine.high %v8277_v2, %v8277_v2  ;;  %v12869_v45 = vadd.f32 %v12868_v1, %v12867_v24  ;;  %v12777_v16 = vpop.f32.mrb[147].mxu0 }
 0x433   :  { %v8762_v40 = vsel %vm15056_vm6, %v21260_v12, %v21259_v13  ;;  %v8766_v44 = vsel %vm15056_vm6, %v19353_v14, %v21261_v38  ;;  %v19552_v14 = vrot.slane %v8277_v2, %v14719_v25  ;;  %v12870_v13 = vpop.f32.mrb[146].mxu1 }
 0x434   :  { %v19543_v19 = vadd.f32 %v8762_v40, %v18960_v63  ;;  %v19555_v63 = vadd.f32 %v8766_v44, %v18952_v29  ;;  %v8535_v50 = vcombine.high %v19546_v46, %v19546_v46  ;;  %v19559_v12 = vrot.slane %v8534_v11, 9  ;;  %v12871_v2 = vpop.f32.mrb[147].mxu1 }
 0x435   :  { %v20383_v40 = vrot.slane %v19546_v46, 7  ;;  %v19563_v38 = vrot.slane %v8536_v53, %v14719_v25  ;;  %v8551_v17 = vcombine.high %v19552_v14, %v19552_v14  ;;  %v20384_v24 = vrot.slane %v19552_v14, 7 }
 0x436   :  { %21262 = vst [vmem:[#allocation19_spill] sm:$0xff] %v19543_v19  ;;  %21263 = vst [vmem:[#allocation6_spill] sm:$0xff] %v19555_v63  ;;  %v8282_v22 = vadd.f32 %v12869_v45, %v12775_v41  ;;  %v12778_v29 = vadd.f32 %v12777_v16, %v12776_v42  ;;  %v19572_v11 = vrot.slane %v8535_v50, 7  ;;  %v12872_v42 = vadd.f32 %v12871_v2, %v12870_v13  ;;  %v21264_v50 = vld [vmem:[#allocation17_spill] sm:$0xff] }
 0x437   :  { %v19570_v44 = vrot.slane %v20383_v40, 2  ;;  %v8552_v1 = vcombine.high %v19563_v38, %v19563_v38  ;;  %v19579_v21 = vrot.slane %v20384_v24, 2  ;;  %v19581_v3 = vrot.slane %v8551_v17, 7  ;;  %v12779_v51 = vpop.f32.mrb[148].mxu0  ;;  %v21268_v17 = vld [vmem:[#allocation11_spill] sm:$0xff] }
 0x438   :  { %v8553_v43 = vcombine.high %v8282_v22, %v8282_v22  ;;  %v19584_v16 = vrot.slane %v8282_v22, %v14719_v25  ;;  %v19590_v40 = vadd.f32 %v8769_v56, %v21264_v50  ;;  %v12873_v63 = vpop.f32.mrb[148].mxu1  ;;  %v21266_v22 = vrot.slane %v19349_v8, 7 }
 0x439   :  { %v19587_v45 = vrot.slane %v8552_v1, 7  ;;  %v21267_v41 = vrot.slane %v19374_v54, 2  ;;  %v8285_v2 = vadd.f32 %v12872_v42, %v12778_v29  ;;  %v12780_v1 = vpop.f32.mrb[149].mxu0  ;;  %v8775_v50 = vsel %vm15056_vm6, %v19393_v58, %v19382_v62 }
 0x43a   :  { %21265 = vst [vmem:[#allocation7_spill] sm:$0xff] %v19590_v40  ;;  %v19593_v53 = vrot.slane %v8553_v43, %v14719_v25  ;;  %v8568_v24 = vcombine.high %v19584_v16, %v19584_v16  ;;  %v12874_v43 = vpop.f32.mrb[149].mxu1  ;;  %v21270_v54 = vrot.slane %v19584_v16, 7  ;;  %v12782_v42 = vpop.f32.mrb[150].mxu0  ;;  %v12781_v62 = vadd.f32 %v12780_v1, %v12779_v51  ;;  %v21271_v51 = vld [vmem:[#allocation41_spill] sm:$0xff] }
 0x43b   :  { %v8772_v13 = vsel %vm15056_vm6, %v21267_v41, %v21266_v22  ;;  %v12876_v22 = vpop.f32.mrb[150].mxu1  ;;  %v8570_v56 = vcombine.high %v8285_v2, %v8285_v2  ;;  %v19622_v6 = vrot.slane %v8285_v2, %v14719_v25  ;;  %v12875_v58 = vadd.f32 %v12874_v43, %v12873_v63 }
 0x43c   :  { %v19610_v40 = vadd.f32 %v8772_v13, %v21268_v17  ;;  %v8569_v8 = vcombine.high %v19593_v53, %v19593_v53  ;;  %v19616_v19 = vrot.slane %v21270_v54, 2  ;;  %v19618_v41 = vrot.slane %v8568_v24, 7  ;;  %v12783_v17 = vpop.f32.mrb[151].mxu0  ;;  %v12877_v13 = vpop.f32.mrb[151].mxu1 }
 0x43d   :  { %v12784_v54 = vadd.f32 %v12783_v17, %v12782_v42  ;;  %v12878_v47 = vadd.f32 %v12877_v13, %v12876_v22  ;;  %v19628_v24 = vrot.slane %v8570_v56, %v14719_v25  ;;  %v8585_v29 = vcombine.high %v19622_v6, %v19622_v6 }
 0x43e   :  { %21269 = vst [vmem:[#allocation33_spill] sm:$0xff] %v19610_v40  ;;  %v19625_v32 = vrot.slane %v8569_v8, 9  ;;  %v20386_v60 = vrot.slane %v19622_v6, 7  ;;  %v8290_v2 = vadd.f32 %v12875_v58, %v12781_v62  ;;  %v19634_v63 = vadd.f32 %v8775_v50, %v21271_v51 }
 0x43f   :  { %v8293_v15 = vadd.f32 %v12878_v47, %v12784_v54  ;;  %v21273_v1 = vrot.slane %v19457_v27, 9  ;;  %v21274_v8 = vrot.slane %v19482_v23, 7  ;;  %v21275_v56 = vrot.slane %v19504_v18, 2  ;;  %v12785_v17 = vpop.f32.mrb[152].mxu0 }
 0x440   :  { %21272 = vst [vmem:[#allocation8_spill] sm:$0xff] %v19634_v63  ;;  %v8586_v22 = vcombine.high %v19628_v24, %v19628_v24  ;;  %v19651_v47 = vrot.slane %v20386_v60, 2  ;;  %v19653_v50 = vrot.slane %v8585_v29, 7  ;;  %v20385_v27 = vrot.slane %v19628_v24, 7  ;;  %v12879_v13 = vpop.f32.mrb[152].mxu1 }
 0x441   :  { %v8779_v43 = vsel %vm15056_vm6, %v21273_v1, %v19504_v18  ;;  %v8782_v42 = vsel %vm15056_vm6, %v21275_v56, %v21274_v8  ;;  %v8587_v62 = vcombine.high %v8290_v2, %v8290_v2  ;;  %v19657_v58 = vrot.slane %v8290_v2, %v14719_v25  ;;  %v12786_v1 = vpop.f32.mrb[153].mxu0  ;;  %v12880_v8 = vpop.f32.mrb[153].mxu1 }
 0x442   :  { %v8604_v23 = vcombine.high %v8293_v15, %v8293_v15  ;;  %v19660_v18 = vrot.slane %v8293_v15, %v14719_v25  ;;  %v19665_v51 = vrot.slane %v20385_v27, 2  ;;  %v19667_v29 = vrot.slane %v8586_v22, 7  ;;  %v12788_v22 = vpop.f32.mrb[154].mxu0  ;;  %v12882_v60 = vpop.f32.mrb[154].mxu1 }
 0x443   :  { %v8785_v2 = vsel %vm15056_vm6, %v19516_v28, %v19518_v39  ;;  %v19674_v15 = vrot.slane %v8587_v62, %v14719_v25  ;;  %v8602_v56 = vcombine.high %v19657_v58, %v19657_v58  ;;  %v12787_v37 = vadd.f32 %v12786_v1, %v12785_v17  ;;  %v12789_v0 = vpop.f32.mrb[155].mxu0  ;;  %v12883_v62 = vpop.f32.mrb[155].mxu1 }
 0x444   :  { %v19680_v27 = vrot.slane %v8604_v23, %v14719_v25  ;;  %v8619_v40 = vcombine.high %v19660_v18, %v19660_v18  ;;  %v12881_v28 = vadd.f32 %v12880_v8, %v12879_v13  ;;  %v12790_v63 = vadd.f32 %v12789_v0, %v12788_v22 }
 0x445   :  { %v8603_v34 = vcombine.high %v19674_v15, %v19674_v15  ;;  %v19687_v49 = vrot.slane %v8602_v56, 7  ;;  %v20388_v54 = vrot.slane %v19674_v15, 7 }
 0x446   :  { %v8620_v23 = vcombine.high %v19680_v27, %v19680_v27  ;;  %v19692_v30 = vrot.slane %v8619_v40, 9  ;;  %v20387_v4 = vrot.slane %v19680_v27, 7  ;;  %v8298_v10 = vadd.f32 %v12881_v28, %v12787_v37 }
 0x447   :  { %v19698_v13 = vrot.slane %v20388_v54, 2  ;;  %v19700_v1 = vrot.slane %v8603_v34, 7  ;;  %v12884_v37 = vadd.f32 %v12883_v62, %v12882_v60  ;;  %v12791_v28 = vpop.f32.mrb[156].mxu0  ;;  %v19714_v34 = vadd.f32 %v8779_v43, %v18978_v20 }
 0x448   :  { %v19702_v8 = vrot.slane %v8620_v23, 7  ;;  %v19706_v56 = vrot.slane %v20387_v4, 2  ;;  %v8621_v40 = vcombine.high %v8298_v10, %v8298_v10  ;;  %v19709_v36 = vrot.slane %v8298_v10, %v14719_v25  ;;  %v12885_v17 = vpop.f32.mrb[156].mxu1  ;;  %v12792_v0 = vpop.f32.mrb[157].mxu0 }
 0x449   :  { %v19717_v23 = vadd.f32 %v8782_v42, %v18981_v26  ;;  %v8301_v62 = vadd.f32 %v12884_v37, %v12790_v63  ;;  %v12886_v54 = vpop.f32.mrb[157].mxu1  ;;  %v12793_v22 = vadd.f32 %v12792_v0, %v12791_v28  ;;  %v12794_v61 = vpop.f32.mrb[158].mxu0  ;;  %v19726_v20 = vadd.f32 %v8785_v2, %v18984_v59 }
 0x44a   :  { %v19720_v4 = vrot.slane %v8621_v40, %v14719_v25  ;;  %v8636_v10 = vcombine.high %v19709_v36, %v19709_v36  ;;  %v20390_v60 = vrot.slane %v19709_v36, 7  ;;  %v12887_v57 = vadd.f32 %v12886_v54, %v12885_v17  ;;  %v12888_v52 = vpop.f32.mrb[158].mxu1  ;;  %v12795_v59 = vpop.f32.mrb[159].mxu0 }
 0x44b   :  { %v21276_v26 = vrot.slane %v19524_v48, 7  ;;  %v21277_v43 = vrot.slane %v19518_v39, 2  ;;  %v12889_v61 = vpop.f32.mrb[159].mxu1  ;;  %v8638_v2 = vcombine.high %v8301_v62, %v8301_v62  ;;  %v19744_v48 = vrot.slane %v8301_v62, %v14719_v25  ;;  %v21284_v52 = vld [vmem:[#allocation43_spill] sm:$0xff] }
 0x44c   :  { %v8637_v40 = vcombine.high %v19720_v4, %v19720_v4  ;;  %v19738_v63 = vrot.slane %v20390_v60, 2  ;;  %v19740_v54 = vrot.slane %v8636_v10, 7  ;;  %v8306_v39 = vadd.f32 %v12887_v57, %v12793_v22 }
 0x44d   :  { %v8788_v42 = vsel %vm15056_vm6, %v21277_v43, %v21276_v26  ;;  %v21278_v17 = vrot.slane %v19546_v46, 7  ;;  %v8795_v28 = vsel %vm15056_vm6, %v19570_v44, %v19572_v11  ;;  %v21279_v26 = vld [vmem:[#allocation42_spill] sm:$0xff]  ;;  %v19764_v57 = vrot.slane %v8638_v2, %v14719_v25 }
 0x44e   :  { %v19751_v0 = vrot.slane %v8637_v40, 7  ;;  %v19758_v10 = vadd.f32 %v8788_v42, %v18991_v31  ;;  %v8653_v46 = vcombine.high %v19744_v48, %v19744_v48  ;;  %v8655_v22 = vcombine.high %v8306_v39, %v8306_v39  ;;  %v21280_v44 = vld [vmem:[#allocation10_spill] sm:$0xff] }
 0x44f   :  { %v8792_v37 = vsel %vm15056_vm6, %v19559_v12, %v21278_v17  ;;  %v20389_v12 = vrot.slane %v19744_v48, 7  ;;  %v19771_v40 = vrot.slane %v8306_v39, %v14719_v25  ;;  %v19774_v31 = vadd.f32 %v8795_v28, %v21280_v44  ;;  %v12907_v28 = vpop.f32.mrb[160].mxu0 }
 0x450   :  { %v19761_v62 = vadd.f32 %v8792_v37, %v21279_v26  ;;  %v21281_v42 = vrot.slane %v19552_v14, 7  ;;  %v21282_v59 = vrot.slane %v19572_v11, 2  ;;  %v8654_v2 = vcombine.high %v19764_v57, %v19764_v57  ;;  %v13001_v26 = vpop.f32.mrb[160].mxu1 }
 0x451   :  { %v19786_v17 = vrot.slane %v20389_v12, 2  ;;  %v19788_v37 = vrot.slane %v8653_v46, 7  ;;  %v19792_v14 = vrot.slane %v8655_v22, %v14719_v25  ;;  %v8670_v11 = vcombine.high %v19771_v40, %v19771_v40 }
 0x452   :  { %v8798_v61 = vsel %vm15056_vm6, %v21282_v59, %v21281_v42  ;;  %v20391_v44 = vrot.slane %v19771_v40, 7  ;;  %v12908_v42 = vpop.f32.mrb[161].mxu0  ;;  %v13002_v59 = vpop.f32.mrb[161].mxu1  ;;  %v8801_v46 = vsel %vm15056_vm6, %v19579_v21, %v19581_v3  ;;  %v19802_v39 = vrot.slane %v8654_v2, 9 }
 0x453   :  { %v12910_v28 = vpop.f32.mrb[162].mxu0  ;;  %v13004_v26 = vpop.f32.mrb[162].mxu1  ;;  %v21283_v22 = vrot.slane %v19563_v38, 9  ;;  %v19810_v42 = vadd.f32 %v8798_v61, %v21284_v52  ;;  %v8671_v59 = vcombine.high %v19792_v14, %v19792_v14  ;;  %v19818_v21 = vrot.slane %v8670_v11, 7  ;;  %v21285_v38 = vld [vmem:[#allocation9_spill] sm:$0xff] }
 0x454   :  { %v19816_v3 = vrot.slane %v20391_v44, 2  ;;  %v20392_v2 = vrot.slane %v19792_v14, 7  ;;  %v12911_v28 = vpop.f32.mrb[163].mxu0  ;;  %v13005_v26 = vpop.f32.mrb[163].mxu1  ;;  %v19822_v43 = vadd.f32 %v8801_v46, %v21285_v38  ;;  %v21287_v52 = vrot.slane %v19584_v16, 7  ;;  %v21291_v38 = vld [vmem:[#allocation44_spill] sm:$0xff] }
 0x455   :  { %v8805_v12 = vsel %vm15056_vm6, %v21283_v22, %v19587_v45  ;;  %v21286_v22 = vld [vmem:[#allocation12_spill] sm:$0xff]  ;;  %v21288_v61 = vrot.slane %v19587_v45, 2  ;;  %v8811_v11 = vsel %vm15056_vm6, %v19616_v19, %v19618_v41  ;;  %v21289_v16 = vrot.slane %v19593_v53, 7 }
 0x456   :  { %v19825_v60 = vadd.f32 %v8805_v12, %v21286_v22  ;;  %v19840_v46 = vrot.slane %v20392_v2, 2  ;;  %v19842_v12 = vrot.slane %v8671_v59, 7  ;;  %v21290_v45 = vrot.slane %v19618_v41, 2 }
 0x457   :  { %v8808_v44 = vsel %vm15056_vm6, %v21288_v61, %v21287_v52  ;;  %v21292_v52 = vld [vmem:[#allocation15_spill] sm:$0xff]  ;;  %v21293_v61 = vld [vmem:[#allocation32_spill] sm:$0xff]  ;;  %v21294_v2 = vrot.slane %v19622_v6, 7  ;;  %v8821_v41 = vsel %vm15056_vm6, %v19651_v47, %v19653_v50  ;;  %v21296_v59 = vrot.slane %v19653_v50, 2  ;;  %v21299_v47 = vld [vmem:[#allocation46_spill] sm:$0xff] }
 0x458   :  { %v8814_v26 = vsel %vm15056_vm6, %v21290_v45, %v21289_v16  ;;  %v19851_v22 = vadd.f32 %v8808_v44, %v21291_v38  ;;  %v19854_v19 = vadd.f32 %v8811_v11, %v21292_v52  ;;  %v21295_v44 = vrot.slane %v19628_v24, 7  ;;  %v21297_v16 = vld [vmem:[#allocation66_spill] sm:$0xff]  ;;  %v21301_v50 = vld [vmem:[#allocation45_spill] sm:$0xff] }
 0x459   :  { %v19857_v28 = vadd.f32 %v8814_v26, %v21293_v61  ;;  %v8818_v53 = vsel %vm15056_vm6, %v19625_v32, %v21294_v2  ;;  %v8827_v6 = vsel %vm15056_vm6, %v19665_v51, %v19667_v29  ;;  %v12913_v32 = vpop.f32.mrb[164].mxu0  ;;  %v13007_v2 = vpop.f32.mrb[164].mxu1  ;;  %v21298_v26 = vld [vmem:[#allocation16_spill] sm:$0xff]  ;;  %v21303_v61 = vrot.slane %v19657_v58, 9 }
 0x45a   :  { %v8824_v11 = vsel %vm15056_vm6, %v21296_v59, %v21295_v44  ;;  %v19879_v45 = vadd.f32 %v8818_v53, %v21297_v16  ;;  %v19882_v38 = vadd.f32 %v8821_v41, %v21298_v26  ;;  %v19888_v52 = vadd.f32 %v8827_v6, %v21301_v50  ;;  %v12914_v29 = vpop.f32.mrb[165].mxu0  ;;  %v13008_v53 = vpop.f32.mrb[165].mxu1  ;;  %v21306_v6 = vld [vmem:[#allocation70_spill] sm:$0xff] }
 0x45b   :  { %v19885_v24 = vadd.f32 %v8824_v11, %v21299_v47  ;;  %v8831_v51 = vsel %vm15056_vm6, %v21303_v61, %v19687_v49  ;;  %v21304_v44 = vrot.slane %v19674_v15, 7  ;;  %v21305_v59 = vrot.slane %v19687_v49, 2  ;;  %v12916_v50 = vpop.f32.mrb[166].mxu0  ;;  %v13010_v61 = vpop.f32.mrb[166].mxu1 }
 0x45c   :  { %21302 = vst [vmem:[#allocation28_spill] sm:$0xff] %v19888_v52  ;;  %v8837_v11 = vsel %vm15056_vm6, %v19698_v13, %v19700_v1  ;;  %v19906_v16 = vadd.f32 %v8831_v51, %v21306_v6  ;;  %v21307_v58 = vrot.slane %v19660_v18, 7  ;;  %v21308_v26 = vrot.slane %v19700_v1, 2  ;;  %v21310_v52 = vld [vmem:[#allocation71_spill] sm:$0xff]  ;;  %v12917_v13 = vpop.f32.mrb[167].mxu0  ;;  %v13011_v51 = vpop.f32.mrb[167].mxu1 }
 0x45d   :  { %21300 = vst [vmem:[#allocation29_spill] sm:$0xff] %v19885_v24  ;;  %v8834_v41 = vsel %vm15056_vm6, %v21305_v59, %v21304_v44  ;;  %v12915_v47 = vadd.f32 %v12914_v29, %v12913_v32  ;;  %v13009_v49 = vadd.f32 %v13008_v53, %v13007_v2  ;;  %v21309_v44 = vld [vmem:[#allocation68_spill] sm:$0xff]  ;;  %v19918_v24 = vadd.f32 %v8837_v11, %v21310_v52  ;;  %v21312_v32 = vld [vmem:[#allocation47_spill] sm:$0xff] }
 0x45e   :  { %v8840_v15 = vsel %vm15056_vm6, %v21308_v26, %v21307_v58  ;;  %v19915_v59 = vadd.f32 %v8834_v41, %v21309_v44  ;;  %v21311_v6 = vrot.slane %v19680_v27, 7  ;;  %v8847_v1 = vsel %vm15056_vm6, %v19706_v56, %v19702_v8  ;;  %v21315_v58 = vld [vmem:[#allocation62_spill] sm:$0xff]  ;;  %v21316_v26 = vld [vmem:[#allocation67_spill] sm:$0xff] }
 0x45f   :  { %v19930_v2 = vadd.f32 %v8840_v15, %v21312_v32  ;;  %v21313_v29 = vrot.slane %v19709_v36, 7  ;;  %v21314_v52 = vrot.slane %v19702_v8, 2  ;;  %v9438_v27 = vadd.f32 %v13009_v49, %v12915_v47  ;;  %v21318_v15 = vld [vmem:[#allocation54_spill] sm:$0xff] }
 0x460   :  { %v8844_v18 = vsel %vm15056_vm6, %v19692_v30, %v21311_v6  ;;  %v12918_v41 = vadd.f32 %v12917_v13, %v12916_v50  ;;  %v13012_v11 = vadd.f32 %v13011_v51, %v13010_v61  ;;  %v19942_v44 = vadd.f32 %v8847_v1, %v21316_v26  ;;  %v21319_v61 = vld [vmem:[#allocation51_spill] sm:$0xff]  ;;  %v21320_v51 = vld [vmem:[#allocation69_spill] sm:$0xff]  ;;  %v21327_v26 = vld [vmem:[#allocation48_spill] sm:$0xff] }
 0x461   :  { %v8850_v53 = vsel %vm15056_vm6, %v21314_v52, %v21313_v29  ;;  %v19939_v30 = vadd.f32 %v8844_v18, %v21315_v58  ;;  %v8853_v56 = vsel %vm15056_vm6, %v19738_v63, %v19740_v54  ;;  %v21317_v36 = vrot.slane %v19720_v4, 9 }
 0x462   :  { %v19954_v47 = vadd.f32 %v8850_v53, %v21318_v15  ;;  %v9550_v49 = vcombine.high %v9438_v27, %v9438_v27  ;;  %v9441_v50 = vadd.f32 %v13012_v11, %v12918_v41  ;;  %v19957_v13 = vadd.f32 %v8853_v56, %v21319_v61  ;;  %v12919_v41 = vpop.f32.mrb[168].mxu0  ;;  %v21326_v11 = vld [vmem:[#allocation57_spill] sm:$0xff] }
 0x463   :  { %v8857_v8 = vsel %vm15056_vm6, %v21317_v36, %v19751_v0  ;;  %v21321_v18 = vrot.slane %v19744_v48, 7  ;;  %v21322_v63 = vrot.slane %v19751_v0, 2  ;;  %v8863_v54 = vsel %vm15056_vm6, %v19786_v17, %v19788_v37  ;;  %v13013_v17 = vpop.f32.mrb[168].mxu1 }
 0x464   :  { %v19960_v6 = vadd.f32 %v8857_v8, %v21320_v51  ;;  %v21323_v1 = vrot.slane %v19764_v57, 7  ;;  %v21324_v32 = vrot.slane %v19788_v37, 2  ;;  %v21325_v52 = vrot.slane %v19771_v40, 7  ;;  %v12920_v37 = vpop.f32.mrb[169].mxu0  ;;  %v13014_v58 = vpop.f32.mrb[169].mxu1  ;;  %v21329_v40 = vld [vmem:[#allocation50_spill] sm:$0xff] }
 0x465   :  { %v8860_v4 = vsel %vm15056_vm6, %v21322_v63, %v21321_v18  ;;  %v9557_v0 = vrot.slane %v9550_v49, %v14719_v25  ;;  %v9559_v53 = vcombine.high %v9441_v50, %v9441_v50  ;;  %v9566_v27 = vrot.slane %v9441_v50, %v14719_v25  ;;  %v21332_v18 = vld [vmem:[#allocation25_spill] sm:$0xff] }
 0x466   :  { %v8866_v29 = vsel %vm15056_vm6, %v21324_v32, %v21323_v1  ;;  %v8870_v48 = vsel %vm15056_vm6, %v19802_v39, %v21325_v52  ;;  %v19986_v57 = vadd.f32 %v8860_v4, %v21326_v11  ;;  %v19989_v56 = vadd.f32 %v8863_v54, %v21327_v26  ;;  %v12922_v4 = vpop.f32.mrb[170].mxu0  ;;  %v13016_v54 = vpop.f32.mrb[170].mxu1 }
 0x467   :  { %v19992_v36 = vadd.f32 %v8866_v29, %v21329_v40  ;;  %v8873_v39 = vsel %vm15056_vm6, %v19816_v3, %v19818_v21  ;;  %v21330_v8 = vrot.slane %v19792_v14, 7  ;;  %v21331_v15 = vrot.slane %v19818_v21, 2  ;;  %v12923_v29 = vpop.f32.mrb[171].mxu0  ;;  %v13017_v52 = vpop.f32.mrb[171].mxu1  ;;  %v21333_v3 = vld [vmem:[#allocation55_spill] sm:$0xff]  ;;  %v21337_v40 = vld [vmem:[#allocation22_spill] sm:$0xff] }
 0x468   :  { %21328 = vst [vmem:[#allocation31_spill] sm:$0xff] %v19989_v56  ;;  %v9558_v50 = vcombine.high %v9557_v0, %v9557_v0  ;;  %v9573_v61 = vrot.slane %v9559_v53, %v14719_v25  ;;  %v9574_v51 = vcombine.high %v9566_v27, %v9566_v27  ;;  %v9947_v63 = vadd.f32 %v9566_v27, %v21332_v18  ;;  %v21335_v0 = vld [vmem:[#allocation49_spill] sm:$0xff]  ;;  %v21336_v53 = vld [vmem:[#allocation58_spill] sm:$0xff]  ;;  %v21340_v56 = vld [vmem:[#allocation59_spill] sm:$0xff] }
 0x469   :  { %v8876_v49 = vsel %vm15056_vm6, %v21331_v15, %v21330_v8  ;;  %v12921_v1 = vadd.f32 %v12920_v37, %v12919_v41  ;;  %v13015_v32 = vadd.f32 %v13014_v58, %v13013_v17  ;;  %v8879_v14 = vsel %vm15056_vm6, %v19840_v46, %v19842_v12  ;;  %v21338_v8 = vld [vmem:[#allocation65_spill] sm:$0xff]  ;;  %v21341_v46 = vld [vmem:[#allocation63_spill] sm:$0xff] }
 0x46a   :  { %v20011_v21 = vadd.f32 %v8870_v48, %v21333_v3  ;;  %v9946_v11 = vadd.f32 %v9558_v50, %v21335_v0  ;;  %v9948_v26 = vadd.f32 %v9574_v51, %v21336_v53  ;;  %v9949_v27 = vadd.f32 %v9573_v61, %v21337_v40  ;;  %v21339_v58 = vld [vmem:[#allocation53_spill] sm:$0xff]  ;;  %v21342_v48 = vld [vmem:[#allocation56_spill] sm:$0xff] }
 0x46b   :  { %v10038_v15 = vadd.f32 %v21338_v8, %v9947_v63  ;;  %v9446_v41 = vadd.f32 %v13015_v32, %v12921_v1  ;;  %v12924_v17 = vadd.f32 %v12923_v29, %v12922_v4  ;;  %v13018_v37 = vadd.f32 %v13017_v52, %v13016_v54  ;;  %v21344_v63 = vld [vmem:[#allocation72_spill] sm:$0xff]  ;;  %v13019_v32 = vpop.f32.mrb[172].mxu1 }
 0x46c   :  { %21334 = vst [vmem:[#allocation36_spill] sm:$0xff] %v20011_v21  ;;  %v20018_v18 = vadd.f32 %v8873_v39, %v21339_v58  ;;  %v10037_v35 = vadd.f32 %v21340_v56, %v9946_v11  ;;  %v10039_v12 = vadd.f32 %v21341_v46, %v9948_v26  ;;  %v10040_v3 = vadd.f32 %v21342_v48, %v9949_v27  ;;  %v21343_v21 = vld [vmem:[#allocation52_spill] sm:$0xff]  ;;  %v12925_v39 = vpop.f32.mrb[172].mxu0 }
 0x46d   :  { %v20024_v50 = vadd.f32 %v8876_v49, %v21343_v21  ;;  %v9575_v51 = vcombine.high %v9446_v41, %v9446_v41  ;;  %v9582_v61 = vrot.slane %v9446_v41, %v14719_v25  ;;  %v9449_v0 = vadd.f32 %v13018_v37, %v12924_v17  ;;  %v21346_v11 = vld [vmem:[#allocation64_spill] sm:$0xff]  ;;  %v12926_v40 = vpop.f32.mrb[173].mxu0  ;;  %v13020_v49 = vpop.f32.mrb[173].mxu1 }
 0x46e   :  { %v20028_v1 = vadd.f32 %v8879_v14, %v21344_v63  ;;  %v10165_v4 = vcombine.low %v10037_v35, %v10038_v15  ;;  %v10166_v54 = vcombine.low %v10039_v12, %v10040_v3  ;;  %v12927_v14 = vadd.f32 %v12926_v40, %v12925_v39  ;;  %v12928_v17 = vpop.f32.mrb[174].mxu0  ;;  %v13022_v15 = vpop.f32.mrb[174].mxu1  ;;  %v21347_v58 = vld [vmem:[#allocation60_spill] sm:$0xff] }
 0x46f   :  { %v9589_v29 = vrot.slane %v9575_v51, %v14719_v25  ;;  %v9590_v52 = vcombine.high %v9582_v61, %v9582_v61  ;;  %v9950_v53 = vadd.f32 %v9582_v61, %v21346_v11  ;;  %v9592_v26 = vcombine.high %v9449_v0, %v9449_v0  ;;  %v12929_v3 = vpop.f32.mrb[175].mxu0  ;;  %v13023_v51 = vpop.f32.mrb[175].mxu1 }
 0x470   :  { %21345 = vst [vmem:[#allocation34_spill] sm:$0xff] %v20028_v1  ;;  %v10173_v21 = vrot.slane %v10165_v4, %v14719_v25  ;;  %v10180_v27 = vrot.slane %v10166_v54, %v14719_v25  ;;  %v9599_v41 = vrot.slane %v9449_v0, %v14719_v25  ;;  %v13021_v4 = vadd.f32 %v13020_v49, %v13019_v32 }
 0x471   :  { %v9591_v37 = vcombine.high %v9589_v29, %v9589_v29  ;;  %v9951_v35 = vadd.f32 %v9590_v52, %v21347_v58  ;;  %v9952_v12 = vadd.f32 %v9589_v29, %v19290_v7  ;;  %v9606_v63 = vrot.slane %v9592_v26, %v14719_v25 }
 0x472   :  { %v10181_v61 = vcombine.low %v10173_v21, %v10180_v27  ;;  %v9607_v11 = vcombine.high %v9599_v41, %v9599_v41  ;;  %v10041_v0 = vadd.f32 %v21340_v56, %v9950_v53  ;;  %v12930_v40 = vadd.f32 %v12929_v3, %v12928_v17  ;;  %v12931_v17 = vpop.f32.mrb[176].mxu0 }
 0x473   :  { %v9953_v54 = vadd.f32 %v9591_v37, %v19293_v9  ;;  %v10042_v39 = vadd.f32 %v21338_v8, %v9951_v35  ;;  %v9608_v1 = vcombine.high %v9606_v63, %v9606_v63  ;;  %v9955_v7 = vadd.f32 %v9606_v63, %v19320_v33  ;;  %v13025_v37 = vpop.f32.mrb[176].mxu1  ;;  %v12932_v35 = vpop.f32.mrb[177].mxu0 }
 0x474   :  { %10454 = vst.msk [vmem:[#allocation2] sm:$0xff] %vm10453_vm7, %v10181_v61  ;;  %v9954_v52 = vadd.f32 %v9607_v11, %v19311_v55  ;;  %v9454_v29 = vadd.f32 %v13021_v4, %v12927_v14  ;;  %v10043_v21 = vadd.f32 %v21341_v46, %v9952_v12  ;;  %v13024_v49 = vadd.f32 %v13023_v51, %v13022_v15  ;;  %v13026_v12 = vpop.f32.mrb[177].mxu1  ;;  %v12934_v51 = vpop.f32.mrb[178].mxu0  ;;  %v21348_v11 = vld [vmem:[#allocation73_spill] sm:$0xff] }
 0x475   :  { %v10044_v26 = vadd.f32 %v21342_v48, %v9953_v54  ;;  %v10182_v32 = vcombine.low %v10041_v0, %v10042_v39  ;;  %v9956_v9 = vadd.f32 %v9608_v1, %v19323_v5  ;;  %v10046_v27 = vadd.f32 %v21338_v8, %v9955_v7  ;;  %v13028_v61 = vpop.f32.mrb[178].mxu1  ;;  %v12935_v39 = vpop.f32.mrb[179].mxu0 }
 0x476   :  { %v10045_v53 = vadd.f32 %v21340_v56, %v9954_v52  ;;  %v9609_v41 = vcombine.high %v9454_v29, %v9454_v29  ;;  %v9616_v33 = vrot.slane %v9454_v29, %v14719_v25  ;;  %v9457_v14 = vadd.f32 %v13024_v49, %v12930_v40  ;;  %v13029_v52 = vpop.f32.mrb[179].mxu1  ;;  %v21349_v29 = vld [vmem:[#allocation24_spill] sm:$0xff] }
 0x477   :  { %v10183_v58 = vcombine.low %v10043_v21, %v10044_v26  ;;  %v10190_v55 = vrot.slane %v10182_v32, %v14719_v25  ;;  %v10047_v5 = vadd.f32 %v21341_v46, %v9956_v9  ;;  %v12933_v1 = vadd.f32 %v12932_v35, %v12931_v17 }
 0x478   :  { %v10199_v3 = vcombine.low %v10045_v53, %v10046_v27  ;;  %v9623_v15 = vrot.slane %v9609_v41, %v14719_v25  ;;  %v9957_v4 = vadd.f32 %v9616_v33, %v21348_v11  ;;  %v9625_v54 = vcombine.high %v9457_v14, %v9457_v14  ;;  %v21350_v27 = vld [vmem:[#allocation61_spill] sm:$0xff]  ;;  %v21352_v11 = vld [vmem:[#allocation76_spill] sm:$0xff] }
 0x479   :  { %v10197_v63 = vrot.slane %v10183_v58, %v14719_v25  ;;  %v9632_v0 = vrot.slane %v9457_v14, %v14719_v25  ;;  %v13027_v26 = vadd.f32 %v13026_v12, %v13025_v37  ;;  %v21351_v58 = vld [vmem:[#allocation75_spill] sm:$0xff]  ;;  %v12936_v37 = vadd.f32 %v12935_v39, %v12934_v51 }
 0x47a   :  { %v10207_v40 = vrot.slane %v10199_v3, %v14719_v25  ;;  %v9624_v7 = vcombine.high %v9623_v15, %v9623_v15  ;;  %v9958_v21 = vadd.f32 %v9623_v15, %v21349_v29  ;;  %v10048_v49 = vadd.f32 %v21342_v48, %v9957_v4 }
 0x47b   :  { %v10198_v32 = vcombine.low %v10190_v55, %v10197_v63  ;;  %v9639_v9 = vrot.slane %v9625_v54, %v14719_v25  ;;  %v9640_v53 = vcombine.high %v9632_v0, %v9632_v0  ;;  %v9960_v33 = vadd.f32 %v9632_v0, %v21351_v58  ;;  %v12937_v54 = vpop.f32.mrb[180].mxu0  ;;  %v21353_v0 = vld [vmem:[#allocation74_spill] sm:$0xff] }
 0x47c   :  { %v9959_v41 = vadd.f32 %v9624_v7, %v21350_v27  ;;  %v10049_v17 = vadd.f32 %v21340_v56, %v9958_v21  ;;  %v9462_v14 = vadd.f32 %v13027_v26, %v12933_v1  ;;  %v10200_v35 = vcombine.low %v10047_v5, %v10048_v49  ;;  %v13031_v7 = vpop.f32.mrb[180].mxu1  ;;  %v12938_v26 = vpop.f32.mrb[181].mxu0 }
 0x47d   :  { %10455 = vst.msk [vmem:[#allocation2 + $0x8] sm:$0xff] %vm10453_vm7, %v10198_v32  ;;  %v9641_v3 = vcombine.high %v9639_v9, %v9639_v9  ;;  %v9961_v15 = vadd.f32 %v9640_v53, %v21352_v11  ;;  %v10051_v12 = vadd.f32 %v21341_v46, %v9960_v33  ;;  %v13030_v5 = vadd.f32 %v13029_v52, %v13028_v61  ;;  %v13032_v32 = vpop.f32.mrb[181].mxu1  ;;  %v21354_v9 = vld [vmem:[#allocation77_spill] sm:$0xff]  ;;  %v12940_v27 = vpop.f32.mrb[182].mxu0  ;;  %v21355_v61 = vld [vmem:[#allocation78_spill] sm:$0xff] }
 0x47e   :  { %v10050_v55 = vadd.f32 %v21338_v8, %v9959_v41  ;;  %v9642_v63 = vcombine.high %v9462_v14, %v9462_v14  ;;  %v9649_v4 = vrot.slane %v9462_v14, %v14719_v25  ;;  %v10214_v29 = vrot.slane %v10200_v35, %v14719_v25  ;;  %v13034_v41 = vpop.f32.mrb[182].mxu1  ;;  %v12941_v11 = vpop.f32.mrb[183].mxu0 }
 0x47f   :  { %v9962_v1 = vadd.f32 %v9641_v3, %v21353_v0  ;;  %v10052_v21 = vadd.f32 %v21342_v48, %v9961_v15  ;;  %v9465_v35 = vadd.f32 %v13030_v5, %v12936_v37  ;;  %v13035_v3 = vpop.f32.mrb[183].mxu1  ;;  %v21356_v0 = vld [vmem:[#allocation79_spill] sm:$0xff] }
 0x480   :  { %v10216_v49 = vcombine.low %v10049_v17, %v10050_v55  ;;  %v9656_v51 = vrot.slane %v9642_v63, %v14719_v25  ;;  %v9657_v39 = vcombine.high %v9649_v4, %v9649_v4  ;;  %v9963_v53 = vadd.f32 %v9649_v4, %v21354_v9 }
 0x481   :  { %v10215_v58 = vcombine.low %v10207_v40, %v10214_v29  ;;  %v10053_v33 = vadd.f32 %v21340_v56, %v9962_v1  ;;  %v10217_v14 = vcombine.low %v10051_v12, %v10052_v21  ;;  %v9658_v4 = vcombine.high %v9465_v35, %v9465_v35 }
 0x482   :  { %v10224_v15 = vrot.slane %v10216_v49, %v14719_v25  ;;  %v9964_v52 = vadd.f32 %v9657_v39, %v21355_v61  ;;  %v9965_v17 = vadd.f32 %v9656_v51, %v21356_v0  ;;  %v10054_v55 = vadd.f32 %v21338_v8, %v9963_v53  ;;  %v21357_v39 = vld [vmem:[#allocation30_spill] sm:$0xff]  ;;  %v13037_v0 = vpop.f32.mrb[184].mxu1 }
 0x483   :  { %10456 = vst.msk [vmem:[#allocation2 + $0x10] sm:$0xff] %vm10453_vm7, %v10215_v58  ;;  %v10231_v63 = vrot.slane %v10217_v14, %v14719_v25  ;;  %v9665_v40 = vrot.slane %v9465_v35, %v14719_v25  ;;  %v12939_v29 = vadd.f32 %v12938_v26, %v12937_v54  ;;  %v13033_v21 = vadd.f32 %v13032_v32, %v13031_v7  ;;  %v12943_v14 = vpop.f32.mrb[184].mxu0  ;;  %v21358_v35 = vld [vmem:[#allocation81_spill] sm:$0xff] }
 0x484   :  { %v10055_v37 = vadd.f32 %v21341_v46, %v9964_v52  ;;  %v10056_v12 = vadd.f32 %v21342_v48, %v9965_v17  ;;  %v10233_v1 = vcombine.low %v10053_v33, %v10054_v55  ;;  %v9672_v49 = vrot.slane %v9658_v4, %v14719_v25  ;;  %v21359_v33 = vld [vmem:[#allocation27_spill] sm:$0xff]  ;;  %v12944_v32 = vpop.f32.mrb[185].mxu0 }
 0x485   :  { %v10232_v5 = vcombine.low %v10224_v15, %v10231_v63  ;;  %v9673_v51 = vcombine.high %v9665_v40, %v9665_v40  ;;  %v9966_v9 = vadd.f32 %v9665_v40, %v21357_v39  ;;  %v9470_v58 = vadd.f32 %v13033_v21, %v12939_v29  ;;  %v13038_v15 = vpop.f32.mrb[185].mxu1  ;;  %v21360_v40 = vld [vmem:[#allocation80_spill] sm:$0xff] }
 0x486   :  { %v10234_v53 = vcombine.low %v10055_v37, %v10056_v12  ;;  %v12942_v61 = vadd.f32 %v12941_v11, %v12940_v27  ;;  %v10241_v54 = vrot.slane %v10233_v1, %v14719_v25  ;;  %v9674_v26 = vcombine.high %v9672_v49, %v9672_v49  ;;  %v12946_v27 = vpop.f32.mrb[186].mxu0  ;;  %v13040_v11 = vpop.f32.mrb[186].mxu1 }
 0x487   :  { %10457 = vst.msk [vmem:[#allocation2 + $0x18] sm:$0xff] %vm10453_vm7, %v10232_v5  ;;  %v9967_v52 = vadd.f32 %v9673_v51, %v21358_v35  ;;  %v9968_v7 = vadd.f32 %v9672_v49, %v21359_v33  ;;  %v9675_v55 = vcombine.high %v9470_v58, %v9470_v58  ;;  %v9682_v63 = vrot.slane %v9470_v58, %v14719_v25  ;;  %v12947_v21 = vpop.f32.mrb[187].mxu0  ;;  %v13041_v5 = vpop.f32.mrb[187].mxu1 }
 0x488   :  { %v10248_v17 = vrot.slane %v10234_v53, %v14719_v25  ;;  %v13036_v4 = vadd.f32 %v13035_v3, %v13034_v41  ;;  %v9969_v29 = vadd.f32 %v9674_v26, %v21360_v40  ;;  %v10057_v37 = vadd.f32 %v21340_v56, %v9966_v9  ;;  %v21361_v9 = vld [vmem:[#allocation18_spill] sm:$0xff] }
 0x489   :  { %v10058_v12 = vadd.f32 %v21338_v8, %v9967_v52  ;;  %v12945_v1 = vadd.f32 %v12944_v32, %v12943_v14  ;;  %v9689_v51 = vrot.slane %v9675_v55, %v14719_v25  ;;  %v9690_v39 = vcombine.high %v9682_v63, %v9682_v63  ;;  %v21362_v52 = vld [vmem:[#allocation35_spill] sm:$0xff]  ;;  %v21363_v55 = vld [vmem:[#allocation5_spill] sm:$0xff] }
 0x48a   :  { %v10249_v49 = vcombine.low %v10241_v54, %v10248_v17  ;;  %v9473_v53 = vadd.f32 %v13036_v4, %v12942_v61  ;;  %v10059_v35 = vadd.f32 %v21341_v46, %v9968_v7  ;;  %v10060_v41 = vadd.f32 %v21342_v48, %v9969_v29  ;;  %v13043_v4 = vpop.f32.mrb[188].mxu1  ;;  %v21364_v29 = vld [vmem:[#allocation19_spill] sm:$0xff] }
 0x48b   :  { %v10250_v3 = vcombine.low %v10057_v37, %v10058_v12  ;;  %v13039_v58 = vadd.f32 %v13038_v15, %v13037_v0  ;;  %v9691_v26 = vcombine.high %v9689_v51, %v9689_v51  ;;  %v9970_v33 = vadd.f32 %v9690_v39, %v21361_v9  ;;  %v12949_v15 = vpop.f32.mrb[188].mxu0  ;;  %v21366_v9 = vld [vmem:[#allocation33_spill] sm:$0xff] }
 0x48c   :  { %10458 = vst.msk [vmem:[#allocation2 + $0x20] sm:$0xff] %vm10453_vm7, %v10249_v49  ;;  %v9971_v14 = vadd.f32 %v9689_v51, %v21362_v52  ;;  %v9692_v32 = vcombine.high %v9473_v53, %v9473_v53  ;;  %v10251_v27 = vcombine.low %v10059_v35, %v10060_v41  ;;  %v9699_v54 = vrot.slane %v9473_v53, %v14719_v25  ;;  %v12950_v21 = vpop.f32.mrb[189].mxu0  ;;  %v21365_v51 = vld [vmem:[#allocation6_spill] sm:$0xff] }
 0x48d   :  { %v9478_v17 = vadd.f32 %v13039_v58, %v12945_v1  ;;  %v9972_v61 = vadd.f32 %v9691_v26, %v21363_v55  ;;  %v10061_v7 = vadd.f32 %v21340_v56, %v9970_v33  ;;  %v10258_v11 = vrot.slane %v10250_v3, %v14719_v25  ;;  %v13044_v1 = vpop.f32.mrb[189].mxu1  ;;  %v12952_v35 = vpop.f32.mrb[190].mxu0  ;;  %v21368_v55 = vld [vmem:[#allocation8_spill] sm:$0xff] }
 0x48e   :  { %v10062_v63 = vadd.f32 %v21338_v8, %v9971_v14  ;;  %v9706_v0 = vrot.slane %v9692_v32, %v14719_v25  ;;  %v10265_v40 = vrot.slane %v10251_v27, %v14719_v25  ;;  %v9973_v37 = vadd.f32 %v9699_v54, %v21364_v29  ;;  %v13046_v41 = vpop.f32.mrb[190].mxu1  ;;  %v12953_v52 = vpop.f32.mrb[191].mxu0  ;;  %v21367_v32 = vld [vmem:[#allocation7_spill] sm:$0xff] }
 0x48f   :  { %v9714_v12 = vrot.slane %v9478_v17, %v14719_v25  ;;  %v10063_v53 = vadd.f32 %v21341_v46, %v9972_v61  ;;  %v13047_v14 = vpop.f32.mrb[191].mxu1  ;;  %v12954_v54 = vadd.f32 %v12953_v52, %v12952_v35 }
 0x490   :  { %v10267_v5 = vcombine.low %v10061_v7, %v10062_v63  ;;  %v9707_v49 = vcombine.high %v9706_v0, %v9706_v0  ;;  %v9974_v39 = vadd.f32 %v9706_v0, %v21365_v51  ;;  %v10266_v58 = vcombine.low %v10258_v11, %v10265_v40  ;;  %v13049_v21 = vpop.f32.mrb[192].mxu1 }
 0x491   :  { %v10064_v26 = vadd.f32 %v21342_v48, %v9973_v37  ;;  %v9715_v3 = vcombine.high %v9714_v12, %v9714_v12  ;;  %v9976_v33 = vadd.f32 %v9714_v12, %v21366_v9  ;;  %v13048_v63 = vadd.f32 %v13047_v14, %v13046_v41  ;;  %v12955_v12 = vpop.f32.mrb[192].mxu0  ;;  %v13050_v35 = vpop.f32.mrb[193].mxu1 }
 0x492   :  { %v9975_v27 = vadd.f32 %v9707_v49, %v21367_v32  ;;  %10459 = vst.msk [vmem:[#allocation2 + $0x28] sm:$0xff] %vm10453_vm7, %v10266_v58  ;;  %v10275_v61 = vrot.slane %v10267_v5, %v14719_v25  ;;  %v10065_v0 = vadd.f32 %v21340_v56, %v9974_v39  ;;  %v12956_v5 = vpop.f32.mrb[193].mxu0  ;;  %v13051_v41 = vadd.f32 %v13050_v35, %v13049_v21 }
 0x493   :  { %v10268_v17 = vcombine.low %v10063_v53, %v10064_v26  ;;  %v9977_v7 = vadd.f32 %v9715_v3, %v21368_v55  ;;  %v10067_v11 = vadd.f32 %v21341_v46, %v9976_v33  ;;  %v9487_v29 = vadd.f32 %v13048_v63, %v12954_v54  ;;  %v12958_v58 = vpop.f32.mrb[194].mxu0  ;;  %v13052_v26 = vpop.f32.mrb[194].mxu1 }
 0x494   :  { %v10066_v15 = vadd.f32 %v21338_v8, %v9975_v27  ;;  %v12957_v39 = vadd.f32 %v12956_v5, %v12955_v12  ;;  %v12959_v14 = vpop.f32.mrb[195].mxu0  ;;  %v13053_v32 = vpop.f32.mrb[195].mxu1 }
 0x495   :  { %v10282_v4 = vrot.slane %v10268_v17, %v14719_v25  ;;  %v10068_v40 = vadd.f32 %v21342_v48, %v9977_v7  ;;  %v9716_v51 = vcombine.high %v9487_v29, %v9487_v29  ;;  %v9723_v53 = vrot.slane %v9487_v29, %v14719_v25 }
 0x496   :  { %v10284_v37 = vcombine.low %v10065_v0, %v10066_v15  ;;  %v9492_v27 = vadd.f32 %v13051_v41, %v12957_v39  ;;  %v12960_v54 = vadd.f32 %v12959_v14, %v12958_v58  ;;  %v13054_v17 = vadd.f32 %v13053_v32, %v13052_v26 }
 0x497   :  { %v10283_v1 = vcombine.low %v10275_v61, %v10282_v4  ;;  %v10285_v49 = vcombine.low %v10067_v11, %v10068_v40  ;;  %v9730_v33 = vrot.slane %v9716_v51, %v14719_v25  ;;  %v9731_v52 = vcombine.high %v9723_v53, %v9723_v53 }
 0x498   :  { %v10292_v3 = vrot.slane %v10284_v37, %v14719_v25  ;;  %v9733_v0 = vcombine.high %v9492_v27, %v9492_v27  ;;  %v9740_v15 = vrot.slane %v9492_v27, %v14719_v25  ;;  %v9495_v4 = vadd.f32 %v13054_v17, %v12960_v54 }
 0x499   :  { %10460 = vst.msk [vmem:[#allocation2 + $0x30] sm:$0xff] %vm10453_vm7, %v10283_v1  ;;  %v10299_v9 = vrot.slane %v10285_v49, %v14719_v25  ;;  %v9732_v7 = vcombine.high %v9730_v33, %v9730_v33  ;;  %v9978_v63 = vadd.f32 %v9731_v52, %v19714_v34  ;;  %v9979_v61 = vadd.f32 %v9730_v33, %v19717_v23  ;;  %v12961_v23 = vpop.f32.mrb[196].mxu0  ;;  %v13055_v1 = vpop.f32.mrb[196].mxu1 }
 0x49a   :  { %v9747_v37 = vrot.slane %v9733_v0, %v14719_v25  ;;  %v9981_v12 = vadd.f32 %v9740_v15, %v19758_v10  ;;  %v9749_v21 = vcombine.high %v9495_v4, %v9495_v4  ;;  %v9756_v34 = vrot.slane %v9495_v4, %v14719_v25  ;;  %v12962_v53 = vpop.f32.mrb[197].mxu0  ;;  %v13056_v5 = vpop.f32.mrb[197].mxu1 }
 0x49b   :  { %v10300_v55 = vcombine.low %v10292_v3, %v10299_v9  ;;  %v9980_v11 = vadd.f32 %v9732_v7, %v19726_v20  ;;  %v10069_v40 = vadd.f32 %v21340_v56, %v9978_v63  ;;  %v10070_v29 = vadd.f32 %v21338_v8, %v9979_v61  ;;  %v12964_v58 = vpop.f32.mrb[198].mxu0  ;;  %v13058_v26 = vpop.f32.mrb[198].mxu1 }
 0x49c   :  { %v9748_v35 = vcombine.high %v9747_v37, %v9747_v37  ;;  %v9982_v20 = vadd.f32 %v9747_v37, %v19761_v62  ;;  %v10072_v39 = vadd.f32 %v21342_v48, %v9981_v12  ;;  %v9763_v41 = vrot.slane %v9749_v21, %v14719_v25  ;;  %v12965_v33 = vpop.f32.mrb[199].mxu0  ;;  %v13059_v52 = vpop.f32.mrb[199].mxu1 }
 0x49d   :  { %10461 = vst.msk [vmem:[#allocation2 + $0x38] sm:$0xff] %vm10453_vm7, %v10300_v55  ;;  %v10301_v49 = vcombine.low %v10069_v40, %v10070_v29  ;;  %v10071_v51 = vadd.f32 %v21341_v46, %v9980_v11  ;;  %v9764_v10 = vcombine.high %v9756_v34, %v9756_v34  ;;  %v9984_v3 = vadd.f32 %v9756_v34, %v19810_v42 }
 0x49e   :  { %v12963_v9 = vadd.f32 %v12962_v53, %v12961_v23  ;;  %v9983_v32 = vadd.f32 %v9748_v35, %v19774_v31  ;;  %v9765_v54 = vcombine.high %v9763_v41, %v9763_v41  ;;  %v10073_v62 = vadd.f32 %v21340_v56, %v9982_v20 }
 0x49f   :  { %v10309_v14 = vrot.slane %v10301_v49, %v14719_v25  ;;  %v10302_v27 = vcombine.low %v10071_v51, %v10072_v39  ;;  %v9985_v17 = vadd.f32 %v9764_v10, %v19822_v43  ;;  %v13057_v55 = vadd.f32 %v13056_v5, %v13055_v1  ;;  %v12967_v37 = vpop.f32.mrb[200].mxu0 }
 0x4a0   :  { %v12966_v7 = vadd.f32 %v12965_v33, %v12964_v58  ;;  %v10074_v63 = vadd.f32 %v21338_v8, %v9983_v32  ;;  %v9986_v42 = vadd.f32 %v9765_v54, %v19825_v60  ;;  %v13060_v0 = vadd.f32 %v13059_v52, %v13058_v26  ;;  %v13061_v12 = vpop.f32.mrb[200].mxu1  ;;  %v12968_v1 = vpop.f32.mrb[201].mxu0 }
 0x4a1   :  { %v10316_v61 = vrot.slane %v10302_v27, %v14719_v25  ;;  %v10075_v15 = vadd.f32 %v21341_v46, %v9984_v3  ;;  %v10076_v4 = vadd.f32 %v21342_v48, %v9985_v17  ;;  %v9500_v31 = vadd.f32 %v13057_v55, %v12963_v9  ;;  %v13062_v49 = vpop.f32.mrb[201].mxu1  ;;  %v12970_v35 = vpop.f32.mrb[202].mxu0 }
 0x4a2   :  { %v10318_v40 = vcombine.low %v10073_v62, %v10074_v63  ;;  %v9503_v29 = vadd.f32 %v13060_v0, %v12966_v7  ;;  %v10077_v43 = vadd.f32 %v21340_v56, %v9986_v42  ;;  %v12969_v5 = vadd.f32 %v12968_v1, %v12967_v37  ;;  %v13064_v20 = vpop.f32.mrb[202].mxu1  ;;  %v12971_v10 = vpop.f32.mrb[203].mxu0  ;;  %v21369_v7 = vld [vmem:[#allocation29_spill] sm:$0xff] }
 0x4a3   :  { %v10317_v11 = vcombine.low %v10309_v14, %v10316_v61  ;;  %v10319_v21 = vcombine.low %v10075_v15, %v10076_v4  ;;  %v9766_v34 = vcombine.high %v9500_v31, %v9500_v31  ;;  %v9773_v23 = vrot.slane %v9500_v31, %v14719_v25  ;;  %v13065_v3 = vpop.f32.mrb[203].mxu1 }
 0x4a4   :  { %v10326_v60 = vrot.slane %v10318_v40, %v14719_v25  ;;  %v9782_v51 = vcombine.high %v9503_v29, %v9503_v29  ;;  %v9789_v53 = vrot.slane %v9503_v29, %v14719_v25  ;;  %v13063_v14 = vadd.f32 %v13062_v49, %v13061_v12 }
 0x4a5   :  { %10462 = vst.msk [vmem:[#allocation2 + $0x40] sm:$0xff] %vm10453_vm7, %v10317_v11  ;;  %v10333_v39 = vrot.slane %v10319_v21, %v14719_v25  ;;  %v9780_v41 = vrot.slane %v9766_v34, %v14719_v25  ;;  %v9781_v58 = vcombine.high %v9773_v23, %v9773_v23  ;;  %v9987_v26 = vadd.f32 %v9773_v23, %v19851_v22 }
 0x4a6   :  { %v9796_v9 = vrot.slane %v9782_v51, %v14719_v25  ;;  %v9797_v33 = vcombine.high %v9789_v53, %v9789_v53  ;;  %v9990_v52 = vadd.f32 %v9789_v53, %v19879_v45  ;;  %v9508_v0 = vadd.f32 %v13063_v14, %v12969_v5 }
 0x4a7   :  { %v10334_v32 = vcombine.low %v10326_v60, %v10333_v39  ;;  %v9988_v27 = vadd.f32 %v9781_v58, %v19854_v19  ;;  %v9989_v54 = vadd.f32 %v9780_v41, %v19857_v28  ;;  %v10078_v62 = vadd.f32 %v21338_v8, %v9987_v26  ;;  %v21370_v19 = vld [vmem:[#allocation28_spill] sm:$0xff] }
 0x4a8   :  { %v9798_v17 = vcombine.high %v9796_v9, %v9796_v9  ;;  %v9991_v55 = vadd.f32 %v9797_v33, %v19882_v38  ;;  %v9992_v22 = vadd.f32 %v9796_v9, %v21369_v7  ;;  %v10081_v63 = vadd.f32 %v21340_v56, %v9990_v52  ;;  %v12973_v38 = vpop.f32.mrb[204].mxu0  ;;  %v13067_v11 = vpop.f32.mrb[204].mxu1 }
 0x4a9   :  { %10463 = vst.msk [vmem:[#allocation2 + $0x48] sm:$0xff] %vm10453_vm7, %v10334_v32  ;;  %v10079_v61 = vadd.f32 %v21341_v46, %v9988_v27  ;;  %v10080_v45 = vadd.f32 %v21342_v48, %v9989_v54  ;;  %v10335_v42 = vcombine.low %v10077_v43, %v10078_v62  ;;  %v12972_v31 = vadd.f32 %v12971_v10, %v12970_v35  ;;  %v12974_v21 = vpop.f32.mrb[205].mxu0  ;;  %v13068_v34 = vpop.f32.mrb[205].mxu1 }
 0x4aa   :  { %v9993_v15 = vadd.f32 %v9798_v17, %v21370_v19  ;;  %v10082_v28 = vadd.f32 %v21338_v8, %v9991_v55  ;;  %v10083_v4 = vadd.f32 %v21341_v46, %v9992_v22  ;;  %v9799_v37 = vcombine.high %v9508_v0, %v9508_v0  ;;  %v12976_v60 = vpop.f32.mrb[206].mxu0  ;;  %v13070_v51 = vpop.f32.mrb[206].mxu1 }
 0x4ab   :  { %v10336_v40 = vcombine.low %v10079_v61, %v10080_v45  ;;  %v10343_v29 = vrot.slane %v10335_v42, %v14719_v25  ;;  %v9806_v12 = vrot.slane %v9508_v0, %v14719_v25  ;;  %v13066_v1 = vadd.f32 %v13065_v3, %v13064_v20  ;;  %v12977_v41 = vpop.f32.mrb[207].mxu0  ;;  %v13071_v58 = vpop.f32.mrb[207].mxu1 }
 0x4ac   :  { %v10084_v43 = vadd.f32 %v21342_v48, %v9993_v15  ;;  %v10352_v23 = vcombine.low %v10081_v63, %v10082_v28  ;;  %v12975_v49 = vadd.f32 %v12974_v21, %v12973_v38  ;;  %v9813_v5 = vrot.slane %v9799_v37, %v14719_v25 }
 0x4ad   :  { %v10350_v53 = vrot.slane %v10336_v40, %v14719_v25  ;;  %v9814_v35 = vcombine.high %v9806_v12, %v9806_v12  ;;  %v13069_v39 = vadd.f32 %v13068_v34, %v13067_v11  ;;  %v9511_v9 = vadd.f32 %v13066_v1, %v12972_v31 }
 0x4ae   :  { %v10353_v26 = vcombine.low %v10083_v4, %v10084_v43  ;;  %v10360_v10 = vrot.slane %v10352_v23, %v14719_v25  ;;  %v12978_v33 = vadd.f32 %v12977_v41, %v12976_v60  ;;  %v9815_v14 = vcombine.high %v9813_v5, %v9813_v5 }
 0x4af   :  { %v10351_v52 = vcombine.low %v10343_v29, %v10350_v53  ;;  %v9994_v20 = vadd.f32 %v9814_v35, %v19906_v16  ;;  %v9995_v3 = vadd.f32 %v9813_v5, %v19915_v59  ;;  %v9816_v27 = vcombine.high %v9511_v9, %v9511_v9  ;;  %v12979_v45 = vpop.f32.mrb[208].mxu0 }
 0x4b0   :  { %v10367_v32 = vrot.slane %v10353_v26, %v14719_v25  ;;  %v9823_v54 = vrot.slane %v9511_v9, %v14719_v25  ;;  %v9516_v62 = vadd.f32 %v13069_v39, %v12975_v49  ;;  %v9996_v17 = vadd.f32 %v9815_v14, %v19918_v24  ;;  %v13073_v42 = vpop.f32.mrb[208].mxu1  ;;  %v12980_v24 = vpop.f32.mrb[209].mxu0 }
 0x4b1   :  { %10464 = vst.msk [vmem:[#allocation2 + $0x50] sm:$0xff] %vm10453_vm7, %v10351_v52  ;;  %v10085_v55 = vadd.f32 %v21340_v56, %v9994_v20  ;;  %v10086_v7 = vadd.f32 %v21338_v8, %v9995_v3  ;;  %v13072_v22 = vadd.f32 %v13071_v58, %v13070_v51  ;;  %v9830_v16 = vrot.slane %v9816_v27, %v14719_v25  ;;  %v13074_v4 = vpop.f32.mrb[209].mxu1  ;;  %v12982_v40 = vpop.f32.mrb[210].mxu0  ;;  %v21371_v3 = vld [vmem:[#allocation31_spill] sm:$0xff] }
 0x4b2   :  { %v10368_v63 = vcombine.low %v10360_v10, %v10367_v32  ;;  %v9997_v59 = vadd.f32 %v9823_v54, %v19930_v2  ;;  %v9832_v61 = vcombine.high %v9516_v62, %v9516_v62  ;;  %v10087_v19 = vadd.f32 %v21341_v46, %v9996_v17  ;;  %v13076_v29 = vpop.f32.mrb[210].mxu1  ;;  %v12983_v43 = vpop.f32.mrb[211].mxu0 }
 0x4b3   :  { %v10369_v0 = vcombine.low %v10085_v55, %v10086_v7  ;;  %v9839_v15 = vrot.slane %v9516_v62, %v14719_v25  ;;  %v9519_v28 = vadd.f32 %v13072_v22, %v12978_v33  ;;  %v9831_v31 = vcombine.high %v9830_v16, %v9830_v16  ;;  %v13077_v23 = vpop.f32.mrb[211].mxu1 }
 0x4b4   :  { %10465 = vst.msk [vmem:[#allocation2 + $0x58] sm:$0xff] %vm10453_vm7, %v10368_v63  ;;  %v9998_v38 = vadd.f32 %v9830_v16, %v19939_v30  ;;  %v10088_v11 = vadd.f32 %v21342_v48, %v9997_v59  ;;  %v9846_v2 = vrot.slane %v9832_v61, %v14719_v25  ;;  %v12981_v58 = vadd.f32 %v12980_v24, %v12979_v45  ;;  %v21372_v45 = vld [vmem:[#allocation36_spill] sm:$0xff] }
 0x4b5   :  { %v10377_v37 = vrot.slane %v10369_v0, %v14719_v25  ;;  %v9847_v12 = vcombine.high %v9839_v15, %v9839_v15  ;;  %v10000_v21 = vadd.f32 %v9839_v15, %v19954_v47  ;;  %v9849_v34 = vcombine.high %v9519_v28, %v9519_v28 }
 0x4b6   :  { %v9999_v1 = vadd.f32 %v9831_v31, %v19942_v44  ;;  %v10089_v49 = vadd.f32 %v21340_v56, %v9998_v38  ;;  %v10370_v60 = vcombine.low %v10087_v19, %v10088_v11  ;;  %v9848_v30 = vcombine.high %v9846_v2, %v9846_v2 }
 0x4b7   :  { %v10001_v51 = vadd.f32 %v9847_v12, %v19957_v13  ;;  %v10091_v53 = vadd.f32 %v21341_v46, %v10000_v21  ;;  %v9856_v5 = vrot.slane %v9519_v28, %v14719_v25  ;;  %v9863_v35 = vrot.slane %v9849_v34, %v14719_v25 }
 0x4b8   :  { %v10090_v39 = vadd.f32 %v21338_v8, %v9999_v1  ;;  %v10384_v47 = vrot.slane %v10370_v60, %v14719_v25  ;;  %v10002_v41 = vadd.f32 %v9848_v30, %v19960_v6  ;;  %v13075_v14 = vadd.f32 %v13074_v4, %v13073_v42  ;;  %v21373_v4 = vld [vmem:[#allocation34_spill] sm:$0xff] }
 0x4b9   :  { %v10092_v44 = vadd.f32 %v21342_v48, %v10001_v51  ;;  %v9864_v26 = vcombine.high %v9856_v5, %v9856_v5  ;;  %v10003_v10 = vadd.f32 %v9856_v5, %v19986_v57  ;;  %v10005_v13 = vadd.f32 %v9863_v35, %v19992_v36 }
 0x4ba   :  { %v10385_v9 = vcombine.low %v10377_v37, %v10384_v47  ;;  %v10386_v33 = vcombine.low %v10089_v49, %v10090_v39  ;;  %v10093_v52 = vadd.f32 %v21340_v56, %v10002_v41  ;;  %v9524_v54 = vadd.f32 %v13075_v14, %v12981_v58 }
 0x4bb   :  { %v10387_v20 = vcombine.low %v10091_v53, %v10092_v44  ;;  %v10004_v32 = vadd.f32 %v9864_v26, %v21371_v3  ;;  %v10094_v27 = vadd.f32 %v21338_v8, %v10003_v10  ;;  %v10096_v6 = vadd.f32 %v21342_v48, %v10005_v13 }
 0x4bc   :  { %10466 = vst.msk [vmem:[#allocation2 + $0x60] sm:$0xff] %vm10453_vm7, %v10385_v9  ;;  %v10394_v62 = vrot.slane %v10386_v33, %v14719_v25  ;;  %v9865_v55 = vcombine.high %v9524_v54, %v9524_v54  ;;  %v9872_v7 = vrot.slane %v9524_v54, %v14719_v25 }
 0x4bd   :  { %v10401_v57 = vrot.slane %v10387_v20, %v14719_v25  ;;  %v10095_v36 = vadd.f32 %v21341_v46, %v10004_v32  ;;  %v10403_v17 = vcombine.low %v10093_v52, %v10094_v27 }
 0x4be   :  { %v9879_v59 = vrot.slane %v9865_v55, %v14719_v25  ;;  %v9880_v61 = vcombine.high %v9872_v7, %v9872_v7  ;;  %v10006_v42 = vadd.f32 %v9872_v7, %v21372_v45 }
 0x4bf   :  { %v10402_v22 = vcombine.low %v10394_v62, %v10401_v57  ;;  %v10404_v63 = vcombine.low %v10095_v36, %v10096_v6  ;;  %v10411_v16 = vrot.slane %v10403_v17, %v14719_v25 }
 0x4c0   :  { %v9881_v19 = vcombine.high %v9879_v59, %v9879_v59  ;;  %v10007_v15 = vadd.f32 %v9880_v61, %v20018_v18  ;;  %v10008_v28 = vadd.f32 %v9879_v59, %v20024_v50  ;;  %v10097_v38 = vadd.f32 %v21340_v56, %v10006_v42 }
 0x4c1   :  { %10467 = vst.msk [vmem:[#allocation2 + $0x68] sm:$0xff] %vm10453_vm7, %v10402_v22  ;;  %v10418_v0 = vrot.slane %v10404_v63, %v14719_v25 }
 0x4c2   :  { %v10009_v31 = vadd.f32 %v9881_v19, %v21373_v4  ;;  %v10098_v11 = vadd.f32 %v21338_v8, %v10007_v15  ;;  %v10099_v2 = vadd.f32 %v21341_v46, %v10008_v28 }
 0x4c3   :  { %v10419_v24 = vcombine.low %v10411_v16, %v10418_v0 }
 0x4c4   :  { %v10100_v40 = vadd.f32 %v21342_v48, %v10009_v31  ;;  %v10420_v29 = vcombine.low %v10097_v38, %v10098_v11 }
 0x4c5   :  { %10468 = vst.msk [vmem:[#allocation2 + $0x70] sm:$0xff] %vm10453_vm7, %v10419_v24 }
 0x4c6   :  { %v10421_v37 = vcombine.low %v10099_v2, %v10100_v40  ;;  %v10428_v18 = vrot.slane %v10420_v29, %v14719_v25 }
 0x4c8   :  { %v10435_v50 = vrot.slane %v10421_v37, %v14719_v25 }
 0x4ca   :  { %v10436_v12 = vcombine.low %v10428_v18, %v10435_v50 }
 0x4cc   :  { %10469 = vst.msk [vmem:[#allocation2 + $0x78] sm:$0xff] %vm10453_vm7, %v10436_v12 }
 0x4cd   :  { %13670 = shalt.err (!%p13667_p4)
}
 0x4ce   :  { %s13671_s7 = scalar_lea.hbm %s20249_s3, 2048 }
 0x4cf   :  { %p13672_p5 = scmp.ne.s32.totalorder %s20249_s3, %s13671_s7  ;;  %p13675_p6 = scmp.lt.u32.totalorder %s13671_s7, %s20249_s3 }
 0x4d1   :  { %p13677_p7 = pnand %p13675_p6, %p13672_p5 }
 0x4d3   :  { %13680 = shalt.err (!%p13677_p7)
}
 0x4d4   :  { %s13685_s12 = smov 128   ;;  %s13686_s13 = smov 8  }
 0x4d5   :  { %10481 = dma.vmem_to_hbm [thread:$0]  %s10476_s30, 2048, %s20249_s3, [#allocation3], %s13685_s12, %s13685_s12, %s13686_s13  }
 0x4d6   :  { %13681 = dma.done.wait [#allocation3], 2048  }
 0x4d7   :  { %13682 = vsyncadd [#allocation3], 4294965248 }
 0x4d8   :  { %10485 = vsyncpa [#allocation3], 1 }

</bundles_post_ra>
